<compile_context>
chip_gen: v6e
topology: v6e:2x2x1
jax: 0.10.0
libtpu: 0.0.40
codegen_flags: <defaults>
</compile_context>

<pallas_src>
import functools
import math

import jax
import jax.numpy as jnp
from jax.experimental import pallas as pl
from jax.experimental.pallas import tpu as pltpu


# ----------------------------------------------------------------------------
# Tiled matmul kernel (backbone conv path): C = relu(A @ B + bias)
# ----------------------------------------------------------------------------

def _matmul_kernel(a_ref, b_ref, bias_ref, o_ref, acc_ref, *, relu):
    @pl.when(pl.program_id(2) == 0)
    def _():
        acc_ref[...] = jnp.zeros_like(acc_ref)

    acc_ref[...] += jnp.dot(a_ref[...], b_ref[...],
                            preferred_element_type=jnp.float32)

    @pl.when(pl.program_id(2) == pl.num_programs(2) - 1)
    def _():
        y = acc_ref[...] + bias_ref[...]
        if relu:
            y = jnp.maximum(y, 0.0)
        o_ref[...] = y.astype(o_ref.dtype)


def _rup(x, m):
    return (x + m - 1) // m * m


def pallas_matmul(a, b, bias, relu=False, tm_cap=256, tn_cap=256, tk_cap=512):
    """a:[M,K] @ b:[K,N] + bias[N] (+ReLU) -> [M,N] f32.

    Tiled over (M, N, K) with K last, f32 VMEM accumulator, bf16 MXU operands.
    Inputs are zero-padded up to tile multiples (zero K-padding is exact)."""
    M, K = a.shape
    K2, N = b.shape
    assert K == K2
    tm = min(tm_cap, _rup(M, 8))
    tn = min(tn_cap, _rup(N, 128))
    tk = min(tk_cap, _rup(K, 128))
    Mp, Kp, Np = _rup(M, tm), _rup(K, tk), _rup(N, tn)

    a_p = jnp.zeros((Mp, Kp), jnp.bfloat16).at[:M, :K].set(a.astype(jnp.bfloat16))
    b_p = jnp.zeros((Kp, Np), jnp.bfloat16).at[:K, :N].set(b.astype(jnp.bfloat16))
    bias_p = jnp.zeros((1, Np), jnp.float32).at[:, :N].set(
        bias.reshape(1, N).astype(jnp.float32))

    out = pl.pallas_call(
        functools.partial(_matmul_kernel, relu=relu),
        out_shape=jax.ShapeDtypeStruct((Mp, Np), jnp.float32),
        grid=(Mp // tm, Np // tn, Kp // tk),
        in_specs=[
            pl.BlockSpec((tm, tk), lambda i, j, k: (i, k)),
            pl.BlockSpec((tk, tn), lambda i, j, k: (k, j)),
            # bias indexed by the N-tile only -> stays resident across the K axis
            pl.BlockSpec((1, tn), lambda i, j, k: (0, j)),
        ],
        out_specs=pl.BlockSpec((tm, tn), lambda i, j, k: (i, j)),
        scratch_shapes=[pltpu.VMEM((tm, tn), jnp.float32)],
        compiler_params=pltpu.CompilerParams(
            dimension_semantics=("parallel", "parallel", "arbitrary")),
    )(a_p, b_p, bias_p)
    return out[:M, :N]


# ----------------------------------------------------------------------------
# Conv glue (im2col) for the tiny synthetic backbone
# ----------------------------------------------------------------------------

def _im2col(x_nhwc, k, stride, pad):
    B, H, W, C = x_nhwc.shape
    xp = jnp.pad(x_nhwc, ((0, 0), (pad, pad), (pad, pad), (0, 0)))
    Ho = (H + 2 * pad - k) // stride + 1
    Wo = (W + 2 * pad - k) // stride + 1
    cols = []
    for di in range(k):
        for dj in range(k):
            cols.append(xp[:, di:di + stride * Ho:stride,
                           dj:dj + stride * Wo:stride, :])
    patches = jnp.stack(cols, axis=-2)              # [B,Ho,Wo,k*k,C]
    return patches.reshape(B, Ho, Wo, k * k * C), Ho, Wo


def conv2d_nhwc(x, w_mat, bias, stride, pad, k=3, relu=False):
    """x:[B,H,W,Cin]; w_mat:[k*k*Cin, Cout] (PyTorch [Cout,Cin,kh,kw] pre-folded)."""
    # TODO(synk): for a real (large) backbone, fold the im2col expansion into the
    # conv kernel via halo-DMA'd NHWC tiles instead of materializing 9x patches
    # in HBM; kept wrapper-side here because the synthetic features are <20 KB.
    B = x.shape[0]
    patches, Ho, Wo = _im2col(x, k, stride, pad)
    cols = patches.reshape(B * Ho * Wo, -1)
    out = pallas_matmul(cols, w_mat, bias, relu=relu)
    return out.reshape(B, Ho, Wo, -1)


def backbone_forward(x_nchw, bp):
    x = jnp.transpose(x_nchw, (0, 2, 3, 1))         # NCHW -> NHWC
    x = conv2d_nhwc(x, bp["conv1_w"], bp["conv1_b"], stride=2, pad=1, relu=True)
    x = conv2d_nhwc(x, bp["conv2_w"], bp["conv2_b"], stride=2, pad=1, relu=True)
    return x


# ----------------------------------------------------------------------------
# Fused BoQ aggregator kernel: one pallas_call per batch element
# ----------------------------------------------------------------------------

def _layernorm(x, g, b, eps=1e-5):
    mu = jnp.mean(x, axis=-1, keepdims=True)
    c = x - mu
    var = jnp.mean(c * c, axis=-1, keepdims=True)
    return c * jax.lax.rsqrt(var + eps) * g + b


def _mha(q_in, kv_in, wqkv, bqkv, wo, bo, nheads, dh, scale, self_attn):
    """torch.nn.MultiheadAttention forward (batch handled by the grid).

    q_in:[Lq,D] f32, kv_in:[Lk,D] f32, wqkv:[D,3D] bf16, bqkv:[1,3D] f32,
    wo:[D,D] f32, bo:[1,D] f32.  Heads via static lane slices; output projection
    accumulated per head (== concat(heads) @ wo)."""
    D = nheads * dh
    if self_attn:
        qkv = jnp.dot(q_in.astype(jnp.bfloat16), wqkv,
                      preferred_element_type=jnp.float32) + bqkv
        qp, kp, vp = qkv[:, :D], qkv[:, D:2 * D], qkv[:, 2 * D:]
    else:
        qp = jnp.dot(q_in.astype(jnp.bfloat16), wqkv[:, :D],
                     preferred_element_type=jnp.float32) + bqkv[:, :D]
        kv = jnp.dot(kv_in.astype(jnp.bfloat16), wqkv[:, D:],
                     preferred_element_type=jnp.float32) + bqkv[:, D:]
        kp, vp = kv[:, :D], kv[:, D:]

    acc = jnp.broadcast_to(bo, (q_in.shape[0], D)).astype(jnp.float32)
    for h in range(nheads):
        sl = slice(h * dh, (h + 1) * dh)
        qh, kh, vh = qp[:, sl], kp[:, sl], vp[:, sl]
        s = jax.lax.dot_general(qh.astype(jnp.bfloat16), kh.astype(jnp.bfloat16),
                                (((1,), (1,)), ((), ())),
                                preferred_element_type=jnp.float32) * scale
        s = s - jnp.max(s, axis=-1, keepdims=True)
        e = jnp.exp(s)
        p = e * pl.reciprocal(jnp.sum(e, axis=-1, keepdims=True), approx=True)
        oh = jnp.dot(p.astype(jnp.bfloat16), vh.astype(jnp.bfloat16),
                     preferred_element_type=jnp.float32)
        acc = acc + jnp.dot(oh.astype(jnp.bfloat16),
                            wo[sl, :].astype(jnp.bfloat16),
                            preferred_element_type=jnp.float32)
    return acc


def _boq_agg_kernel(cols_ref, *refs, treedef, nheads, dh, num_layers, nq, d,
                    row_dim):
    o_ref = refs[-1]
    param_refs = refs[:-1]
    # Reconstruct the parameter pytree (of refs) and load everything once; all
    # weights are whole-array VMEM blocks, constant across the batch grid.
    pv = jax.tree_util.tree_map(
        lambda r: r[...], jax.tree_util.tree_unflatten(treedef, param_refs))
    blk = pv["blocks"]
    scale = 1.0 / math.sqrt(dh)

    # proj conv (as matmul over im2col patches) + input LayerNorm
    x = jnp.dot(cols_ref[0], pv["proj_w"],
                preferred_element_type=jnp.float32) + pv["proj_b"]
    x = _layernorm(x, pv["nin_g"], pv["nin_b"])

    # fc accumulator kept transposed: o2t[r, d] = sum_q fc_w[r, q] * out[q, d]
    o2t = jnp.broadcast_to(pv["fc_b"], (row_dim, d)).astype(jnp.float32)

    for l in range(num_layers):
        # --- TransformerEncoderLayer (post-norm, ReLU FFN, dropout=0) ---
        sa = _mha(x, x, blk["enc_wqkv"][l], blk["enc_bqkv"][l],
                  blk["enc_wo"][l], blk["enc_bo"][l], nheads, dh, scale, True)
        x = _layernorm(x + sa, blk["enc_n1g"][l], blk["enc_n1b"][l])
        h = jnp.dot(x.astype(jnp.bfloat16), blk["enc_w1"][l],
                    preferred_element_type=jnp.float32) + blk["enc_b1"][l]
        h = jnp.maximum(h, 0.0)
        h = jnp.dot(h.astype(jnp.bfloat16), blk["enc_w2"][l],
                    preferred_element_type=jnp.float32) + blk["enc_b2"][l]
        x = _layernorm(x + h, blk["enc_n2g"][l], blk["enc_n2b"][l])

        # --- learnable queries: self-attention + LayerNorm ---
        q = blk["queries"][l]
        q = q + _mha(q, q, blk["qsa_wqkv"][l], blk["qsa_bqkv"][l],
                     blk["qsa_wo"][l], blk["qsa_bo"][l], nheads, dh, scale, True)
        q = _layernorm(q, blk["nq_g"][l], blk["nq_b"][l])

        # --- cross attention (queries -> encoded features) + LayerNorm ---
        out_l = _mha(q, x, blk["ca_wqkv"][l], blk["ca_bqkv"][l],
                     blk["ca_wo"][l], blk["ca_bo"][l], nheads, dh, scale, False)
        out_l = _layernorm(out_l, blk["nout_g"][l], blk["nout_b"][l])

        # fc over the concatenated query axis, folded into per-block accumulation
        # (== concat(outs, axis=1).permute(0,2,1) @ fc_w.T + fc_b)
        o2t = o2t + jnp.dot(blk_fc := pv["fc_w"][:, l * nq:(l + 1) * nq],
                            out_l.astype(jnp.bfloat16),
                            preferred_element_type=jnp.float32)

    # L2 normalize over all d*row_dim elements == F.normalize on flattened desc
    nrm2 = jnp.sum(o2t * o2t, axis=(0, 1), keepdims=True)
    inv = jax.lax.rsqrt(jnp.maximum(nrm2, 1e-24))       # eps=1e-12 on the norm
    o_ref[0] = o2t * inv


def _const_index_map(ndim):
    zeros = (0,) * ndim
    return lambda b: zeros


def boq_aggregator(feat_nhwc, ap, nheads):
    B, H, W, _ = feat_nhwc.shape
    patches, Ho, Wo = _im2col(feat_nhwc, k=3, stride=1, pad=1)
    L = Ho * Wo
    cols = patches.reshape(B, L, -1).astype(jnp.bfloat16)

    d = ap["proj_b"].shape[-1]
    row_dim = ap["fc_w"].shape[0]
    num_layers, nq = ap["blocks"]["queries"].shape[0], ap["blocks"]["queries"].shape[1]
    dh = d // nheads

    leaves, treedef = jax.tree_util.tree_flatten(ap)
    in_specs = [pl.BlockSpec((1, L, cols.shape[-1]), lambda b: (b, 0, 0))]
    in_specs += [pl.BlockSpec(leaf.shape, _const_index_map(leaf.ndim))
                 for leaf in leaves]

    out = pl.pallas_call(
        functools.partial(_boq_agg_kernel, treedef=treedef, nheads=nheads, dh=dh,
                          num_layers=num_layers, nq=nq, d=d, row_dim=row_dim),
        out_shape=jax.ShapeDtypeStruct((B, row_dim, d), jnp.float32),
        grid=(B,),
        in_specs=in_specs,
        out_specs=pl.BlockSpec((1, row_dim, d), lambda b: (b, 0, 0)),
        compiler_params=pltpu.CompilerParams(dimension_semantics=("parallel",)),
    )(cols, *leaves)
    # transpose+flatten glue: [B, row_dim, d] -> [B, d*row_dim] (PyTorch flatten order)
    return out.transpose(0, 2, 1).reshape(B, d * row_dim)


def vpr_model_forward(x_nchw, params, nheads):
    feat = backbone_forward(x_nchw, params["backbone"])
    return boq_aggregator(feat, params["aggregator"], nheads)


# ----------------------------------------------------------------------------
# Deterministic synthetic parameter init (backbone/aggregator are injected deps)
# ----------------------------------------------------------------------------

def _init_linear(key, d_in, d_out, scale=0.05):
    k1, k2 = jax.random.split(key)
    w = jax.random.normal(k1, (d_in, d_out), jnp.float32) * scale
    b = jax.random.normal(k2, (d_out,), jnp.float32) * scale
    return w, b


def _init_conv(key, cin, cout, k=3, scale=0.05):
    k1, k2 = jax.random.split(key)
    w = jax.random.normal(k1, (cout, cin, k, k), jnp.float32) * scale   # torch layout
    w_mat = jnp.transpose(w, (2, 3, 1, 0)).reshape(k * k * cin, cout)   # im2col layout
    b = jax.random.normal(k2, (cout,), jnp.float32) * scale
    return w_mat, b


def _init_mha(key, d):
    ks = jax.random.split(key, 4)
    wq, bq = _init_linear(ks[0], d, d)
    wk, bk = _init_linear(ks[1], d, d)
    wv, bv = _init_linear(ks[2], d, d)
    wo, bo = _init_linear(ks[3], d, d)
    wqkv = jnp.concatenate([wq, wk, wv], axis=1).astype(jnp.bfloat16)   # [d, 3d]
    bqkv = jnp.concatenate([bq, bk, bv]).reshape(1, 3 * d)
    return wqkv, bqkv, wo, bo.reshape(1, d)


def _init_boq_block(key, d, nq):
    ks = jax.random.split(key, 6)
    enc_wqkv, enc_bqkv, enc_wo, enc_bo = _init_mha(ks[0], d)
    w1, b1 = _init_linear(ks[1], d, 4 * d)
    w2, b2 = _init_linear(ks[2], 4 * d, d)
    queries = jax.random.normal(ks[3], (nq, d), jnp.float32)
    qsa_wqkv, qsa_bqkv, qsa_wo, qsa_bo = _init_mha(ks[4], d)
    ca_wqkv, ca_bqkv, ca_wo, ca_bo = _init_mha(ks[5], d)
    ones = jnp.ones((1, d), jnp.float32)
    zeros = jnp.zeros((1, d), jnp.float32)
    return dict(
        enc_wqkv=enc_wqkv, enc_bqkv=enc_bqkv, enc_wo=enc_wo, enc_bo=enc_bo,
        enc_n1g=ones, enc_n1b=zeros,
        enc_w1=w1.astype(jnp.bfloat16), enc_b1=b1.reshape(1, 4 * d),
        enc_w2=w2.astype(jnp.bfloat16), enc_b2=b2.reshape(1, d),
        enc_n2g=ones, enc_n2b=zeros,
        queries=queries,
        qsa_wqkv=qsa_wqkv, qsa_bqkv=qsa_bqkv, qsa_wo=qsa_wo, qsa_bo=qsa_bo,
        nq_g=ones, nq_b=zeros,
        ca_wqkv=ca_wqkv, ca_bqkv=ca_bqkv, ca_wo=ca_wo, ca_bo=ca_bo,
        nout_g=ones, nout_b=zeros,
    )


def init_params(key, c_in=3, c_mid=8, c_feat=16, proj_c=32, nq=8, num_layers=2,
                row_dim=4):
    ks = jax.random.split(key, 8)
    conv1_w, conv1_b = _init_conv(ks[0], c_in, c_mid)
    conv2_w, conv2_b = _init_conv(ks[1], c_mid, c_feat)
    proj_w, proj_b = _init_conv(ks[2], c_feat, proj_c)
    fc_w, fc_b = _init_linear(ks[3], num_layers * nq, row_dim)
    block_list = [_init_boq_block(k, proj_c, nq)
                  for k in jax.random.split(ks[4], num_layers)]
    blocks = jax.tree_util.tree_map(lambda *xs: jnp.stack(xs, axis=0), *block_list)
    return dict(
        backbone=dict(conv1_w=conv1_w, conv1_b=conv1_b,
                      conv2_w=conv2_w, conv2_b=conv2_b),
        aggregator=dict(
            proj_w=proj_w.astype(jnp.bfloat16), proj_b=proj_b.reshape(1, proj_c),
            nin_g=jnp.ones((1, proj_c), jnp.float32),
            nin_b=jnp.zeros((1, proj_c), jnp.float32),
            blocks=blocks,
            fc_w=jnp.transpose(fc_w).astype(jnp.bfloat16),   # [row_dim, L*nq]
            fc_b=fc_b.reshape(row_dim, 1)))


# ----------------------------------------------------------------------------

if __name__ == "__main__":
    B, C, H, W = 2, 3, 16, 16
    NHEADS, ROW_DIM = 4, 4

    key = jax.random.PRNGKey(0)
    kx, kp = jax.random.split(key)
    x = jax.random.normal(kx, (B, C, H, W), jnp.float32)   # NCHW, like PyTorch
    params = init_params(kp, row_dim=ROW_DIM)

    fwd = jax.jit(functools.partial(vpr_model_forward, nheads=NHEADS))
    out = jax.block_until_ready(fwd(x, params))

    assert out.shape == (B, 32 * ROW_DIM), out.shape
    # TODO(synk): real VPRModel uses a pretrained ResNet/DinoV2 backbone; a small
    # synthetic conv backbone is used here since backbone is an injected dependency.
    print("KERNEL_OK")
</pallas_src>

<mosaic_0001>
module attributes {stable_mosaic.version = 11 : i64} {
  func.func @_matmul_kernel(%arg0: i32, %arg1: i32, %arg2: i32, %arg3: memref<128x128xbf16, #tpu.memory_space<vmem>>, %arg4: memref<128x128xbf16, #tpu.memory_space<vmem>>, %arg5: memref<1x128xf32, #tpu.memory_space<vmem>>, %arg6: memref<128x128xf32, #tpu.memory_space<vmem>>, %arg7: memref<128x128xf32, #tpu.memory_space<vmem>>) attributes {dimension_semantics = [#tpu.dimension_semantics<parallel>, #tpu.dimension_semantics<parallel>, #tpu.dimension_semantics<arbitrary>], iteration_bounds = array<i64: 1, 1, 1>, scalar_prefetch = 0 : i64, scratch_operands = 1 : i64, tpu.core_type = #tpu.core_type<tc>, window_params = [{transform_indices = @transform_0, window_bounds = array<i64: 128, 128>}, {transform_indices = @transform_1, window_bounds = array<i64: 128, 128>}, {transform_indices = @transform_2, window_bounds = array<i64: 1, 128>}, {transform_indices = @transform_3, window_bounds = array<i64: 128, 128>}]} {
    %c0_i32 = arith.constant 0 : i32
    %0 = arith.cmpi eq, %arg2, %c0_i32 : i32
    %1 = arith.extui %0 : i1 to i32
    %c0_i32_0 = arith.constant 0 : i32
    %2 = arith.cmpi ne, %1, %c0_i32_0 : i32
    scf.if %2 {
      %cst_10 = arith.constant 0.000000e+00 : f32
      %12 = vector.broadcast %cst_10 : f32 to vector<128x128xf32>
      %c0_11 = arith.constant 0 : index
      %c0_12 = arith.constant 0 : index
      %13 = vector.load %arg7[%c0_11, %c0_12] : memref<128x128xf32, #tpu.memory_space<vmem>>, vector<128x128xf32>
      tpu.vector_store %arg7[%c0_11, %c0_12], %12 {strides = array<i32>} : memref<128x128xf32, #tpu.memory_space<vmem>>, vector<128x128xf32>,
    } else {
    }
    %c0 = arith.constant 0 : index
    %c0_1 = arith.constant 0 : index
    %3 = vector.load %arg7[%c0, %c0_1] : memref<128x128xf32, #tpu.memory_space<vmem>>, vector<128x128xf32>
    %c0_2 = arith.constant 0 : index
    %c0_3 = arith.constant 0 : index
    %4 = vector.load %arg3[%c0_2, %c0_3] : memref<128x128xbf16, #tpu.memory_space<vmem>>, vector<128x128xbf16>
    %c0_4 = arith.constant 0 : index
    %c0_5 = arith.constant 0 : index
    %5 = vector.load %arg4[%c0_4, %c0_5] : memref<128x128xbf16, #tpu.memory_space<vmem>>, vector<128x128xbf16>
    %cst = arith.constant dense<0.000000e+00> : vector<128x128xf32>
    %6 = tpu.matmul %4, %5, %cst {dimension_numbers = #tpu.dot_dimension_numbers<[1], [0], [0], [1], [0, 0, 1, 1], [], []>} : vector<128x128xbf16>, vector<128x128xbf16>, vector<128x128xf32> -> vector<128x128xf32>
    %7 = arith.addf %3, %6 : vector<128x128xf32>
    %c0_6 = arith.constant 0 : index
    %c0_7 = arith.constant 0 : index
    %8 = vector.load %arg7[%c0_6, %c0_7] : memref<128x128xf32, #tpu.memory_space<vmem>>, vector<128x128xf32>
    tpu.vector_store %arg7[%c0_6, %c0_7], %7 {strides = array<i32>} : memref<128x128xf32, #tpu.memory_space<vmem>>, vector<128x128xf32>,
    %c0_i32_8 = arith.constant 0 : i32
    %9 = arith.cmpi eq, %arg2, %c0_i32_8 : i32
    %10 = arith.extui %9 : i1 to i32
    %c0_i32_9 = arith.constant 0 : i32
    %11 = arith.cmpi ne, %10, %c0_i32_9 : i32
    scf.if %11 {
      %c0_10 = arith.constant 0 : index
      %c0_11 = arith.constant 0 : index
      %12 = vector.load %arg7[%c0_10, %c0_11] : memref<128x128xf32, #tpu.memory_space<vmem>>, vector<128x128xf32>
      %c0_12 = arith.constant 0 : index
      %c0_13 = arith.constant 0 : index
      %13 = vector.load %arg5[%c0_12, %c0_13] : memref<1x128xf32, #tpu.memory_space<vmem>>, vector<1x128xf32>
      %14 = vector.broadcast %13 : vector<1x128xf32> to vector<128x128xf32>
      %15 = arith.addf %12, %14 : vector<128x128xf32>
      %cst_14 = arith.constant 0.000000e+00 : f32
      %16 = vector.broadcast %cst_14 : f32 to vector<128x128xf32>
      %17 = arith.maximumf %15, %16 : vector<128x128xf32>
      %c0_15 = arith.constant 0 : index
      %c0_16 = arith.constant 0 : index
      %18 = vector.load %arg6[%c0_15, %c0_16] : memref<128x128xf32, #tpu.memory_space<vmem>>, vector<128x128xf32>
      tpu.vector_store %arg6[%c0_15, %c0_16], %17 {strides = array<i32>} : memref<128x128xf32, #tpu.memory_space<vmem>>, vector<128x128xf32>,
    } else {
    }
    return
  }
  func.func @transform_0(%arg0: i32, %arg1: i32, %arg2: i32) -> (i32, i32) {
    %c0_i32 = arith.constant 0 : i32
    return %arg0, %arg2 : i32, i32
  }
  func.func @transform_1(%arg0: i32, %arg1: i32, %arg2: i32) -> (i32, i32) {
    %c0_i32 = arith.constant 0 : i32
    return %arg2, %arg1 : i32, i32
  }
  func.func @transform_2(%arg0: i32, %arg1: i32, %arg2: i32) -> (i32, i32) {
    %c0_i32 = arith.constant 0 : i32
    %c0_i32_0 = arith.constant 0 : i32
    return %c0_i32, %arg1 : i32, i32
  }
  func.func @transform_3(%arg0: i32, %arg1: i32, %arg2: i32) -> (i32, i32) {
    %c0_i32 = arith.constant 0 : i32
    return %arg0, %arg1 : i32, i32
  }
}

module attributes {stable_mosaic.version = 11 : i64} {
  func.func @_matmul_kernel(%arg0: i32, %arg1: i32, %arg2: i32, %arg3: memref<32x128xbf16, #tpu.memory_space<vmem>>, %arg4: memref<128x128xbf16, #tpu.memory_space<vmem>>, %arg5: memref<1x128xf32, #tpu.memory_space<vmem>>, %arg6: memref<32x128xf32, #tpu.memory_space<vmem>>, %arg7: memref<32x128xf32, #tpu.memory_space<vmem>>) attributes {dimension_semantics = [#tpu.dimension_semantics<parallel>, #tpu.dimension_semantics<parallel>, #tpu.dimension_semantics<arbitrary>], iteration_bounds = array<i64: 1, 1, 1>, scalar_prefetch = 0 : i64, scratch_operands = 1 : i64, tpu.core_type = #tpu.core_type<tc>, window_params = [{transform_indices = @transform_0, window_bounds = array<i64: 32, 128>}, {transform_indices = @transform_1, window_bounds = array<i64: 128, 128>}, {transform_indices = @transform_2, window_bounds = array<i64: 1, 128>}, {transform_indices = @transform_3, window_bounds = array<i64: 32, 128>}]} {
    %c0_i32 = arith.constant 0 : i32
    %0 = arith.cmpi eq, %arg2, %c0_i32 : i32
    %1 = arith.extui %0 : i1 to i32
    %c0_i32_0 = arith.constant 0 : i32
    %2 = arith.cmpi ne, %1, %c0_i32_0 : i32
    scf.if %2 {
      %cst_10 = arith.constant 0.000000e+00 : f32
      %12 = vector.broadcast %cst_10 : f32 to vector<32x128xf32>
      %c0_11 = arith.constant 0 : index
      %c0_12 = arith.constant 0 : index
      %13 = vector.load %arg7[%c0_11, %c0_12] : memref<32x128xf32, #tpu.memory_space<vmem>>, vector<32x128xf32>
      tpu.vector_store %arg7[%c0_11, %c0_12], %12 {strides = array<i32>} : memref<32x128xf32, #tpu.memory_space<vmem>>, vector<32x128xf32>,
    } else {
    }
    %c0 = arith.constant 0 : index
    %c0_1 = arith.constant 0 : index
    %3 = vector.load %arg7[%c0, %c0_1] : memref<32x128xf32, #tpu.memory_space<vmem>>, vector<32x128xf32>
    %c0_2 = arith.constant 0 : index
    %c0_3 = arith.constant 0 : index
    %4 = vector.load %arg3[%c0_2, %c0_3] : memref<32x128xbf16, #tpu.memory_space<vmem>>, vector<32x128xbf16>
    %c0_4 = arith.constant 0 : index
    %c0_5 = arith.constant 0 : index
    %5 = vector.load %arg4[%c0_4, %c0_5] : memref<128x128xbf16, #tpu.memory_space<vmem>>, vector<128x128xbf16>
    %cst = arith.constant dense<0.000000e+00> : vector<32x128xf32>
    %6 = tpu.matmul %4, %5, %cst {dimension_numbers = #tpu.dot_dimension_numbers<[1], [0], [0], [1], [0, 0, 1, 1], [], []>} : vector<32x128xbf16>, vector<128x128xbf16>, vector<32x128xf32> -> vector<32x128xf32>
    %7 = arith.addf %3, %6 : vector<32x128xf32>
    %c0_6 = arith.constant 0 : index
    %c0_7 = arith.constant 0 : index
    %8 = vector.load %arg7[%c0_6, %c0_7] : memref<32x128xf32, #tpu.memory_space<vmem>>, vector<32x128xf32>
    tpu.vector_store %arg7[%c0_6, %c0_7], %7 {strides = array<i32>} : memref<32x128xf32, #tpu.memory_space<vmem>>, vector<32x128xf32>,
    %c0_i32_8 = arith.constant 0 : i32
    %9 = arith.cmpi eq, %arg2, %c0_i32_8 : i32
    %10 = arith.extui %9 : i1 to i32
    %c0_i32_9 = arith.constant 0 : i32
    %11 = arith.cmpi ne, %10, %c0_i32_9 : i32
    scf.if %11 {
      %c0_10 = arith.constant 0 : index
      %c0_11 = arith.constant 0 : index
      %12 = vector.load %arg7[%c0_10, %c0_11] : memref<32x128xf32, #tpu.memory_space<vmem>>, vector<32x128xf32>
      %c0_12 = arith.constant 0 : index
      %c0_13 = arith.constant 0 : index
      %13 = vector.load %arg5[%c0_12, %c0_13] : memref<1x128xf32, #tpu.memory_space<vmem>>, vector<1x128xf32>
      %14 = vector.broadcast %13 : vector<1x128xf32> to vector<32x128xf32>
      %15 = arith.addf %12, %14 : vector<32x128xf32>
      %cst_14 = arith.constant 0.000000e+00 : f32
      %16 = vector.broadcast %cst_14 : f32 to vector<32x128xf32>
      %17 = arith.maximumf %15, %16 : vector<32x128xf32>
      %c0_15 = arith.constant 0 : index
      %c0_16 = arith.constant 0 : index
      %18 = vector.load %arg6[%c0_15, %c0_16] : memref<32x128xf32, #tpu.memory_space<vmem>>, vector<32x128xf32>
      tpu.vector_store %arg6[%c0_15, %c0_16], %17 {strides = array<i32>} : memref<32x128xf32, #tpu.memory_space<vmem>>, vector<32x128xf32>,
    } else {
    }
    return
  }
  func.func @transform_0(%arg0: i32, %arg1: i32, %arg2: i32) -> (i32, i32) {
    %c0_i32 = arith.constant 0 : i32
    return %arg0, %arg2 : i32, i32
  }
  func.func @transform_1(%arg0: i32, %arg1: i32, %arg2: i32) -> (i32, i32) {
    %c0_i32 = arith.constant 0 : i32
    return %arg2, %arg1 : i32, i32
  }
  func.func @transform_2(%arg0: i32, %arg1: i32, %arg2: i32) -> (i32, i32) {
    %c0_i32 = arith.constant 0 : i32
    %c0_i32_0 = arith.constant 0 : i32
    return %c0_i32, %arg1 : i32, i32
  }
  func.func @transform_3(%arg0: i32, %arg1: i32, %arg2: i32) -> (i32, i32) {
    %c0_i32 = arith.constant 0 : i32
    return %arg0, %arg1 : i32, i32
  }
}

module attributes {stable_mosaic.version = 11 : i64} {
  func.func @_boq_agg_kernel(%arg0: i32, %arg1: memref<1x16x144xbf16, #tpu.memory_space<vmem>>, %arg2: memref<2x1x32xf32, #tpu.memory_space<vmem>>, %arg3: memref<2x1x96xf32, #tpu.memory_space<vmem>>, %arg4: memref<2x32x32xf32, #tpu.memory_space<vmem>>, %arg5: memref<2x32x96xbf16, #tpu.memory_space<vmem>>, %arg6: memref<2x1x128xf32, #tpu.memory_space<vmem>>, %arg7: memref<2x1x32xf32, #tpu.memory_space<vmem>>, %arg8: memref<2x1x32xf32, #tpu.memory_space<vmem>>, %arg9: memref<2x1x96xf32, #tpu.memory_space<vmem>>, %arg10: memref<2x1x32xf32, #tpu.memory_space<vmem>>, %arg11: memref<2x1x32xf32, #tpu.memory_space<vmem>>, %arg12: memref<2x1x32xf32, #tpu.memory_space<vmem>>, %arg13: memref<2x1x32xf32, #tpu.memory_space<vmem>>, %arg14: memref<2x32x128xbf16, #tpu.memory_space<vmem>>, %arg15: memref<2x128x32xbf16, #tpu.memory_space<vmem>>, %arg16: memref<2x32x32xf32, #tpu.memory_space<vmem>>, %arg17: memref<2x32x96xbf16, #tpu.memory_space<vmem>>, %arg18: memref<2x1x32xf32, #tpu.memory_space<vmem>>, %arg19: memref<2x1x32xf32, #tpu.memory_space<vmem>>, %arg20: memref<2x1x32xf32, #tpu.memory_space<vmem>>, %arg21: memref<2x1x32xf32, #tpu.memory_space<vmem>>, %arg22: memref<2x1x32xf32, #tpu.memory_space<vmem>>, %arg23: memref<2x1x96xf32, #tpu.memory_space<vmem>>, %arg24: memref<2x32x32xf32, #tpu.memory_space<vmem>>, %arg25: memref<2x32x96xbf16, #tpu.memory_space<vmem>>, %arg26: memref<2x8x32xf32, #tpu.memory_space<vmem>>, %arg27: memref<4x1xf32, #tpu.memory_space<vmem>>, %arg28: memref<4x16xbf16, #tpu.memory_space<vmem>>, %arg29: memref<1x32xf32, #tpu.memory_space<vmem>>, %arg30: memref<1x32xf32, #tpu.memory_space<vmem>>, %arg31: memref<1x32xf32, #tpu.memory_space<vmem>>, %arg32: memref<144x32xbf16, #tpu.memory_space<vmem>>, %arg33: memref<1x4x32xf32, #tpu.memory_space<vmem>>) attributes {dimension_semantics = [#tpu.dimension_semantics<parallel>], iteration_bounds = array<i64: 2>, scalar_prefetch = 0 : i64, scratch_operands = 0 : i64, tpu.core_type = #tpu.core_type<tc>, window_params = [{transform_indices = @transform_0, window_bounds = array<i64: 1, 16, 144>}, {pipeline_mode = #tpu.pipeline_mode<synchronous>, transform_indices = @transform_1, window_bounds = array<i64: 2, 1, 32>}, {pipeline_mode = #tpu.pipeline_mode<synchronous>, transform_indices = @transform_2, window_bounds = array<i64: 2, 1, 96>}, {pipeline_mode = #tpu.pipeline_mode<synchronous>, transform_indices = @transform_3, window_bounds = array<i64: 2, 32, 32>}, {pipeline_mode = #tpu.pipeline_mode<synchronous>, transform_indices = @transform_4, window_bounds = array<i64: 2, 32, 96>}, {pipeline_mode = #tpu.pipeline_mode<synchronous>, transform_indices = @transform_5, window_bounds = array<i64: 2, 1, 128>}, {pipeline_mode = #tpu.pipeline_mode<synchronous>, transform_indices = @transform_6, window_bounds = array<i64: 2, 1, 32>}, {pipeline_mode = #tpu.pipeline_mode<synchronous>, transform_indices = @transform_7, window_bounds = array<i64: 2, 1, 32>}, {pipeline_mode = #tpu.pipeline_mode<synchronous>, transform_indices = @transform_8, window_bounds = array<i64: 2, 1, 96>}, {pipeline_mode = #tpu.pipeline_mode<synchronous>, transform_indices = @transform_9, window_bounds = array<i64: 2, 1, 32>}, {pipeline_mode = #tpu.pipeline_mode<synchronous>, transform_indices = @transform_10, window_bounds = array<i64: 2, 1, 32>}, {pipeline_mode = #tpu.pipeline_mode<synchronous>, transform_indices = @transform_11, window_bounds = array<i64: 2, 1, 32>}, {pipeline_mode = #tpu.pipeline_mode<synchronous>, transform_indices = @transform_12, window_bounds = array<i64: 2, 1, 32>}, {pipeline_mode = #tpu.pipeline_mode<synchronous>, transform_indices = @transform_13, window_bounds = array<i64: 2, 32, 128>}, {pipeline_mode = #tpu.pipeline_mode<synchronous>, transform_indices = @transform_14, window_bounds = array<i64: 2, 128, 32>}, {pipeline_mode = #tpu.pipeline_mode<synchronous>, transform_indices = @transform_15, window_bounds = array<i64: 2, 32, 32>}, {pipeline_mode = #tpu.pipeline_mode<synchronous>, transform_indices = @transform_16, window_bounds = array<i64: 2, 32, 96>}, {pipeline_mode = #tpu.pipeline_mode<synchronous>, transform_indices = @transform_17, window_bounds = array<i64: 2, 1, 32>}, {pipeline_mode = #tpu.pipeline_mode<synchronous>, transform_indices = @transform_18, window_bounds = array<i64: 2, 1, 32>}, {pipeline_mode = #tpu.pipeline_mode<synchronous>, transform_indices = @transform_19, window_bounds = array<i64: 2, 1, 32>}, {pipeline_mode = #tpu.pipeline_mode<synchronous>, transform_indices = @transform_20, window_bounds = array<i64: 2, 1, 32>}, {pipeline_mode = #tpu.pipeline_mode<synchronous>, transform_indices = @transform_21, window_bounds = array<i64: 2, 1, 32>}, {pipeline_mode = #tpu.pipeline_mode<synchronous>, transform_indices = @transform_22, window_bounds = array<i64: 2, 1, 96>}, {pipeline_mode = #tpu.pipeline_mode<synchronous>, transform_indices = @transform_23, window_bounds = array<i64: 2, 32, 32>}, {pipeline_mode = #tpu.pipeline_mode<synchronous>, transform_indices = @transform_24, window_bounds = array<i64: 2, 32, 96>}, {pipeline_mode = #tpu.pipeline_mode<synchronous>, transform_indices = @transform_25, window_bounds = array<i64: 2, 8, 32>}, {pipeline_mode = #tpu.pipeline_mode<synchronous>, transform_indices = @transform_26, window_bounds = array<i64: 4, 1>}, {pipeline_mode = #tpu.pipeline_mode<synchronous>, transform_indices = @transform_27, window_bounds = array<i64: 4, 16>}, {pipeline_mode = #tpu.pipeline_mode<synchronous>, transform_indices = @transform_28, window_bounds = array<i64: 1, 32>}, {pipeline_mode = #tpu.pipeline_mode<synchronous>, transform_indices = @transform_29, window_bounds = array<i64: 1, 32>}, {pipeline_mode = #tpu.pipeline_mode<synchronous>, transform_indices = @transform_30, window_bounds = array<i64: 1, 32>}, {pipeline_mode = #tpu.pipeline_mode<synchronous>, transform_indices = @transform_31, window_bounds = array<i64: 144, 32>}, {transform_indices = @transform_32, window_bounds = array<i64: 1, 4, 32>}]} {
    %c0 = arith.constant 0 : index
    %c0_0 = arith.constant 0 : index
    %c0_1 = arith.constant 0 : index
    %0 = vector.load %arg2[%c0, %c0_0, %c0_1] : memref<2x1x32xf32, #tpu.memory_space<vmem>>, vector<2x1x32xf32>
    %c0_2 = arith.constant 0 : index
    %c0_3 = arith.constant 0 : index
    %c0_4 = arith.constant 0 : index
    %1 = vector.load %arg3[%c0_2, %c0_3, %c0_4] : memref<2x1x96xf32, #tpu.memory_space<vmem>>, vector<2x1x96xf32>
    %c0_5 = arith.constant 0 : index
    %c0_6 = arith.constant 0 : index
    %c0_7 = arith.constant 0 : index
    %2 = vector.load %arg4[%c0_5, %c0_6, %c0_7] : memref<2x32x32xf32, #tpu.memory_space<vmem>>, vector<2x32x32xf32>
    %c0_8 = arith.constant 0 : index
    %c0_9 = arith.constant 0 : index
    %c0_10 = arith.constant 0 : index
    %3 = vector.load %arg5[%c0_8, %c0_9, %c0_10] : memref<2x32x96xbf16, #tpu.memory_space<vmem>>, vector<2x32x96xbf16>
    %c0_11 = arith.constant 0 : index
    %c0_12 = arith.constant 0 : index
    %c0_13 = arith.constant 0 : index
    %4 = vector.load %arg6[%c0_11, %c0_12, %c0_13] : memref<2x1x128xf32, #tpu.memory_space<vmem>>, vector<2x1x128xf32>
    %c0_14 = arith.constant 0 : index
    %c0_15 = arith.constant 0 : index
    %c0_16 = arith.constant 0 : index
    %5 = vector.load %arg7[%c0_14, %c0_15, %c0_16] : memref<2x1x32xf32, #tpu.memory_space<vmem>>, vector<2x1x32xf32>
    %c0_17 = arith.constant 0 : index
    %c0_18 = arith.constant 0 : index
    %c0_19 = arith.constant 0 : index
    %6 = vector.load %arg8[%c0_17, %c0_18, %c0_19] : memref<2x1x32xf32, #tpu.memory_space<vmem>>, vector<2x1x32xf32>
    %c0_20 = arith.constant 0 : index
    %c0_21 = arith.constant 0 : index
    %c0_22 = arith.constant 0 : index
    %7 = vector.load %arg9[%c0_20, %c0_21, %c0_22] : memref<2x1x96xf32, #tpu.memory_space<vmem>>, vector<2x1x96xf32>
    %c0_23 = arith.constant 0 : index
    %c0_24 = arith.constant 0 : index
    %c0_25 = arith.constant 0 : index
    %8 = vector.load %arg10[%c0_23, %c0_24, %c0_25] : memref<2x1x32xf32, #tpu.memory_space<vmem>>, vector<2x1x32xf32>
    %c0_26 = arith.constant 0 : index
    %c0_27 = arith.constant 0 : index
    %c0_28 = arith.constant 0 : index
    %9 = vector.load %arg11[%c0_26, %c0_27, %c0_28] : memref<2x1x32xf32, #tpu.memory_space<vmem>>, vector<2x1x32xf32>
    %c0_29 = arith.constant 0 : index
    %c0_30 = arith.constant 0 : index
    %c0_31 = arith.constant 0 : index
    %10 = vector.load %arg12[%c0_29, %c0_30, %c0_31] : memref<2x1x32xf32, #tpu.memory_space<vmem>>, vector<2x1x32xf32>
    %c0_32 = arith.constant 0 : index
    %c0_33 = arith.constant 0 : index
    %c0_34 = arith.constant 0 : index
    %11 = vector.load %arg13[%c0_32, %c0_33, %c0_34] : memref<2x1x32xf32, #tpu.memory_space<vmem>>, vector<2x1x32xf32>
    %c0_35 = arith.constant 0 : index
    %c0_36 = arith.constant 0 : index
    %c0_37 = arith.constant 0 : index
    %12 = vector.load %arg14[%c0_35, %c0_36, %c0_37] : memref<2x32x128xbf16, #tpu.memory_space<vmem>>, vector<2x32x128xbf16>
    %c0_38 = arith.constant 0 : index
    %c0_39 = arith.constant 0 : index
    %c0_40 = arith.constant 0 : index
    %13 = vector.load %arg15[%c0_38, %c0_39, %c0_40] : memref<2x128x32xbf16, #tpu.memory_space<vmem>>, vector<2x128x32xbf16>
    %c0_41 = arith.constant 0 : index
    %c0_42 = arith.constant 0 : index
    %c0_43 = arith.constant 0 : index
    %14 = vector.load %arg16[%c0_41, %c0_42, %c0_43] : memref<2x32x32xf32, #tpu.memory_space<vmem>>, vector<2x32x32xf32>
    %c0_44 = arith.constant 0 : index
    %c0_45 = arith.constant 0 : index
    %c0_46 = arith.constant 0 : index
    %15 = vector.load %arg17[%c0_44, %c0_45, %c0_46] : memref<2x32x96xbf16, #tpu.memory_space<vmem>>, vector<2x32x96xbf16>
    %c0_47 = arith.constant 0 : index
    %c0_48 = arith.constant 0 : index
    %c0_49 = arith.constant 0 : index
    %16 = vector.load %arg18[%c0_47, %c0_48, %c0_49] : memref<2x1x32xf32, #tpu.memory_space<vmem>>, vector<2x1x32xf32>
    %c0_50 = arith.constant 0 : index
    %c0_51 = arith.constant 0 : index
    %c0_52 = arith.constant 0 : index
    %17 = vector.load %arg19[%c0_50, %c0_51, %c0_52] : memref<2x1x32xf32, #tpu.memory_space<vmem>>, vector<2x1x32xf32>
    %c0_53 = arith.constant 0 : index
    %c0_54 = arith.constant 0 : index
    %c0_55 = arith.constant 0 : index
    %18 = vector.load %arg20[%c0_53, %c0_54, %c0_55] : memref<2x1x32xf32, #tpu.memory_space<vmem>>, vector<2x1x32xf32>
    %c0_56 = arith.constant 0 : index
    %c0_57 = arith.constant 0 : index
    %c0_58 = arith.constant 0 : index
    %19 = vector.load %arg21[%c0_56, %c0_57, %c0_58] : memref<2x1x32xf32, #tpu.memory_space<vmem>>, vector<2x1x32xf32>
    %c0_59 = arith.constant 0 : index
    %c0_60 = arith.constant 0 : index
    %c0_61 = arith.constant 0 : index
    %20 = vector.load %arg22[%c0_59, %c0_60, %c0_61] : memref<2x1x32xf32, #tpu.memory_space<vmem>>, vector<2x1x32xf32>
    %c0_62 = arith.constant 0 : index
    %c0_63 = arith.constant 0 : index
    %c0_64 = arith.constant 0 : index
    %21 = vector.load %arg23[%c0_62, %c0_63, %c0_64] : memref<2x1x96xf32, #tpu.memory_space<vmem>>, vector<2x1x96xf32>
    %c0_65 = arith.constant 0 : index
    %c0_66 = arith.constant 0 : index
    %c0_67 = arith.constant 0 : index
    %22 = vector.load %arg24[%c0_65, %c0_66, %c0_67] : memref<2x32x32xf32, #tpu.memory_space<vmem>>, vector<2x32x32xf32>
    %c0_68 = arith.constant 0 : index
    %c0_69 = arith.constant 0 : index
    %c0_70 = arith.constant 0 : index
    %23 = vector.load %arg25[%c0_68, %c0_69, %c0_70] : memref<2x32x96xbf16, #tpu.memory_space<vmem>>, vector<2x32x96xbf16>
    %c0_71 = arith.constant 0 : index
    %c0_72 = arith.constant 0 : index
    %c0_73 = arith.constant 0 : index
    %24 = vector.load %arg26[%c0_71, %c0_72, %c0_73] : memref<2x8x32xf32, #tpu.memory_space<vmem>>, vector<2x8x32xf32>
    %c0_74 = arith.constant 0 : index
    %c0_75 = arith.constant 0 : index
    %25 = vector.load %arg27[%c0_74, %c0_75] : memref<4x1xf32, #tpu.memory_space<vmem>>, vector<4x1xf32>
    %c0_76 = arith.constant 0 : index
    %c0_77 = arith.constant 0 : index
    %26 = vector.load %arg28[%c0_76, %c0_77] : memref<4x16xbf16, #tpu.memory_space<vmem>>, vector<4x16xbf16>
    %c0_78 = arith.constant 0 : index
    %c0_79 = arith.constant 0 : index
    %27 = vector.load %arg29[%c0_78, %c0_79] : memref<1x32xf32, #tpu.memory_space<vmem>>, vector<1x32xf32>
    %c0_80 = arith.constant 0 : index
    %c0_81 = arith.constant 0 : index
    %28 = vector.load %arg30[%c0_80, %c0_81] : memref<1x32xf32, #tpu.memory_space<vmem>>, vector<1x32xf32>
    %c0_82 = arith.constant 0 : index
    %c0_83 = arith.constant 0 : index
    %29 = vector.load %arg31[%c0_82, %c0_83] : memref<1x32xf32, #tpu.memory_space<vmem>>, vector<1x32xf32>
    %c0_84 = arith.constant 0 : index
    %c0_85 = arith.constant 0 : index
    %30 = vector.load %arg32[%c0_84, %c0_85] : memref<144x32xbf16, #tpu.memory_space<vmem>>, vector<144x32xbf16>
    %c0_86 = arith.constant 0 : index
    %c0_87 = arith.constant 0 : index
    %c0_88 = arith.constant 0 : index
    %31 = vector.load %arg1[%c0_86, %c0_87, %c0_88] : memref<1x16x144xbf16, #tpu.memory_space<vmem>>, vector<1x16x144xbf16>
    %32 = vector.shape_cast %31 : vector<1x16x144xbf16> to vector<16x144xbf16>
    %cst = arith.constant dense<0.000000e+00> : vector<16x32xf32>
    %33 = tpu.matmul %32, %30, %cst {dimension_numbers = #tpu.dot_dimension_numbers<[1], [0], [0], [1], [0, 0, 1, 1], [], []>} : vector<16x144xbf16>, vector<144x32xbf16>, vector<16x32xf32> -> vector<16x32xf32>
    %34 = vector.broadcast %29 : vector<1x32xf32> to vector<16x32xf32>
    %35 = arith.addf %33, %34 : vector<16x32xf32>
    %cst_89 = arith.constant dense<0.000000e+00> : vector<16xf32>
    %36 = vector.multi_reduction <add>, %35, %cst_89 [1] : vector<16x32xf32> to vector<16xf32>
    %37 = vector.shape_cast %36 : vector<16xf32> to vector<16x1xf32>
    %cst_90 = arith.constant 3.200000e+01 : f32
    %38 = vector.broadcast %cst_90 : f32 to vector<16x1xf32>
    %39 = arith.divf %37, %38 : vector<16x1xf32>
    %40 = vector.broadcast %39 : vector<16x1xf32> to vector<16x32xf32>
    %41 = arith.subf %35, %40 : vector<16x32xf32>
    %42 = arith.mulf %41, %41 : vector<16x32xf32>
    %cst_91 = arith.constant dense<0.000000e+00> : vector<16xf32>
    %43 = vector.multi_reduction <add>, %42, %cst_91 [1] : vector<16x32xf32> to vector<16xf32>
    %44 = vector.shape_cast %43 : vector<16xf32> to vector<16x1xf32>
    %cst_92 = arith.constant 3.200000e+01 : f32
    %45 = vector.broadcast %cst_92 : f32 to vector<16x1xf32>
    %46 = arith.divf %44, %45 : vector<16x1xf32>
    %cst_93 = arith.constant 9.99999974E-6 : f32
    %47 = vector.broadcast %cst_93 : f32 to vector<16x1xf32>
    %48 = arith.addf %46, %47 : vector<16x1xf32>
    %49 = math.rsqrt %48 : vector<16x1xf32>
    %50 = vector.broadcast %49 : vector<16x1xf32> to vector<16x32xf32>
    %51 = arith.mulf %41, %50 : vector<16x32xf32>
    %52 = vector.broadcast %28 : vector<1x32xf32> to vector<16x32xf32>
    %53 = arith.mulf %51, %52 : vector<16x32xf32>
    %54 = vector.broadcast %27 : vector<1x32xf32> to vector<16x32xf32>
    %55 = arith.addf %53, %54 : vector<16x32xf32>
    %56 = vector.shape_cast %25 : vector<4x1xf32> to vector<4x1xf32>
    %57 = vector.broadcast %56 : vector<4x1xf32> to vector<4x32xf32>
    %58 = vector.extract_strided_slice %15 {offsets = [0, 0, 0], sizes = [1, 32, 96], strides = [1, 1, 1]} : vector<2x32x96xbf16> to vector<1x32x96xbf16>
    %59 = vector.shape_cast %58 : vector<1x32x96xbf16> to vector<32x96xbf16>
    %60 = vector.extract_strided_slice %7 {offsets = [0, 0, 0], sizes = [1, 1, 96], strides = [1, 1, 1]} : vector<2x1x96xf32> to vector<1x1x96xf32>
    %61 = vector.shape_cast %60 : vector<1x1x96xf32> to vector<1x96xf32>
    %62 = vector.extract_strided_slice %14 {offsets = [0, 0, 0], sizes = [1, 32, 32], strides = [1, 1, 1]} : vector<2x32x32xf32> to vector<1x32x32xf32>
    %63 = vector.shape_cast %62 : vector<1x32x32xf32> to vector<32x32xf32>
    %64 = vector.extract_strided_slice %6 {offsets = [0, 0, 0], sizes = [1, 1, 32], strides = [1, 1, 1]} : vector<2x1x32xf32> to vector<1x1x32xf32>
    %65 = vector.shape_cast %64 : vector<1x1x32xf32> to vector<1x32xf32>
    %66 = arith.truncf %55 : vector<16x32xf32> to vector<16x32xbf16>
    %cst_94 = arith.constant dense<0.000000e+00> : vector<16x96xf32>
    %67 = tpu.matmul %66, %59, %cst_94 {dimension_numbers = #tpu.dot_dimension_numbers<[1], [0], [0], [1], [0, 0, 1, 1], [], []>} : vector<16x32xbf16>, vector<32x96xbf16>, vector<16x96xf32> -> vector<16x96xf32>
    %68 = vector.broadcast %61 : vector<1x96xf32> to vector<16x96xf32>
    %69 = arith.addf %67, %68 : vector<16x96xf32>
    %70 = vector.extract_strided_slice %69 {offsets = [0, 0], sizes = [16, 32], strides = [1, 1]} : vector<16x96xf32> to vector<16x32xf32>
    %71 = vector.extract_strided_slice %69 {offsets = [0, 32], sizes = [16, 32], strides = [1, 1]} : vector<16x96xf32> to vector<16x32xf32>
    %72 = vector.extract_strided_slice %69 {offsets = [0, 64], sizes = [16, 32], strides = [1, 1]} : vector<16x96xf32> to vector<16x32xf32>
    %73 = vector.shape_cast %65 : vector<1x32xf32> to vector<1x32xf32>
    %74 = vector.broadcast %73 : vector<1x32xf32> to vector<16x32xf32>
    %75 = vector.extract_strided_slice %70 {offsets = [0, 0], sizes = [16, 8], strides = [1, 1]} : vector<16x32xf32> to vector<16x8xf32>
    %76 = vector.extract_strided_slice %71 {offsets = [0, 0], sizes = [16, 8], strides = [1, 1]} : vector<16x32xf32> to vector<16x8xf32>
    %77 = vector.extract_strided_slice %72 {offsets = [0, 0], sizes = [16, 8], strides = [1, 1]} : vector<16x32xf32> to vector<16x8xf32>
    %78 = arith.truncf %75 : vector<16x8xf32> to vector<16x8xbf16>
    %79 = arith.truncf %76 : vector<16x8xf32> to vector<16x8xbf16>
    %cst_95 = arith.constant dense<0.000000e+00> : vector<16x16xf32>
    %80 = tpu.matmul %78, %79, %cst_95 {dimension_numbers = #tpu.dot_dimension_numbers<[1], [1], [0], [0], [0, 0, 1, 0], [], []>} : vector<16x8xbf16>, vector<16x8xbf16>, vector<16x16xf32> -> vector<16x16xf32>
    %cst_96 = arith.constant 0.353553385 : f32
    %81 = vector.broadcast %cst_96 : f32 to vector<16x16xf32>
    %82 = arith.mulf %80, %81 : vector<16x16xf32>
    %cst_97 = arith.constant dense<0xFF800000> : vector<16xf32>
    %83 = vector.multi_reduction <maximumf>, %82, %cst_97 [1] : vector<16x16xf32> to vector<16xf32>
    %84 = vector.shape_cast %83 : vector<16xf32> to vector<16x1xf32>
    %85 = vector.broadcast %84 : vector<16x1xf32> to vector<16x16xf32>
    %86 = arith.subf %82, %85 : vector<16x16xf32>
    %87 = math.exp %86 : vector<16x16xf32>
    %cst_98 = arith.constant dense<0.000000e+00> : vector<16xf32>
    %88 = vector.multi_reduction <add>, %87, %cst_98 [1] : vector<16x16xf32> to vector<16xf32>
    %89 = vector.shape_cast %88 : vector<16xf32> to vector<16x1xf32>
    %90 = tpu.reciprocal %89 {approx = true} : vector<16x1xf32> -> vector<16x1xf32>
    %91 = vector.broadcast %90 : vector<16x1xf32> to vector<16x16xf32>
    %92 = arith.mulf %87, %91 : vector<16x16xf32>
    %93 = arith.truncf %92 : vector<16x16xf32> to vector<16x16xbf16>
    %94 = arith.truncf %77 : vector<16x8xf32> to vector<16x8xbf16>
    %cst_99 = arith.constant dense<0.000000e+00> : vector<16x8xf32>
    %95 = tpu.matmul %93, %94, %cst_99 {dimension_numbers = #tpu.dot_dimension_numbers<[1], [0], [0], [1], [0, 0, 1, 1], [], []>} : vector<16x16xbf16>, vector<16x8xbf16>, vector<16x8xf32> -> vector<16x8xf32>
    %96 = arith.truncf %95 : vector<16x8xf32> to vector<16x8xbf16>
    %97 = vector.extract_strided_slice %63 {offsets = [0, 0], sizes = [8, 32], strides = [1, 1]} : vector<32x32xf32> to vector<8x32xf32>
    %98 = arith.truncf %97 : vector<8x32xf32> to vector<8x32xbf16>
    %cst_100 = arith.constant dense<0.000000e+00> : vector<16x32xf32>
    %99 = tpu.matmul %96, %98, %cst_100 {dimension_numbers = #tpu.dot_dimension_numbers<[1], [0], [0], [1], [0, 0, 1, 1], [], []>} : vector<16x8xbf16>, vector<8x32xbf16>, vector<16x32xf32> -> vector<16x32xf32>
    %100 = arith.addf %74, %99 : vector<16x32xf32>
    %101 = vector.extract_strided_slice %70 {offsets = [0, 8], sizes = [16, 8], strides = [1, 1]} : vector<16x32xf32> to vector<16x8xf32>
    %102 = vector.extract_strided_slice %71 {offsets = [0, 8], sizes = [16, 8], strides = [1, 1]} : vector<16x32xf32> to vector<16x8xf32>
    %103 = vector.extract_strided_slice %72 {offsets = [0, 8], sizes = [16, 8], strides = [1, 1]} : vector<16x32xf32> to vector<16x8xf32>
    %104 = arith.truncf %101 : vector<16x8xf32> to vector<16x8xbf16>
    %105 = arith.truncf %102 : vector<16x8xf32> to vector<16x8xbf16>
    %cst_101 = arith.constant dense<0.000000e+00> : vector<16x16xf32>
    %106 = tpu.matmul %104, %105, %cst_101 {dimension_numbers = #tpu.dot_dimension_numbers<[1], [1], [0], [0], [0, 0, 1, 0], [], []>} : vector<16x8xbf16>, vector<16x8xbf16>, vector<16x16xf32> -> vector<16x16xf32>
    %cst_102 = arith.constant 0.353553385 : f32
    %107 = vector.broadcast %cst_102 : f32 to vector<16x16xf32>
    %108 = arith.mulf %106, %107 : vector<16x16xf32>
    %cst_103 = arith.constant dense<0xFF800000> : vector<16xf32>
    %109 = vector.multi_reduction <maximumf>, %108, %cst_103 [1] : vector<16x16xf32> to vector<16xf32>
    %110 = vector.shape_cast %109 : vector<16xf32> to vector<16x1xf32>
    %111 = vector.broadcast %110 : vector<16x1xf32> to vector<16x16xf32>
    %112 = arith.subf %108, %111 : vector<16x16xf32>
    %113 = math.exp %112 : vector<16x16xf32>
    %cst_104 = arith.constant dense<0.000000e+00> : vector<16xf32>
    %114 = vector.multi_reduction <add>, %113, %cst_104 [1] : vector<16x16xf32> to vector<16xf32>
    %115 = vector.shape_cast %114 : vector<16xf32> to vector<16x1xf32>
    %116 = tpu.reciprocal %115 {approx = true} : vector<16x1xf32> -> vector<16x1xf32>
    %117 = vector.broadcast %116 : vector<16x1xf32> to vector<16x16xf32>
    %118 = arith.mulf %113, %117 : vector<16x16xf32>
    %119 = arith.truncf %118 : vector<16x16xf32> to vector<16x16xbf16>
    %120 = arith.truncf %103 : vector<16x8xf32> to vector<16x8xbf16>
    %cst_105 = arith.constant dense<0.000000e+00> : vector<16x8xf32>
    %121 = tpu.matmul %119, %120, %cst_105 {dimension_numbers = #tpu.dot_dimension_numbers<[1], [0], [0], [1], [0, 0, 1, 1], [], []>} : vector<16x16xbf16>, vector<16x8xbf16>, vector<16x8xf32> -> vector<16x8xf32>
    %122 = arith.truncf %121 : vector<16x8xf32> to vector<16x8xbf16>
    %123 = vector.extract_strided_slice %63 {offsets = [8, 0], sizes = [8, 32], strides = [1, 1]} : vector<32x32xf32> to vector<8x32xf32>
    %124 = arith.truncf %123 : vector<8x32xf32> to vector<8x32xbf16>
    %cst_106 = arith.constant dense<0.000000e+00> : vector<16x32xf32>
    %125 = tpu.matmul %122, %124, %cst_106 {dimension_numbers = #tpu.dot_dimension_numbers<[1], [0], [0], [1], [0, 0, 1, 1], [], []>} : vector<16x8xbf16>, vector<8x32xbf16>, vector<16x32xf32> -> vector<16x32xf32>
    %126 = arith.addf %100, %125 : vector<16x32xf32>
    %127 = vector.extract_strided_slice %70 {offsets = [0, 16], sizes = [16, 8], strides = [1, 1]} : vector<16x32xf32> to vector<16x8xf32>
    %128 = vector.extract_strided_slice %71 {offsets = [0, 16], sizes = [16, 8], strides = [1, 1]} : vector<16x32xf32> to vector<16x8xf32>
    %129 = vector.extract_strided_slice %72 {offsets = [0, 16], sizes = [16, 8], strides = [1, 1]} : vector<16x32xf32> to vector<16x8xf32>
    %130 = arith.truncf %127 : vector<16x8xf32> to vector<16x8xbf16>
    %131 = arith.truncf %128 : vector<16x8xf32> to vector<16x8xbf16>
    %cst_107 = arith.constant dense<0.000000e+00> : vector<16x16xf32>
    %132 = tpu.matmul %130, %131, %cst_107 {dimension_numbers = #tpu.dot_dimension_numbers<[1], [1], [0], [0], [0, 0, 1, 0], [], []>} : vector<16x8xbf16>, vector<16x8xbf16>, vector<16x16xf32> -> vector<16x16xf32>
    %cst_108 = arith.constant 0.353553385 : f32
    %133 = vector.broadcast %cst_108 : f32 to vector<16x16xf32>
    %134 = arith.mulf %132, %133 : vector<16x16xf32>
    %cst_109 = arith.constant dense<0xFF800000> : vector<16xf32>
    %135 = vector.multi_reduction <maximumf>, %134, %cst_109 [1] : vector<16x16xf32> to vector<16xf32>
    %136 = vector.shape_cast %135 : vector<16xf32> to vector<16x1xf32>
    %137 = vector.broadcast %136 : vector<16x1xf32> to vector<16x16xf32>
    %138 = arith.subf %134, %137 : vector<16x16xf32>
    %139 = math.exp %138 : vector<16x16xf32>
    %cst_110 = arith.constant dense<0.000000e+00> : vector<16xf32>
    %140 = vector.multi_reduction <add>, %139, %cst_110 [1] : vector<16x16xf32> to vector<16xf32>
    %141 = vector.shape_cast %140 : vector<16xf32> to vector<16x1xf32>
    %142 = tpu.reciprocal %141 {approx = true} : vector<16x1xf32> -> vector<16x1xf32>
    %143 = vector.broadcast %142 : vector<16x1xf32> to vector<16x16xf32>
    %144 = arith.mulf %139, %143 : vector<16x16xf32>
    %145 = arith.truncf %144 : vector<16x16xf32> to vector<16x16xbf16>
    %146 = arith.truncf %129 : vector<16x8xf32> to vector<16x8xbf16>
    %cst_111 = arith.constant dense<0.000000e+00> : vector<16x8xf32>
    %147 = tpu.matmul %145, %146, %cst_111 {dimension_numbers = #tpu.dot_dimension_numbers<[1], [0], [0], [1], [0, 0, 1, 1], [], []>} : vector<16x16xbf16>, vector<16x8xbf16>, vector<16x8xf32> -> vector<16x8xf32>
    %148 = arith.truncf %147 : vector<16x8xf32> to vector<16x8xbf16>
    %149 = vector.extract_strided_slice %63 {offsets = [16, 0], sizes = [8, 32], strides = [1, 1]} : vector<32x32xf32> to vector<8x32xf32>
    %150 = arith.truncf %149 : vector<8x32xf32> to vector<8x32xbf16>
    %cst_112 = arith.constant dense<0.000000e+00> : vector<16x32xf32>
    %151 = tpu.matmul %148, %150, %cst_112 {dimension_numbers = #tpu.dot_dimension_numbers<[1], [0], [0], [1], [0, 0, 1, 1], [], []>} : vector<16x8xbf16>, vector<8x32xbf16>, vector<16x32xf32> -> vector<16x32xf32>
    %152 = arith.addf %126, %151 : vector<16x32xf32>
    %153 = vector.extract_strided_slice %70 {offsets = [0, 24], sizes = [16, 8], strides = [1, 1]} : vector<16x32xf32> to vector<16x8xf32>
    %154 = vector.extract_strided_slice %71 {offsets = [0, 24], sizes = [16, 8], strides = [1, 1]} : vector<16x32xf32> to vector<16x8xf32>
    %155 = vector.extract_strided_slice %72 {offsets = [0, 24], sizes = [16, 8], strides = [1, 1]} : vector<16x32xf32> to vector<16x8xf32>
    %156 = arith.truncf %153 : vector<16x8xf32> to vector<16x8xbf16>
    %157 = arith.truncf %154 : vector<16x8xf32> to vector<16x8xbf16>
    %cst_113 = arith.constant dense<0.000000e+00> : vector<16x16xf32>
    %158 = tpu.matmul %156, %157, %cst_113 {dimension_numbers = #tpu.dot_dimension_numbers<[1], [1], [0], [0], [0, 0, 1, 0], [], []>} : vector<16x8xbf16>, vector<16x8xbf16>, vector<16x16xf32> -> vector<16x16xf32>
    %cst_114 = arith.constant 0.353553385 : f32
    %159 = vector.broadcast %cst_114 : f32 to vector<16x16xf32>
    %160 = arith.mulf %158, %159 : vector<16x16xf32>
    %cst_115 = arith.constant dense<0xFF800000> : vector<16xf32>
    %161 = vector.multi_reduction <maximumf>, %160, %cst_115 [1] : vector<16x16xf32> to vector<16xf32>
    %162 = vector.shape_cast %161 : vector<16xf32> to vector<16x1xf32>
    %163 = vector.broadcast %162 : vector<16x1xf32> to vector<16x16xf32>
    %164 = arith.subf %160, %163 : vector<16x16xf32>
    %165 = math.exp %164 : vector<16x16xf32>
    %cst_116 = arith.constant dense<0.000000e+00> : vector<16xf32>
    %166 = vector.multi_reduction <add>, %165, %cst_116 [1] : vector<16x16xf32> to vector<16xf32>
    %167 = vector.shape_cast %166 : vector<16xf32> to vector<16x1xf32>
    %168 = tpu.reciprocal %167 {approx = true} : vector<16x1xf32> -> vector<16x1xf32>
    %169 = vector.broadcast %168 : vector<16x1xf32> to vector<16x16xf32>
    %170 = arith.mulf %165, %169 : vector<16x16xf32>
    %171 = arith.truncf %170 : vector<16x16xf32> to vector<16x16xbf16>
    %172 = arith.truncf %155 : vector<16x8xf32> to vector<16x8xbf16>
    %cst_117 = arith.constant dense<0.000000e+00> : vector<16x8xf32>
    %173 = tpu.matmul %171, %172, %cst_117 {dimension_numbers = #tpu.dot_dimension_numbers<[1], [0], [0], [1], [0, 0, 1, 1], [], []>} : vector<16x16xbf16>, vector<16x8xbf16>, vector<16x8xf32> -> vector<16x8xf32>
    %174 = arith.truncf %173 : vector<16x8xf32> to vector<16x8xbf16>
    %175 = vector.extract_strided_slice %63 {offsets = [24, 0], sizes = [8, 32], strides = [1, 1]} : vector<32x32xf32> to vector<8x32xf32>
    %176 = arith.truncf %175 : vector<8x32xf32> to vector<8x32xbf16>
    %cst_118 = arith.constant dense<0.000000e+00> : vector<16x32xf32>
    %177 = tpu.matmul %174, %176, %cst_118 {dimension_numbers = #tpu.dot_dimension_numbers<[1], [0], [0], [1], [0, 0, 1, 1], [], []>} : vector<16x8xbf16>, vector<8x32xbf16>, vector<16x32xf32> -> vector<16x32xf32>
    %178 = arith.addf %152, %177 : vector<16x32xf32>
    %179 = arith.addf %55, %178 : vector<16x32xf32>
    %180 = vector.extract_strided_slice %9 {offsets = [0, 0, 0], sizes = [1, 1, 32], strides = [1, 1, 1]} : vector<2x1x32xf32> to vector<1x1x32xf32>
    %181 = vector.shape_cast %180 : vector<1x1x32xf32> to vector<1x32xf32>
    %182 = vector.extract_strided_slice %8 {offsets = [0, 0, 0], sizes = [1, 1, 32], strides = [1, 1, 1]} : vector<2x1x32xf32> to vector<1x1x32xf32>
    %183 = vector.shape_cast %182 : vector<1x1x32xf32> to vector<1x32xf32>
    %cst_119 = arith.constant dense<0.000000e+00> : vector<16xf32>
    %184 = vector.multi_reduction <add>, %179, %cst_119 [1] : vector<16x32xf32> to vector<16xf32>
    %185 = vector.shape_cast %184 : vector<16xf32> to vector<16x1xf32>
    %cst_120 = arith.constant 3.200000e+01 : f32
    %186 = vector.broadcast %cst_120 : f32 to vector<16x1xf32>
    %187 = arith.divf %185, %186 : vector<16x1xf32>
    %188 = vector.broadcast %187 : vector<16x1xf32> to vector<16x32xf32>
    %189 = arith.subf %179, %188 : vector<16x32xf32>
    %190 = arith.mulf %189, %189 : vector<16x32xf32>
    %cst_121 = arith.constant dense<0.000000e+00> : vector<16xf32>
    %191 = vector.multi_reduction <add>, %190, %cst_121 [1] : vector<16x32xf32> to vector<16xf32>
    %192 = vector.shape_cast %191 : vector<16xf32> to vector<16x1xf32>
    %cst_122 = arith.constant 3.200000e+01 : f32
    %193 = vector.broadcast %cst_122 : f32 to vector<16x1xf32>
    %194 = arith.divf %192, %193 : vector<16x1xf32>
    %cst_123 = arith.constant 9.99999974E-6 : f32
    %195 = vector.broadcast %cst_123 : f32 to vector<16x1xf32>
    %196 = arith.addf %194, %195 : vector<16x1xf32>
    %197 = math.rsqrt %196 : vector<16x1xf32>
    %198 = vector.broadcast %197 : vector<16x1xf32> to vector<16x32xf32>
    %199 = arith.mulf %189, %198 : vector<16x32xf32>
    %200 = vector.broadcast %181 : vector<1x32xf32> to vector<16x32xf32>
    %201 = arith.mulf %199, %200 : vector<16x32xf32>
    %202 = vector.broadcast %183 : vector<1x32xf32> to vector<16x32xf32>
    %203 = arith.addf %201, %202 : vector<16x32xf32>
    %204 = arith.truncf %203 : vector<16x32xf32> to vector<16x32xbf16>
    %205 = vector.extract_strided_slice %12 {offsets = [0, 0, 0], sizes = [1, 32, 128], strides = [1, 1, 1]} : vector<2x32x128xbf16> to vector<1x32x128xbf16>
    %206 = vector.shape_cast %205 : vector<1x32x128xbf16> to vector<32x128xbf16>
    %cst_124 = arith.constant dense<0.000000e+00> : vector<16x128xf32>
    %207 = tpu.matmul %204, %206, %cst_124 {dimension_numbers = #tpu.dot_dimension_numbers<[1], [0], [0], [1], [0, 0, 1, 1], [], []>} : vector<16x32xbf16>, vector<32x128xbf16>, vector<16x128xf32> -> vector<16x128xf32>
    %208 = vector.extract_strided_slice %4 {offsets = [0, 0, 0], sizes = [1, 1, 128], strides = [1, 1, 1]} : vector<2x1x128xf32> to vector<1x1x128xf32>
    %209 = vector.shape_cast %208 : vector<1x1x128xf32> to vector<1x128xf32>
    %210 = vector.broadcast %209 : vector<1x128xf32> to vector<16x128xf32>
    %211 = arith.addf %207, %210 : vector<16x128xf32>
    %cst_125 = arith.constant 0.000000e+00 : f32
    %212 = vector.broadcast %cst_125 : f32 to vector<16x128xf32>
    %213 = arith.maximumf %211, %212 : vector<16x128xf32>
    %214 = arith.truncf %213 : vector<16x128xf32> to vector<16x128xbf16>
    %215 = vector.extract_strided_slice %13 {offsets = [0, 0, 0], sizes = [1, 128, 32], strides = [1, 1, 1]} : vector<2x128x32xbf16> to vector<1x128x32xbf16>
    %216 = vector.shape_cast %215 : vector<1x128x32xbf16> to vector<128x32xbf16>
    %cst_126 = arith.constant dense<0.000000e+00> : vector<16x32xf32>
    %217 = tpu.matmul %214, %216, %cst_126 {dimension_numbers = #tpu.dot_dimension_numbers<[1], [0], [0], [1], [0, 0, 1, 1], [], []>} : vector<16x128xbf16>, vector<128x32xbf16>, vector<16x32xf32> -> vector<16x32xf32>
    %218 = vector.extract_strided_slice %5 {offsets = [0, 0, 0], sizes = [1, 1, 32], strides = [1, 1, 1]} : vector<2x1x32xf32> to vector<1x1x32xf32>
    %219 = vector.shape_cast %218 : vector<1x1x32xf32> to vector<1x32xf32>
    %220 = vector.broadcast %219 : vector<1x32xf32> to vector<16x32xf32>
    %221 = arith.addf %217, %220 : vector<16x32xf32>
    %222 = arith.addf %203, %221 : vector<16x32xf32>
    %223 = vector.extract_strided_slice %11 {offsets = [0, 0, 0], sizes = [1, 1, 32], strides = [1, 1, 1]} : vector<2x1x32xf32> to vector<1x1x32xf32>
    %224 = vector.shape_cast %223 : vector<1x1x32xf32> to vector<1x32xf32>
    %225 = vector.extract_strided_slice %10 {offsets = [0, 0, 0], sizes = [1, 1, 32], strides = [1, 1, 1]} : vector<2x1x32xf32> to vector<1x1x32xf32>
    %226 = vector.shape_cast %225 : vector<1x1x32xf32> to vector<1x32xf32>
    %cst_127 = arith.constant dense<0.000000e+00> : vector<16xf32>
    %227 = vector.multi_reduction <add>, %222, %cst_127 [1] : vector<16x32xf32> to vector<16xf32>
    %228 = vector.shape_cast %227 : vector<16xf32> to vector<16x1xf32>
    %cst_128 = arith.constant 3.200000e+01 : f32
    %229 = vector.broadcast %cst_128 : f32 to vector<16x1xf32>
    %230 = arith.divf %228, %229 : vector<16x1xf32>
    %231 = vector.broadcast %230 : vector<16x1xf32> to vector<16x32xf32>
    %232 = arith.subf %222, %231 : vector<16x32xf32>
    %233 = arith.mulf %232, %232 : vector<16x32xf32>
    %cst_129 = arith.constant dense<0.000000e+00> : vector<16xf32>
    %234 = vector.multi_reduction <add>, %233, %cst_129 [1] : vector<16x32xf32> to vector<16xf32>
    %235 = vector.shape_cast %234 : vector<16xf32> to vector<16x1xf32>
    %cst_130 = arith.constant 3.200000e+01 : f32
    %236 = vector.broadcast %cst_130 : f32 to vector<16x1xf32>
    %237 = arith.divf %235, %236 : vector<16x1xf32>
    %cst_131 = arith.constant 9.99999974E-6 : f32
    %238 = vector.broadcast %cst_131 : f32 to vector<16x1xf32>
    %239 = arith.addf %237, %238 : vector<16x1xf32>
    %240 = math.rsqrt %239 : vector<16x1xf32>
    %241 = vector.broadcast %240 : vector<16x1xf32> to vector<16x32xf32>
    %242 = arith.mulf %232, %241 : vector<16x32xf32>
    %243 = vector.broadcast %224 : vector<1x32xf32> to vector<16x32xf32>
    %244 = arith.mulf %242, %243 : vector<16x32xf32>
    %245 = vector.broadcast %226 : vector<1x32xf32> to vector<16x32xf32>
    %246 = arith.addf %244, %245 : vector<16x32xf32>
    %247 = vector.extract_strided_slice %24 {offsets = [0, 0, 0], sizes = [1, 8, 32], strides = [1, 1, 1]} : vector<2x8x32xf32> to vector<1x8x32xf32>
    %248 = vector.shape_cast %247 : vector<1x8x32xf32> to vector<8x32xf32>
    %249 = vector.extract_strided_slice %23 {offsets = [0, 0, 0], sizes = [1, 32, 96], strides = [1, 1, 1]} : vector<2x32x96xbf16> to vector<1x32x96xbf16>
    %250 = vector.shape_cast %249 : vector<1x32x96xbf16> to vector<32x96xbf16>
    %251 = vector.extract_strided_slice %21 {offsets = [0, 0, 0], sizes = [1, 1, 96], strides = [1, 1, 1]} : vector<2x1x96xf32> to vector<1x1x96xf32>
    %252 = vector.shape_cast %251 : vector<1x1x96xf32> to vector<1x96xf32>
    %253 = vector.extract_strided_slice %22 {offsets = [0, 0, 0], sizes = [1, 32, 32], strides = [1, 1, 1]} : vector<2x32x32xf32> to vector<1x32x32xf32>
    %254 = vector.shape_cast %253 : vector<1x32x32xf32> to vector<32x32xf32>
    %255 = vector.extract_strided_slice %20 {offsets = [0, 0, 0], sizes = [1, 1, 32], strides = [1, 1, 1]} : vector<2x1x32xf32> to vector<1x1x32xf32>
    %256 = vector.shape_cast %255 : vector<1x1x32xf32> to vector<1x32xf32>
    %257 = arith.truncf %248 : vector<8x32xf32> to vector<8x32xbf16>
    %cst_132 = arith.constant dense<0.000000e+00> : vector<8x96xf32>
    %258 = tpu.matmul %257, %250, %cst_132 {dimension_numbers = #tpu.dot_dimension_numbers<[1], [0], [0], [1], [0, 0, 1, 1], [], []>} : vector<8x32xbf16>, vector<32x96xbf16>, vector<8x96xf32> -> vector<8x96xf32>
    %259 = vector.broadcast %252 : vector<1x96xf32> to vector<8x96xf32>
    %260 = arith.addf %258, %259 : vector<8x96xf32>
    %261 = vector.extract_strided_slice %260 {offsets = [0, 0], sizes = [8, 32], strides = [1, 1]} : vector<8x96xf32> to vector<8x32xf32>
    %262 = vector.extract_strided_slice %260 {offsets = [0, 32], sizes = [8, 32], strides = [1, 1]} : vector<8x96xf32> to vector<8x32xf32>
    %263 = vector.extract_strided_slice %260 {offsets = [0, 64], sizes = [8, 32], strides = [1, 1]} : vector<8x96xf32> to vector<8x32xf32>
    %264 = vector.shape_cast %256 : vector<1x32xf32> to vector<1x32xf32>
    %265 = vector.broadcast %264 : vector<1x32xf32> to vector<8x32xf32>
    %266 = vector.extract_strided_slice %261 {offsets = [0, 0], sizes = [8, 8], strides = [1, 1]} : vector<8x32xf32> to vector<8x8xf32>
    %267 = vector.extract_strided_slice %262 {offsets = [0, 0], sizes = [8, 8], strides = [1, 1]} : vector<8x32xf32> to vector<8x8xf32>
    %268 = vector.extract_strided_slice %263 {offsets = [0, 0], sizes = [8, 8], strides = [1, 1]} : vector<8x32xf32> to vector<8x8xf32>
    %269 = arith.truncf %266 : vector<8x8xf32> to vector<8x8xbf16>
    %270 = arith.truncf %267 : vector<8x8xf32> to vector<8x8xbf16>
    %cst_133 = arith.constant dense<0.000000e+00> : vector<8x8xf32>
    %271 = tpu.matmul %269, %270, %cst_133 {dimension_numbers = #tpu.dot_dimension_numbers<[1], [1], [0], [0], [0, 0, 1, 0], [], []>} : vector<8x8xbf16>, vector<8x8xbf16>, vector<8x8xf32> -> vector<8x8xf32>
    %cst_134 = arith.constant 0.353553385 : f32
    %272 = vector.broadcast %cst_134 : f32 to vector<8x8xf32>
    %273 = arith.mulf %271, %272 : vector<8x8xf32>
    %cst_135 = arith.constant dense<0xFF800000> : vector<8xf32>
    %274 = vector.multi_reduction <maximumf>, %273, %cst_135 [1] : vector<8x8xf32> to vector<8xf32>
    %275 = vector.shape_cast %274 : vector<8xf32> to vector<8x1xf32>
    %276 = vector.broadcast %275 : vector<8x1xf32> to vector<8x8xf32>
    %277 = arith.subf %273, %276 : vector<8x8xf32>
    %278 = math.exp %277 : vector<8x8xf32>
    %cst_136 = arith.constant dense<0.000000e+00> : vector<8xf32>
    %279 = vector.multi_reduction <add>, %278, %cst_136 [1] : vector<8x8xf32> to vector<8xf32>
    %280 = vector.shape_cast %279 : vector<8xf32> to vector<8x1xf32>
    %281 = tpu.reciprocal %280 {approx = true} : vector<8x1xf32> -> vector<8x1xf32>
    %282 = vector.broadcast %281 : vector<8x1xf32> to vector<8x8xf32>
    %283 = arith.mulf %278, %282 : vector<8x8xf32>
    %284 = arith.truncf %283 : vector<8x8xf32> to vector<8x8xbf16>
    %285 = arith.truncf %268 : vector<8x8xf32> to vector<8x8xbf16>
    %cst_137 = arith.constant dense<0.000000e+00> : vector<8x8xf32>
    %286 = tpu.matmul %284, %285, %cst_137 {dimension_numbers = #tpu.dot_dimension_numbers<[1], [0], [0], [1], [0, 0, 1, 1], [], []>} : vector<8x8xbf16>, vector<8x8xbf16>, vector<8x8xf32> -> vector<8x8xf32>
    %287 = arith.truncf %286 : vector<8x8xf32> to vector<8x8xbf16>
    %288 = vector.extract_strided_slice %254 {offsets = [0, 0], sizes = [8, 32], strides = [1, 1]} : vector<32x32xf32> to vector<8x32xf32>
    %289 = arith.truncf %288 : vector<8x32xf32> to vector<8x32xbf16>
    %cst_138 = arith.constant dense<0.000000e+00> : vector<8x32xf32>
    %290 = tpu.matmul %287, %289, %cst_138 {dimension_numbers = #tpu.dot_dimension_numbers<[1], [0], [0], [1], [0, 0, 1, 1], [], []>} : vector<8x8xbf16>, vector<8x32xbf16>, vector<8x32xf32> -> vector<8x32xf32>
    %291 = arith.addf %265, %290 : vector<8x32xf32>
    %292 = vector.extract_strided_slice %261 {offsets = [0, 8], sizes = [8, 8], strides = [1, 1]} : vector<8x32xf32> to vector<8x8xf32>
    %293 = vector.extract_strided_slice %262 {offsets = [0, 8], sizes = [8, 8], strides = [1, 1]} : vector<8x32xf32> to vector<8x8xf32>
    %294 = vector.extract_strided_slice %263 {offsets = [0, 8], sizes = [8, 8], strides = [1, 1]} : vector<8x32xf32> to vector<8x8xf32>
    %295 = arith.truncf %292 : vector<8x8xf32> to vector<8x8xbf16>
    %296 = arith.truncf %293 : vector<8x8xf32> to vector<8x8xbf16>
    %cst_139 = arith.constant dense<0.000000e+00> : vector<8x8xf32>
    %297 = tpu.matmul %295, %296, %cst_139 {dimension_numbers = #tpu.dot_dimension_numbers<[1], [1], [0], [0], [0, 0, 1, 0], [], []>} : vector<8x8xbf16>, vector<8x8xbf16>, vector<8x8xf32> -> vector<8x8xf32>
    %cst_140 = arith.constant 0.353553385 : f32
    %298 = vector.broadcast %cst_140 : f32 to vector<8x8xf32>
    %299 = arith.mulf %297, %298 : vector<8x8xf32>
    %cst_141 = arith.constant dense<0xFF800000> : vector<8xf32>
    %300 = vector.multi_reduction <maximumf>, %299, %cst_141 [1] : vector<8x8xf32> to vector<8xf32>
    %301 = vector.shape_cast %300 : vector<8xf32> to vector<8x1xf32>
    %302 = vector.broadcast %301 : vector<8x1xf32> to vector<8x8xf32>
    %303 = arith.subf %299, %302 : vector<8x8xf32>
    %304 = math.exp %303 : vector<8x8xf32>
    %cst_142 = arith.constant dense<0.000000e+00> : vector<8xf32>
    %305 = vector.multi_reduction <add>, %304, %cst_142 [1] : vector<8x8xf32> to vector<8xf32>
    %306 = vector.shape_cast %305 : vector<8xf32> to vector<8x1xf32>
    %307 = tpu.reciprocal %306 {approx = true} : vector<8x1xf32> -> vector<8x1xf32>
    %308 = vector.broadcast %307 : vector<8x1xf32> to vector<8x8xf32>
    %309 = arith.mulf %304, %308 : vector<8x8xf32>
    %310 = arith.truncf %309 : vector<8x8xf32> to vector<8x8xbf16>
    %311 = arith.truncf %294 : vector<8x8xf32> to vector<8x8xbf16>
    %cst_143 = arith.constant dense<0.000000e+00> : vector<8x8xf32>
    %312 = tpu.matmul %310, %311, %cst_143 {dimension_numbers = #tpu.dot_dimension_numbers<[1], [0], [0], [1], [0, 0, 1, 1], [], []>} : vector<8x8xbf16>, vector<8x8xbf16>, vector<8x8xf32> -> vector<8x8xf32>
    %313 = arith.truncf %312 : vector<8x8xf32> to vector<8x8xbf16>
    %314 = vector.extract_strided_slice %254 {offsets = [8, 0], sizes = [8, 32], strides = [1, 1]} : vector<32x32xf32> to vector<8x32xf32>
    %315 = arith.truncf %314 : vector<8x32xf32> to vector<8x32xbf16>
    %cst_144 = arith.constant dense<0.000000e+00> : vector<8x32xf32>
    %316 = tpu.matmul %313, %315, %cst_144 {dimension_numbers = #tpu.dot_dimension_numbers<[1], [0], [0], [1], [0, 0, 1, 1], [], []>} : vector<8x8xbf16>, vector<8x32xbf16>, vector<8x32xf32> -> vector<8x32xf32>
    %317 = arith.addf %291, %316 : vector<8x32xf32>
    %318 = vector.extract_strided_slice %261 {offsets = [0, 16], sizes = [8, 8], strides = [1, 1]} : vector<8x32xf32> to vector<8x8xf32>
    %319 = vector.extract_strided_slice %262 {offsets = [0, 16], sizes = [8, 8], strides = [1, 1]} : vector<8x32xf32> to vector<8x8xf32>
    %320 = vector.extract_strided_slice %263 {offsets = [0, 16], sizes = [8, 8], strides = [1, 1]} : vector<8x32xf32> to vector<8x8xf32>
    %321 = arith.truncf %318 : vector<8x8xf32> to vector<8x8xbf16>
    %322 = arith.truncf %319 : vector<8x8xf32> to vector<8x8xbf16>
    %cst_145 = arith.constant dense<0.000000e+00> : vector<8x8xf32>
    %323 = tpu.matmul %321, %322, %cst_145 {dimension_numbers = #tpu.dot_dimension_numbers<[1], [1], [0], [0], [0, 0, 1, 0], [], []>} : vector<8x8xbf16>, vector<8x8xbf16>, vector<8x8xf32> -> vector<8x8xf32>
    %cst_146 = arith.constant 0.353553385 : f32
    %324 = vector.broadcast %cst_146 : f32 to vector<8x8xf32>
    %325 = arith.mulf %323, %324 : vector<8x8xf32>
    %cst_147 = arith.constant dense<0xFF800000> : vector<8xf32>
    %326 = vector.multi_reduction <maximumf>, %325, %cst_147 [1] : vector<8x8xf32> to vector<8xf32>
    %327 = vector.shape_cast %326 : vector<8xf32> to vector<8x1xf32>
    %328 = vector.broadcast %327 : vector<8x1xf32> to vector<8x8xf32>
    %329 = arith.subf %325, %328 : vector<8x8xf32>
    %330 = math.exp %329 : vector<8x8xf32>
    %cst_148 = arith.constant dense<0.000000e+00> : vector<8xf32>
    %331 = vector.multi_reduction <add>, %330, %cst_148 [1] : vector<8x8xf32> to vector<8xf32>
    %332 = vector.shape_cast %331 : vector<8xf32> to vector<8x1xf32>
    %333 = tpu.reciprocal %332 {approx = true} : vector<8x1xf32> -> vector<8x1xf32>
    %334 = vector.broadcast %333 : vector<8x1xf32> to vector<8x8xf32>
    %335 = arith.mulf %330, %334 : vector<8x8xf32>
    %336 = arith.truncf %335 : vector<8x8xf32> to vector<8x8xbf16>
    %337 = arith.truncf %320 : vector<8x8xf32> to vector<8x8xbf16>
    %cst_149 = arith.constant dense<0.000000e+00> : vector<8x8xf32>
    %338 = tpu.matmul %336, %337, %cst_149 {dimension_numbers = #tpu.dot_dimension_numbers<[1], [0], [0], [1], [0, 0, 1, 1], [], []>} : vector<8x8xbf16>, vector<8x8xbf16>, vector<8x8xf32> -> vector<8x8xf32>
    %339 = arith.truncf %338 : vector<8x8xf32> to vector<8x8xbf16>
    %340 = vector.extract_strided_slice %254 {offsets = [16, 0], sizes = [8, 32], strides = [1, 1]} : vector<32x32xf32> to vector<8x32xf32>
    %341 = arith.truncf %340 : vector<8x32xf32> to vector<8x32xbf16>
    %cst_150 = arith.constant dense<0.000000e+00> : vector<8x32xf32>
    %342 = tpu.matmul %339, %341, %cst_150 {dimension_numbers = #tpu.dot_dimension_numbers<[1], [0], [0], [1], [0, 0, 1, 1], [], []>} : vector<8x8xbf16>, vector<8x32xbf16>, vector<8x32xf32> -> vector<8x32xf32>
    %343 = arith.addf %317, %342 : vector<8x32xf32>
    %344 = vector.extract_strided_slice %261 {offsets = [0, 24], sizes = [8, 8], strides = [1, 1]} : vector<8x32xf32> to vector<8x8xf32>
    %345 = vector.extract_strided_slice %262 {offsets = [0, 24], sizes = [8, 8], strides = [1, 1]} : vector<8x32xf32> to vector<8x8xf32>
    %346 = vector.extract_strided_slice %263 {offsets = [0, 24], sizes = [8, 8], strides = [1, 1]} : vector<8x32xf32> to vector<8x8xf32>
    %347 = arith.truncf %344 : vector<8x8xf32> to vector<8x8xbf16>
    %348 = arith.truncf %345 : vector<8x8xf32> to vector<8x8xbf16>
    %cst_151 = arith.constant dense<0.000000e+00> : vector<8x8xf32>
    %349 = tpu.matmul %347, %348, %cst_151 {dimension_numbers = #tpu.dot_dimension_numbers<[1], [1], [0], [0], [0, 0, 1, 0], [], []>} : vector<8x8xbf16>, vector<8x8xbf16>, vector<8x8xf32> -> vector<8x8xf32>
    %cst_152 = arith.constant 0.353553385 : f32
    %350 = vector.broadcast %cst_152 : f32 to vector<8x8xf32>
    %351 = arith.mulf %349, %350 : vector<8x8xf32>
    %cst_153 = arith.constant dense<0xFF800000> : vector<8xf32>
    %352 = vector.multi_reduction <maximumf>, %351, %cst_153 [1] : vector<8x8xf32> to vector<8xf32>
    %353 = vector.shape_cast %352 : vector<8xf32> to vector<8x1xf32>
    %354 = vector.broadcast %353 : vector<8x1xf32> to vector<8x8xf32>
    %355 = arith.subf %351, %354 : vector<8x8xf32>
    %356 = math.exp %355 : vector<8x8xf32>
    %cst_154 = arith.constant dense<0.000000e+00> : vector<8xf32>
    %357 = vector.multi_reduction <add>, %356, %cst_154 [1] : vector<8x8xf32> to vector<8xf32>
    %358 = vector.shape_cast %357 : vector<8xf32> to vector<8x1xf32>
    %359 = tpu.reciprocal %358 {approx = true} : vector<8x1xf32> -> vector<8x1xf32>
    %360 = vector.broadcast %359 : vector<8x1xf32> to vector<8x8xf32>
    %361 = arith.mulf %356, %360 : vector<8x8xf32>
    %362 = arith.truncf %361 : vector<8x8xf32> to vector<8x8xbf16>
    %363 = arith.truncf %346 : vector<8x8xf32> to vector<8x8xbf16>
    %cst_155 = arith.constant dense<0.000000e+00> : vector<8x8xf32>
    %364 = tpu.matmul %362, %363, %cst_155 {dimension_numbers = #tpu.dot_dimension_numbers<[1], [0], [0], [1], [0, 0, 1, 1], [], []>} : vector<8x8xbf16>, vector<8x8xbf16>, vector<8x8xf32> -> vector<8x8xf32>
    %365 = arith.truncf %364 : vector<8x8xf32> to vector<8x8xbf16>
    %366 = vector.extract_strided_slice %254 {offsets = [24, 0], sizes = [8, 32], strides = [1, 1]} : vector<32x32xf32> to vector<8x32xf32>
    %367 = arith.truncf %366 : vector<8x32xf32> to vector<8x32xbf16>
    %cst_156 = arith.constant dense<0.000000e+00> : vector<8x32xf32>
    %368 = tpu.matmul %365, %367, %cst_156 {dimension_numbers = #tpu.dot_dimension_numbers<[1], [0], [0], [1], [0, 0, 1, 1], [], []>} : vector<8x8xbf16>, vector<8x32xbf16>, vector<8x32xf32> -> vector<8x32xf32>
    %369 = arith.addf %343, %368 : vector<8x32xf32>
    %370 = arith.addf %248, %369 : vector<8x32xf32>
    %371 = vector.extract_strided_slice %19 {offsets = [0, 0, 0], sizes = [1, 1, 32], strides = [1, 1, 1]} : vector<2x1x32xf32> to vector<1x1x32xf32>
    %372 = vector.shape_cast %371 : vector<1x1x32xf32> to vector<1x32xf32>
    %373 = vector.extract_strided_slice %18 {offsets = [0, 0, 0], sizes = [1, 1, 32], strides = [1, 1, 1]} : vector<2x1x32xf32> to vector<1x1x32xf32>
    %374 = vector.shape_cast %373 : vector<1x1x32xf32> to vector<1x32xf32>
    %cst_157 = arith.constant dense<0.000000e+00> : vector<8xf32>
    %375 = vector.multi_reduction <add>, %370, %cst_157 [1] : vector<8x32xf32> to vector<8xf32>
    %376 = vector.shape_cast %375 : vector<8xf32> to vector<8x1xf32>
    %cst_158 = arith.constant 3.200000e+01 : f32
    %377 = vector.broadcast %cst_158 : f32 to vector<8x1xf32>
    %378 = arith.divf %376, %377 : vector<8x1xf32>
    %379 = vector.broadcast %378 : vector<8x1xf32> to vector<8x32xf32>
    %380 = arith.subf %370, %379 : vector<8x32xf32>
    %381 = arith.mulf %380, %380 : vector<8x32xf32>
    %cst_159 = arith.constant dense<0.000000e+00> : vector<8xf32>
    %382 = vector.multi_reduction <add>, %381, %cst_159 [1] : vector<8x32xf32> to vector<8xf32>
    %383 = vector.shape_cast %382 : vector<8xf32> to vector<8x1xf32>
    %cst_160 = arith.constant 3.200000e+01 : f32
    %384 = vector.broadcast %cst_160 : f32 to vector<8x1xf32>
    %385 = arith.divf %383, %384 : vector<8x1xf32>
    %cst_161 = arith.constant 9.99999974E-6 : f32
    %386 = vector.broadcast %cst_161 : f32 to vector<8x1xf32>
    %387 = arith.addf %385, %386 : vector<8x1xf32>
    %388 = math.rsqrt %387 : vector<8x1xf32>
    %389 = vector.broadcast %388 : vector<8x1xf32> to vector<8x32xf32>
    %390 = arith.mulf %380, %389 : vector<8x32xf32>
    %391 = vector.broadcast %372 : vector<1x32xf32> to vector<8x32xf32>
    %392 = arith.mulf %390, %391 : vector<8x32xf32>
    %393 = vector.broadcast %374 : vector<1x32xf32> to vector<8x32xf32>
    %394 = arith.addf %392, %393 : vector<8x32xf32>
    %395 = vector.extract_strided_slice %3 {offsets = [0, 0, 0], sizes = [1, 32, 96], strides = [1, 1, 1]} : vector<2x32x96xbf16> to vector<1x32x96xbf16>
    %396 = vector.shape_cast %395 : vector<1x32x96xbf16> to vector<32x96xbf16>
    %397 = vector.extract_strided_slice %1 {offsets = [0, 0, 0], sizes = [1, 1, 96], strides = [1, 1, 1]} : vector<2x1x96xf32> to vector<1x1x96xf32>
    %398 = vector.shape_cast %397 : vector<1x1x96xf32> to vector<1x96xf32>
    %399 = vector.extract_strided_slice %2 {offsets = [0, 0, 0], sizes = [1, 32, 32], strides = [1, 1, 1]} : vector<2x32x32xf32> to vector<1x32x32xf32>
    %400 = vector.shape_cast %399 : vector<1x32x32xf32> to vector<32x32xf32>
    %401 = vector.extract_strided_slice %0 {offsets = [0, 0, 0], sizes = [1, 1, 32], strides = [1, 1, 1]} : vector<2x1x32xf32> to vector<1x1x32xf32>
    %402 = vector.shape_cast %401 : vector<1x1x32xf32> to vector<1x32xf32>
    %403 = arith.truncf %394 : vector<8x32xf32> to vector<8x32xbf16>
    %404 = vector.extract_strided_slice %396 {offsets = [0, 0], sizes = [32, 32], strides = [1, 1]} : vector<32x96xbf16> to vector<32x32xbf16>
    %cst_162 = arith.constant dense<0.000000e+00> : vector<8x32xf32>
    %405 = tpu.matmul %403, %404, %cst_162 {dimension_numbers = #tpu.dot_dimension_numbers<[1], [0], [0], [1], [0, 0, 1, 1], [], []>} : vector<8x32xbf16>, vector<32x32xbf16>, vector<8x32xf32> -> vector<8x32xf32>
    %406 = vector.extract_strided_slice %398 {offsets = [0, 0], sizes = [1, 32], strides = [1, 1]} : vector<1x96xf32> to vector<1x32xf32>
    %407 = vector.broadcast %406 : vector<1x32xf32> to vector<8x32xf32>
    %408 = arith.addf %405, %407 : vector<8x32xf32>
    %409 = arith.truncf %246 : vector<16x32xf32> to vector<16x32xbf16>
    %410 = vector.extract_strided_slice %396 {offsets = [0, 32], sizes = [32, 64], strides = [1, 1]} : vector<32x96xbf16> to vector<32x64xbf16>
    %cst_163 = arith.constant dense<0.000000e+00> : vector<16x64xf32>
    %411 = tpu.matmul %409, %410, %cst_163 {dimension_numbers = #tpu.dot_dimension_numbers<[1], [0], [0], [1], [0, 0, 1, 1], [], []>} : vector<16x32xbf16>, vector<32x64xbf16>, vector<16x64xf32> -> vector<16x64xf32>
    %412 = vector.extract_strided_slice %398 {offsets = [0, 32], sizes = [1, 64], strides = [1, 1]} : vector<1x96xf32> to vector<1x64xf32>
    %413 = vector.broadcast %412 : vector<1x64xf32> to vector<16x64xf32>
    %414 = arith.addf %411, %413 : vector<16x64xf32>
    %415 = vector.extract_strided_slice %414 {offsets = [0, 0], sizes = [16, 32], strides = [1, 1]} : vector<16x64xf32> to vector<16x32xf32>
    %416 = vector.extract_strided_slice %414 {offsets = [0, 32], sizes = [16, 32], strides = [1, 1]} : vector<16x64xf32> to vector<16x32xf32>
    %417 = vector.shape_cast %402 : vector<1x32xf32> to vector<1x32xf32>
    %418 = vector.broadcast %417 : vector<1x32xf32> to vector<8x32xf32>
    %419 = vector.extract_strided_slice %408 {offsets = [0, 0], sizes = [8, 8], strides = [1, 1]} : vector<8x32xf32> to vector<8x8xf32>
    %420 = vector.extract_strided_slice %415 {offsets = [0, 0], sizes = [16, 8], strides = [1, 1]} : vector<16x32xf32> to vector<16x8xf32>
    %421 = vector.extract_strided_slice %416 {offsets = [0, 0], sizes = [16, 8], strides = [1, 1]} : vector<16x32xf32> to vector<16x8xf32>
    %422 = arith.truncf %419 : vector<8x8xf32> to vector<8x8xbf16>
    %423 = arith.truncf %420 : vector<16x8xf32> to vector<16x8xbf16>
    %cst_164 = arith.constant dense<0.000000e+00> : vector<8x16xf32>
    %424 = tpu.matmul %422, %423, %cst_164 {dimension_numbers = #tpu.dot_dimension_numbers<[1], [1], [0], [0], [0, 0, 1, 0], [], []>} : vector<8x8xbf16>, vector<16x8xbf16>, vector<8x16xf32> -> vector<8x16xf32>
    %cst_165 = arith.constant 0.353553385 : f32
    %425 = vector.broadcast %cst_165 : f32 to vector<8x16xf32>
    %426 = arith.mulf %424, %425 : vector<8x16xf32>
    %cst_166 = arith.constant dense<0xFF800000> : vector<8xf32>
    %427 = vector.multi_reduction <maximumf>, %426, %cst_166 [1] : vector<8x16xf32> to vector<8xf32>
    %428 = vector.shape_cast %427 : vector<8xf32> to vector<8x1xf32>
    %429 = vector.broadcast %428 : vector<8x1xf32> to vector<8x16xf32>
    %430 = arith.subf %426, %429 : vector<8x16xf32>
    %431 = math.exp %430 : vector<8x16xf32>
    %cst_167 = arith.constant dense<0.000000e+00> : vector<8xf32>
    %432 = vector.multi_reduction <add>, %431, %cst_167 [1] : vector<8x16xf32> to vector<8xf32>
    %433 = vector.shape_cast %432 : vector<8xf32> to vector<8x1xf32>
    %434 = tpu.reciprocal %433 {approx = true} : vector<8x1xf32> -> vector<8x1xf32>
    %435 = vector.broadcast %434 : vector<8x1xf32> to vector<8x16xf32>
    %436 = arith.mulf %431, %435 : vector<8x16xf32>
    %437 = arith.truncf %436 : vector<8x16xf32> to vector<8x16xbf16>
    %438 = arith.truncf %421 : vector<16x8xf32> to vector<16x8xbf16>
    %cst_168 = arith.constant dense<0.000000e+00> : vector<8x8xf32>
    %439 = tpu.matmul %437, %438, %cst_168 {dimension_numbers = #tpu.dot_dimension_numbers<[1], [0], [0], [1], [0, 0, 1, 1], [], []>} : vector<8x16xbf16>, vector<16x8xbf16>, vector<8x8xf32> -> vector<8x8xf32>
    %440 = arith.truncf %439 : vector<8x8xf32> to vector<8x8xbf16>
    %441 = vector.extract_strided_slice %400 {offsets = [0, 0], sizes = [8, 32], strides = [1, 1]} : vector<32x32xf32> to vector<8x32xf32>
    %442 = arith.truncf %441 : vector<8x32xf32> to vector<8x32xbf16>
    %cst_169 = arith.constant dense<0.000000e+00> : vector<8x32xf32>
    %443 = tpu.matmul %440, %442, %cst_169 {dimension_numbers = #tpu.dot_dimension_numbers<[1], [0], [0], [1], [0, 0, 1, 1], [], []>} : vector<8x8xbf16>, vector<8x32xbf16>, vector<8x32xf32> -> vector<8x32xf32>
    %444 = arith.addf %418, %443 : vector<8x32xf32>
    %445 = vector.extract_strided_slice %408 {offsets = [0, 8], sizes = [8, 8], strides = [1, 1]} : vector<8x32xf32> to vector<8x8xf32>
    %446 = vector.extract_strided_slice %415 {offsets = [0, 8], sizes = [16, 8], strides = [1, 1]} : vector<16x32xf32> to vector<16x8xf32>
    %447 = vector.extract_strided_slice %416 {offsets = [0, 8], sizes = [16, 8], strides = [1, 1]} : vector<16x32xf32> to vector<16x8xf32>
    %448 = arith.truncf %445 : vector<8x8xf32> to vector<8x8xbf16>
    %449 = arith.truncf %446 : vector<16x8xf32> to vector<16x8xbf16>
    %cst_170 = arith.constant dense<0.000000e+00> : vector<8x16xf32>
    %450 = tpu.matmul %448, %449, %cst_170 {dimension_numbers = #tpu.dot_dimension_numbers<[1], [1], [0], [0], [0, 0, 1, 0], [], []>} : vector<8x8xbf16>, vector<16x8xbf16>, vector<8x16xf32> -> vector<8x16xf32>
    %cst_171 = arith.constant 0.353553385 : f32
    %451 = vector.broadcast %cst_171 : f32 to vector<8x16xf32>
    %452 = arith.mulf %450, %451 : vector<8x16xf32>
    %cst_172 = arith.constant dense<0xFF800000> : vector<8xf32>
    %453 = vector.multi_reduction <maximumf>, %452, %cst_172 [1] : vector<8x16xf32> to vector<8xf32>
    %454 = vector.shape_cast %453 : vector<8xf32> to vector<8x1xf32>
    %455 = vector.broadcast %454 : vector<8x1xf32> to vector<8x16xf32>
    %456 = arith.subf %452, %455 : vector<8x16xf32>
    %457 = math.exp %456 : vector<8x16xf32>
    %cst_173 = arith.constant dense<0.000000e+00> : vector<8xf32>
    %458 = vector.multi_reduction <add>, %457, %cst_173 [1] : vector<8x16xf32> to vector<8xf32>
    %459 = vector.shape_cast %458 : vector<8xf32> to vector<8x1xf32>
    %460 = tpu.reciprocal %459 {approx = true} : vector<8x1xf32> -> vector<8x1xf32>
    %461 = vector.broadcast %460 : vector<8x1xf32> to vector<8x16xf32>
    %462 = arith.mulf %457, %461 : vector<8x16xf32>
    %463 = arith.truncf %462 : vector<8x16xf32> to vector<8x16xbf16>
    %464 = arith.truncf %447 : vector<16x8xf32> to vector<16x8xbf16>
    %cst_174 = arith.constant dense<0.000000e+00> : vector<8x8xf32>
    %465 = tpu.matmul %463, %464, %cst_174 {dimension_numbers = #tpu.dot_dimension_numbers<[1], [0], [0], [1], [0, 0, 1, 1], [], []>} : vector<8x16xbf16>, vector<16x8xbf16>, vector<8x8xf32> -> vector<8x8xf32>
    %466 = arith.truncf %465 : vector<8x8xf32> to vector<8x8xbf16>
    %467 = vector.extract_strided_slice %400 {offsets = [8, 0], sizes = [8, 32], strides = [1, 1]} : vector<32x32xf32> to vector<8x32xf32>
    %468 = arith.truncf %467 : vector<8x32xf32> to vector<8x32xbf16>
    %cst_175 = arith.constant dense<0.000000e+00> : vector<8x32xf32>
    %469 = tpu.matmul %466, %468, %cst_175 {dimension_numbers = #tpu.dot_dimension_numbers<[1], [0], [0], [1], [0, 0, 1, 1], [], []>} : vector<8x8xbf16>, vector<8x32xbf16>, vector<8x32xf32> -> vector<8x32xf32>
    %470 = arith.addf %444, %469 : vector<8x32xf32>
    %471 = vector.extract_strided_slice %408 {offsets = [0, 16], sizes = [8, 8], strides = [1, 1]} : vector<8x32xf32> to vector<8x8xf32>
    %472 = vector.extract_strided_slice %415 {offsets = [0, 16], sizes = [16, 8], strides = [1, 1]} : vector<16x32xf32> to vector<16x8xf32>
    %473 = vector.extract_strided_slice %416 {offsets = [0, 16], sizes = [16, 8], strides = [1, 1]} : vector<16x32xf32> to vector<16x8xf32>
    %474 = arith.truncf %471 : vector<8x8xf32> to vector<8x8xbf16>
    %475 = arith.truncf %472 : vector<16x8xf32> to vector<16x8xbf16>
    %cst_176 = arith.constant dense<0.000000e+00> : vector<8x16xf32>
    %476 = tpu.matmul %474, %475, %cst_176 {dimension_numbers = #tpu.dot_dimension_numbers<[1], [1], [0], [0], [0, 0, 1, 0], [], []>} : vector<8x8xbf16>, vector<16x8xbf16>, vector<8x16xf32> -> vector<8x16xf32>
    %cst_177 = arith.constant 0.353553385 : f32
    %477 = vector.broadcast %cst_177 : f32 to vector<8x16xf32>
    %478 = arith.mulf %476, %477 : vector<8x16xf32>
    %cst_178 = arith.constant dense<0xFF800000> : vector<8xf32>
    %479 = vector.multi_reduction <maximumf>, %478, %cst_178 [1] : vector<8x16xf32> to vector<8xf32>
    %480 = vector.shape_cast %479 : vector<8xf32> to vector<8x1xf32>
    %481 = vector.broadcast %480 : vector<8x1xf32> to vector<8x16xf32>
    %482 = arith.subf %478, %481 : vector<8x16xf32>
    %483 = math.exp %482 : vector<8x16xf32>
    %cst_179 = arith.constant dense<0.000000e+00> : vector<8xf32>
    %484 = vector.multi_reduction <add>, %483, %cst_179 [1] : vector<8x16xf32> to vector<8xf32>
    %485 = vector.shape_cast %484 : vector<8xf32> to vector<8x1xf32>
    %486 = tpu.reciprocal %485 {approx = true} : vector<8x1xf32> -> vector<8x1xf32>
    %487 = vector.broadcast %486 : vector<8x1xf32> to vector<8x16xf32>
    %488 = arith.mulf %483, %487 : vector<8x16xf32>
    %489 = arith.truncf %488 : vector<8x16xf32> to vector<8x16xbf16>
    %490 = arith.truncf %473 : vector<16x8xf32> to vector<16x8xbf16>
    %cst_180 = arith.constant dense<0.000000e+00> : vector<8x8xf32>
    %491 = tpu.matmul %489, %490, %cst_180 {dimension_numbers = #tpu.dot_dimension_numbers<[1], [0], [0], [1], [0, 0, 1, 1], [], []>} : vector<8x16xbf16>, vector<16x8xbf16>, vector<8x8xf32> -> vector<8x8xf32>
    %492 = arith.truncf %491 : vector<8x8xf32> to vector<8x8xbf16>
    %493 = vector.extract_strided_slice %400 {offsets = [16, 0], sizes = [8, 32], strides = [1, 1]} : vector<32x32xf32> to vector<8x32xf32>
    %494 = arith.truncf %493 : vector<8x32xf32> to vector<8x32xbf16>
    %cst_181 = arith.constant dense<0.000000e+00> : vector<8x32xf32>
    %495 = tpu.matmul %492, %494, %cst_181 {dimension_numbers = #tpu.dot_dimension_numbers<[1], [0], [0], [1], [0, 0, 1, 1], [], []>} : vector<8x8xbf16>, vector<8x32xbf16>, vector<8x32xf32> -> vector<8x32xf32>
    %496 = arith.addf %470, %495 : vector<8x32xf32>
    %497 = vector.extract_strided_slice %408 {offsets = [0, 24], sizes = [8, 8], strides = [1, 1]} : vector<8x32xf32> to vector<8x8xf32>
    %498 = vector.extract_strided_slice %415 {offsets = [0, 24], sizes = [16, 8], strides = [1, 1]} : vector<16x32xf32> to vector<16x8xf32>
    %499 = vector.extract_strided_slice %416 {offsets = [0, 24], sizes = [16, 8], strides = [1, 1]} : vector<16x32xf32> to vector<16x8xf32>
    %500 = arith.truncf %497 : vector<8x8xf32> to vector<8x8xbf16>
    %501 = arith.truncf %498 : vector<16x8xf32> to vector<16x8xbf16>
    %cst_182 = arith.constant dense<0.000000e+00> : vector<8x16xf32>
    %502 = tpu.matmul %500, %501, %cst_182 {dimension_numbers = #tpu.dot_dimension_numbers<[1], [1], [0], [0], [0, 0, 1, 0], [], []>} : vector<8x8xbf16>, vector<16x8xbf16>, vector<8x16xf32> -> vector<8x16xf32>
    %cst_183 = arith.constant 0.353553385 : f32
    %503 = vector.broadcast %cst_183 : f32 to vector<8x16xf32>
    %504 = arith.mulf %502, %503 : vector<8x16xf32>
    %cst_184 = arith.constant dense<0xFF800000> : vector<8xf32>
    %505 = vector.multi_reduction <maximumf>, %504, %cst_184 [1] : vector<8x16xf32> to vector<8xf32>
    %506 = vector.shape_cast %505 : vector<8xf32> to vector<8x1xf32>
    %507 = vector.broadcast %506 : vector<8x1xf32> to vector<8x16xf32>
    %508 = arith.subf %504, %507 : vector<8x16xf32>
    %509 = math.exp %508 : vector<8x16xf32>
    %cst_185 = arith.constant dense<0.000000e+00> : vector<8xf32>
    %510 = vector.multi_reduction <add>, %509, %cst_185 [1] : vector<8x16xf32> to vector<8xf32>
    %511 = vector.shape_cast %510 : vector<8xf32> to vector<8x1xf32>
    %512 = tpu.reciprocal %511 {approx = true} : vector<8x1xf32> -> vector<8x1xf32>
    %513 = vector.broadcast %512 : vector<8x1xf32> to vector<8x16xf32>
    %514 = arith.mulf %509, %513 : vector<8x16xf32>
    %515 = arith.truncf %514 : vector<8x16xf32> to vector<8x16xbf16>
    %516 = arith.truncf %499 : vector<16x8xf32> to vector<16x8xbf16>
    %cst_186 = arith.constant dense<0.000000e+00> : vector<8x8xf32>
    %517 = tpu.matmul %515, %516, %cst_186 {dimension_numbers = #tpu.dot_dimension_numbers<[1], [0], [0], [1], [0, 0, 1, 1], [], []>} : vector<8x16xbf16>, vector<16x8xbf16>, vector<8x8xf32> -> vector<8x8xf32>
    %518 = arith.truncf %517 : vector<8x8xf32> to vector<8x8xbf16>
    %519 = vector.extract_strided_slice %400 {offsets = [24, 0], sizes = [8, 32], strides = [1, 1]} : vector<32x32xf32> to vector<8x32xf32>
    %520 = arith.truncf %519 : vector<8x32xf32> to vector<8x32xbf16>
    %cst_187 = arith.constant dense<0.000000e+00> : vector<8x32xf32>
    %521 = tpu.matmul %518, %520, %cst_187 {dimension_numbers = #tpu.dot_dimension_numbers<[1], [0], [0], [1], [0, 0, 1, 1], [], []>} : vector<8x8xbf16>, vector<8x32xbf16>, vector<8x32xf32> -> vector<8x32xf32>
    %522 = arith.addf %496, %521 : vector<8x32xf32>
    %523 = vector.extract_strided_slice %17 {offsets = [0, 0, 0], sizes = [1, 1, 32], strides = [1, 1, 1]} : vector<2x1x32xf32> to vector<1x1x32xf32>
    %524 = vector.shape_cast %523 : vector<1x1x32xf32> to vector<1x32xf32>
    %525 = vector.extract_strided_slice %16 {offsets = [0, 0, 0], sizes = [1, 1, 32], strides = [1, 1, 1]} : vector<2x1x32xf32> to vector<1x1x32xf32>
    %526 = vector.shape_cast %525 : vector<1x1x32xf32> to vector<1x32xf32>
    %cst_188 = arith.constant dense<0.000000e+00> : vector<8xf32>
    %527 = vector.multi_reduction <add>, %522, %cst_188 [1] : vector<8x32xf32> to vector<8xf32>
    %528 = vector.shape_cast %527 : vector<8xf32> to vector<8x1xf32>
    %cst_189 = arith.constant 3.200000e+01 : f32
    %529 = vector.broadcast %cst_189 : f32 to vector<8x1xf32>
    %530 = arith.divf %528, %529 : vector<8x1xf32>
    %531 = vector.broadcast %530 : vector<8x1xf32> to vector<8x32xf32>
    %532 = arith.subf %522, %531 : vector<8x32xf32>
    %533 = arith.mulf %532, %532 : vector<8x32xf32>
    %cst_190 = arith.constant dense<0.000000e+00> : vector<8xf32>
    %534 = vector.multi_reduction <add>, %533, %cst_190 [1] : vector<8x32xf32> to vector<8xf32>
    %535 = vector.shape_cast %534 : vector<8xf32> to vector<8x1xf32>
    %cst_191 = arith.constant 3.200000e+01 : f32
    %536 = vector.broadcast %cst_191 : f32 to vector<8x1xf32>
    %537 = arith.divf %535, %536 : vector<8x1xf32>
    %cst_192 = arith.constant 9.99999974E-6 : f32
    %538 = vector.broadcast %cst_192 : f32 to vector<8x1xf32>
    %539 = arith.addf %537, %538 : vector<8x1xf32>
    %540 = math.rsqrt %539 : vector<8x1xf32>
    %541 = vector.broadcast %540 : vector<8x1xf32> to vector<8x32xf32>
    %542 = arith.mulf %532, %541 : vector<8x32xf32>
    %543 = vector.broadcast %524 : vector<1x32xf32> to vector<8x32xf32>
    %544 = arith.mulf %542, %543 : vector<8x32xf32>
    %545 = vector.broadcast %526 : vector<1x32xf32> to vector<8x32xf32>
    %546 = arith.addf %544, %545 : vector<8x32xf32>
    %547 = vector.extract_strided_slice %26 {offsets = [0, 0], sizes = [4, 8], strides = [1, 1]} : vector<4x16xbf16> to vector<4x8xbf16>
    %548 = arith.truncf %546 : vector<8x32xf32> to vector<8x32xbf16>
    %cst_193 = arith.constant dense<0.000000e+00> : vector<4x32xf32>
    %549 = tpu.matmul %547, %548, %cst_193 {dimension_numbers = #tpu.dot_dimension_numbers<[1], [0], [0], [1], [0, 0, 1, 1], [], []>} : vector<4x8xbf16>, vector<8x32xbf16>, vector<4x32xf32> -> vector<4x32xf32>
    %550 = arith.addf %57, %549 : vector<4x32xf32>
    %551 = vector.extract_strided_slice %15 {offsets = [1, 0, 0], sizes = [1, 32, 96], strides = [1, 1, 1]} : vector<2x32x96xbf16> to vector<1x32x96xbf16>
    %552 = vector.shape_cast %551 : vector<1x32x96xbf16> to vector<32x96xbf16>
    %553 = vector.extract_strided_slice %7 {offsets = [1, 0, 0], sizes = [1, 1, 96], strides = [1, 1, 1]} : vector<2x1x96xf32> to vector<1x1x96xf32>
    %554 = vector.shape_cast %553 : vector<1x1x96xf32> to vector<1x96xf32>
    %555 = vector.extract_strided_slice %14 {offsets = [1, 0, 0], sizes = [1, 32, 32], strides = [1, 1, 1]} : vector<2x32x32xf32> to vector<1x32x32xf32>
    %556 = vector.shape_cast %555 : vector<1x32x32xf32> to vector<32x32xf32>
    %557 = vector.extract_strided_slice %6 {offsets = [1, 0, 0], sizes = [1, 1, 32], strides = [1, 1, 1]} : vector<2x1x32xf32> to vector<1x1x32xf32>
    %558 = vector.shape_cast %557 : vector<1x1x32xf32> to vector<1x32xf32>
    %559 = arith.truncf %246 : vector<16x32xf32> to vector<16x32xbf16>
    %cst_194 = arith.constant dense<0.000000e+00> : vector<16x96xf32>
    %560 = tpu.matmul %559, %552, %cst_194 {dimension_numbers = #tpu.dot_dimension_numbers<[1], [0], [0], [1], [0, 0, 1, 1], [], []>} : vector<16x32xbf16>, vector<32x96xbf16>, vector<16x96xf32> -> vector<16x96xf32>
    %561 = vector.broadcast %554 : vector<1x96xf32> to vector<16x96xf32>
    %562 = arith.addf %560, %561 : vector<16x96xf32>
    %563 = vector.extract_strided_slice %562 {offsets = [0, 0], sizes = [16, 32], strides = [1, 1]} : vector<16x96xf32> to vector<16x32xf32>
    %564 = vector.extract_strided_slice %562 {offsets = [0, 32], sizes = [16, 32], strides = [1, 1]} : vector<16x96xf32> to vector<16x32xf32>
    %565 = vector.extract_strided_slice %562 {offsets = [0, 64], sizes = [16, 32], strides = [1, 1]} : vector<16x96xf32> to vector<16x32xf32>
    %566 = vector.shape_cast %558 : vector<1x32xf32> to vector<1x32xf32>
    %567 = vector.broadcast %566 : vector<1x32xf32> to vector<16x32xf32>
    %568 = vector.extract_strided_slice %563 {offsets = [0, 0], sizes = [16, 8], strides = [1, 1]} : vector<16x32xf32> to vector<16x8xf32>
    %569 = vector.extract_strided_slice %564 {offsets = [0, 0], sizes = [16, 8], strides = [1, 1]} : vector<16x32xf32> to vector<16x8xf32>
    %570 = vector.extract_strided_slice %565 {offsets = [0, 0], sizes = [16, 8], strides = [1, 1]} : vector<16x32xf32> to vector<16x8xf32>
    %571 = arith.truncf %568 : vector<16x8xf32> to vector<16x8xbf16>
    %572 = arith.truncf %569 : vector<16x8xf32> to vector<16x8xbf16>
    %cst_195 = arith.constant dense<0.000000e+00> : vector<16x16xf32>
    %573 = tpu.matmul %571, %572, %cst_195 {dimension_numbers = #tpu.dot_dimension_numbers<[1], [1], [0], [0], [0, 0, 1, 0], [], []>} : vector<16x8xbf16>, vector<16x8xbf16>, vector<16x16xf32> -> vector<16x16xf32>
    %cst_196 = arith.constant 0.353553385 : f32
    %574 = vector.broadcast %cst_196 : f32 to vector<16x16xf32>
    %575 = arith.mulf %573, %574 : vector<16x16xf32>
    %cst_197 = arith.constant dense<0xFF800000> : vector<16xf32>
    %576 = vector.multi_reduction <maximumf>, %575, %cst_197 [1] : vector<16x16xf32> to vector<16xf32>
    %577 = vector.shape_cast %576 : vector<16xf32> to vector<16x1xf32>
    %578 = vector.broadcast %577 : vector<16x1xf32> to vector<16x16xf32>
    %579 = arith.subf %575, %578 : vector<16x16xf32>
    %580 = math.exp %579 : vector<16x16xf32>
    %cst_198 = arith.constant dense<0.000000e+00> : vector<16xf32>
    %581 = vector.multi_reduction <add>, %580, %cst_198 [1] : vector<16x16xf32> to vector<16xf32>
    %582 = vector.shape_cast %581 : vector<16xf32> to vector<16x1xf32>
    %583 = tpu.reciprocal %582 {approx = true} : vector<16x1xf32> -> vector<16x1xf32>
    %584 = vector.broadcast %583 : vector<16x1xf32> to vector<16x16xf32>
    %585 = arith.mulf %580, %584 : vector<16x16xf32>
    %586 = arith.truncf %585 : vector<16x16xf32> to vector<16x16xbf16>
    %587 = arith.truncf %570 : vector<16x8xf32> to vector<16x8xbf16>
    %cst_199 = arith.constant dense<0.000000e+00> : vector<16x8xf32>
    %588 = tpu.matmul %586, %587, %cst_199 {dimension_numbers = #tpu.dot_dimension_numbers<[1], [0], [0], [1], [0, 0, 1, 1], [], []>} : vector<16x16xbf16>, vector<16x8xbf16>, vector<16x8xf32> -> vector<16x8xf32>
    %589 = arith.truncf %588 : vector<16x8xf32> to vector<16x8xbf16>
    %590 = vector.extract_strided_slice %556 {offsets = [0, 0], sizes = [8, 32], strides = [1, 1]} : vector<32x32xf32> to vector<8x32xf32>
    %591 = arith.truncf %590 : vector<8x32xf32> to vector<8x32xbf16>
    %cst_200 = arith.constant dense<0.000000e+00> : vector<16x32xf32>
    %592 = tpu.matmul %589, %591, %cst_200 {dimension_numbers = #tpu.dot_dimension_numbers<[1], [0], [0], [1], [0, 0, 1, 1], [], []>} : vector<16x8xbf16>, vector<8x32xbf16>, vector<16x32xf32> -> vector<16x32xf32>
    %593 = arith.addf %567, %592 : vector<16x32xf32>
    %594 = vector.extract_strided_slice %563 {offsets = [0, 8], sizes = [16, 8], strides = [1, 1]} : vector<16x32xf32> to vector<16x8xf32>
    %595 = vector.extract_strided_slice %564 {offsets = [0, 8], sizes = [16, 8], strides = [1, 1]} : vector<16x32xf32> to vector<16x8xf32>
    %596 = vector.extract_strided_slice %565 {offsets = [0, 8], sizes = [16, 8], strides = [1, 1]} : vector<16x32xf32> to vector<16x8xf32>
    %597 = arith.truncf %594 : vector<16x8xf32> to vector<16x8xbf16>
    %598 = arith.truncf %595 : vector<16x8xf32> to vector<16x8xbf16>
    %cst_201 = arith.constant dense<0.000000e+00> : vector<16x16xf32>
    %599 = tpu.matmul %597, %598, %cst_201 {dimension_numbers = #tpu.dot_dimension_numbers<[1], [1], [0], [0], [0, 0, 1, 0], [], []>} : vector<16x8xbf16>, vector<16x8xbf16>, vector<16x16xf32> -> vector<16x16xf32>
    %cst_202 = arith.constant 0.353553385 : f32
    %600 = vector.broadcast %cst_202 : f32 to vector<16x16xf32>
    %601 = arith.mulf %599, %600 : vector<16x16xf32>
    %cst_203 = arith.constant dense<0xFF800000> : vector<16xf32>
    %602 = vector.multi_reduction <maximumf>, %601, %cst_203 [1] : vector<16x16xf32> to vector<16xf32>
    %603 = vector.shape_cast %602 : vector<16xf32> to vector<16x1xf32>
    %604 = vector.broadcast %603 : vector<16x1xf32> to vector<16x16xf32>
    %605 = arith.subf %601, %604 : vector<16x16xf32>
    %606 = math.exp %605 : vector<16x16xf32>
    %cst_204 = arith.constant dense<0.000000e+00> : vector<16xf32>
    %607 = vector.multi_reduction <add>, %606, %cst_204 [1] : vector<16x16xf32> to vector<16xf32>
    %608 = vector.shape_cast %607 : vector<16xf32> to vector<16x1xf32>
    %609 = tpu.reciprocal %608 {approx = true} : vector<16x1xf32> -> vector<16x1xf32>
    %610 = vector.broadcast %609 : vector<16x1xf32> to vector<16x16xf32>
    %611 = arith.mulf %606, %610 : vector<16x16xf32>
    %612 = arith.truncf %611 : vector<16x16xf32> to vector<16x16xbf16>
    %613 = arith.truncf %596 : vector<16x8xf32> to vector<16x8xbf16>
    %cst_205 = arith.constant dense<0.000000e+00> : vector<16x8xf32>
    %614 = tpu.matmul %612, %613, %cst_205 {dimension_numbers = #tpu.dot_dimension_numbers<[1], [0], [0], [1], [0, 0, 1, 1], [], []>} : vector<16x16xbf16>, vector<16x8xbf16>, vector<16x8xf32> -> vector<16x8xf32>
    %615 = arith.truncf %614 : vector<16x8xf32> to vector<16x8xbf16>
    %616 = vector.extract_strided_slice %556 {offsets = [8, 0], sizes = [8, 32], strides = [1, 1]} : vector<32x32xf32> to vector<8x32xf32>
    %617 = arith.truncf %616 : vector<8x32xf32> to vector<8x32xbf16>
    %cst_206 = arith.constant dense<0.000000e+00> : vector<16x32xf32>
    %618 = tpu.matmul %615, %617, %cst_206 {dimension_numbers = #tpu.dot_dimension_numbers<[1], [0], [0], [1], [0, 0, 1, 1], [], []>} : vector<16x8xbf16>, vector<8x32xbf16>, vector<16x32xf32> -> vector<16x32xf32>
    %619 = arith.addf %593, %618 : vector<16x32xf32>
    %620 = vector.extract_strided_slice %563 {offsets = [0, 16], sizes = [16, 8], strides = [1, 1]} : vector<16x32xf32> to vector<16x8xf32>
    %621 = vector.extract_strided_slice %564 {offsets = [0, 16], sizes = [16, 8], strides = [1, 1]} : vector<16x32xf32> to vector<16x8xf32>
    %622 = vector.extract_strided_slice %565 {offsets = [0, 16], sizes = [16, 8], strides = [1, 1]} : vector<16x32xf32> to vector<16x8xf32>
    %623 = arith.truncf %620 : vector<16x8xf32> to vector<16x8xbf16>
    %624 = arith.truncf %621 : vector<16x8xf32> to vector<16x8xbf16>
    %cst_207 = arith.constant dense<0.000000e+00> : vector<16x16xf32>
    %625 = tpu.matmul %623, %624, %cst_207 {dimension_numbers = #tpu.dot_dimension_numbers<[1], [1], [0], [0], [0, 0, 1, 0], [], []>} : vector<16x8xbf16>, vector<16x8xbf16>, vector<16x16xf32> -> vector<16x16xf32>
    %cst_208 = arith.constant 0.353553385 : f32
    %626 = vector.broadcast %cst_208 : f32 to vector<16x16xf32>
    %627 = arith.mulf %625, %626 : vector<16x16xf32>
    %cst_209 = arith.constant dense<0xFF800000> : vector<16xf32>
    %628 = vector.multi_reduction <maximumf>, %627, %cst_209 [1] : vector<16x16xf32> to vector<16xf32>
    %629 = vector.shape_cast %628 : vector<16xf32> to vector<16x1xf32>
    %630 = vector.broadcast %629 : vector<16x1xf32> to vector<16x16xf32>
    %631 = arith.subf %627, %630 : vector<16x16xf32>
    %632 = math.exp %631 : vector<16x16xf32>
    %cst_210 = arith.constant dense<0.000000e+00> : vector<16xf32>
    %633 = vector.multi_reduction <add>, %632, %cst_210 [1] : vector<16x16xf32> to vector<16xf32>
    %634 = vector.shape_cast %633 : vector<16xf32> to vector<16x1xf32>
    %635 = tpu.reciprocal %634 {approx = true} : vector<16x1xf32> -> vector<16x1xf32>
    %636 = vector.broadcast %635 : vector<16x1xf32> to vector<16x16xf32>
    %637 = arith.mulf %632, %636 : vector<16x16xf32>
    %638 = arith.truncf %637 : vector<16x16xf32> to vector<16x16xbf16>
    %639 = arith.truncf %622 : vector<16x8xf32> to vector<16x8xbf16>
    %cst_211 = arith.constant dense<0.000000e+00> : vector<16x8xf32>
    %640 = tpu.matmul %638, %639, %cst_211 {dimension_numbers = #tpu.dot_dimension_numbers<[1], [0], [0], [1], [0, 0, 1, 1], [], []>} : vector<16x16xbf16>, vector<16x8xbf16>, vector<16x8xf32> -> vector<16x8xf32>
    %641 = arith.truncf %640 : vector<16x8xf32> to vector<16x8xbf16>
    %642 = vector.extract_strided_slice %556 {offsets = [16, 0], sizes = [8, 32], strides = [1, 1]} : vector<32x32xf32> to vector<8x32xf32>
    %643 = arith.truncf %642 : vector<8x32xf32> to vector<8x32xbf16>
    %cst_212 = arith.constant dense<0.000000e+00> : vector<16x32xf32>
    %644 = tpu.matmul %641, %643, %cst_212 {dimension_numbers = #tpu.dot_dimension_numbers<[1], [0], [0], [1], [0, 0, 1, 1], [], []>} : vector<16x8xbf16>, vector<8x32xbf16>, vector<16x32xf32> -> vector<16x32xf32>
    %645 = arith.addf %619, %644 : vector<16x32xf32>
    %646 = vector.extract_strided_slice %563 {offsets = [0, 24], sizes = [16, 8], strides = [1, 1]} : vector<16x32xf32> to vector<16x8xf32>
    %647 = vector.extract_strided_slice %564 {offsets = [0, 24], sizes = [16, 8], strides = [1, 1]} : vector<16x32xf32> to vector<16x8xf32>
    %648 = vector.extract_strided_slice %565 {offsets = [0, 24], sizes = [16, 8], strides = [1, 1]} : vector<16x32xf32> to vector<16x8xf32>
    %649 = arith.truncf %646 : vector<16x8xf32> to vector<16x8xbf16>
    %650 = arith.truncf %647 : vector<16x8xf32> to vector<16x8xbf16>
    %cst_213 = arith.constant dense<0.000000e+00> : vector<16x16xf32>
    %651 = tpu.matmul %649, %650, %cst_213 {dimension_numbers = #tpu.dot_dimension_numbers<[1], [1], [0], [0], [0, 0, 1, 0], [], []>} : vector<16x8xbf16>, vector<16x8xbf16>, vector<16x16xf32> -> vector<16x16xf32>
    %cst_214 = arith.constant 0.353553385 : f32
    %652 = vector.broadcast %cst_214 : f32 to vector<16x16xf32>
    %653 = arith.mulf %651, %652 : vector<16x16xf32>
    %cst_215 = arith.constant dense<0xFF800000> : vector<16xf32>
    %654 = vector.multi_reduction <maximumf>, %653, %cst_215 [1] : vector<16x16xf32> to vector<16xf32>
    %655 = vector.shape_cast %654 : vector<16xf32> to vector<16x1xf32>
    %656 = vector.broadcast %655 : vector<16x1xf32> to vector<16x16xf32>
    %657 = arith.subf %653, %656 : vector<16x16xf32>
    %658 = math.exp %657 : vector<16x16xf32>
    %cst_216 = arith.constant dense<0.000000e+00> : vector<16xf32>
    %659 = vector.multi_reduction <add>, %658, %cst_216 [1] : vector<16x16xf32> to vector<16xf32>
    %660 = vector.shape_cast %659 : vector<16xf32> to vector<16x1xf32>
    %661 = tpu.reciprocal %660 {approx = true} : vector<16x1xf32> -> vector<16x1xf32>
    %662 = vector.broadcast %661 : vector<16x1xf32> to vector<16x16xf32>
    %663 = arith.mulf %658, %662 : vector<16x16xf32>
    %664 = arith.truncf %663 : vector<16x16xf32> to vector<16x16xbf16>
    %665 = arith.truncf %648 : vector<16x8xf32> to vector<16x8xbf16>
    %cst_217 = arith.constant dense<0.000000e+00> : vector<16x8xf32>
    %666 = tpu.matmul %664, %665, %cst_217 {dimension_numbers = #tpu.dot_dimension_numbers<[1], [0], [0], [1], [0, 0, 1, 1], [], []>} : vector<16x16xbf16>, vector<16x8xbf16>, vector<16x8xf32> -> vector<16x8xf32>
    %667 = arith.truncf %666 : vector<16x8xf32> to vector<16x8xbf16>
    %668 = vector.extract_strided_slice %556 {offsets = [24, 0], sizes = [8, 32], strides = [1, 1]} : vector<32x32xf32> to vector<8x32xf32>
    %669 = arith.truncf %668 : vector<8x32xf32> to vector<8x32xbf16>
    %cst_218 = arith.constant dense<0.000000e+00> : vector<16x32xf32>
    %670 = tpu.matmul %667, %669, %cst_218 {dimension_numbers = #tpu.dot_dimension_numbers<[1], [0], [0], [1], [0, 0, 1, 1], [], []>} : vector<16x8xbf16>, vector<8x32xbf16>, vector<16x32xf32> -> vector<16x32xf32>
    %671 = arith.addf %645, %670 : vector<16x32xf32>
    %672 = arith.addf %246, %671 : vector<16x32xf32>
    %673 = vector.extract_strided_slice %9 {offsets = [1, 0, 0], sizes = [1, 1, 32], strides = [1, 1, 1]} : vector<2x1x32xf32> to vector<1x1x32xf32>
    %674 = vector.shape_cast %673 : vector<1x1x32xf32> to vector<1x32xf32>
    %675 = vector.extract_strided_slice %8 {offsets = [1, 0, 0], sizes = [1, 1, 32], strides = [1, 1, 1]} : vector<2x1x32xf32> to vector<1x1x32xf32>
    %676 = vector.shape_cast %675 : vector<1x1x32xf32> to vector<1x32xf32>
    %cst_219 = arith.constant dense<0.000000e+00> : vector<16xf32>
    %677 = vector.multi_reduction <add>, %672, %cst_219 [1] : vector<16x32xf32> to vector<16xf32>
    %678 = vector.shape_cast %677 : vector<16xf32> to vector<16x1xf32>
    %cst_220 = arith.constant 3.200000e+01 : f32
    %679 = vector.broadcast %cst_220 : f32 to vector<16x1xf32>
    %680 = arith.divf %678, %679 : vector<16x1xf32>
    %681 = vector.broadcast %680 : vector<16x1xf32> to vector<16x32xf32>
    %682 = arith.subf %672, %681 : vector<16x32xf32>
    %683 = arith.mulf %682, %682 : vector<16x32xf32>
    %cst_221 = arith.constant dense<0.000000e+00> : vector<16xf32>
    %684 = vector.multi_reduction <add>, %683, %cst_221 [1] : vector<16x32xf32> to vector<16xf32>
    %685 = vector.shape_cast %684 : vector<16xf32> to vector<16x1xf32>
    %cst_222 = arith.constant 3.200000e+01 : f32
    %686 = vector.broadcast %cst_222 : f32 to vector<16x1xf32>
    %687 = arith.divf %685, %686 : vector<16x1xf32>
    %cst_223 = arith.constant 9.99999974E-6 : f32
    %688 = vector.broadcast %cst_223 : f32 to vector<16x1xf32>
    %689 = arith.addf %687, %688 : vector<16x1xf32>
    %690 = math.rsqrt %689 : vector<16x1xf32>
    %691 = vector.broadcast %690 : vector<16x1xf32> to vector<16x32xf32>
    %692 = arith.mulf %682, %691 : vector<16x32xf32>
    %693 = vector.broadcast %674 : vector<1x32xf32> to vector<16x32xf32>
    %694 = arith.mulf %692, %693 : vector<16x32xf32>
    %695 = vector.broadcast %676 : vector<1x32xf32> to vector<16x32xf32>
    %696 = arith.addf %694, %695 : vector<16x32xf32>
    %697 = arith.truncf %696 : vector<16x32xf32> to vector<16x32xbf16>
    %698 = vector.extract_strided_slice %12 {offsets = [1, 0, 0], sizes = [1, 32, 128], strides = [1, 1, 1]} : vector<2x32x128xbf16> to vector<1x32x128xbf16>
    %699 = vector.shape_cast %698 : vector<1x32x128xbf16> to vector<32x128xbf16>
    %cst_224 = arith.constant dense<0.000000e+00> : vector<16x128xf32>
    %700 = tpu.matmul %697, %699, %cst_224 {dimension_numbers = #tpu.dot_dimension_numbers<[1], [0], [0], [1], [0, 0, 1, 1], [], []>} : vector<16x32xbf16>, vector<32x128xbf16>, vector<16x128xf32> -> vector<16x128xf32>
    %701 = vector.extract_strided_slice %4 {offsets = [1, 0, 0], sizes = [1, 1, 128], strides = [1, 1, 1]} : vector<2x1x128xf32> to vector<1x1x128xf32>
    %702 = vector.shape_cast %701 : vector<1x1x128xf32> to vector<1x128xf32>
    %703 = vector.broadcast %702 : vector<1x128xf32> to vector<16x128xf32>
    %704 = arith.addf %700, %703 : vector<16x128xf32>
    %cst_225 = arith.constant 0.000000e+00 : f32
    %705 = vector.broadcast %cst_225 : f32 to vector<16x128xf32>
    %706 = arith.maximumf %704, %705 : vector<16x128xf32>
    %707 = arith.truncf %706 : vector<16x128xf32> to vector<16x128xbf16>
    %708 = vector.extract_strided_slice %13 {offsets = [1, 0, 0], sizes = [1, 128, 32], strides = [1, 1, 1]} : vector<2x128x32xbf16> to vector<1x128x32xbf16>
    %709 = vector.shape_cast %708 : vector<1x128x32xbf16> to vector<128x32xbf16>
    %cst_226 = arith.constant dense<0.000000e+00> : vector<16x32xf32>
    %710 = tpu.matmul %707, %709, %cst_226 {dimension_numbers = #tpu.dot_dimension_numbers<[1], [0], [0], [1], [0, 0, 1, 1], [], []>} : vector<16x128xbf16>, vector<128x32xbf16>, vector<16x32xf32> -> vector<16x32xf32>
    %711 = vector.extract_strided_slice %5 {offsets = [1, 0, 0], sizes = [1, 1, 32], strides = [1, 1, 1]} : vector<2x1x32xf32> to vector<1x1x32xf32>
    %712 = vector.shape_cast %711 : vector<1x1x32xf32> to vector<1x32xf32>
    %713 = vector.broadcast %712 : vector<1x32xf32> to vector<16x32xf32>
    %714 = arith.addf %710, %713 : vector<16x32xf32>
    %715 = arith.addf %696, %714 : vector<16x32xf32>
    %716 = vector.extract_strided_slice %11 {offsets = [1, 0, 0], sizes = [1, 1, 32], strides = [1, 1, 1]} : vector<2x1x32xf32> to vector<1x1x32xf32>
    %717 = vector.shape_cast %716 : vector<1x1x32xf32> to vector<1x32xf32>
    %718 = vector.extract_strided_slice %10 {offsets = [1, 0, 0], sizes = [1, 1, 32], strides = [1, 1, 1]} : vector<2x1x32xf32> to vector<1x1x32xf32>
    %719 = vector.shape_cast %718 : vector<1x1x32xf32> to vector<1x32xf32>
    %cst_227 = arith.constant dense<0.000000e+00> : vector<16xf32>
    %720 = vector.multi_reduction <add>, %715, %cst_227 [1] : vector<16x32xf32> to vector<16xf32>
    %721 = vector.shape_cast %720 : vector<16xf32> to vector<16x1xf32>
    %cst_228 = arith.constant 3.200000e+01 : f32
    %722 = vector.broadcast %cst_228 : f32 to vector<16x1xf32>
    %723 = arith.divf %721, %722 : vector<16x1xf32>
    %724 = vector.broadcast %723 : vector<16x1xf32> to vector<16x32xf32>
    %725 = arith.subf %715, %724 : vector<16x32xf32>
    %726 = arith.mulf %725, %725 : vector<16x32xf32>
    %cst_229 = arith.constant dense<0.000000e+00> : vector<16xf32>
    %727 = vector.multi_reduction <add>, %726, %cst_229 [1] : vector<16x32xf32> to vector<16xf32>
    %728 = vector.shape_cast %727 : vector<16xf32> to vector<16x1xf32>
    %cst_230 = arith.constant 3.200000e+01 : f32
    %729 = vector.broadcast %cst_230 : f32 to vector<16x1xf32>
    %730 = arith.divf %728, %729 : vector<16x1xf32>
    %cst_231 = arith.constant 9.99999974E-6 : f32
    %731 = vector.broadcast %cst_231 : f32 to vector<16x1xf32>
    %732 = arith.addf %730, %731 : vector<16x1xf32>
    %733 = math.rsqrt %732 : vector<16x1xf32>
    %734 = vector.broadcast %733 : vector<16x1xf32> to vector<16x32xf32>
    %735 = arith.mulf %725, %734 : vector<16x32xf32>
    %736 = vector.broadcast %717 : vector<1x32xf32> to vector<16x32xf32>
    %737 = arith.mulf %735, %736 : vector<16x32xf32>
    %738 = vector.broadcast %719 : vector<1x32xf32> to vector<16x32xf32>
    %739 = arith.addf %737, %738 : vector<16x32xf32>
    %740 = vector.extract_strided_slice %24 {offsets = [1, 0, 0], sizes = [1, 8, 32], strides = [1, 1, 1]} : vector<2x8x32xf32> to vector<1x8x32xf32>
    %741 = vector.shape_cast %740 : vector<1x8x32xf32> to vector<8x32xf32>
    %742 = vector.extract_strided_slice %23 {offsets = [1, 0, 0], sizes = [1, 32, 96], strides = [1, 1, 1]} : vector<2x32x96xbf16> to vector<1x32x96xbf16>
    %743 = vector.shape_cast %742 : vector<1x32x96xbf16> to vector<32x96xbf16>
    %744 = vector.extract_strided_slice %21 {offsets = [1, 0, 0], sizes = [1, 1, 96], strides = [1, 1, 1]} : vector<2x1x96xf32> to vector<1x1x96xf32>
    %745 = vector.shape_cast %744 : vector<1x1x96xf32> to vector<1x96xf32>
    %746 = vector.extract_strided_slice %22 {offsets = [1, 0, 0], sizes = [1, 32, 32], strides = [1, 1, 1]} : vector<2x32x32xf32> to vector<1x32x32xf32>
    %747 = vector.shape_cast %746 : vector<1x32x32xf32> to vector<32x32xf32>
    %748 = vector.extract_strided_slice %20 {offsets = [1, 0, 0], sizes = [1, 1, 32], strides = [1, 1, 1]} : vector<2x1x32xf32> to vector<1x1x32xf32>
    %749 = vector.shape_cast %748 : vector<1x1x32xf32> to vector<1x32xf32>
    %750 = arith.truncf %741 : vector<8x32xf32> to vector<8x32xbf16>
    %cst_232 = arith.constant dense<0.000000e+00> : vector<8x96xf32>
    %751 = tpu.matmul %750, %743, %cst_232 {dimension_numbers = #tpu.dot_dimension_numbers<[1], [0], [0], [1], [0, 0, 1, 1], [], []>} : vector<8x32xbf16>, vector<32x96xbf16>, vector<8x96xf32> -> vector<8x96xf32>
    %752 = vector.broadcast %745 : vector<1x96xf32> to vector<8x96xf32>
    %753 = arith.addf %751, %752 : vector<8x96xf32>
    %754 = vector.extract_strided_slice %753 {offsets = [0, 0], sizes = [8, 32], strides = [1, 1]} : vector<8x96xf32> to vector<8x32xf32>
    %755 = vector.extract_strided_slice %753 {offsets = [0, 32], sizes = [8, 32], strides = [1, 1]} : vector<8x96xf32> to vector<8x32xf32>
    %756 = vector.extract_strided_slice %753 {offsets = [0, 64], sizes = [8, 32], strides = [1, 1]} : vector<8x96xf32> to vector<8x32xf32>
    %757 = vector.shape_cast %749 : vector<1x32xf32> to vector<1x32xf32>
    %758 = vector.broadcast %757 : vector<1x32xf32> to vector<8x32xf32>
    %759 = vector.extract_strided_slice %754 {offsets = [0, 0], sizes = [8, 8], strides = [1, 1]} : vector<8x32xf32> to vector<8x8xf32>
    %760 = vector.extract_strided_slice %755 {offsets = [0, 0], sizes = [8, 8], strides = [1, 1]} : vector<8x32xf32> to vector<8x8xf32>
    %761 = vector.extract_strided_slice %756 {offsets = [0, 0], sizes = [8, 8], strides = [1, 1]} : vector<8x32xf32> to vector<8x8xf32>
    %762 = arith.truncf %759 : vector<8x8xf32> to vector<8x8xbf16>
    %763 = arith.truncf %760 : vector<8x8xf32> to vector<8x8xbf16>
    %cst_233 = arith.constant dense<0.000000e+00> : vector<8x8xf32>
    %764 = tpu.matmul %762, %763, %cst_233 {dimension_numbers = #tpu.dot_dimension_numbers<[1], [1], [0], [0], [0, 0, 1, 0], [], []>} : vector<8x8xbf16>, vector<8x8xbf16>, vector<8x8xf32> -> vector<8x8xf32>
    %cst_234 = arith.constant 0.353553385 : f32
    %765 = vector.broadcast %cst_234 : f32 to vector<8x8xf32>
    %766 = arith.mulf %764, %765 : vector<8x8xf32>
    %cst_235 = arith.constant dense<0xFF800000> : vector<8xf32>
    %767 = vector.multi_reduction <maximumf>, %766, %cst_235 [1] : vector<8x8xf32> to vector<8xf32>
    %768 = vector.shape_cast %767 : vector<8xf32> to vector<8x1xf32>
    %769 = vector.broadcast %768 : vector<8x1xf32> to vector<8x8xf32>
    %770 = arith.subf %766, %769 : vector<8x8xf32>
    %771 = math.exp %770 : vector<8x8xf32>
    %cst_236 = arith.constant dense<0.000000e+00> : vector<8xf32>
    %772 = vector.multi_reduction <add>, %771, %cst_236 [1] : vector<8x8xf32> to vector<8xf32>
    %773 = vector.shape_cast %772 : vector<8xf32> to vector<8x1xf32>
    %774 = tpu.reciprocal %773 {approx = true} : vector<8x1xf32> -> vector<8x1xf32>
    %775 = vector.broadcast %774 : vector<8x1xf32> to vector<8x8xf32>
    %776 = arith.mulf %771, %775 : vector<8x8xf32>
    %777 = arith.truncf %776 : vector<8x8xf32> to vector<8x8xbf16>
    %778 = arith.truncf %761 : vector<8x8xf32> to vector<8x8xbf16>
    %cst_237 = arith.constant dense<0.000000e+00> : vector<8x8xf32>
    %779 = tpu.matmul %777, %778, %cst_237 {dimension_numbers = #tpu.dot_dimension_numbers<[1], [0], [0], [1], [0, 0, 1, 1], [], []>} : vector<8x8xbf16>, vector<8x8xbf16>, vector<8x8xf32> -> vector<8x8xf32>
    %780 = arith.truncf %779 : vector<8x8xf32> to vector<8x8xbf16>
    %781 = vector.extract_strided_slice %747 {offsets = [0, 0], sizes = [8, 32], strides = [1, 1]} : vector<32x32xf32> to vector<8x32xf32>
    %782 = arith.truncf %781 : vector<8x32xf32> to vector<8x32xbf16>
    %cst_238 = arith.constant dense<0.000000e+00> : vector<8x32xf32>
    %783 = tpu.matmul %780, %782, %cst_238 {dimension_numbers = #tpu.dot_dimension_numbers<[1], [0], [0], [1], [0, 0, 1, 1], [], []>} : vector<8x8xbf16>, vector<8x32xbf16>, vector<8x32xf32> -> vector<8x32xf32>
    %784 = arith.addf %758, %783 : vector<8x32xf32>
    %785 = vector.extract_strided_slice %754 {offsets = [0, 8], sizes = [8, 8], strides = [1, 1]} : vector<8x32xf32> to vector<8x8xf32>
    %786 = vector.extract_strided_slice %755 {offsets = [0, 8], sizes = [8, 8], strides = [1, 1]} : vector<8x32xf32> to vector<8x8xf32>
    %787 = vector.extract_strided_slice %756 {offsets = [0, 8], sizes = [8, 8], strides = [1, 1]} : vector<8x32xf32> to vector<8x8xf32>
    %788 = arith.truncf %785 : vector<8x8xf32> to vector<8x8xbf16>
    %789 = arith.truncf %786 : vector<8x8xf32> to vector<8x8xbf16>
    %cst_239 = arith.constant dense<0.000000e+00> : vector<8x8xf32>
    %790 = tpu.matmul %788, %789, %cst_239 {dimension_numbers = #tpu.dot_dimension_numbers<[1], [1], [0], [0], [0, 0, 1, 0], [], []>} : vector<8x8xbf16>, vector<8x8xbf16>, vector<8x8xf32> -> vector<8x8xf32>
    %cst_240 = arith.constant 0.353553385 : f32
    %791 = vector.broadcast %cst_240 : f32 to vector<8x8xf32>
    %792 = arith.mulf %790, %791 : vector<8x8xf32>
    %cst_241 = arith.constant dense<0xFF800000> : vector<8xf32>
    %793 = vector.multi_reduction <maximumf>, %792, %cst_241 [1] : vector<8x8xf32> to vector<8xf32>
    %794 = vector.shape_cast %793 : vector<8xf32> to vector<8x1xf32>
    %795 = vector.broadcast %794 : vector<8x1xf32> to vector<8x8xf32>
    %796 = arith.subf %792, %795 : vector<8x8xf32>
    %797 = math.exp %796 : vector<8x8xf32>
    %cst_242 = arith.constant dense<0.000000e+00> : vector<8xf32>
    %798 = vector.multi_reduction <add>, %797, %cst_242 [1] : vector<8x8xf32> to vector<8xf32>
    %799 = vector.shape_cast %798 : vector<8xf32> to vector<8x1xf32>
    %800 = tpu.reciprocal %799 {approx = true} : vector<8x1xf32> -> vector<8x1xf32>
    %801 = vector.broadcast %800 : vector<8x1xf32> to vector<8x8xf32>
    %802 = arith.mulf %797, %801 : vector<8x8xf32>
    %803 = arith.truncf %802 : vector<8x8xf32> to vector<8x8xbf16>
    %804 = arith.truncf %787 : vector<8x8xf32> to vector<8x8xbf16>
    %cst_243 = arith.constant dense<0.000000e+00> : vector<8x8xf32>
    %805 = tpu.matmul %803, %804, %cst_243 {dimension_numbers = #tpu.dot_dimension_numbers<[1], [0], [0], [1], [0, 0, 1, 1], [], []>} : vector<8x8xbf16>, vector<8x8xbf16>, vector<8x8xf32> -> vector<8x8xf32>
    %806 = arith.truncf %805 : vector<8x8xf32> to vector<8x8xbf16>
    %807 = vector.extract_strided_slice %747 {offsets = [8, 0], sizes = [8, 32], strides = [1, 1]} : vector<32x32xf32> to vector<8x32xf32>
    %808 = arith.truncf %807 : vector<8x32xf32> to vector<8x32xbf16>
    %cst_244 = arith.constant dense<0.000000e+00> : vector<8x32xf32>
    %809 = tpu.matmul %806, %808, %cst_244 {dimension_numbers = #tpu.dot_dimension_numbers<[1], [0], [0], [1], [0, 0, 1, 1], [], []>} : vector<8x8xbf16>, vector<8x32xbf16>, vector<8x32xf32> -> vector<8x32xf32>
    %810 = arith.addf %784, %809 : vector<8x32xf32>
    %811 = vector.extract_strided_slice %754 {offsets = [0, 16], sizes = [8, 8], strides = [1, 1]} : vector<8x32xf32> to vector<8x8xf32>
    %812 = vector.extract_strided_slice %755 {offsets = [0, 16], sizes = [8, 8], strides = [1, 1]} : vector<8x32xf32> to vector<8x8xf32>
    %813 = vector.extract_strided_slice %756 {offsets = [0, 16], sizes = [8, 8], strides = [1, 1]} : vector<8x32xf32> to vector<8x8xf32>
    %814 = arith.truncf %811 : vector<8x8xf32> to vector<8x8xbf16>
    %815 = arith.truncf %812 : vector<8x8xf32> to vector<8x8xbf16>
    %cst_245 = arith.constant dense<0.000000e+00> : vector<8x8xf32>
    %816 = tpu.matmul %814, %815, %cst_245 {dimension_numbers = #tpu.dot_dimension_numbers<[1], [1], [0], [0], [0, 0, 1, 0], [], []>} : vector<8x8xbf16>, vector<8x8xbf16>, vector<8x8xf32> -> vector<8x8xf32>
    %cst_246 = arith.constant 0.353553385 : f32
    %817 = vector.broadcast %cst_246 : f32 to vector<8x8xf32>
    %818 = arith.mulf %816, %817 : vector<8x8xf32>
    %cst_247 = arith.constant dense<0xFF800000> : vector<8xf32>
    %819 = vector.multi_reduction <maximumf>, %818, %cst_247 [1] : vector<8x8xf32> to vector<8xf32>
    %820 = vector.shape_cast %819 : vector<8xf32> to vector<8x1xf32>
    %821 = vector.broadcast %820 : vector<8x1xf32> to vector<8x8xf32>
    %822 = arith.subf %818, %821 : vector<8x8xf32>
    %823 = math.exp %822 : vector<8x8xf32>
    %cst_248 = arith.constant dense<0.000000e+00> : vector<8xf32>
    %824 = vector.multi_reduction <add>, %823, %cst_248 [1] : vector<8x8xf32> to vector<8xf32>
    %825 = vector.shape_cast %824 : vector<8xf32> to vector<8x1xf32>
    %826 = tpu.reciprocal %825 {approx = true} : vector<8x1xf32> -> vector<8x1xf32>
    %827 = vector.broadcast %826 : vector<8x1xf32> to vector<8x8xf32>
    %828 = arith.mulf %823, %827 : vector<8x8xf32>
    %829 = arith.truncf %828 : vector<8x8xf32> to vector<8x8xbf16>
    %830 = arith.truncf %813 : vector<8x8xf32> to vector<8x8xbf16>
    %cst_249 = arith.constant dense<0.000000e+00> : vector<8x8xf32>
    %831 = tpu.matmul %829, %830, %cst_249 {dimension_numbers = #tpu.dot_dimension_numbers<[1], [0], [0], [1], [0, 0, 1, 1], [], []>} : vector<8x8xbf16>, vector<8x8xbf16>, vector<8x8xf32> -> vector<8x8xf32>
    %832 = arith.truncf %831 : vector<8x8xf32> to vector<8x8xbf16>
    %833 = vector.extract_strided_slice %747 {offsets = [16, 0], sizes = [8, 32], strides = [1, 1]} : vector<32x32xf32> to vector<8x32xf32>
    %834 = arith.truncf %833 : vector<8x32xf32> to vector<8x32xbf16>
    %cst_250 = arith.constant dense<0.000000e+00> : vector<8x32xf32>
    %835 = tpu.matmul %832, %834, %cst_250 {dimension_numbers = #tpu.dot_dimension_numbers<[1], [0], [0], [1], [0, 0, 1, 1], [], []>} : vector<8x8xbf16>, vector<8x32xbf16>, vector<8x32xf32> -> vector<8x32xf32>
    %836 = arith.addf %810, %835 : vector<8x32xf32>
    %837 = vector.extract_strided_slice %754 {offsets = [0, 24], sizes = [8, 8], strides = [1, 1]} : vector<8x32xf32> to vector<8x8xf32>
    %838 = vector.extract_strided_slice %755 {offsets = [0, 24], sizes = [8, 8], strides = [1, 1]} : vector<8x32xf32> to vector<8x8xf32>
    %839 = vector.extract_strided_slice %756 {offsets = [0, 24], sizes = [8, 8], strides = [1, 1]} : vector<8x32xf32> to vector<8x8xf32>
    %840 = arith.truncf %837 : vector<8x8xf32> to vector<8x8xbf16>
    %841 = arith.truncf %838 : vector<8x8xf32> to vector<8x8xbf16>
    %cst_251 = arith.constant dense<0.000000e+00> : vector<8x8xf32>
    %842 = tpu.matmul %840, %841, %cst_251 {dimension_numbers = #tpu.dot_dimension_numbers<[1], [1], [0], [0], [0, 0, 1, 0], [], []>} : vector<8x8xbf16>, vector<8x8xbf16>, vector<8x8xf32> -> vector<8x8xf32>
    %cst_252 = arith.constant 0.353553385 : f32
    %843 = vector.broadcast %cst_252 : f32 to vector<8x8xf32>
    %844 = arith.mulf %842, %843 : vector<8x8xf32>
    %cst_253 = arith.constant dense<0xFF800000> : vector<8xf32>
    %845 = vector.multi_reduction <maximumf>, %844, %cst_253 [1] : vector<8x8xf32> to vector<8xf32>
    %846 = vector.shape_cast %845 : vector<8xf32> to vector<8x1xf32>
    %847 = vector.broadcast %846 : vector<8x1xf32> to vector<8x8xf32>
    %848 = arith.subf %844, %847 : vector<8x8xf32>
    %849 = math.exp %848 : vector<8x8xf32>
    %cst_254 = arith.constant dense<0.000000e+00> : vector<8xf32>
    %850 = vector.multi_reduction <add>, %849, %cst_254 [1] : vector<8x8xf32> to vector<8xf32>
    %851 = vector.shape_cast %850 : vector<8xf32> to vector<8x1xf32>
    %852 = tpu.reciprocal %851 {approx = true} : vector<8x1xf32> -> vector<8x1xf32>
    %853 = vector.broadcast %852 : vector<8x1xf32> to vector<8x8xf32>
    %854 = arith.mulf %849, %853 : vector<8x8xf32>
    %855 = arith.truncf %854 : vector<8x8xf32> to vector<8x8xbf16>
    %856 = arith.truncf %839 : vector<8x8xf32> to vector<8x8xbf16>
    %cst_255 = arith.constant dense<0.000000e+00> : vector<8x8xf32>
    %857 = tpu.matmul %855, %856, %cst_255 {dimension_numbers = #tpu.dot_dimension_numbers<[1], [0], [0], [1], [0, 0, 1, 1], [], []>} : vector<8x8xbf16>, vector<8x8xbf16>, vector<8x8xf32> -> vector<8x8xf32>
    %858 = arith.truncf %857 : vector<8x8xf32> to vector<8x8xbf16>
    %859 = vector.extract_strided_slice %747 {offsets = [24, 0], sizes = [8, 32], strides = [1, 1]} : vector<32x32xf32> to vector<8x32xf32>
    %860 = arith.truncf %859 : vector<8x32xf32> to vector<8x32xbf16>
    %cst_256 = arith.constant dense<0.000000e+00> : vector<8x32xf32>
    %861 = tpu.matmul %858, %860, %cst_256 {dimension_numbers = #tpu.dot_dimension_numbers<[1], [0], [0], [1], [0, 0, 1, 1], [], []>} : vector<8x8xbf16>, vector<8x32xbf16>, vector<8x32xf32> -> vector<8x32xf32>
    %862 = arith.addf %836, %861 : vector<8x32xf32>
    %863 = arith.addf %741, %862 : vector<8x32xf32>
    %864 = vector.extract_strided_slice %19 {offsets = [1, 0, 0], sizes = [1, 1, 32], strides = [1, 1, 1]} : vector<2x1x32xf32> to vector<1x1x32xf32>
    %865 = vector.shape_cast %864 : vector<1x1x32xf32> to vector<1x32xf32>
    %866 = vector.extract_strided_slice %18 {offsets = [1, 0, 0], sizes = [1, 1, 32], strides = [1, 1, 1]} : vector<2x1x32xf32> to vector<1x1x32xf32>
    %867 = vector.shape_cast %866 : vector<1x1x32xf32> to vector<1x32xf32>
    %cst_257 = arith.constant dense<0.000000e+00> : vector<8xf32>
    %868 = vector.multi_reduction <add>, %863, %cst_257 [1] : vector<8x32xf32> to vector<8xf32>
    %869 = vector.shape_cast %868 : vector<8xf32> to vector<8x1xf32>
    %cst_258 = arith.constant 3.200000e+01 : f32
    %870 = vector.broadcast %cst_258 : f32 to vector<8x1xf32>
    %871 = arith.divf %869, %870 : vector<8x1xf32>
    %872 = vector.broadcast %871 : vector<8x1xf32> to vector<8x32xf32>
    %873 = arith.subf %863, %872 : vector<8x32xf32>
    %874 = arith.mulf %873, %873 : vector<8x32xf32>
    %cst_259 = arith.constant dense<0.000000e+00> : vector<8xf32>
    %875 = vector.multi_reduction <add>, %874, %cst_259 [1] : vector<8x32xf32> to vector<8xf32>
    %876 = vector.shape_cast %875 : vector<8xf32> to vector<8x1xf32>
    %cst_260 = arith.constant 3.200000e+01 : f32
    %877 = vector.broadcast %cst_260 : f32 to vector<8x1xf32>
    %878 = arith.divf %876, %877 : vector<8x1xf32>
    %cst_261 = arith.constant 9.99999974E-6 : f32
    %879 = vector.broadcast %cst_261 : f32 to vector<8x1xf32>
    %880 = arith.addf %878, %879 : vector<8x1xf32>
    %881 = math.rsqrt %880 : vector<8x1xf32>
    %882 = vector.broadcast %881 : vector<8x1xf32> to vector<8x32xf32>
    %883 = arith.mulf %873, %882 : vector<8x32xf32>
    %884 = vector.broadcast %865 : vector<1x32xf32> to vector<8x32xf32>
    %885 = arith.mulf %883, %884 : vector<8x32xf32>
    %886 = vector.broadcast %867 : vector<1x32xf32> to vector<8x32xf32>
    %887 = arith.addf %885, %886 : vector<8x32xf32>
    %888 = vector.extract_strided_slice %3 {offsets = [1, 0, 0], sizes = [1, 32, 96], strides = [1, 1, 1]} : vector<2x32x96xbf16> to vector<1x32x96xbf16>
    %889 = vector.shape_cast %888 : vector<1x32x96xbf16> to vector<32x96xbf16>
    %890 = vector.extract_strided_slice %1 {offsets = [1, 0, 0], sizes = [1, 1, 96], strides = [1, 1, 1]} : vector<2x1x96xf32> to vector<1x1x96xf32>
    %891 = vector.shape_cast %890 : vector<1x1x96xf32> to vector<1x96xf32>
    %892 = vector.extract_strided_slice %2 {offsets = [1, 0, 0], sizes = [1, 32, 32], strides = [1, 1, 1]} : vector<2x32x32xf32> to vector<1x32x32xf32>
    %893 = vector.shape_cast %892 : vector<1x32x32xf32> to vector<32x32xf32>
    %894 = vector.extract_strided_slice %0 {offsets = [1, 0, 0], sizes = [1, 1, 32], strides = [1, 1, 1]} : vector<2x1x32xf32> to vector<1x1x32xf32>
    %895 = vector.shape_cast %894 : vector<1x1x32xf32> to vector<1x32xf32>
    %896 = arith.truncf %887 : vector<8x32xf32> to vector<8x32xbf16>
    %897 = vector.extract_strided_slice %889 {offsets = [0, 0], sizes = [32, 32], strides = [1, 1]} : vector<32x96xbf16> to vector<32x32xbf16>
    %cst_262 = arith.constant dense<0.000000e+00> : vector<8x32xf32>
    %898 = tpu.matmul %896, %897, %cst_262 {dimension_numbers = #tpu.dot_dimension_numbers<[1], [0], [0], [1], [0, 0, 1, 1], [], []>} : vector<8x32xbf16>, vector<32x32xbf16>, vector<8x32xf32> -> vector<8x32xf32>
    %899 = vector.extract_strided_slice %891 {offsets = [0, 0], sizes = [1, 32], strides = [1, 1]} : vector<1x96xf32> to vector<1x32xf32>
    %900 = vector.broadcast %899 : vector<1x32xf32> to vector<8x32xf32>
    %901 = arith.addf %898, %900 : vector<8x32xf32>
    %902 = arith.truncf %739 : vector<16x32xf32> to vector<16x32xbf16>
    %903 = vector.extract_strided_slice %889 {offsets = [0, 32], sizes = [32, 64], strides = [1, 1]} : vector<32x96xbf16> to vector<32x64xbf16>
    %cst_263 = arith.constant dense<0.000000e+00> : vector<16x64xf32>
    %904 = tpu.matmul %902, %903, %cst_263 {dimension_numbers = #tpu.dot_dimension_numbers<[1], [0], [0], [1], [0, 0, 1, 1], [], []>} : vector<16x32xbf16>, vector<32x64xbf16>, vector<16x64xf32> -> vector<16x64xf32>
    %905 = vector.extract_strided_slice %891 {offsets = [0, 32], sizes = [1, 64], strides = [1, 1]} : vector<1x96xf32> to vector<1x64xf32>
    %906 = vector.broadcast %905 : vector<1x64xf32> to vector<16x64xf32>
    %907 = arith.addf %904, %906 : vector<16x64xf32>
    %908 = vector.extract_strided_slice %907 {offsets = [0, 0], sizes = [16, 32], strides = [1, 1]} : vector<16x64xf32> to vector<16x32xf32>
    %909 = vector.extract_strided_slice %907 {offsets = [0, 32], sizes = [16, 32], strides = [1, 1]} : vector<16x64xf32> to vector<16x32xf32>
    %910 = vector.shape_cast %895 : vector<1x32xf32> to vector<1x32xf32>
    %911 = vector.broadcast %910 : vector<1x32xf32> to vector<8x32xf32>
    %912 = vector.extract_strided_slice %901 {offsets = [0, 0], sizes = [8, 8], strides = [1, 1]} : vector<8x32xf32> to vector<8x8xf32>
    %913 = vector.extract_strided_slice %908 {offsets = [0, 0], sizes = [16, 8], strides = [1, 1]} : vector<16x32xf32> to vector<16x8xf32>
    %914 = vector.extract_strided_slice %909 {offsets = [0, 0], sizes = [16, 8], strides = [1, 1]} : vector<16x32xf32> to vector<16x8xf32>
    %915 = arith.truncf %912 : vector<8x8xf32> to vector<8x8xbf16>
    %916 = arith.truncf %913 : vector<16x8xf32> to vector<16x8xbf16>
    %cst_264 = arith.constant dense<0.000000e+00> : vector<8x16xf32>
    %917 = tpu.matmul %915, %916, %cst_264 {dimension_numbers = #tpu.dot_dimension_numbers<[1], [1], [0], [0], [0, 0, 1, 0], [], []>} : vector<8x8xbf16>, vector<16x8xbf16>, vector<8x16xf32> -> vector<8x16xf32>
    %cst_265 = arith.constant 0.353553385 : f32
    %918 = vector.broadcast %cst_265 : f32 to vector<8x16xf32>
    %919 = arith.mulf %917, %918 : vector<8x16xf32>
    %cst_266 = arith.constant dense<0xFF800000> : vector<8xf32>
    %920 = vector.multi_reduction <maximumf>, %919, %cst_266 [1] : vector<8x16xf32> to vector<8xf32>
    %921 = vector.shape_cast %920 : vector<8xf32> to vector<8x1xf32>
    %922 = vector.broadcast %921 : vector<8x1xf32> to vector<8x16xf32>
    %923 = arith.subf %919, %922 : vector<8x16xf32>
    %924 = math.exp %923 : vector<8x16xf32>
    %cst_267 = arith.constant dense<0.000000e+00> : vector<8xf32>
    %925 = vector.multi_reduction <add>, %924, %cst_267 [1] : vector<8x16xf32> to vector<8xf32>
    %926 = vector.shape_cast %925 : vector<8xf32> to vector<8x1xf32>
    %927 = tpu.reciprocal %926 {approx = true} : vector<8x1xf32> -> vector<8x1xf32>
    %928 = vector.broadcast %927 : vector<8x1xf32> to vector<8x16xf32>
    %929 = arith.mulf %924, %928 : vector<8x16xf32>
    %930 = arith.truncf %929 : vector<8x16xf32> to vector<8x16xbf16>
    %931 = arith.truncf %914 : vector<16x8xf32> to vector<16x8xbf16>
    %cst_268 = arith.constant dense<0.000000e+00> : vector<8x8xf32>
    %932 = tpu.matmul %930, %931, %cst_268 {dimension_numbers = #tpu.dot_dimension_numbers<[1], [0], [0], [1], [0, 0, 1, 1], [], []>} : vector<8x16xbf16>, vector<16x8xbf16>, vector<8x8xf32> -> vector<8x8xf32>
    %933 = arith.truncf %932 : vector<8x8xf32> to vector<8x8xbf16>
    %934 = vector.extract_strided_slice %893 {offsets = [0, 0], sizes = [8, 32], strides = [1, 1]} : vector<32x32xf32> to vector<8x32xf32>
    %935 = arith.truncf %934 : vector<8x32xf32> to vector<8x32xbf16>
    %cst_269 = arith.constant dense<0.000000e+00> : vector<8x32xf32>
    %936 = tpu.matmul %933, %935, %cst_269 {dimension_numbers = #tpu.dot_dimension_numbers<[1], [0], [0], [1], [0, 0, 1, 1], [], []>} : vector<8x8xbf16>, vector<8x32xbf16>, vector<8x32xf32> -> vector<8x32xf32>
    %937 = arith.addf %911, %936 : vector<8x32xf32>
    %938 = vector.extract_strided_slice %901 {offsets = [0, 8], sizes = [8, 8], strides = [1, 1]} : vector<8x32xf32> to vector<8x8xf32>
    %939 = vector.extract_strided_slice %908 {offsets = [0, 8], sizes = [16, 8], strides = [1, 1]} : vector<16x32xf32> to vector<16x8xf32>
    %940 = vector.extract_strided_slice %909 {offsets = [0, 8], sizes = [16, 8], strides = [1, 1]} : vector<16x32xf32> to vector<16x8xf32>
    %941 = arith.truncf %938 : vector<8x8xf32> to vector<8x8xbf16>
    %942 = arith.truncf %939 : vector<16x8xf32> to vector<16x8xbf16>
    %cst_270 = arith.constant dense<0.000000e+00> : vector<8x16xf32>
    %943 = tpu.matmul %941, %942, %cst_270 {dimension_numbers = #tpu.dot_dimension_numbers<[1], [1], [0], [0], [0, 0, 1, 0], [], []>} : vector<8x8xbf16>, vector<16x8xbf16>, vector<8x16xf32> -> vector<8x16xf32>
    %cst_271 = arith.constant 0.353553385 : f32
    %944 = vector.broadcast %cst_271 : f32 to vector<8x16xf32>
    %945 = arith.mulf %943, %944 : vector<8x16xf32>
    %cst_272 = arith.constant dense<0xFF800000> : vector<8xf32>
    %946 = vector.multi_reduction <maximumf>, %945, %cst_272 [1] : vector<8x16xf32> to vector<8xf32>
    %947 = vector.shape_cast %946 : vector<8xf32> to vector<8x1xf32>
    %948 = vector.broadcast %947 : vector<8x1xf32> to vector<8x16xf32>
    %949 = arith.subf %945, %948 : vector<8x16xf32>
    %950 = math.exp %949 : vector<8x16xf32>
    %cst_273 = arith.constant dense<0.000000e+00> : vector<8xf32>
    %951 = vector.multi_reduction <add>, %950, %cst_273 [1] : vector<8x16xf32> to vector<8xf32>
    %952 = vector.shape_cast %951 : vector<8xf32> to vector<8x1xf32>
    %953 = tpu.reciprocal %952 {approx = true} : vector<8x1xf32> -> vector<8x1xf32>
    %954 = vector.broadcast %953 : vector<8x1xf32> to vector<8x16xf32>
    %955 = arith.mulf %950, %954 : vector<8x16xf32>
    %956 = arith.truncf %955 : vector<8x16xf32> to vector<8x16xbf16>
    %957 = arith.truncf %940 : vector<16x8xf32> to vector<16x8xbf16>
    %cst_274 = arith.constant dense<0.000000e+00> : vector<8x8xf32>
    %958 = tpu.matmul %956, %957, %cst_274 {dimension_numbers = #tpu.dot_dimension_numbers<[1], [0], [0], [1], [0, 0, 1, 1], [], []>} : vector<8x16xbf16>, vector<16x8xbf16>, vector<8x8xf32> -> vector<8x8xf32>
    %959 = arith.truncf %958 : vector<8x8xf32> to vector<8x8xbf16>
    %960 = vector.extract_strided_slice %893 {offsets = [8, 0], sizes = [8, 32], strides = [1, 1]} : vector<32x32xf32> to vector<8x32xf32>
    %961 = arith.truncf %960 : vector<8x32xf32> to vector<8x32xbf16>
    %cst_275 = arith.constant dense<0.000000e+00> : vector<8x32xf32>
    %962 = tpu.matmul %959, %961, %cst_275 {dimension_numbers = #tpu.dot_dimension_numbers<[1], [0], [0], [1], [0, 0, 1, 1], [], []>} : vector<8x8xbf16>, vector<8x32xbf16>, vector<8x32xf32> -> vector<8x32xf32>
    %963 = arith.addf %937, %962 : vector<8x32xf32>
    %964 = vector.extract_strided_slice %901 {offsets = [0, 16], sizes = [8, 8], strides = [1, 1]} : vector<8x32xf32> to vector<8x8xf32>
    %965 = vector.extract_strided_slice %908 {offsets = [0, 16], sizes = [16, 8], strides = [1, 1]} : vector<16x32xf32> to vector<16x8xf32>
    %966 = vector.extract_strided_slice %909 {offsets = [0, 16], sizes = [16, 8], strides = [1, 1]} : vector<16x32xf32> to vector<16x8xf32>
    %967 = arith.truncf %964 : vector<8x8xf32> to vector<8x8xbf16>
    %968 = arith.truncf %965 : vector<16x8xf32> to vector<16x8xbf16>
    %cst_276 = arith.constant dense<0.000000e+00> : vector<8x16xf32>
    %969 = tpu.matmul %967, %968, %cst_276 {dimension_numbers = #tpu.dot_dimension_numbers<[1], [1], [0], [0], [0, 0, 1, 0], [], []>} : vector<8x8xbf16>, vector<16x8xbf16>, vector<8x16xf32> -> vector<8x16xf32>
    %cst_277 = arith.constant 0.353553385 : f32
    %970 = vector.broadcast %cst_277 : f32 to vector<8x16xf32>
    %971 = arith.mulf %969, %970 : vector<8x16xf32>
    %cst_278 = arith.constant dense<0xFF800000> : vector<8xf32>
    %972 = vector.multi_reduction <maximumf>, %971, %cst_278 [1] : vector<8x16xf32> to vector<8xf32>
    %973 = vector.shape_cast %972 : vector<8xf32> to vector<8x1xf32>
    %974 = vector.broadcast %973 : vector<8x1xf32> to vector<8x16xf32>
    %975 = arith.subf %971, %974 : vector<8x16xf32>
    %976 = math.exp %975 : vector<8x16xf32>
    %cst_279 = arith.constant dense<0.000000e+00> : vector<8xf32>
    %977 = vector.multi_reduction <add>, %976, %cst_279 [1] : vector<8x16xf32> to vector<8xf32>
    %978 = vector.shape_cast %977 : vector<8xf32> to vector<8x1xf32>
    %979 = tpu.reciprocal %978 {approx = true} : vector<8x1xf32> -> vector<8x1xf32>
    %980 = vector.broadcast %979 : vector<8x1xf32> to vector<8x16xf32>
    %981 = arith.mulf %976, %980 : vector<8x16xf32>
    %982 = arith.truncf %981 : vector<8x16xf32> to vector<8x16xbf16>
    %983 = arith.truncf %966 : vector<16x8xf32> to vector<16x8xbf16>
    %cst_280 = arith.constant dense<0.000000e+00> : vector<8x8xf32>
    %984 = tpu.matmul %982, %983, %cst_280 {dimension_numbers = #tpu.dot_dimension_numbers<[1], [0], [0], [1], [0, 0, 1, 1], [], []>} : vector<8x16xbf16>, vector<16x8xbf16>, vector<8x8xf32> -> vector<8x8xf32>
    %985 = arith.truncf %984 : vector<8x8xf32> to vector<8x8xbf16>
    %986 = vector.extract_strided_slice %893 {offsets = [16, 0], sizes = [8, 32], strides = [1, 1]} : vector<32x32xf32> to vector<8x32xf32>
    %987 = arith.truncf %986 : vector<8x32xf32> to vector<8x32xbf16>
    %cst_281 = arith.constant dense<0.000000e+00> : vector<8x32xf32>
    %988 = tpu.matmul %985, %987, %cst_281 {dimension_numbers = #tpu.dot_dimension_numbers<[1], [0], [0], [1], [0, 0, 1, 1], [], []>} : vector<8x8xbf16>, vector<8x32xbf16>, vector<8x32xf32> -> vector<8x32xf32>
    %989 = arith.addf %963, %988 : vector<8x32xf32>
    %990 = vector.extract_strided_slice %901 {offsets = [0, 24], sizes = [8, 8], strides = [1, 1]} : vector<8x32xf32> to vector<8x8xf32>
    %991 = vector.extract_strided_slice %908 {offsets = [0, 24], sizes = [16, 8], strides = [1, 1]} : vector<16x32xf32> to vector<16x8xf32>
    %992 = vector.extract_strided_slice %909 {offsets = [0, 24], sizes = [16, 8], strides = [1, 1]} : vector<16x32xf32> to vector<16x8xf32>
    %993 = arith.truncf %990 : vector<8x8xf32> to vector<8x8xbf16>
    %994 = arith.truncf %991 : vector<16x8xf32> to vector<16x8xbf16>
    %cst_282 = arith.constant dense<0.000000e+00> : vector<8x16xf32>
    %995 = tpu.matmul %993, %994, %cst_282 {dimension_numbers = #tpu.dot_dimension_numbers<[1], [1], [0], [0], [0, 0, 1, 0], [], []>} : vector<8x8xbf16>, vector<16x8xbf16>, vector<8x16xf32> -> vector<8x16xf32>
    %cst_283 = arith.constant 0.353553385 : f32
    %996 = vector.broadcast %cst_283 : f32 to vector<8x16xf32>
    %997 = arith.mulf %995, %996 : vector<8x16xf32>
    %cst_284 = arith.constant dense<0xFF800000> : vector<8xf32>
    %998 = vector.multi_reduction <maximumf>, %997, %cst_284 [1] : vector<8x16xf32> to vector<8xf32>
    %999 = vector.shape_cast %998 : vector<8xf32> to vector<8x1xf32>
    %1000 = vector.broadcast %999 : vector<8x1xf32> to vector<8x16xf32>
    %1001 = arith.subf %997, %1000 : vector<8x16xf32>
    %1002 = math.exp %1001 : vector<8x16xf32>
    %cst_285 = arith.constant dense<0.000000e+00> : vector<8xf32>
    %1003 = vector.multi_reduction <add>, %1002, %cst_285 [1] : vector<8x16xf32> to vector<8xf32>
    %1004 = vector.shape_cast %1003 : vector<8xf32> to vector<8x1xf32>
    %1005 = tpu.reciprocal %1004 {approx = true} : vector<8x1xf32> -> vector<8x1xf32>
    %1006 = vector.broadcast %1005 : vector<8x1xf32> to vector<8x16xf32>
    %1007 = arith.mulf %1002, %1006 : vector<8x16xf32>
    %1008 = arith.truncf %1007 : vector<8x16xf32> to vector<8x16xbf16>
    %1009 = arith.truncf %992 : vector<16x8xf32> to vector<16x8xbf16>
    %cst_286 = arith.constant dense<0.000000e+00> : vector<8x8xf32>
    %1010 = tpu.matmul %1008, %1009, %cst_286 {dimension_numbers = #tpu.dot_dimension_numbers<[1], [0], [0], [1], [0, 0, 1, 1], [], []>} : vector<8x16xbf16>, vector<16x8xbf16>, vector<8x8xf32> -> vector<8x8xf32>
    %1011 = arith.truncf %1010 : vector<8x8xf32> to vector<8x8xbf16>
    %1012 = vector.extract_strided_slice %893 {offsets = [24, 0], sizes = [8, 32], strides = [1, 1]} : vector<32x32xf32> to vector<8x32xf32>
    %1013 = arith.truncf %1012 : vector<8x32xf32> to vector<8x32xbf16>
    %cst_287 = arith.constant dense<0.000000e+00> : vector<8x32xf32>
    %1014 = tpu.matmul %1011, %1013, %cst_287 {dimension_numbers = #tpu.dot_dimension_numbers<[1], [0], [0], [1], [0, 0, 1, 1], [], []>} : vector<8x8xbf16>, vector<8x32xbf16>, vector<8x32xf32> -> vector<8x32xf32>
    %1015 = arith.addf %989, %1014 : vector<8x32xf32>
    %1016 = vector.extract_strided_slice %17 {offsets = [1, 0, 0], sizes = [1, 1, 32], strides = [1, 1, 1]} : vector<2x1x32xf32> to vector<1x1x32xf32>
    %1017 = vector.shape_cast %1016 : vector<1x1x32xf32> to vector<1x32xf32>
    %1018 = vector.extract_strided_slice %16 {offsets = [1, 0, 0], sizes = [1, 1, 32], strides = [1, 1, 1]} : vector<2x1x32xf32> to vector<1x1x32xf32>
    %1019 = vector.shape_cast %1018 : vector<1x1x32xf32> to vector<1x32xf32>
    %cst_288 = arith.constant dense<0.000000e+00> : vector<8xf32>
    %1020 = vector.multi_reduction <add>, %1015, %cst_288 [1] : vector<8x32xf32> to vector<8xf32>
    %1021 = vector.shape_cast %1020 : vector<8xf32> to vector<8x1xf32>
    %cst_289 = arith.constant 3.200000e+01 : f32
    %1022 = vector.broadcast %cst_289 : f32 to vector<8x1xf32>
    %1023 = arith.divf %1021, %1022 : vector<8x1xf32>
    %1024 = vector.broadcast %1023 : vector<8x1xf32> to vector<8x32xf32>
    %1025 = arith.subf %1015, %1024 : vector<8x32xf32>
    %1026 = arith.mulf %1025, %1025 : vector<8x32xf32>
    %cst_290 = arith.constant dense<0.000000e+00> : vector<8xf32>
    %1027 = vector.multi_reduction <add>, %1026, %cst_290 [1] : vector<8x32xf32> to vector<8xf32>
    %1028 = vector.shape_cast %1027 : vector<8xf32> to vector<8x1xf32>
    %cst_291 = arith.constant 3.200000e+01 : f32
    %1029 = vector.broadcast %cst_291 : f32 to vector<8x1xf32>
    %1030 = arith.divf %1028, %1029 : vector<8x1xf32>
    %cst_292 = arith.constant 9.99999974E-6 : f32
    %1031 = vector.broadcast %cst_292 : f32 to vector<8x1xf32>
    %1032 = arith.addf %1030, %1031 : vector<8x1xf32>
    %1033 = math.rsqrt %1032 : vector<8x1xf32>
    %1034 = vector.broadcast %1033 : vector<8x1xf32> to vector<8x32xf32>
    %1035 = arith.mulf %1025, %1034 : vector<8x32xf32>
    %1036 = vector.broadcast %1017 : vector<1x32xf32> to vector<8x32xf32>
    %1037 = arith.mulf %1035, %1036 : vector<8x32xf32>
    %1038 = vector.broadcast %1019 : vector<1x32xf32> to vector<8x32xf32>
    %1039 = arith.addf %1037, %1038 : vector<8x32xf32>
    %1040 = vector.extract_strided_slice %26 {offsets = [0, 8], sizes = [4, 8], strides = [1, 1]} : vector<4x16xbf16> to vector<4x8xbf16>
    %1041 = arith.truncf %1039 : vector<8x32xf32> to vector<8x32xbf16>
    %cst_293 = arith.constant dense<0.000000e+00> : vector<4x32xf32>
    %1042 = tpu.matmul %1040, %1041, %cst_293 {dimension_numbers = #tpu.dot_dimension_numbers<[1], [0], [0], [1], [0, 0, 1, 1], [], []>} : vector<4x8xbf16>, vector<8x32xbf16>, vector<4x32xf32> -> vector<4x32xf32>
    %1043 = arith.addf %550, %1042 : vector<4x32xf32>
    %1044 = arith.mulf %1043, %1043 : vector<4x32xf32>
    %1045 = vector.shape_cast %1044 : vector<4x32xf32> to vector<1x4x32xf32>
    %cst_294 = arith.constant dense<0.000000e+00> : vector<1xf32>
    %1046 = vector.multi_reduction <add>, %1045, %cst_294 [1, 2] : vector<1x4x32xf32> to vector<1xf32>
    %1047 = vector.shape_cast %1046 : vector<1xf32> to vector<1x1x1xf32>
    %1048 = vector.extract %1047[0, 0, 0] : f32 from vector<1x1x1xf32>
    %1049 = vector.broadcast %1048 : f32 to vector<1x1xf32>
    %cst_295 = arith.constant 1.000000e-24 : f32
    %1050 = vector.broadcast %cst_295 : f32 to vector<1x1xf32>
    %1051 = arith.maximumf %1049, %1050 : vector<1x1xf32>
    %1052 = math.rsqrt %1051 : vector<1x1xf32>
    %1053 = vector.broadcast %1052 : vector<1x1xf32> to vector<4x32xf32>
    %1054 = arith.mulf %1043, %1053 : vector<4x32xf32>
    %c0_296 = arith.constant 0 : index
    %c0_297 = arith.constant 0 : index
    %c0_298 = arith.constant 0 : index
    %1055 = vector.load %arg33[%c0_296, %c0_297, %c0_298] : memref<1x4x32xf32, #tpu.memory_space<vmem>>, vector<1x4x32xf32>
    %1056 = vector.shape_cast %1055 : vector<1x4x32xf32> to vector<4x32xf32>
    %1057 = vector.shape_cast %1054 : vector<4x32xf32> to vector<1x4x32xf32>
    tpu.vector_store %arg33[%c0_296, %c0_297, %c0_298], %1057 {strides = array<i32>} : memref<1x4x32xf32, #tpu.memory_space<vmem>>, vector<1x4x32xf32>,
    return
  }
  func.func @transform_0(%arg0: i32) -> (i32, i32, i32) {
    %c0_i32 = arith.constant 0 : i32
    %c0_i32_0 = arith.constant 0 : i32
    %c0_i32_1 = arith.constant 0 : i32
    return %arg0, %c0_i32, %c0_i32_0 : i32, i32, i32
  }
  func.func @transform_1(%arg0: i32) -> (i32, i32, i32) {
    %c0_i32 = arith.constant 0 : i32
    %c0_i32_0 = arith.constant 0 : i32
    %c0_i32_1 = arith.constant 0 : i32
    %c0_i32_2 = arith.constant 0 : i32
    return %c0_i32, %c0_i32_0, %c0_i32_1 : i32, i32, i32
  }
  func.func @transform_2(%arg0: i32) -> (i32, i32, i32) {
    %c0_i32 = arith.constant 0 : i32
    %c0_i32_0 = arith.constant 0 : i32
    %c0_i32_1 = arith.constant 0 : i32
    %c0_i32_2 = arith.constant 0 : i32
    return %c0_i32, %c0_i32_0, %c0_i32_1 : i32, i32, i32
  }
  func.func @transform_3(%arg0: i32) -> (i32, i32, i32) {
    %c0_i32 = arith.constant 0 : i32
    %c0_i32_0 = arith.constant 0 : i32
    %c0_i32_1 = arith.constant 0 : i32
    %c0_i32_2 = arith.constant 0 : i32
    return %c0_i32, %c0_i32_0, %c0_i32_1 : i32, i32, i32
  }
  func.func @transform_4(%arg0: i32) -> (i32, i32, i32) {
    %c0_i32 = arith.constant 0 : i32
    %c0_i32_0 = arith.constant 0 : i32
    %c0_i32_1 = arith.constant 0 : i32
    %c0_i32_2 = arith.constant 0 : i32
    return %c0_i32, %c0_i32_0, %c0_i32_1 : i32, i32, i32
  }
  func.func @transform_5(%arg0: i32) -> (i32, i32, i32) {
    %c0_i32 = arith.constant 0 : i32
    %c0_i32_0 = arith.constant 0 : i32
    %c0_i32_1 = arith.constant 0 : i32
    %c0_i32_2 = arith.constant 0 : i32
    return %c0_i32, %c0_i32_0, %c0_i32_1 : i32, i32, i32
  }
  func.func @transform_6(%arg0: i32) -> (i32, i32, i32) {
    %c0_i32 = arith.constant 0 : i32
    %c0_i32_0 = arith.constant 0 : i32
    %c0_i32_1 = arith.constant 0 : i32
    %c0_i32_2 = arith.constant 0 : i32
    return %c0_i32, %c0_i32_0, %c0_i32_1 : i32, i32, i32
  }
  func.func @transform_7(%arg0: i32) -> (i32, i32, i32) {
    %c0_i32 = arith.constant 0 : i32
    %c0_i32_0 = arith.constant 0 : i32
    %c0_i32_1 = arith.constant 0 : i32
    %c0_i32_2 = arith.constant 0 : i32
    return %c0_i32, %c0_i32_0, %c0_i32_1 : i32, i32, i32
  }
  func.func @transform_8(%arg0: i32) -> (i32, i32, i32) {
    %c0_i32 = arith.constant 0 : i32
    %c0_i32_0 = arith.constant 0 : i32
    %c0_i32_1 = arith.constant 0 : i32
    %c0_i32_2 = arith.constant 0 : i32
    return %c0_i32, %c0_i32_0, %c0_i32_1 : i32, i32, i32
  }
  func.func @transform_9(%arg0: i32) -> (i32, i32, i32) {
    %c0_i32 = arith.constant 0 : i32
    %c0_i32_0 = arith.constant 0 : i32
    %c0_i32_1 = arith.constant 0 : i32
    %c0_i32_2 = arith.constant 0 : i32
    return %c0_i32, %c0_i32_0, %c0_i32_1 : i32, i32, i32
  }
  func.func @transform_10(%arg0: i32) -> (i32, i32, i32) {
    %c0_i32 = arith.constant 0 : i32
    %c0_i32_0 = arith.constant 0 : i32
    %c0_i32_1 = arith.constant 0 : i32
    %c0_i32_2 = arith.constant 0 : i32
    return %c0_i32, %c0_i32_0, %c0_i32_1 : i32, i32, i32
  }
  func.func @transform_11(%arg0: i32) -> (i32, i32, i32) {
    %c0_i32 = arith.constant 0 : i32
    %c0_i32_0 = arith.constant 0 : i32
    %c0_i32_1 = arith.constant 0 : i32
    %c0_i32_2 = arith.constant 0 : i32
    return %c0_i32, %c0_i32_0, %c0_i32_1 : i32, i32, i32
  }
  func.func @transform_12(%arg0: i32) -> (i32, i32, i32) {
    %c0_i32 = arith.constant 0 : i32
    %c0_i32_0 = arith.constant 0 : i32
    %c0_i32_1 = arith.constant 0 : i32
    %c0_i32_2 = arith.constant 0 : i32
    return %c0_i32, %c0_i32_0, %c0_i32_1 : i32, i32, i32
  }
  func.func @transform_13(%arg0: i32) -> (i32, i32, i32) {
    %c0_i32 = arith.constant 0 : i32
    %c0_i32_0 = arith.constant 0 : i32
    %c0_i32_1 = arith.constant 0 : i32
    %c0_i32_2 = arith.constant 0 : i32
    return %c0_i32, %c0_i32_0, %c0_i32_1 : i32, i32, i32
  }
  func.func @transform_14(%arg0: i32) -> (i32, i32, i32) {
    %c0_i32 = arith.constant 0 : i32
    %c0_i32_0 = arith.constant 0 : i32
    %c0_i32_1 = arith.constant 0 : i32
    %c0_i32_2 = arith.constant 0 : i32
    return %c0_i32, %c0_i32_0, %c0_i32_1 : i32, i32, i32
  }
  func.func @transform_15(%arg0: i32) -> (i32, i32, i32) {
    %c0_i32 = arith.constant 0 : i32
    %c0_i32_0 = arith.constant 0 : i32
    %c0_i32_1 = arith.constant 0 : i32
    %c0_i32_2 = arith.constant 0 : i32
    return %c0_i32, %c0_i32_0, %c0_i32_1 : i32, i32, i32
  }
  func.func @transform_16(%arg0: i32) -> (i32, i32, i32) {
    %c0_i32 = arith.constant 0 : i32
    %c0_i32_0 = arith.constant 0 : i32
    %c0_i32_1 = arith.constant 0 : i32
    %c0_i32_2 = arith.constant 0 : i32
    return %c0_i32, %c0_i32_0, %c0_i32_1 : i32, i32, i32
  }
  func.func @transform_17(%arg0: i32) -> (i32, i32, i32) {
    %c0_i32 = arith.constant 0 : i32
    %c0_i32_0 = arith.constant 0 : i32
    %c0_i32_1 = arith.constant 0 : i32
    %c0_i32_2 = arith.constant 0 : i32
    return %c0_i32, %c0_i32_0, %c0_i32_1 : i32, i32, i32
  }
  func.func @transform_18(%arg0: i32) -> (i32, i32, i32) {
    %c0_i32 = arith.constant 0 : i32
    %c0_i32_0 = arith.constant 0 : i32
    %c0_i32_1 = arith.constant 0 : i32
    %c0_i32_2 = arith.constant 0 : i32
    return %c0_i32, %c0_i32_0, %c0_i32_1 : i32, i32, i32
  }
  func.func @transform_19(%arg0: i32) -> (i32, i32, i32) {
    %c0_i32 = arith.constant 0 : i32
    %c0_i32_0 = arith.constant 0 : i32
    %c0_i32_1 = arith.constant 0 : i32
    %c0_i32_2 = arith.constant 0 : i32
    return %c0_i32, %c0_i32_0, %c0_i32_1 : i32, i32, i32
  }
  func.func @transform_20(%arg0: i32) -> (i32, i32, i32) {
    %c0_i32 = arith.constant 0 : i32
    %c0_i32_0 = arith.constant 0 : i32
    %c0_i32_1 = arith.constant 0 : i32
    %c0_i32_2 = arith.constant 0 : i32
    return %c0_i32, %c0_i32_0, %c0_i32_1 : i32, i32, i32
  }
  func.func @transform_21(%arg0: i32) -> (i32, i32, i32) {
    %c0_i32 = arith.constant 0 : i32
    %c0_i32_0 = arith.constant 0 : i32
    %c0_i32_1 = arith.constant 0 : i32
    %c0_i32_2 = arith.constant 0 : i32
    return %c0_i32, %c0_i32_0, %c0_i32_1 : i32, i32, i32
  }
  func.func @transform_22(%arg0: i32) -> (i32, i32, i32) {
    %c0_i32 = arith.constant 0 : i32
    %c0_i32_0 = arith.constant 0 : i32
    %c0_i32_1 = arith.constant 0 : i32
    %c0_i32_2 = arith.constant 0 : i32
    return %c0_i32, %c0_i32_0, %c0_i32_1 : i32, i32, i32
  }
  func.func @transform_23(%arg0: i32) -> (i32, i32, i32) {
    %c0_i32 = arith.constant 0 : i32
    %c0_i32_0 = arith.constant 0 : i32
    %c0_i32_1 = arith.constant 0 : i32
    %c0_i32_2 = arith.constant 0 : i32
    return %c0_i32, %c0_i32_0, %c0_i32_1 : i32, i32, i32
  }
  func.func @transform_24(%arg0: i32) -> (i32, i32, i32) {
    %c0_i32 = arith.constant 0 : i32
    %c0_i32_0 = arith.constant 0 : i32
    %c0_i32_1 = arith.constant 0 : i32
    %c0_i32_2 = arith.constant 0 : i32
    return %c0_i32, %c0_i32_0, %c0_i32_1 : i32, i32, i32
  }
  func.func @transform_25(%arg0: i32) -> (i32, i32, i32) {
    %c0_i32 = arith.constant 0 : i32
    %c0_i32_0 = arith.constant 0 : i32
    %c0_i32_1 = arith.constant 0 : i32
    %c0_i32_2 = arith.constant 0 : i32
    return %c0_i32, %c0_i32_0, %c0_i32_1 : i32, i32, i32
  }
  func.func @transform_26(%arg0: i32) -> (i32, i32) {
    %c0_i32 = arith.constant 0 : i32
    %c0_i32_0 = arith.constant 0 : i32
    %c0_i32_1 = arith.constant 0 : i32
    return %c0_i32, %c0_i32_0 : i32, i32
  }
  func.func @transform_27(%arg0: i32) -> (i32, i32) {
    %c0_i32 = arith.constant 0 : i32
    %c0_i32_0 = arith.constant 0 : i32
    %c0_i32_1 = arith.constant 0 : i32
    return %c0_i32, %c0_i32_0 : i32, i32
  }
  func.func @transform_28(%arg0: i32) -> (i32, i32) {
    %c0_i32 = arith.constant 0 : i32
    %c0_i32_0 = arith.constant 0 : i32
    %c0_i32_1 = arith.constant 0 : i32
    return %c0_i32, %c0_i32_0 : i32, i32
  }
  func.func @transform_29(%arg0: i32) -> (i32, i32) {
    %c0_i32 = arith.constant 0 : i32
    %c0_i32_0 = arith.constant 0 : i32
    %c0_i32_1 = arith.constant 0 : i32
    return %c0_i32, %c0_i32_0 : i32, i32
  }
  func.func @transform_30(%arg0: i32) -> (i32, i32) {
    %c0_i32 = arith.constant 0 : i32
    %c0_i32_0 = arith.constant 0 : i32
    %c0_i32_1 = arith.constant 0 : i32
    return %c0_i32, %c0_i32_0 : i32, i32
  }
  func.func @transform_31(%arg0: i32) -> (i32, i32) {
    %c0_i32 = arith.constant 0 : i32
    %c0_i32_0 = arith.constant 0 : i32
    %c0_i32_1 = arith.constant 0 : i32
    return %c0_i32, %c0_i32_0 : i32, i32
  }
  func.func @transform_32(%arg0: i32) -> (i32, i32, i32) {
    %c0_i32 = arith.constant 0 : i32
    %c0_i32_0 = arith.constant 0 : i32
    %c0_i32_1 = arith.constant 0 : i32
    return %arg0, %c0_i32, %c0_i32_0 : i32, i32, i32
  }
}

</mosaic_0001>

<bundles_post_ra>
// kernel: vpr_model_forward.3
= control target key start
LH: loop header
LB: loop body
LE: loop exit
PB: predicated region body
PF: predicated region fallthrough
CT: control target
= control target key end

     0   :  { %s602_s1 = inlined_call_operand.vmem [shape: bf16[128,128], index: 1, kind: input, shape index: {}]   ;;  %s603_s0 = inlined_call_operand.vmem [shape: bf16[128,128], index: 0, kind: input, shape index: {}]   ;;  %s604_s2 = inlined_call_operand.vmem [shape: f32[1,128], index: 2, kind: input, shape index: {}]   ;;  %s605_s3 = inlined_call_operand.vmem [shape: f32[128,128], index: 3, kind: output, shape index: {}]  }
   0x1   :  { %v467_v0 = vld [vmem:[%s602_s1 + $0x38] sm:$0xff]   ;;  %v468_v1 = vld [vmem:[%s602_s1 + $0x30] sm:$0xff]   ;;  %v469_v2 = vld [vmem:[%s602_s1 + $0x28] sm:$0xff]  }
   0x2   :  { %419 = vmatprep.subr.bf16.mxu0 %v467_v0  ;;  %451 = vmatprep.subr.bf16.mxu1 %v467_v0  ;;  %v470_v3 = vld [vmem:[%s602_s1 + $0x20] sm:$0xff]   ;;  %v471_v6 = vld [vmem:[%s602_s1 + $0x18] sm:$0xff]   ;;  %v472_v7 = vld [vmem:[%s602_s1 + $0x10] sm:$0xff]  }
   0x3   :  { %420 = vmatpush3.bf16.msra.mxu0 %v467_v0  ;;  %459 = vmatpush3.bf16.msra.mxu1 %v467_v0  ;;  %v475_v4 = vld [vmem:[%s603_s0] sm:$0xff]   ;;  %v473_v8 = vld [vmem:[%s602_s1 + $0x8] sm:$0xff]   ;;  %v479_v12 = vld [vmem:[%s603_s0 + $0x10] sm:$0xff]  }
   0x4   :  { %421 = vmatprep.subr.bf16.mxu0 %v468_v1  ;;  %452 = vmatprep.subr.bf16.mxu1 %v468_v1  ;;  %v476_v5 = vld [vmem:[%s603_s0 + $0x20] sm:$0xff]   ;;  %v477_v10 = vld [vmem:[%s603_s0 + $0x8] sm:$0xff]   ;;  %v480_v13 = vld [vmem:[%s603_s0 + $0x30] sm:$0xff]  }
   0x5   :  { %435 = vmatprep.mubr.bf16.mxu0 %v475_v4  ;;  %443 = vmatprep.mubr.bf16.mxu1 %v476_v5  ;;  %v474_v9 = vld [vmem:[%s602_s1] sm:$0xff]   ;;  %v478_v11 = vld [vmem:[%s603_s0 + $0x28] sm:$0xff]   ;;  %v481_v14 = vld [vmem:[%s603_s0 + $0x18] sm:$0xff]  }
   0x6   :  { %v482_v15 = vld [vmem:[%s603_s0 + $0x38] sm:$0xff]   ;;  %v402_v16 = vld [vmem:[%s604_s2] ss:$0 sm:$0xff] }
   0x7   :  { %422 = vmatpush3.bf16.msra.mxu0 %v468_v1  ;;  %460 = vmatpush3.bf16.msra.mxu1 %v468_v1 }
   0x8   :  { %423 = vmatprep.subr.bf16.mxu0 %v469_v2  ;;  %453 = vmatprep.subr.bf16.mxu1 %v469_v2 }
   0xb   :  { %424 = vmatpush3.bf16.msra.mxu0 %v469_v2  ;;  %461 = vmatpush3.bf16.msra.mxu1 %v469_v2 }
   0xc   :  { %425 = vmatprep.subr.bf16.mxu0 %v470_v3  ;;  %454 = vmatprep.subr.bf16.mxu1 %v470_v3 }
   0xf   :  { %426 = vmatpush3.bf16.msra.mxu0 %v470_v3  ;;  %462 = vmatpush3.bf16.msra.mxu1 %v470_v3 }
  0x10   :  { %427 = vmatprep.subr.bf16.mxu0 %v471_v6  ;;  %455 = vmatprep.subr.bf16.mxu1 %v471_v6 }
  0x13   :  { %428 = vmatpush3.bf16.msra.mxu0 %v471_v6  ;;  %463 = vmatpush3.bf16.msra.mxu1 %v471_v6 }
  0x14   :  { %429 = vmatprep.subr.bf16.mxu0 %v472_v7  ;;  %456 = vmatprep.subr.bf16.mxu1 %v472_v7 }
  0x17   :  { %430 = vmatpush3.bf16.msra.mxu0 %v472_v7  ;;  %464 = vmatpush3.bf16.msra.mxu1 %v472_v7 }
  0x18   :  { %431 = vmatprep.subr.bf16.mxu0 %v473_v8  ;;  %457 = vmatprep.subr.bf16.mxu1 %v473_v8 }
  0x1b   :  { %432 = vmatpush3.bf16.msra.mxu0 %v473_v8  ;;  %465 = vmatpush3.bf16.msra.mxu1 %v473_v8 }
  0x1c   :  { %433 = vmatprep.subr.bf16.mxu0 %v474_v9  ;;  %458 = vmatprep.subr.bf16.mxu1 %v474_v9 }
  0x1f   :  { %434 = vmatpush3.bf16.msra.mxu0 %v474_v9  ;;  %466 = vmatpush3.bf16.msra.mxu1 %v474_v9 }
  0x22   :  { %436 = vmatmul.mubr.bf16.vlgmr.msra.gmra.mxu0 %v477_v10  ;;  %444 = vmatmul.mubr.bf16.vlgmr.msra.gmra.mxu1 %v478_v11 }
  0x23   :  { %439 = vmatprep.mubr.bf16.mxu0 %v479_v12  ;;  %447 = vmatprep.mubr.bf16.mxu1 %v480_v13 }
  0x2a   :  { %440 = vmatmul.mubr.bf16.gmra.mxu0 %v481_v14  ;;  %448 = vmatmul.mubr.bf16.gmra.mxu1 %v482_v15 }
  0xe2   :  { %v437_v17 = vpop.f32.mrf.mxu0  ;;  %v445_v18 = vpop.f32.mrf.mxu1 }
  0xe3   :  { %v336_v19 = vadd.f32 %v437_v17, %v402_v16  ;;  %v344_v20 = vadd.f32 %v445_v18, %v402_v16 }
  0xe4   :  { %v213_v21 = vpop.f32.mrf.mxu0  ;;  %v245_v22 = vpop.f32.mrf.mxu1 }
  0xe5   :  { %v352_v23 = vmax.f32 %v336_v19, 0.0  ;;  %v360_v24 = vmax.f32 %v344_v20, 0.0  ;;  %v334_v25 = vadd.f32 %v402_v16, %v213_v21  ;;  %v342_v26 = vadd.f32 %v402_v16, %v245_v22 }
  0xe6   :  { %v438_v27 = vpop.f32.mrf.mxu0  ;;  %v446_v28 = vpop.f32.mrf.mxu1 }
  0xe7   :  { %368 = vst [vmem:[%s605_s3 + $0x10] sm:$0xff] %v352_v23  ;;  %376 = vst [vmem:[%s605_s3 + $0x50] sm:$0xff] %v360_v24  ;;  %v350_v29 = vmax.f32 %v334_v25, 0.0  ;;  %v358_v30 = vmax.f32 %v342_v26, 0.0  ;;  %v337_v31 = vadd.f32 %v438_v27, %v402_v16  ;;  %v345_v32 = vadd.f32 %v446_v28, %v402_v16 }
  0xe8   :  { %v216_v33 = vpop.f32.mrf.mxu0  ;;  %v248_v34 = vpop.f32.mrf.mxu1 }
  0xe9   :  { %366 = vst [vmem:[%s605_s3] sm:$0xff] %v350_v29  ;;  %374 = vst [vmem:[%s605_s3 + $0x40] sm:$0xff] %v358_v30  ;;  %v353_v35 = vmax.f32 %v337_v31, 0.0  ;;  %v361_v36 = vmax.f32 %v345_v32, 0.0  ;;  %v335_v37 = vadd.f32 %v402_v16, %v216_v33  ;;  %v343_v38 = vadd.f32 %v402_v16, %v248_v34 }
  0xea   :  { %v441_v39 = vpop.f32.mrf.mxu0  ;;  %v449_v40 = vpop.f32.mrf.mxu1 }
  0xeb   :  { %369 = vst [vmem:[%s605_s3 + $0x18] sm:$0xff] %v353_v35  ;;  %377 = vst [vmem:[%s605_s3 + $0x58] sm:$0xff] %v361_v36  ;;  %v351_v41 = vmax.f32 %v335_v37, 0.0  ;;  %v359_v42 = vmax.f32 %v343_v38, 0.0  ;;  %v340_v43 = vadd.f32 %v441_v39, %v402_v16  ;;  %v348_v44 = vadd.f32 %v449_v40, %v402_v16 }
  0xec   :  { %v229_v45 = vpop.f32.mrf.mxu0  ;;  %v261_v46 = vpop.f32.mrf.mxu1 }
  0xed   :  { %367 = vst [vmem:[%s605_s3 + $0x8] sm:$0xff] %v351_v41  ;;  %375 = vst [vmem:[%s605_s3 + $0x48] sm:$0xff] %v359_v42  ;;  %v356_v47 = vmax.f32 %v340_v43, 0.0  ;;  %v364_v48 = vmax.f32 %v348_v44, 0.0  ;;  %v338_v49 = vadd.f32 %v402_v16, %v229_v45  ;;  %v346_v50 = vadd.f32 %v402_v16, %v261_v46 }
  0xee   :  { %v442_v51 = vpop.f32.mrf.mxu0  ;;  %v450_v52 = vpop.f32.mrf.mxu1 }
  0xef   :  { %372 = vst [vmem:[%s605_s3 + $0x30] sm:$0xff] %v356_v47  ;;  %380 = vst [vmem:[%s605_s3 + $0x70] sm:$0xff] %v364_v48  ;;  %v354_v53 = vmax.f32 %v338_v49, 0.0  ;;  %v362_v54 = vmax.f32 %v346_v50, 0.0  ;;  %v341_v55 = vadd.f32 %v442_v51, %v402_v16  ;;  %v349_v56 = vadd.f32 %v450_v52, %v402_v16 }
  0xf0   :  { %v232_v57 = vpop.f32.mrf.mxu0  ;;  %v264_v58 = vpop.f32.mrf.mxu1 }
  0xf1   :  { %370 = vst [vmem:[%s605_s3 + $0x20] sm:$0xff] %v354_v53  ;;  %378 = vst [vmem:[%s605_s3 + $0x60] sm:$0xff] %v362_v54  ;;  %v357_v59 = vmax.f32 %v341_v55, 0.0  ;;  %v365_v60 = vmax.f32 %v349_v56, 0.0  ;;  %v339_v61 = vadd.f32 %v402_v16, %v232_v57  ;;  %v347_v62 = vadd.f32 %v402_v16, %v264_v58 }
  0xf3   :  { %373 = vst [vmem:[%s605_s3 + $0x38] sm:$0xff] %v357_v59  ;;  %381 = vst [vmem:[%s605_s3 + $0x78] sm:$0xff] %v365_v60  ;;  %v355_v63 = vmax.f32 %v339_v61, 0.0  ;;  %v363_v0 = vmax.f32 %v347_v62, 0.0 }
  0xf5   :  { %371 = vst [vmem:[%s605_s3 + $0x28] sm:$0xff] %v355_v63  ;;  %379 = vst [vmem:[%s605_s3 + $0x68] sm:$0xff] %v363_v0 }

// kernel: vpr_model_forward.4
= control target key start
LH: loop header
LB: loop body
LE: loop exit
PB: predicated region body
PF: predicated region fallthrough
CT: control target
= control target key end

     0   :  { %s310_s1 = inlined_call_operand.vmem [shape: bf16[128,128], index: 1, kind: input, shape index: {}]   ;;  %s311_s0 = inlined_call_operand.vmem [shape: bf16[32,128], index: 0, kind: input, shape index: {}]   ;;  %s312_s2 = inlined_call_operand.vmem [shape: f32[1,128], index: 2, kind: input, shape index: {}]   ;;  %s313_s3 = inlined_call_operand.vmem [shape: f32[32,128], index: 3, kind: output, shape index: {}]  }
   0x1   :  { %v235_v0 = vld [vmem:[%s310_s1 + $0x38] sm:$0xff]   ;;  %v236_v1 = vld [vmem:[%s310_s1 + $0x30] sm:$0xff]   ;;  %v237_v2 = vld [vmem:[%s310_s1 + $0x28] sm:$0xff]  }
   0x2   :  { %215 = vmatprep.subr.bf16.mxu0 %v235_v0  ;;  %v238_v3 = vld [vmem:[%s310_s1 + $0x20] sm:$0xff]   ;;  %v239_v5 = vld [vmem:[%s310_s1 + $0x18] sm:$0xff]   ;;  %v240_v6 = vld [vmem:[%s310_s1 + $0x10] sm:$0xff]  }
   0x3   :  { %216 = vmatpush3.bf16.msra.mxu0 %v235_v0  ;;  %v243_v4 = vld [vmem:[%s311_s0] sm:$0xff]   ;;  %v241_v7 = vld [vmem:[%s310_s1 + $0x8] sm:$0xff]  }
   0x4   :  { %217 = vmatprep.subr.bf16.mxu0 %v236_v1  ;;  %231 = vmatprep.mubr.bf16.mxu0 %v243_v4  ;;  %v242_v8 = vld [vmem:[%s310_s1] sm:$0xff]   ;;  %v244_v9 = vld [vmem:[%s311_s0 + $0x8] sm:$0xff]  }
   0x5   :  { %v204_v10 = vld [vmem:[%s312_s2] ss:$0 sm:$0xff] }
   0x7   :  { %218 = vmatpush3.bf16.msra.mxu0 %v236_v1 }
   0x8   :  { %219 = vmatprep.subr.bf16.mxu0 %v237_v2 }
   0xb   :  { %220 = vmatpush3.bf16.msra.mxu0 %v237_v2 }
   0xc   :  { %221 = vmatprep.subr.bf16.mxu0 %v238_v3 }
   0xf   :  { %222 = vmatpush3.bf16.msra.mxu0 %v238_v3 }
  0x10   :  { %223 = vmatprep.subr.bf16.mxu0 %v239_v5 }
  0x13   :  { %224 = vmatpush3.bf16.msra.mxu0 %v239_v5 }
  0x14   :  { %225 = vmatprep.subr.bf16.mxu0 %v240_v6 }
  0x17   :  { %226 = vmatpush3.bf16.msra.mxu0 %v240_v6 }
  0x18   :  { %227 = vmatprep.subr.bf16.mxu0 %v241_v7 }
  0x1b   :  { %228 = vmatpush3.bf16.msra.mxu0 %v241_v7 }
  0x1c   :  { %229 = vmatprep.subr.bf16.mxu0 %v242_v8 }
  0x1f   :  { %230 = vmatpush3.bf16.msra.mxu0 %v242_v8 }
  0x22   :  { %232 = vmatmul.mubr.bf16.vlgmr.msra.gmra.mxu0 %v244_v9 }
  0xe2   :  { %v233_v11 = vpop.f32.mrf.mxu0 }
  0xe3   :  { %v180_v12 = vadd.f32 %v233_v11, %v204_v10 }
  0xe4   :  { %v141_v13 = vpop.f32.mrf.mxu0 }
  0xe5   :  { %v184_v14 = vmax.f32 %v180_v12, 0.0  ;;  %v178_v15 = vadd.f32 %v204_v10, %v141_v13 }
  0xe6   :  { %v234_v16 = vpop.f32.mrf.mxu0 }
  0xe7   :  { %188 = vst [vmem:[%s313_s3 + $0x10] sm:$0xff] %v184_v14  ;;  %v182_v17 = vmax.f32 %v178_v15, 0.0  ;;  %v181_v18 = vadd.f32 %v234_v16, %v204_v10 }
  0xe8   :  { %v144_v19 = vpop.f32.mrf.mxu0 }
  0xe9   :  { %186 = vst [vmem:[%s313_s3] sm:$0xff] %v182_v17  ;;  %v185_v20 = vmax.f32 %v181_v18, 0.0  ;;  %v179_v21 = vadd.f32 %v204_v10, %v144_v19 }
  0xeb   :  { %189 = vst [vmem:[%s313_s3 + $0x18] sm:$0xff] %v185_v20  ;;  %v183_v22 = vmax.f32 %v179_v21, 0.0 }
  0xed   :  { %187 = vst [vmem:[%s313_s3 + $0x8] sm:$0xff] %v183_v22 }

// kernel: vpr_model_forward.5
= control target key start
LH: loop header
LB: loop body
LE: loop exit
PB: predicated region body
PF: predicated region fallthrough
CT: control target
= control target key end

     0   :  { %s7769_s6 = smov 1   ;;  %s7770_s10 = smov 2   ;;  %s8876_s0 = inlined_call_operand.smem [shape: u32[33], index: -1, kind: input, shape index: {}] }
   0x1   :  { %s7823_s5 = sld [smem:[%s8876_s0]]   ;;  %s7771_s14 = smov 3  }
   0x2   :  { %s7828_s9 = sld [smem:[%s8876_s0 + %s7769_s6]]   ;;  %s7772_s18 = smov 4  }
   0x3   :  { %s7833_s13 = sld [smem:[%s8876_s0 + %s7770_s10]]   ;;  %s7773_s22 = smov 5  }
   0x4   :  { %s7838_s17 = sld [smem:[%s8876_s0 + %s7771_s14]]   ;;  %s7774_s26 = smov 6  }
   0x5   :  { %s7843_s21 = sld [smem:[%s8876_s0 + %s7772_s18]]   ;;  %s7775_s30 = smov 7  }
   0x6   :  { %s7848_s25 = sld [smem:[%s8876_s0 + %s7773_s22]]   ;;  %s7776_s4 = smov 8  }
   0x7   :  { %8919 = sst [smem:[#allocation2_spill]] %s7823_s5  ;;  %s7777_s10 = smov 9  }
   0x8   :  { %8920 = sst [smem:[#allocation3_spill]] %s7828_s9  ;;  %s7778_s15 = smov 10  }
   0x9   :  { %8921 = sst [smem:[#allocation4_spill]] %s7833_s13  ;;  %s7779_s20 = smov 11  }
   0xa   :  { %8922 = sst [smem:[#allocation5_spill]] %s7838_s17  ;;  %s7781_s1 = smov 13  }
   0xb   :  { %8923 = sst [smem:[#allocation6_spill]] %s7843_s21  ;;  %s7782_s7 = smov 14  }
   0xc   :  { %s7853_s29 = sld [smem:[%s8876_s0 + %s7774_s26]]   ;;  %s7780_s26 = smov 12  }
   0xd   :  { %s7858_s3 = sld [smem:[%s8876_s0 + %s7775_s30]]   ;;  %s7784_s22 = smov 16  }
   0xe   :  { %s7863_s8 = sld [smem:[%s8876_s0 + %s7776_s4]]   ;;  %s7785_s28 = smov 17  }
   0xf   :  { %s7868_s14 = sld [smem:[%s8876_s0 + %s7777_s10]]  }
  0x10   :  { %s7873_s19 = sld [smem:[%s8876_s0 + %s7778_s15]]   ;;  %s7783_s15 = smov 15  }
  0x11   :  { %s7878_s24 = sld [smem:[%s8876_s0 + %s7779_s20]]  }
  0x12   :  { %8924 = sst [smem:[#allocation7_spill]] %s7853_s29 }
  0x13   :  { %8925 = sst [smem:[#allocation8_spill]] %s7858_s3 }
  0x14   :  { %8926 = sst [smem:[#allocation9_spill]] %s7863_s8 }
  0x15   :  { %s7883_s30 = sld [smem:[%s8876_s0 + %s7780_s26]]  }
  0x16   :  { %s7888_s6 = sld [smem:[%s8876_s0 + %s7781_s1]]  }
  0x17   :  { %8927 = sst [smem:[#allocation10_spill]] %s7878_s24 }
  0x18   :  { %s7893_s12 = sld [smem:[%s8876_s0 + %s7782_s7]]   ;;  %s7786_s7 = smov 18  }
  0x19   :  { %s7898_s20 = sld [smem:[%s8876_s0 + %s7783_s15]]   ;;  %s7787_s15 = smov 19  }
  0x1a   :  { %s7903_s27 = sld [smem:[%s8876_s0 + %s7784_s22]]   ;;  %s7788_s22 = smov 20  }
  0x1b   :  { %8928 = sst [smem:[#allocation11_spill]] %s7883_s30 }
  0x1c   :  { %s7908_s4 = sld [smem:[%s8876_s0 + %s7785_s28]]   ;;  %s7789_s28 = smov 21  }
  0x1d   :  { %s7913_s9 = sld [smem:[%s8876_s0 + %s7786_s7]]   ;;  %s7790_s7 = smov 22  }
  0x1e   :  { %s7918_s17 = sld [smem:[%s8876_s0 + %s7787_s15]]   ;;  %s7791_s15 = smov 23  }
  0x1f   :  { %s7923_s24 = sld [smem:[%s8876_s0 + %s7788_s22]]   ;;  %s7792_s22 = smov 24  }
  0x20   :  { %8929 = sst [smem:[#allocation12_spill]] %s7903_s27 }
  0x22   :  { %8930 = sst [smem:[#allocation13_spill]] %s7908_s4 }
  0x23   :  { %8931 = sst [smem:[#allocation14_spill]] %s7913_s9 }
  0x24   :  { %8932 = sst [smem:[#allocation15_spill]] %s7918_s17 }
  0x25   :  { %8933 = sst [smem:[#allocation16_spill]] %s7923_s24 }
  0x26   :  { %s7928_s4 = sld [smem:[%s8876_s0 + %s7789_s28]]   ;;  %s7793_s28 = smov 25  }
  0x27   :  { %s7933_s9 = sld [smem:[%s8876_s0 + %s7790_s7]]   ;;  %s7794_s7 = smov 26  }
  0x28   :  { %s7938_s17 = sld [smem:[%s8876_s0 + %s7791_s15]]   ;;  %s7795_s15 = smov 27  }
  0x29   :  { %s7943_s24 = sld [smem:[%s8876_s0 + %s7792_s22]]   ;;  %s7796_s22 = smov 28  }
  0x2a   :  { %s7948_s30 = sld [smem:[%s8876_s0 + %s7793_s28]]   ;;  %s7797_s28 = smov 29  }
  0x2b   :  { %s7953_s13 = sld [smem:[%s8876_s0 + %s7794_s7]]   ;;  %s7798_s7 = smov 30  }
  0x2c   :  { %8934 = sst [smem:[#allocation17_spill]] %s7928_s4 }
  0x2d   :  { %s7958_s21 = sld [smem:[%s8876_s0 + %s7795_s15]]   ;;  %s7799_s15 = smov 31  }
  0x2e   :  { %8935 = sst [smem:[#allocation18_spill]] %s7938_s17 }
  0x2f   :  { %s7963_s29 = sld [smem:[%s8876_s0 + %s7796_s22]]   ;;  %s7800_s22 = smov 32  }
  0x30   :  { %s7968_s4 = sld [smem:[%s8876_s0 + %s7797_s28]]   ;;  %s7985_s28 = smov 0  }
  0x31   :  { %8936 = sst [smem:[#allocation19_spill]] %s7953_s13 }
  0x32   :  { %s7973_s13 = sld [smem:[%s8876_s0 + %s7798_s7]]  }
  0x33   :  { %8937 = sst [smem:[#allocation20_spill]] %s7958_s21 }
  0x34   :  { %s7978_s21 = sld [smem:[%s8876_s0 + %s7799_s15]]  }
  0x35   :  { %8938 = sst [smem:[#allocation21_spill]] %s7963_s29 }
  0x36   :  { %8939 = sst [smem:[#allocation22_spill]] %s7968_s4 }
  0x37   :  { %s7983_s17 = sld [smem:[%s8876_s0 + %s7800_s22]]  }
  0x38   :  { %8940 = sst [smem:[#allocation23_spill]] %s7973_s13 }
  0x3a   :  { %8941 = sst [smem:[#allocation24_spill]] %s7978_s21 }
  0x3d   :  { %8942 = sst [smem:[#allocation25_spill]] %s7983_s17 }
  0x3e LB: > { %s8943_s3 = sld [smem:[#allocation8_spill]]  ;;  %s6564_s1 = sadd.s32 4294967295, %s7767_s28   ;;  %s7767_s28 = sphi %s7985_s28, %s75_s28  }
  0x3f   : > { %s8944_s8 = sld [smem:[#allocation9_spill]]  ;;  %p6568_p0 = scmp.ge.s32.totalorder %s7767_s28, 1 }
  0x40   : > { %s8945_s27 = sld [smem:[#allocation12_spill]]  ;;  %p895_p1 = scmp.lt.s32.totalorder %s7767_s28, 3 }
  0x41   : > { %s8946_s21 = sld [smem:[#allocation24_spill]] }
  0x42   : > { %8947 = sst [smem:[#allocation26_spill]] %s7767_s28  ;;  %p896_p2 = pnand %p6568_p0, %p895_p1 }
  0x44   : > { %899 = sbr.rel (%p896_p2) target bundleno = 18614 (0x48b6), region = 148 }
  0x49   : > { %s8948_s5 = sld [smem:[#allocation2_spill]]  ;;  %v7557_v0 = vld [vmem:[%s8946_s21 + $0x38] sm:$0xff]   ;;  %v7801_v1 = vmov 0   ;;  %p976_p3 = scmp.lt.s32.totalorder %s6564_s1, 1  ;;  %v7558_v2 = vld [vmem:[%s8946_s21 + $0x30] sm:$0xff]   ;;  %v7559_v3 = vld [vmem:[%s8946_s21 + $0x28] sm:$0xff]  }
  0x4a   : > { %1206 = vmatprep.subr.bf16.mxu0 %v7801_v1  ;;  %7555 = vset.pattern.permute.xlu1 %v7801_v1  ;;  %vm1202_vm0 = vcmask 130048   ;;  %v7560_v4 = vld [vmem:[%s8946_s21 + $0x20] sm:$0xff]   ;;  %v7561_v6 = vld [vmem:[%s8946_s21 + $0x18] sm:$0xff]   ;;  %s8950_s13 = sld [smem:[#allocation23_spill]]  ;;  %v7562_v7 = vld [vmem:[%s8946_s21 + $0x10] sm:$0xff]   ;;  %vm1247_vm1 = vcmask 261120  }
  0x4b   : > { %1207 = vmatpush1.bf16.msra.mxu0 %v7557_v0  ;;  %7556 = vset.pattern.permute.xlu0 %v7801_v1  ;;  %s8986_s1 = smov (!%p976_p3, %s6564_s1), 1  ;;  %v7563_v8 = vld [vmem:[%s8946_s21 + $0x8] sm:$0xff]   ;;  %v7564_v9 = vld [vmem:[%s8946_s21] sm:$0xff]   ;;  %v7802_v32 = vmov 0.0   ;;  %vm7803_vm2 = vmmov 0   ;;  %s8951_s4 = sld [smem:[#allocation22_spill]] }
  0x4c   : > { %1208 = vmatprep.subr.bf16.mxu0 %v7801_v1  ;;  %8949 = sst [smem:[#allocation27_spill]] %s8986_s1  ;;  %s6737_s0 = sshll.u32 %s8986_s1, 4  ;;  %v7565_v10 = vld [vmem:[%s8946_s21 + $0x40] sm:$0xff]   ;;  %v7569_v31 = vld [vmem:[%s8945_s27 + $0x8] sm:$0xff]   ;;  %6934 = vmatprep.subr.bf16.mxu1 %v7802_v32  ;;  %vm1369_vm3 = vcmask 64512   ;;  %vm1494_vm4 = vcmask 1043456  }
  0x4d   : > { %6938 = vmatprep.mubr.msk.bf16.mxu1 %vm7803_vm2, %v7802_v32  ;;  %6935 = vmatpush3.bf16.msra.mxu1 %v7569_v31  ;;  %v7570_v33 = vld [vmem:[%s8945_s27] sm:$0xff]   ;;  %s8952_s29 = sld [smem:[#allocation21_spill]]  ;;  %s8909_s7 = smov 96   ;;  %vm6463_vm5 = vcmask 257024  }
  0x4e   : > { %6936 = vmatprep.subr.bf16.mxu1 %v7802_v32  ;;  %v6587_v52 = vld [vmem:[%s8944_s8] ss:$0 sm:$0xff]  ;;  %s8907_s10 = smov 88   ;;  %s8911_s11 = smov 120  }
  0x4f   : > { %1209 = vmatpush1.bf16.msra.mxu0 %v7558_v2  ;;  %s980_s2 = scalar_lea.vmem %s8948_s5, %s6737_s0  ;;  %s8891_s15 = smov 64  }
  0x50   : > { %1210 = vmatprep.subr.bf16.mxu0 %v7801_v1  ;;  %v7568_v5 = vld [vmem:[%s980_s2 + $0x4] ss:$8 sps:$4 sm:$0xff]   ;;  %v7566_v11 = vld [vmem:[%s980_s2] ss:$8 sps:$4 sm:$0xff]   ;;  %s8903_s16 = smov 80   ;;  %s8905_s18 = smov 112  }
  0x51   : > { %6584 = vmatprep.mubr.msk.bf16.mxu0 %vm1202_vm0, %v7568_v5  ;;  %v6572_v12 = vld [vmem:[%s8950_s13] ss:$0 sm:$0xff]  ;;  %6937 = vmatpush3.bf16.msra.mxu1 %v7570_v33  ;;  %s8893_s22 = smov 56   ;;  %s8895_s23 = smov 48  }
  0x52   : > { %6942 = vmatprep.subr.bf16.mxu1 %v7802_v32  ;;  %v6585_v42 = vld [vmem:[%s8951_s4] ss:$0 sm:$0xff]  ;;  %s8901_s26 = smov 104   ;;  %s8897_s0 = smov 72  }
  0x53   : > { %1211 = vmatpush1.bf16.msra.mxu0 %v7559_v3  ;;  %v6586_v46 = vld [vmem:[%s8952_s29] ss:$0 sm:$0xff]  ;;  %s8899_s2 = smov 40   ;;  %s8964_s4 = smov 112  }
  0x54   : > { %1212 = vmatprep.subr.bf16.mxu0 %v7801_v1  ;;  %s8965_s5 = smov 80   ;;  %s8966_s13 = sld [smem:[#allocation3_spill]] }
  0x55   : > { %s8967_s21 = smov 104   ;;  %s8968_s29 = smov 72  }
  0x56   : > { %s8970_s28 = sld [smem:[#allocation13_spill]]  ;;  %s8971_s1 = smov 96  }
  0x57   : > { %1213 = vmatpush1.bf16.msra.mxu0 %v7560_v4  ;;  %s8975_s17 = smov 56  }
  0x58   : > { %1214 = vmatprep.subr.bf16.mxu0 %v7801_v1 }
  0x5b   : > { %1215 = vmatpush1.bf16.msra.mxu0 %v7561_v6 }
  0x5c   : > { %1216 = vmatprep.subr.bf16.mxu0 %v7801_v1 }
  0x5f   : > { %1217 = vmatpush1.bf16.msra.mxu0 %v7562_v7 }
  0x60   : > { %1218 = vmatprep.subr.bf16.mxu0 %v7801_v1 }
  0x63   : > { %1219 = vmatpush1.bf16.msra.mxu0 %v7563_v8 }
  0x64   : > { %1220 = vmatprep.subr.bf16.mxu0 %v7801_v1 }
  0x67   : > { %1221 = vmatpush1.bf16.msra.mxu0 %v7564_v9 }
  0x68   : > { %1236 = vmatprep.subr.bf16.mxu0 %v7801_v1 }
  0x6b   : > { %1237 = vmatpush2.bf16.msra.mxu0 %v7565_v10 }
  0x6c   : > { %6966 = vmatprep.subr.bf16.mxu0 %v7802_v32 }
  0x6e   : > { %1239 = vmatmul.mubr.bf16.vlgmr.msra.gmra.mxu0 %v7566_v11 }
  0x6f   : > { %6968 = vmatprep.mubr.msk.bf16.mxu0 %vm7803_vm2, %v7802_v32 }
 0x12e   : > { %v1240_v13 = vpop.f32.mrf.mxu0 }
 0x12f   : > { %v1241_v14 = vadd.f32 %v6572_v12, %v1240_v13 }
 0x130   : > { %v1242_v15 = vpop.f32.mrf.mxu0 }
 0x131   : > { %v1248_v16 = vsel %vm1247_vm1, %v1241_v14, 0.0 }
 0x132   : > { %v1243_v17 = vpop.f32.mrf.mxu0  ;;  %1249 = vadd.xlane.f32.xlu0 %v1248_v16 }
 0x133   : > { %v1244_v18 = vadd.f32 %v6572_v12, %v1243_v17 }
 0x134   : > { %v1245_v19 = vpop.f32.mrf.mxu0 }
 0x135   : > { %v1251_v20 = vsel %vm1247_vm1, %v1244_v18, 0.0 }
 0x136   : > { %1252 = vadd.xlane.f32.xlu0 %v1251_v20 }
 0x1bb   : > { %v1250_v21 = vpop.xlane.xlu0 %1249 }
 0x1bc   : > { %v1255_v22 = vmul.f32 0.03125, %v1250_v21 }
 0x1be   : > { %v1257_v23 = vsub.f32 %v1241_v14, %v1255_v22 }
 0x1bf   : > { %v1253_v24 = vpop.xlane.xlu0 %1252 }
 0x1c0   : > { %v1256_v25 = vmul.f32 0.03125, %v1253_v24  ;;  %v1259_v26 = vmul.f32 %v1257_v23, %v1257_v23 }
 0x1c2   : > { %v1258_v27 = vsub.f32 %v1244_v18, %v1256_v25  ;;  %v1261_v28 = vsel %vm1247_vm1, %v1259_v26, 0.0 }
 0x1c3   : > { %1262 = vadd.xlane.f32.xlu1 %v1261_v28 }
 0x1c4   : > { %v1260_v29 = vmul.f32 %v1258_v27, %v1258_v27 }
 0x1c6   : > { %v1264_v30 = vsel %vm1247_vm1, %v1260_v29, 0.0 }
 0x1c7   : > { %1265 = vadd.xlane.f32.xlu1 %v1264_v30 }
 0x24c   : > { %v1263_v34 = vpop.xlane.xlu1 %1262 }
 0x24d   : > { %v1267_v35 = vmul.f32 0.03125, %v1263_v34 }
 0x24f   : > { %v1269_v36 = vadd.f32 1e-05, %v1267_v35 }
 0x250   : > { %v1266_v37 = vpop.xlane.xlu1 %1265 }
 0x251   : > { %7601 = vrsqrt.f32 %v1269_v36  ;;  %v1268_v38 = vmul.f32 0.03125, %v1266_v37 }
 0x253   : > { %v1270_v39 = vadd.f32 1e-05, %v1268_v38 }
 0x255   : > { %7603 = vrsqrt.f32 %v1270_v39 }
 0x25e   : > { %v7602_v40 = vpop.eup %7601 }
 0x25f   : > { %v1273_v41 = vmul.f32 %v7602_v40, %v1257_v23  ;;  %v1062_v23 = vld [vmem:[%s7898_s20] sm:$0xff] }
 0x260   : > { %v1490_v24 = vpack.c.bf16 %v1062_v23, %v1062_v23 }
 0x261   : > { %v1281_v45 = vmul.f32 %v6585_v42, %v1273_v41 }
 0x262   : > { %v7604_v43 = vpop.eup %7603  ;;  %v1496_v25 = vsel %vm1494_vm4, %v1490_v24, 0 }
 0x263   : > { %v1274_v44 = vmul.f32 %v7604_v43, %v1258_v27  ;;  %v8024_v48 = vadd.f32 %v6586_v46, %v1281_v45 }
 0x265   : > { %v1282_v47 = vmul.f32 %v6585_v42, %v1274_v44 }
 0x267   : > { %v8026_v49 = vadd.f32 %v6586_v46, %v1282_v47 }
 0x269   : > { %v1296_v50 = vpack.c.bf16 %v8026_v49, %v8024_v48 }
 0x26b   : > { %6939 = vmatmul.mubr.msk.bf16.vlgmr.msra.gmra.mxu1 %vm1247_vm1, %v1296_v50 }
 0x26c   : > { %6944 = vmatprep.mubr.msk.bf16.mxu1 %vm7803_vm2, %v7802_v32 }
 0x32b   : > { %v1352_v51 = vpop.f32.mrf.mxu1 }
 0x32c   : > { %v1353_v55 = vadd.f32 %v6587_v52, %v1352_v51 }
 0x32d   : > { %v6940_v53 = vpop.f32.mrf.mxu1 }
 0x32f   : > { %v1355_v54 = vpop.f32.mrf.mxu1 }
 0x330   : > { %v1356_v56 = vadd.f32 %v6587_v52, %v1355_v54 }
 0x331   : > { %v6941_v57 = vpop.f32.mrf.mxu1 }
 0x332   : > { %v8034_v58 = vpack.c.bf16 %v1356_v56, %v1353_v55 }
 0x334   : > { %1367 = vrot.lane.b32.xlu0 %v8034_v58, %s8909_s7 }
 0x338   : > { %1543 = vrot.lane.b32.xlu0 %v8034_v58, %s8907_s10 }
 0x33c   : > { %1541 = vrot.lane.b32.xlu0 %v8034_v58, %s8911_s11 }
 0x3a6   : > { %v1368_v59 = vpop.permute.xlu0 %1367 }
 0x3a7   : > { %v1374_v60 = vsel %vm1369_vm3, %v1368_v59, 0 }
 0x3a8   : > { %6943 = vmatpush3.bf16.xpose.msra.mxu1 %v1374_v60 }
 0x3a9   : > { %6948 = vmatprep.subr.bf16.mxu1 %v7802_v32 }
 0x3aa   : > { %v1544_v28 = vpop.permute.xlu0 %1543 }
 0x3ab   : > { %v1549_v33 = vsel %vm1369_vm3, %v1544_v28, 0 }
 0x3ae   : > { %v1542_v34 = vpop.permute.xlu0 %1541 }
 0x3af   : > { %6945 = vmatmul.mubr.msk.bf16.vlgmr.msra.gmra.mxu1 %vm1369_vm3, %v8034_v58 }
 0x3b0   : > { %6950 = vmatprep.mubr.msk.bf16.mxu1 %vm7803_vm2, %v7802_v32 }
 0x46f   : > { %v1410_v61 = vpop.f32.mrf.mxu1 }
 0x470   : > { %v1417_v62 = vmul.f32 0.35355338, %v1410_v61 }
 0x471   : > { %v6946_v63 = vpop.f32.mrf.mxu1 }
 0x472   : > { %v1419_v0 = vsel %vm1202_vm0, %v1417_v62, -inf }
 0x473   : > { %1420 = vmax.xlane.f32.xlu1 %v1419_v0  ;;  %v1413_v1 = vpop.f32.mrf.mxu1 }
 0x474   : > { %v1418_v2 = vmul.f32 0.35355338, %v1413_v1 }
 0x475   : > { %v6947_v3 = vpop.f32.mrf.mxu1 }
 0x476   : > { %v1422_v4 = vsel %vm1202_vm0, %v1418_v2, -inf }
 0x477   : > { %1423 = vmax.xlane.f32.xlu1 %v1422_v4 }
 0x4fc   : > { %v1421_v5 = vpop.xlane.xlu1 %1420 }
 0x4fd   : > { %v1425_v6 = vsub.f32 %v1417_v62, %v1421_v5 }
 0x4ff   : > { %v1427_v7 = vmul.f32 1.442695, %v1425_v6 }
 0x500   : > { %v1424_v8 = vpop.xlane.xlu1 %1423 }
 0x501   : > { %7605 = vpow2.f32 %v1427_v7  ;;  %v1426_v9 = vsub.f32 %v1418_v2, %v1424_v8  ;;  %v1063_v7 = vld [vmem:[%s7898_s20 + $0x8] sm:$0xff] }
 0x502   : > { %v1665_v8 = vpack.c.bf16 %v1063_v7, %v1063_v7 }
 0x503   : > { %v1429_v10 = vmul.f32 1.442695, %v1426_v9 }
 0x504   : > { %v1670_v9 = vsel %vm1494_vm4, %v1665_v8, 0 }
 0x505   : > { %7607 = vpow2.f32 %v1429_v10 }
 0x50e   : > { %v7606_v11 = vpop.eup %7605 }
 0x50f   : > { %v1431_v12 = vsel %vm1202_vm0, %v7606_v11, 0.0 }
 0x510   : > { %1432 = vadd.xlane.f32.xlu1 %v1431_v12 }
 0x512   : > { %v7608_v13 = vpop.eup %7607 }
 0x513   : > { %v1434_v14 = vsel %vm1202_vm0, %v7608_v13, 0.0 }
 0x514   : > { %1435 = vadd.xlane.f32.xlu1 %v1434_v14 }
 0x525   : > { %1442 = vrot.lane.b32.xlu1 %v8034_v58, %s8891_s15 }
 0x599   : > { %v1433_v15 = vpop.xlane.xlu1 %1432 }
 0x59a   : > { %7609 = vrcp.f32 %v1433_v15 }
 0x59d   : > { %v1436_v16 = vpop.xlane.xlu1 %1435 }
 0x59e   : > { %7611 = vrcp.f32 %v1436_v16 }
 0x5a1   : > { %v1443_v17 = vpop.permute.xlu1 %1442 }
 0x5a2   : > { %6949 = vmatpush3.bf16.msra.mxu1 %v1443_v17 }
 0x5a3   : > { %6954 = vmatprep.subr.bf16.mxu1 %v7802_v32 }
 0x5a7   : > { %v7610_v18 = vpop.eup %7609 }
 0x5a8   : > { %v1439_v20 = vmul.f32 %v7610_v18, %v7606_v11 }
 0x5ab   : > { %v7612_v19 = vpop.eup %7611 }
 0x5ac   : > { %v1440_v21 = vmul.f32 %v7612_v19, %v7608_v13 }
 0x5ae   : > { %v1441_v22 = vpack.c.bf16 %v1440_v21, %v1439_v20 }
 0x5b0   : > { %6951 = vmatmul.mubr.msk.bf16.vlgmr.msra.gmra.mxu1 %vm1202_vm0, %v1441_v22 }
 0x5b1   : > { %6956 = vmatprep.mubr.msk.bf16.mxu1 %vm7803_vm2, %v7802_v32  ;;  %6955 = vmatpush3.bf16.msra.mxu1 %v1496_v25 }
 0x5b2   : > { %6960 = vmatprep.subr.bf16.mxu1 %v7802_v32 }
 0x670   : > { %v1482_v26 = vpop.f32.mrf.mxu1 }
 0x672   : > { %v6952_v27 = vpop.f32.mrf.mxu1 }
 0x674   : > { %v1485_v29 = vpop.f32.mrf.mxu1 }
 0x675   : > { %v1489_v30 = vpack.c.bf16 %v1485_v29, %v1482_v26 }
 0x676   : > { %v6953_v31 = vpop.f32.mrf.mxu1 }
 0x677   : > { %6957 = vmatmul.mubr.msk.bf16.vlgmr.msra.gmra.mxu1 %vm1369_vm3, %v1489_v30 }
 0x678   : > { %6961 = vmatpush3.bf16.xpose.msra.mxu1 %v1549_v33  ;;  %6962 = vmatprep.mubr.msk.bf16.mxu1 %vm7803_vm2, %v7802_v32 }
 0x679   : > { %6972 = vmatprep.subr.bf16.mxu1 %v7802_v32 }
 0x67f   : > { %6963 = vmatmul.mubr.msk.bf16.vlgmr.msra.gmra.mxu1 %vm1369_vm3, %v1542_v34 }
 0x680   : > { %6974 = vmatprep.mubr.msk.bf16.mxu1 %vm7803_vm2, %v7802_v32  ;;  %6973 = vmatpush3.bf16.msra.mxu1 %v1670_v9 }
 0x681   : > { %6984 = vmatprep.subr.bf16.mxu1 %v7802_v32 }
 0x737   : > { %v8069_v35 = vpop.f32.mrf.mxu1 }
 0x739   : > { %v6958_v36 = vpop.f32.mrf.mxu1 }
 0x73a   : > { %v6591_v36 = vld [vmem:[%s8943_s3] ss:$0 sm:$0xff] }
 0x73b   : > { %v8071_v37 = vpop.f32.mrf.mxu1 }
 0x73d   : > { %v6959_v38 = vpop.f32.mrf.mxu1 }
 0x73e   : > { %v1539_v38 = vadd.f32 %v6591_v36, %v8069_v35 }
 0x73f   : > { %v1585_v39 = vpop.f32.mrf.mxu1 }
 0x740   : > { %v1592_v40 = vmul.f32 0.35355338, %v1585_v39 }
 0x741   : > { %v6964_v41 = vpop.f32.mrf.mxu1 }
 0x742   : > { %v1594_v42 = vsel %vm1202_vm0, %v1592_v40, -inf }
 0x743   : > { %1595 = vmax.xlane.f32.xlu0 %v1594_v42  ;;  %v1588_v43 = vpop.f32.mrf.mxu1  ;;  %v1540_v42 = vadd.f32 %v6591_v36, %v8071_v37 }
 0x744   : > { %v1593_v44 = vmul.f32 0.35355338, %v1588_v43 }
 0x745   : > { %v6965_v45 = vpop.f32.mrf.mxu1 }
 0x746   : > { %v1597_v46 = vsel %vm1202_vm0, %v1593_v44, -inf }
 0x747   : > { %1598 = vmax.xlane.f32.xlu1 %v1597_v46 }
 0x758   : > { %1717 = vrot.lane.b32.xlu1 %v8034_v58, %s8903_s16 }
 0x75c   : > { %1715 = vrot.lane.b32.xlu1 %v8034_v58, %s8905_s18 }
 0x7cc   : > { %v1596_v47 = vpop.xlane.xlu0 %1595 }
 0x7cd   : > { %v1600_v50 = vsub.f32 %v1592_v40, %v1596_v47 }
 0x7cf   : > { %v1602_v51 = vmul.f32 1.442695, %v1600_v50 }
 0x7d0   : > { %v1599_v52 = vpop.xlane.xlu1 %1598 }
 0x7d1   : > { %7613 = vpow2.f32 %v1602_v51  ;;  %v1601_v53 = vsub.f32 %v1593_v44, %v1599_v52 }
 0x7d3   : > { %v1604_v54 = vmul.f32 1.442695, %v1601_v53 }
 0x7d4   : > { %v1718_v3 = vpop.permute.xlu1 %1717 }
 0x7d5   : > { %7615 = vpow2.f32 %v1604_v54  ;;  %v1723_v5 = vsel %vm1369_vm3, %v1718_v3, 0 }
 0x7d8   : > { %v1716_v6 = vpop.permute.xlu1 %1715 }
 0x7de   : > { %v7614_v55 = vpop.eup %7613 }
 0x7df   : > { %v1606_v56 = vsel %vm1202_vm0, %v7614_v55, 0.0 }
 0x7e0   : > { %1607 = vadd.xlane.f32.xlu0 %v1606_v56  ;;  %v1064_v56 = vld [vmem:[%s7898_s20 + $0x10] sm:$0xff] }
 0x7e2   : > { %v7616_v57 = vpop.eup %7615 }
 0x7e3   : > { %v1609_v59 = vsel %vm1202_vm0, %v7616_v57, 0.0 }
 0x7e4   : > { %1610 = vadd.xlane.f32.xlu0 %v1609_v59 }
 0x7fa   : > { %1617 = vrot.lane.b32.xlu0 %v8034_v58, %s8893_s22 }
 0x869   : > { %v1608_v60 = vpop.xlane.xlu0 %1607 }
 0x86a   : > { %7617 = vrcp.f32 %v1608_v60 }
 0x86d   : > { %v1611_v61 = vpop.xlane.xlu0 %1610 }
 0x86e   : > { %7619 = vrcp.f32 %v1611_v61 }
 0x871   : > { %v1618_v62 = vpop.permute.xlu0 %1617 }
 0x872   : > { %6967 = vmatpush3.bf16.msra.mxu0 %v1618_v62 }
 0x873   : > { %6978 = vmatprep.subr.bf16.mxu0 %v7802_v32 }
 0x877   : > { %v7618_v63 = vpop.eup %7617 }
 0x878   : > { %v1614_v1 = vmul.f32 %v7618_v63, %v7614_v55 }
 0x87b   : > { %v7620_v0 = vpop.eup %7619 }
 0x87c   : > { %v1615_v2 = vmul.f32 %v7620_v0, %v7616_v57  ;;  %v1839_v57 = vpack.c.bf16 %v1064_v56, %v1064_v56 }
 0x87e   : > { %v1616_v4 = vpack.c.bf16 %v1615_v2, %v1614_v1  ;;  %v1844_v59 = vsel %vm1494_vm4, %v1839_v57, 0 }
 0x880   : > { %6969 = vmatmul.mubr.msk.bf16.vlgmr.msra.gmra.mxu0 %vm1202_vm0, %v1616_v4 }
 0x881   : > { %6979 = vmatpush3.bf16.xpose.msra.mxu0 %v1723_v5  ;;  %6980 = vmatprep.mubr.msk.bf16.mxu0 %vm7803_vm2, %v7802_v32 }
 0x882   : > { %6990 = vmatprep.subr.bf16.mxu0 %v7802_v32 }
 0x888   : > { %6981 = vmatmul.mubr.msk.bf16.vlgmr.msra.gmra.mxu0 %vm1369_vm3, %v1716_v6 }
 0x889   : > { %6992 = vmatprep.mubr.msk.bf16.mxu0 %vm7803_vm2, %v7802_v32  ;;  %6991 = vmatpush3.bf16.msra.mxu0 %v1844_v59 }
 0x88a   : > { %7002 = vmatprep.subr.bf16.mxu0 %v7802_v32 }
 0x940   : > { %v1657_v10 = vpop.f32.mrf.mxu0 }
 0x942   : > { %v6970_v11 = vpop.f32.mrf.mxu0 }
 0x944   : > { %v1660_v12 = vpop.f32.mrf.mxu0 }
 0x945   : > { %v1664_v13 = vpack.c.bf16 %v1660_v12, %v1657_v10 }
 0x946   : > { %v6971_v14 = vpop.f32.mrf.mxu0 }
 0x947   : > { %6975 = vmatmul.mubr.msk.bf16.vlgmr.msra.gmra.mxu1 %vm1369_vm3, %v1664_v13 }
 0x948   : > { %v1759_v15 = vpop.f32.mrf.mxu0  ;;  %6986 = vmatprep.mubr.msk.bf16.mxu1 %vm7803_vm2, %v7802_v32 }
 0x949   : > { %v1766_v16 = vmul.f32 0.35355338, %v1759_v15 }
 0x94a   : > { %v6982_v17 = vpop.f32.mrf.mxu0 }
 0x94b   : > { %v1768_v18 = vsel %vm1202_vm0, %v1766_v16, -inf }
 0x94c   : > { %1769 = vmax.xlane.f32.xlu1 %v1768_v18  ;;  %v1762_v19 = vpop.f32.mrf.mxu0 }
 0x94d   : > { %v1767_v20 = vmul.f32 0.35355338, %v1762_v19 }
 0x94e   : > { %v6983_v21 = vpop.f32.mrf.mxu0 }
 0x94f   : > { %v1771_v22 = vsel %vm1202_vm0, %v1767_v20, -inf }
 0x950   : > { %1772 = vmax.xlane.f32.xlu0 %v1771_v22 }
 0x95d   : > { %1791 = vrot.lane.b32.xlu1 %v8034_v58, %s8895_s23 }
 0x961   : > { %1889 = vrot.lane.b32.xlu1 %v8034_v58, %s8901_s26 }
 0x9d5   : > { %v1770_v23 = vpop.xlane.xlu1 %1769 }
 0x9d6   : > { %v1774_v24 = vsub.f32 %v1766_v16, %v1770_v23 }
 0x9d8   : > { %v1776_v25 = vmul.f32 1.442695, %v1774_v24 }
 0x9d9   : > { %v1792_v26 = vpop.permute.xlu1 %1791  ;;  %v1773_v27 = vpop.xlane.xlu0 %1772 }
 0x9da   : > { %7621 = vpow2.f32 %v1776_v25  ;;  %v1775_v28 = vsub.f32 %v1767_v20, %v1773_v27  ;;  %6985 = vmatpush3.bf16.msra.mxu1 %v1792_v26 }
 0x9db   : > { %6996 = vmatprep.subr.bf16.mxu1 %v7802_v32 }
 0x9dc   : > { %v1778_v29 = vmul.f32 1.442695, %v1775_v28 }
 0x9dd   : > { %v1890_v37 = vpop.permute.xlu1 %1889 }
 0x9de   : > { %7623 = vpow2.f32 %v1778_v29 }
 0x9e7   : > { %v7622_v30 = vpop.eup %7621 }
 0x9e8   : > { %v1780_v31 = vsel %vm1202_vm0, %v7622_v30, 0.0 }
 0x9e9   : > { %1781 = vadd.xlane.f32.xlu0 %v1780_v31 }
 0x9eb   : > { %v7624_v33 = vpop.eup %7623 }
 0x9ec   : > { %v1783_v34 = vsel %vm1202_vm0, %v7624_v33, 0.0 }
 0x9ed   : > { %1784 = vadd.xlane.f32.xlu0 %v1783_v34 }
 0xa03   : > { %1891 = vrot.lane.b32.xlu0 %v8034_v58, %s8897_s0 }
 0xa07   : > { %v1706_v39 = vpop.f32.mrf.mxu1 }
 0xa08   : > { %v8111_v40 = vadd.f32 %v1706_v39, %v1539_v38 }
 0xa09   : > { %v6976_v41 = vpop.f32.mrf.mxu1 }
 0xa0b   : > { %v1709_v43 = vpop.f32.mrf.mxu1 }
 0xa0c   : > { %v1714_v44 = vadd.f32 %v1709_v43, %v1540_v42 }
 0xa0d   : > { %v6977_v45 = vpop.f32.mrf.mxu1 }
 0xa72   : > { %v1782_v46 = vpop.xlane.xlu0 %1781 }
 0xa73   : > { %7625 = vrcp.f32 %v1782_v46 }
 0xa76   : > { %v1785_v47 = vpop.xlane.xlu0 %1784 }
 0xa77   : > { %7627 = vrcp.f32 %v1785_v47 }
 0xa7a   : > { %v1892_v54 = vpop.permute.xlu0 %1891 }
 0xa7b   : > { %v1897_v55 = vsel %vm1369_vm3, %v1892_v54, 0 }
 0xa80   : > { %v7626_v50 = vpop.eup %7625 }
 0xa81   : > { %v1788_v52 = vmul.f32 %v7626_v50, %v7622_v30 }
 0xa84   : > { %v7628_v51 = vpop.eup %7627 }
 0xa85   : > { %v1789_v53 = vmul.f32 %v7628_v51, %v7624_v33  ;;  %v1065_v33 = vld [vmem:[%s7898_s20 + $0x18] sm:$0xff] }
 0xa86   : > { %v2013_v34 = vpack.c.bf16 %v1065_v33, %v1065_v33 }
 0xa87   : > { %v1790_v35 = vpack.c.bf16 %v1789_v53, %v1788_v52 }
 0xa88   : > { %v2018_v36 = vsel %vm1494_vm4, %v2013_v34, 0 }
 0xa89   : > { %6987 = vmatmul.mubr.msk.bf16.vlgmr.msra.gmra.mxu1 %vm1202_vm0, %v1790_v35 }
 0xa8a   : > { %6997 = vmatpush3.bf16.xpose.msra.mxu1 %v1897_v55  ;;  %6998 = vmatprep.mubr.msk.bf16.mxu1 %vm7803_vm2, %v7802_v32 }
 0xa8b   : > { %7008 = vmatprep.subr.bf16.mxu1 %v7802_v32 }
 0xa91   : > { %6999 = vmatmul.mubr.msk.bf16.vlgmr.msra.gmra.mxu1 %vm1369_vm3, %v1890_v37 }
 0xa92   : > { %7010 = vmatprep.mubr.msk.bf16.mxu1 %vm7803_vm2, %v7802_v32  ;;  %7009 = vmatpush3.bf16.msra.mxu1 %v2018_v36 }
 0xa93   : > { %7022 = vmatprep.subr.bf16.mxu1 %v7802_v32 }
 0xb49   : > { %v1831_v60 = vpop.f32.mrf.mxu1 }
 0xb4b   : > { %v6988_v61 = vpop.f32.mrf.mxu1 }
 0xb4d   : > { %v1834_v62 = vpop.f32.mrf.mxu1 }
 0xb4e   : > { %v1838_v63 = vpack.c.bf16 %v1834_v62, %v1831_v60  ;;  %v7571_v62 = vld [vmem:[%s7888_s6 + $0x8] sm:$0xff]  }
 0xb4f   : > { %v6989_v0 = vpop.f32.mrf.mxu1 }
 0xb50   : > { %6993 = vmatmul.mubr.msk.bf16.vlgmr.msra.gmra.mxu0 %vm1369_vm3, %v1838_v63  ;;  %v7572_v63 = vld [vmem:[%s7888_s6] sm:$0xff]   ;;  %v7575_v0 = vld [vmem:[%s7893_s12 + $0x38] sm:$0xff]  }
 0xb51   : > { %v1933_v1 = vpop.f32.mrf.mxu1  ;;  %7004 = vmatprep.mubr.msk.bf16.mxu0 %vm7803_vm2, %v7802_v32 }
 0xb52   : > { %v1940_v2 = vmul.f32 0.35355338, %v1933_v1  ;;  %v7576_v1 = vld [vmem:[%s7893_s12 + $0x30] sm:$0xff]  }
 0xb53   : > { %v7000_v3 = vpop.f32.mrf.mxu1 }
 0xb54   : > { %v1942_v4 = vsel %vm1202_vm0, %v1940_v2, -inf  ;;  %v7578_v3 = vld [vmem:[%s7893_s12 + $0x20] sm:$0xff]  }
 0xb55   : > { %1943 = vmax.xlane.f32.xlu1 %v1942_v4  ;;  %v1936_v5 = vpop.f32.mrf.mxu1  ;;  %v7579_v4 = vld [vmem:[%s7893_s12 + $0x18] sm:$0xff]  }
 0xb56   : > { %v1941_v6 = vmul.f32 0.35355338, %v1936_v5 }
 0xb57   : > { %v7001_v7 = vpop.f32.mrf.mxu1 }
 0xb58   : > { %v1945_v8 = vsel %vm1202_vm0, %v1941_v6, -inf }
 0xb59   : > { %1946 = vmax.xlane.f32.xlu0 %v1945_v8 }
 0xbde   : > { %v1944_v9 = vpop.xlane.xlu1 %1943 }
 0xbdf   : > { %v1948_v10 = vsub.f32 %v1940_v2, %v1944_v9  ;;  %v7577_v2 = vld [vmem:[%s7893_s12 + $0x28] sm:$0xff]  }
 0xbe1   : > { %v1950_v11 = vmul.f32 1.442695, %v1948_v10 }
 0xbe2   : > { %v1947_v12 = vpop.xlane.xlu0 %1946 }
 0xbe3   : > { %7629 = vpow2.f32 %v1950_v11  ;;  %v1949_v13 = vsub.f32 %v1941_v6, %v1947_v12 }
 0xbe5   : > { %v1952_v14 = vmul.f32 1.442695, %v1949_v13  ;;  %v6604_v13 = vld [vmem:[%s7873_s19] ss:$0 sm:$0xff] }
 0xbe7   : > { %7631 = vpow2.f32 %v1952_v14 }
 0xbf0   : > { %v7630_v15 = vpop.eup %7629 }
 0xbf1   : > { %v1954_v16 = vsel %vm1202_vm0, %v7630_v15, 0.0 }
 0xbf2   : > { %1955 = vadd.xlane.f32.xlu0 %v1954_v16 }
 0xbf4   : > { %v7632_v17 = vpop.eup %7631 }
 0xbf5   : > { %v1957_v18 = vsel %vm1202_vm0, %v7632_v17, 0.0 }
 0xbf6   : > { %1958 = vadd.xlane.f32.xlu1 %v1957_v18 }
 0xc08   : > { %1965 = vrot.lane.b32.xlu0 %v8034_v58, %s8899_s2 }
 0xc10   : > { %v1880_v19 = vpop.f32.mrf.mxu0 }
 0xc11   : > { %v1887_v20 = vadd.f32 %v1880_v19, %v8111_v40 }
 0xc12   : > { %v6994_v21 = vpop.f32.mrf.mxu0 }
 0xc13   : > { %v7573_v21 = vld [vmem:[%s7943_s24 + $0x8] sm:$0xff]  }
 0xc14   : > { %v1883_v22 = vpop.f32.mrf.mxu0 }
 0xc15   : > { %v1888_v23 = vadd.f32 %v1883_v22, %v1714_v44 }
 0xc16   : > { %v6995_v24 = vpop.f32.mrf.mxu0 }
 0xc17   : > { %v8179_v24 = vld [vmem:[%s7948_s30] sm:$0xff] }
 0xc7b   : > { %v1956_v25 = vpop.xlane.xlu0 %1955 }
 0xc7c   : > { %7633 = vrcp.f32 %v1956_v25  ;;  %v2312_v25 = vpack.c.bf16 %v8179_v24, %v8179_v24 }
 0xc7f   : > { %v1959_v26 = vpop.xlane.xlu1 %1958  ;;  %v1966_v27 = vpop.permute.xlu0 %1965 }
 0xc80   : > { %7635 = vrcp.f32 %v1959_v26  ;;  %7003 = vmatpush3.bf16.msra.mxu0 %v1966_v27  ;;  %v7580_v26 = vld [vmem:[%s7893_s12 + $0x10] sm:$0xff]   ;;  %v7581_v27 = vld [vmem:[%s7893_s12 + $0x8] sm:$0xff]  }
 0xc81   : > { %7014 = vmatprep.subr.bf16.mxu0 %v7802_v32 }
 0xc89   : > { %v7634_v28 = vpop.eup %7633 }
 0xc8a   : > { %v1962_v30 = vmul.f32 %v7634_v28, %v7630_v15  ;;  %v7582_v28 = vld [vmem:[%s7893_s12] sm:$0xff]  }
 0xc8d   : > { %v7636_v29 = vpop.eup %7635 }
 0xc8e   : > { %v1963_v58 = vmul.f32 %v7636_v29, %v7632_v17  ;;  %v6605_v17 = vld [vmem:[%s7868_s14] ss:$0 sm:$0xff] }
 0xc8f   : > { %v6606_v29 = vld [vmem:[%s7848_s25] ss:$0 sm:$0xff] }
 0xc90   : > { %v1964_v31 = vpack.c.bf16 %v1963_v58, %v1962_v30 }
 0xc92   : > { %7005 = vmatmul.mubr.msk.bf16.vlgmr.msra.gmra.mxu0 %vm1202_vm0, %v1964_v31 }
 0xc93   : > { %7018 = vmatprep.mubr.msk.bf16.mxu0 %vm7803_vm2, %v7802_v32  ;;  %7015 = vmatpush3.bf16.msra.mxu0 %v7571_v62 }
 0xc94   : > { %7016 = vmatprep.subr.bf16.mxu0 %v7802_v32 }
 0xc97   : > { %7017 = vmatpush3.bf16.msra.mxu0 %v7572_v63 }
 0xc98   : > { %7042 = vmatprep.subr.bf16.mxu0 %v7802_v32 }
 0xd52   : > { %v2005_v38 = vpop.f32.mrf.mxu0 }
 0xd54   : > { %v7006_v39 = vpop.f32.mrf.mxu0 }
 0xd56   : > { %v2008_v40 = vpop.f32.mrf.mxu0 }
 0xd57   : > { %v2012_v41 = vpack.c.bf16 %v2008_v40, %v2005_v38  ;;  %v6621_v38 = vld [vmem:[%s7933_s9] ss:$0 sm:$0xff] }
 0xd58   : > { %v7007_v42 = vpop.f32.mrf.mxu0 }
 0xd59   : > { %7011 = vmatmul.mubr.msk.bf16.vlgmr.msra.gmra.mxu1 %vm1369_vm3, %v2012_v41 }
 0xd5a   : > { %7038 = vmatprep.mubr.msk.bf16.mxu1 %vm7803_vm2, %v7802_v32  ;;  %7023 = vmatpush3.bf16.msra.mxu1 %v7575_v0 }
 0xd5b   : > { %7024 = vmatprep.subr.bf16.mxu1 %v7802_v32 }
 0xd5e   : > { %7025 = vmatpush3.bf16.msra.mxu1 %v7576_v1 }
 0xd5f   : > { %7026 = vmatprep.subr.bf16.mxu1 %v7802_v32 }
 0xd62   : > { %7027 = vmatpush3.bf16.msra.mxu1 %v7577_v2 }
 0xd63   : > { %7028 = vmatprep.subr.bf16.mxu1 %v7802_v32 }
 0xd66   : > { %7029 = vmatpush3.bf16.msra.mxu1 %v7578_v3 }
 0xd67   : > { %7030 = vmatprep.subr.bf16.mxu1 %v7802_v32 }
 0xd6a   : > { %7031 = vmatpush3.bf16.msra.mxu1 %v7579_v4 }
 0xd6b   : > { %7032 = vmatprep.subr.bf16.mxu1 %v7802_v32 }
 0xd6e   : > { %7033 = vmatpush3.bf16.msra.mxu1 %v7580_v26 }
 0xd6f   : > { %7034 = vmatprep.subr.bf16.mxu1 %v7802_v32 }
 0xd72   : > { %7035 = vmatpush3.bf16.msra.mxu1 %v7581_v27 }
 0xd73   : > { %7036 = vmatprep.subr.bf16.mxu1 %v7802_v32 }
 0xd76   : > { %7037 = vmatpush3.bf16.msra.mxu1 %v7582_v28 }
 0xd77   : > { %7068 = vmatprep.subr.bf16.mxu1 %v7802_v32 }
 0xe19   : > { %v2054_v43 = vpop.f32.mrf.mxu1 }
 0xe1a   : > { %v2061_v44 = vadd.f32 %v2054_v43, %v1887_v20 }
 0xe1b   : > { %v7012_v45 = vpop.f32.mrf.mxu1 }
 0xe1c   : > { %v2063_v46 = vadd.f32 %v2061_v44, %v8024_v48 }
 0xe1d   : > { %v2057_v47 = vpop.f32.mrf.mxu1 }
 0xe1e   : > { %v2062_v50 = vadd.f32 %v2057_v47, %v1888_v23  ;;  %v2065_v51 = vsel %vm1247_vm1, %v2063_v46, 0.0  ;;  %v7574_v23 = vld [vmem:[%s7943_s24] sm:$0xff]  }
 0xe1f   : > { %2066 = vadd.xlane.f32.xlu1 %v2065_v51  ;;  %v7013_v52 = vpop.f32.mrf.mxu1 }
 0xe20   : > { %v2064_v53 = vadd.f32 %v2062_v50, %v8026_v49 }
 0xe22   : > { %v2068_v54 = vsel %vm1247_vm1, %v2064_v53, 0.0 }
 0xe23   : > { %2069 = vadd.xlane.f32.xlu1 %v2068_v54 }
 0xea8   : > { %v2067_v35 = vpop.xlane.xlu1 %2066 }
 0xea9   : > { %v2071_v55 = vmul.f32 0.03125, %v2067_v35 }
 0xeab   : > { %v2073_v37 = vsub.f32 %v2063_v46, %v2071_v55 }
 0xeac   : > { %v2070_v56 = vpop.xlane.xlu1 %2069 }
 0xead   : > { %v2072_v57 = vmul.f32 0.03125, %v2070_v56  ;;  %v2075_v48 = vmul.f32 %v2073_v37, %v2073_v37 }
 0xeaf   : > { %v2074_v59 = vsub.f32 %v2064_v53, %v2072_v57  ;;  %v2077_v60 = vsel %vm1247_vm1, %v2075_v48, 0.0 }
 0xeb0   : > { %2078 = vadd.xlane.f32.xlu1 %v2077_v60 }
 0xeb1   : > { %v2076_v61 = vmul.f32 %v2074_v59, %v2074_v59 }
 0xeb3   : > { %v2080_v49 = vsel %vm1247_vm1, %v2076_v61, 0.0 }
 0xeb4   : > { %2081 = vadd.xlane.f32.xlu1 %v2080_v49 }
 0xf39   : > { %v2079_v5 = vpop.xlane.xlu1 %2078 }
 0xf3a   : > { %v2083_v6 = vmul.f32 0.03125, %v2079_v5 }
 0xf3c   : > { %v2085_v7 = vadd.f32 1e-05, %v2083_v6 }
 0xf3d   : > { %v2082_v8 = vpop.xlane.xlu1 %2081 }
 0xf3e   : > { %7637 = vrsqrt.f32 %v2085_v7  ;;  %v2084_v9 = vmul.f32 0.03125, %v2082_v8 }
 0xf40   : > { %v2086_v10 = vadd.f32 1e-05, %v2084_v9 }
 0xf42   : > { %7639 = vrsqrt.f32 %v2086_v10 }
 0xf4b   : > { %v7638_v11 = vpop.eup %7637 }
 0xf4c   : > { %v2089_v12 = vmul.f32 %v7638_v11, %v2073_v37 }
 0xf4e   : > { %v2097_v16 = vmul.f32 %v6604_v13, %v2089_v12 }
 0xf4f   : > { %v7640_v14 = vpop.eup %7639 }
 0xf50   : > { %v2090_v15 = vmul.f32 %v7640_v14, %v2074_v59  ;;  %v8167_v19 = vadd.f32 %v6605_v17, %v2097_v16 }
 0xf52   : > { %v2098_v18 = vmul.f32 %v6604_v13, %v2090_v15 }
 0xf54   : > { %v8169_v20 = vadd.f32 %v6605_v17, %v2098_v18 }
 0xf56   : > { %v2107_v22 = vpack.c.bf16 %v8169_v20, %v8167_v19 }
 0xf58   : > { %7019 = vmatmul.mubr.msk.bf16.vlgmr.msra.gmra.mxu0 %vm1247_vm1, %v2107_v22 }
 0xf59   : > { %7043 = vmatpush3.bf16.msra.mxu0 %v7573_v21  ;;  %7046 = vmatprep.mubr.msk.bf16.mxu0 %vm7803_vm2, %v7802_v32 }
 0xf5a   : > { %7044 = vmatprep.subr.bf16.mxu0 %v7802_v32 }
 0xf5d   : > { %7045 = vmatpush3.bf16.msra.mxu0 %v7574_v23 }
 0xf5e   : > { %7050 = vmatprep.subr.bf16.mxu0 %v7802_v32 }
 0xf60   : > { %7047 = vmatmul.mubr.msk.bf16.vlgmr.msra.gmra.mxu0 %vm1247_vm1, %v2312_v25 }
 0xf61   : > { %7052 = vmatprep.mubr.msk.bf16.mxu0 %vm7803_vm2, %v7802_v32 }
0x1018   : > { %v2163_v30 = vpop.f32.mrf.mxu0 }
0x1019   : > { %v2164_v31 = vadd.f32 %v6606_v29, %v2163_v30 }
0x101a   : > { %v7020_v58 = vpop.f32.mrf.mxu0 }
0x101b   : > { %v2170_v39 = vmax.f32 %v2164_v31, 0.0 }
0x101c   : > { %v2166_v33 = vpop.f32.mrf.mxu0 }
0x101d   : > { %v2167_v34 = vadd.f32 %v6606_v29, %v2166_v33 }
0x101e   : > { %v7021_v36 = vpop.f32.mrf.mxu0 }
0x101f   : > { %v2171_v40 = vmax.f32 %v2167_v34, 0.0 }
0x1020   : > { %v2368_v41 = vpop.f32.mrf.mxu0 }
0x1021   : > { %v2172_v42 = vpack.c.bf16 %v2171_v40, %v2170_v39  ;;  %v2369_v43 = vadd.f32 %v6621_v38, %v2368_v41 }
0x1022   : > { %v7048_v44 = vpop.f32.mrf.mxu0 }
0x1023   : > { %v8196_v45 = vpack.c.bf16 %v2369_v43, %v2369_v43  ;;  %7039 = vmatmul.mubr.bf16.vlgmr.msra.gmra.mxu1 %v2172_v42 }
0x1024   : > { %v2371_v46 = vpop.f32.mrf.mxu0  ;;  %7070 = vmatprep.mubr.msk.bf16.mxu1 %vm7803_vm2, %v7802_v32 }
0x1025   : > { %2542 = vrot.lane.b32.xlu0 %v8196_v45, %s8907_s10  ;;  %2382 = vrot.lane.b32.xlu1 %v8196_v45, %s8909_s7  ;;  %s8961_s10 = sld [smem:[#allocation15_spill]] }
0x1026   : > { %v7049_v47 = vpop.f32.mrf.mxu0 }
0x1029   : > { %2540 = vrot.lane.b32.xlu0 %v8196_v45, %s8911_s11 }
0x1097   : > { %v2543_v50 = vpop.permute.xlu0 %2542  ;;  %v2383_v51 = vpop.permute.xlu1 %2382 }
0x1098   : > { %v2548_v52 = vsel %vm1369_vm3, %v2543_v50, 0  ;;  %v2388_v53 = vsel %vm1369_vm3, %v2383_v51, 0 }
0x1099   : > { %7051 = vmatpush3.bf16.xpose.msra.mxu0 %v2388_v53  ;;  %7069 = vmatpush3.bf16.xpose.msra.mxu1 %v2548_v52 }
0x109a   : > { %7056 = vmatprep.subr.bf16.mxu0 %v7802_v32  ;;  %7080 = vmatprep.subr.bf16.mxu1 %v7802_v32 }
0x109b   : > { %v2541_v54 = vpop.permute.xlu0 %2540 }
0x10a0   : > { %7053 = vmatmul.mubr.msk.bf16.vlgmr.msra.gmra.mxu0 %vm1369_vm3, %v8196_v45  ;;  %7071 = vmatmul.mubr.msk.bf16.vlgmr.msra.gmra.mxu1 %vm1369_vm3, %v2541_v54 }
0x10a1   : > { %7058 = vmatprep.mubr.msk.bf16.mxu0 %vm7803_vm2, %v7802_v32  ;;  %7082 = vmatprep.mubr.msk.bf16.mxu1 %vm7803_vm2, %v7802_v32 }
0x10e3   : > { %v8217_v35 = vpop.f32.mrf.mxu1 }
0x10e5   : > { %v7040_v55 = vpop.f32.mrf.mxu1 }
0x10e7   : > { %v8219_v37 = vpop.f32.mrf.mxu1 }
0x10e9   : > { %v7041_v56 = vpop.f32.mrf.mxu1 }
0x1160   : > { %v2424_v57 = vpop.f32.mrf.mxu0  ;;  %v2584_v48 = vpop.f32.mrf.mxu1 }
0x1161   : > { %v2430_v59 = vmul.f32 0.35355338, %v2424_v57  ;;  %v2590_v8 = vmul.f32 0.35355338, %v2584_v48 }
0x1162   : > { %v7054_v60 = vpop.f32.mrf.mxu0  ;;  %v7072_v61 = vpop.f32.mrf.mxu1 }
0x1163   : > { %v2431_v49 = vsel %vm1369_vm3, %v2430_v59, -inf  ;;  %v2591_v10 = vsel %vm1369_vm3, %v2590_v8, -inf }
0x1164   : > { %2432 = vmax.xlane.f32.xlu0 %v2431_v49  ;;  %v2427_v62 = vpop.f32.mrf.mxu0  ;;  %v2587_v63 = vpop.f32.mrf.mxu1 }
0x1166   : > { %v7055_v0 = vpop.f32.mrf.mxu0  ;;  %v7073_v1 = vpop.f32.mrf.mxu1 }
0x117a   : > { %2443 = vrot.lane.b32.xlu0 %v8196_v45, %s8891_s15  ;;  %s8953_s15 = sld [smem:[#allocation18_spill]] }
0x117e   : > { %2702 = vrot.lane.b32.xlu0 %v8196_v45, %s8903_s16  ;;  %s8959_s16 = sld [smem:[#allocation10_spill]] }
0x1180   : > { %v1090_v22 = vld [vmem:[%s8953_s15] sm:$0xff]  ;;  %v1091_v42 = vld [vmem:[%s8953_s15 + $0x8] sm:$0xff] }
0x1181   : > { %v2492_v23 = vpack.c.bf16 %v1090_v22, %v1090_v22  ;;  %v2652_v43 = vpack.c.bf16 %v1091_v42, %v1091_v42 }
0x1182   : > { %2700 = vrot.lane.b32.xlu0 %v8196_v45, %s8905_s18  ;;  %s8960_s18 = sld [smem:[#allocation16_spill]] }
0x1183   : > { %v2497_v25 = vsel %vm1494_vm4, %v2492_v23, 0  ;;  %v2657_v44 = vsel %vm1494_vm4, %v2652_v43, 0 }
0x1184   : > { %7081 = vmatpush3.bf16.msra.mxu1 %v2657_v44 }
0x1185   : > { %7092 = vmatprep.subr.bf16.mxu1 %v7802_v32 }
0x11ed   : > { %v2433_v2 = vpop.xlane.xlu0 %2432 }
0x11ee   : > { %v2434_v3 = vsub.f32 %v2430_v59, %v2433_v2 }
0x11f0   : > { %v2435_v4 = vmul.f32 1.442695, %v2434_v3 }
0x11f1   : > { %v2444_v5 = vpop.permute.xlu0 %2443 }
0x11f2   : > { %7641 = vpow2.f32 %v2435_v4  ;;  %v2449_v6 = vsel %vm1494_vm4, %v2444_v5, 0 }
0x11f3   : > { %7057 = vmatpush3.bf16.msra.mxu0 %v2449_v6 }
0x11f4   : > { %7062 = vmatprep.subr.bf16.mxu0 %v7802_v32 }
0x11f5   : > { %v2703_v38 = vpop.permute.xlu0 %2702 }
0x11f6   : > { %v2708_v40 = vsel %vm1369_vm3, %v2703_v38, 0 }
0x11f9   : > { %v2701_v41 = vpop.permute.xlu0 %2700 }
0x11ff   : > { %v7642_v7 = vpop.eup %7641 }
0x1200   : > { %v2437_v9 = vsel %vm1369_vm3, %v7642_v7, 0.0 }
0x1201   : > { %2438 = vadd.xlane.f32.xlu1 %v2437_v9 }
0x1205   : > { %2592 = vmax.xlane.f32.xlu1 %v2591_v10 }
0x128a   : > { %v2439_v11 = vpop.xlane.xlu1 %2438 }
0x128b   : > { %7643 = vrcp.f32 %v2439_v11 }
0x128e   : > { %v2593_v12 = vpop.xlane.xlu1 %2592 }
0x128f   : > { %v2594_v13 = vsub.f32 %v2590_v8, %v2593_v12 }
0x1291   : > { %v2595_v14 = vmul.f32 1.442695, %v2594_v13 }
0x1293   : > { %7645 = vpow2.f32 %v2595_v14 }
0x1298   : > { %v7644_v15 = vpop.eup %7643 }
0x1299   : > { %v2441_v16 = vmul.f32 %v7644_v15, %v7642_v7 }
0x129b   : > { %v2442_v17 = vpack.c.bf16 %v2441_v16, %v2441_v16 }
0x129d   : > { %7059 = vmatmul.mubr.msk.bf16.vlgmr.msra.gmra.mxu0 %vm1369_vm3, %v2442_v17 }
0x129e   : > { %7064 = vmatprep.mubr.msk.bf16.mxu0 %vm7803_vm2, %v7802_v32  ;;  %7063 = vmatpush3.bf16.msra.mxu0 %v2497_v25 }
0x129f   : > { %7074 = vmatprep.subr.bf16.mxu0 %v7802_v32 }
0x12a0   : > { %v7646_v18 = vpop.eup %7645 }
0x12a1   : > { %v2597_v21 = vsel %vm1369_vm3, %v7646_v18, 0.0 }
0x12a2   : > { %2598 = vadd.xlane.f32.xlu1 %v2597_v21  ;;  %v1092_v21 = vld [vmem:[%s8953_s15 + $0x10] sm:$0xff] }
0x12a3   : > { %v2812_v22 = vpack.c.bf16 %v1092_v21, %v1092_v21 }
0x12a5   : > { %v2817_v23 = vsel %vm1494_vm4, %v2812_v22, 0 }
0x12b3   : > { %2603 = vrot.lane.b32.xlu1 %v8196_v45, %s8893_s22  ;;  %s8954_s22 = sld [smem:[#allocation17_spill]] }
0x12b9   : > { %v6625_v5 = vld [vmem:[%s8954_s22] ss:$0 sm:$0xff] }
0x132b   : > { %v2599_v26 = vpop.xlane.xlu1 %2598 }
0x132c   : > { %7647 = vrcp.f32 %v2599_v26 }
0x132f   : > { %v2604_v27 = vpop.permute.xlu1 %2603 }
0x1330   : > { %v2609_v31 = vsel %vm1494_vm4, %v2604_v27, 0 }
0x1339   : > { %v7648_v30 = vpop.eup %7647 }
0x133a   : > { %v2601_v34 = vmul.f32 %v7648_v30, %v7646_v18 }
0x133c   : > { %v2602_v39 = vpack.c.bf16 %v2601_v34, %v2601_v34 }
0x135d   : > { %v2485_v28 = vpop.f32.mrf.mxu0 }
0x135e   : > { %v2491_v29 = vpack.c.bf16 %v2485_v28, %v2485_v28 }
0x135f   : > { %v7060_v58 = vpop.f32.mrf.mxu0 }
0x1360   : > { %7065 = vmatmul.mubr.msk.bf16.vlgmr.msra.gmra.mxu0 %vm1369_vm3, %v2491_v29 }
0x1361   : > { %7075 = vmatpush3.bf16.msra.mxu0 %v2609_v31  ;;  %v2488_v33 = vpop.f32.mrf.mxu0  ;;  %7076 = vmatprep.mubr.msk.bf16.mxu0 %vm7803_vm2, %v7802_v32 }
0x1362   : > { %7086 = vmatprep.subr.bf16.mxu0 %v7802_v32 }
0x1363   : > { %v7061_v36 = vpop.f32.mrf.mxu0 }
0x1368   : > { %7077 = vmatmul.mubr.msk.bf16.vlgmr.msra.gmra.mxu0 %vm1369_vm3, %v2602_v39 }
0x1369   : > { %7087 = vmatpush3.bf16.xpose.msra.mxu0 %v2708_v40  ;;  %7088 = vmatprep.mubr.msk.bf16.mxu0 %vm7803_vm2, %v7802_v32 }
0x136a   : > { %7098 = vmatprep.subr.bf16.mxu0 %v7802_v32 }
0x1370   : > { %7089 = vmatmul.mubr.msk.bf16.vlgmr.msra.gmra.mxu0 %vm1369_vm3, %v2701_v41 }
0x1371   : > { %7100 = vmatprep.mubr.msk.bf16.mxu0 %vm7803_vm2, %v7802_v32  ;;  %7099 = vmatpush3.bf16.msra.mxu0 %v2817_v23 }
0x1372   : > { %7110 = vmatprep.subr.bf16.mxu0 %v7802_v32 }
0x1420   : > { %v2533_v46 = vpop.f32.mrf.mxu0 }
0x1421   : > { %v2539_v6 = vadd.f32 %v6625_v5, %v2533_v46 }
0x1422   : > { %v7066_v47 = vpop.f32.mrf.mxu0 }
0x1424   : > { %v2536_v50 = vpop.f32.mrf.mxu0 }
0x1426   : > { %v7067_v51 = vpop.f32.mrf.mxu0 }
0x1428   : > { %v2645_v52 = vpop.f32.mrf.mxu0 }
0x1429   : > { %v2651_v53 = vpack.c.bf16 %v2645_v52, %v2645_v52 }
0x142a   : > { %v7078_v54 = vpop.f32.mrf.mxu0 }
0x142b   : > { %7083 = vmatmul.mubr.msk.bf16.vlgmr.msra.gmra.mxu1 %vm1369_vm3, %v2651_v53 }
0x142c   : > { %v2648_v55 = vpop.f32.mrf.mxu0  ;;  %7094 = vmatprep.mubr.msk.bf16.mxu1 %vm7803_vm2, %v7802_v32 }
0x142e   : > { %v7079_v56 = vpop.f32.mrf.mxu0 }
0x1430   : > { %v2744_v57 = vpop.f32.mrf.mxu0 }
0x1431   : > { %v2750_v48 = vmul.f32 0.35355338, %v2744_v57 }
0x1432   : > { %v7090_v59 = vpop.f32.mrf.mxu0 }
0x1433   : > { %v2751_v60 = vsel %vm1369_vm3, %v2750_v48, -inf }
0x1434   : > { %2752 = vmax.xlane.f32.xlu0 %v2751_v60  ;;  %v2747_v61 = vpop.f32.mrf.mxu0 }
0x1436   : > { %v7091_v49 = vpop.f32.mrf.mxu0 }
0x144a   : > { %2763 = vrot.lane.b32.xlu0 %v8196_v45, %s8895_s23  ;;  %s8955_s23 = sld [smem:[#allocation7_spill]] }
0x144e   : > { %2860 = vrot.lane.b32.xlu0 %v8196_v45, %s8901_s26  ;;  %s8958_s26 = sld [smem:[#allocation11_spill]] }
0x1450   : > { %v6610_v28 = vld [vmem:[%s8955_s23] ss:$0 sm:$0xff] }
0x1451   : > { %v2262_v58 = vadd.f32 %v6610_v28, %v8217_v35  ;;  %v2265_v36 = vadd.f32 %v6610_v28, %v8219_v37 }
0x1453   : > { %v2268_v39 = vadd.f32 %v2262_v58, %v8167_v19  ;;  %v2269_v43 = vadd.f32 %v2265_v36, %v8169_v20 }
0x1455   : > { %v2270_v42 = vsel %vm1247_vm1, %v2268_v39, 0.0  ;;  %v2273_v44 = vsel %vm1247_vm1, %v2269_v43, 0.0 }
0x14bd   : > { %v2753_v62 = vpop.xlane.xlu0 %2752 }
0x14be   : > { %v2754_v63 = vsub.f32 %v2750_v48, %v2753_v62 }
0x14c0   : > { %v2755_v0 = vmul.f32 1.442695, %v2754_v63 }
0x14c1   : > { %v2764_v1 = vpop.permute.xlu0 %2763 }
0x14c2   : > { %7649 = vpow2.f32 %v2755_v0  ;;  %v2769_v2 = vsel %vm1494_vm4, %v2764_v1, 0 }
0x14c3   : > { %7093 = vmatpush3.bf16.msra.mxu1 %v2769_v2 }
0x14c4   : > { %7104 = vmatprep.subr.bf16.mxu1 %v7802_v32 }
0x14c5   : > { %v2861_v18 = vpop.permute.xlu0 %2860 }
0x14cf   : > { %v7650_v3 = vpop.eup %7649 }
0x14d0   : > { %v2757_v4 = vsel %vm1369_vm3, %v7650_v3, 0.0 }
0x14d1   : > { %2758 = vadd.xlane.f32.xlu1 %v2757_v4 }
0x14e2   : > { %2862 = vrot.lane.b32.xlu1 %v8196_v45, %s8897_s0  ;;  %s8956_s0 = sld [smem:[#allocation6_spill]] }
0x14e8   : > { %v7583_v2 = vld [vmem:[%s8956_s0 + $0x8] sm:$0xff]  }
0x14eb   : > { %v2693_v7 = vpop.f32.mrf.mxu1 }
0x14ec   : > { %v2699_v8 = vadd.f32 %v2693_v7, %v2539_v6 }
0x14ed   : > { %v7084_v9 = vpop.f32.mrf.mxu1 }
0x14ef   : > { %v2696_v10 = vpop.f32.mrf.mxu1 }
0x14f1   : > { %v7085_v11 = vpop.f32.mrf.mxu1 }
0x155a   : > { %v2759_v12 = vpop.xlane.xlu1 %2758 }
0x155b   : > { %7651 = vrcp.f32 %v2759_v12 }
0x155e   : > { %v2863_v15 = vpop.permute.xlu1 %2862 }
0x155f   : > { %v2868_v17 = vsel %vm1369_vm3, %v2863_v15, 0 }
0x1568   : > { %v7652_v13 = vpop.eup %7651 }
0x1569   : > { %v2761_v14 = vmul.f32 %v7652_v13, %v7650_v3  ;;  %v7584_v3 = vld [vmem:[%s8956_s0] sm:$0xff]  }
0x156b   : > { %v2762_v16 = vpack.c.bf16 %v2761_v14, %v2761_v14 }
0x156d   : > { %7095 = vmatmul.mubr.msk.bf16.vlgmr.msra.gmra.mxu1 %vm1369_vm3, %v2762_v16 }
0x156e   : > { %7105 = vmatpush3.bf16.xpose.msra.mxu1 %v2868_v17  ;;  %7106 = vmatprep.mubr.msk.bf16.mxu1 %vm7803_vm2, %v7802_v32 }
0x156f   : > { %7116 = vmatprep.subr.bf16.mxu1 %v7802_v32 }
0x1575   : > { %7107 = vmatmul.mubr.msk.bf16.vlgmr.msra.gmra.mxu1 %vm1369_vm3, %v2861_v18 }
0x1576   : > { %7118 = vmatprep.mubr.msk.bf16.mxu1 %vm7803_vm2, %v7802_v32 }
0x162d   : > { %v2805_v25 = vpop.f32.mrf.mxu1 }
0x162e   : > { %v2811_v26 = vpack.c.bf16 %v2805_v25, %v2805_v25 }
0x162f   : > { %v7096_v27 = vpop.f32.mrf.mxu1 }
0x1630   : > { %7101 = vmatmul.mubr.msk.bf16.vlgmr.msra.gmra.mxu0 %vm1369_vm3, %v2811_v26 }
0x1631   : > { %v2808_v29 = vpop.f32.mrf.mxu1  ;;  %7112 = vmatprep.mubr.msk.bf16.mxu0 %vm7803_vm2, %v7802_v32 }
0x1633   : > { %v7097_v30 = vpop.f32.mrf.mxu1 }
0x1635   : > { %v2904_v31 = vpop.f32.mrf.mxu1 }
0x1636   : > { %v2910_v33 = vmul.f32 0.35355338, %v2904_v31 }
0x1637   : > { %v7108_v34 = vpop.f32.mrf.mxu1 }
0x1638   : > { %v2911_v38 = vsel %vm1369_vm3, %v2910_v33, -inf }
0x1639   : > { %2912 = vmax.xlane.f32.xlu1 %v2911_v38  ;;  %v2907_v40 = vpop.f32.mrf.mxu1 }
0x163b   : > { %v7109_v41 = vpop.f32.mrf.mxu1 }
0x163c   : > { %v6619_v41 = vld [vmem:[%s8958_s26] ss:$0 sm:$0xff] }
0x163d   : > { %2271 = vadd.xlane.f32.xlu1 %v2270_v42 }
0x1641   : > { %2274 = vadd.xlane.f32.xlu1 %v2273_v44 }
0x16c2   : > { %v2913_v35 = vpop.xlane.xlu1 %2912 }
0x16c3   : > { %v2914_v46 = vsub.f32 %v2910_v33, %v2913_v35  ;;  %v6620_v35 = vld [vmem:[%s8959_s16] ss:$0 sm:$0xff] }
0x16c5   : > { %v2915_v47 = vmul.f32 1.442695, %v2914_v46 }
0x16c6   : > { %v2272_v4 = vpop.xlane.xlu1 %2271 }
0x16c7   : > { %7653 = vpow2.f32 %v2915_v47  ;;  %v2276_v5 = vmul.f32 0.03125, %v2272_v4 }
0x16ca   : > { %v2275_v6 = vpop.xlane.xlu1 %2274 }
0x16cb   : > { %v2277_v9 = vmul.f32 0.03125, %v2275_v6 }
0x16cd   : > { %v2279_v14 = vsub.f32 %v2269_v43, %v2277_v9 }
0x16cf   : > { %v2281_v21 = vmul.f32 %v2279_v14, %v2279_v14 }
0x16d1   : > { %v2285_v22 = vsel %vm1247_vm1, %v2281_v21, 0.0 }
0x16d4   : > { %v7654_v37 = vpop.eup %7653 }
0x16d5   : > { %v2917_v50 = vsel %vm1369_vm3, %v7654_v37, 0.0 }
0x16d6   : > { %2918 = vadd.xlane.f32.xlu0 %v2917_v50 }
0x16ec   : > { %2923 = vrot.lane.b32.xlu0 %v8196_v45, %s8899_s2  ;;  %v1093_v45 = vld [vmem:[%s8953_s15 + $0x18] sm:$0xff]  ;;  %s8957_s2 = sld [smem:[#allocation4_spill]] }
0x16ed   : > { %v2972_v60 = vpack.c.bf16 %v1093_v45, %v1093_v45 }
0x16ef   : > { %v2977_v61 = vsel %vm1494_vm4, %v2972_v60, 0 }
0x16f0   : > { %v2853_v19 = vpop.f32.mrf.mxu0  ;;  %7117 = vmatpush3.bf16.msra.mxu1 %v2977_v61 }
0x16f1   : > { %v2859_v51 = vadd.f32 %v2853_v19, %v2699_v8  ;;  %7130 = vmatprep.subr.bf16.mxu1 %v7802_v32  ;;  %v2278_v8 = vsub.f32 %v2268_v39, %v2276_v5 }
0x16f2   : > { %v7102_v52 = vpop.f32.mrf.mxu0  ;;  %v8318_v23 = vld [vmem:[%s8957_s2] ss:$0 sm:$0xff] }
0x16f3   : > { %v2280_v16 = vmul.f32 %v2278_v8, %v2278_v8 }
0x16f4   : > { %v2856_v20 = vpop.f32.mrf.mxu0 }
0x16f5   : > { %v2282_v18 = vsel %vm1247_vm1, %v2280_v16, 0.0 }
0x16f6   : > { %v7103_v53 = vpop.f32.mrf.mxu0 }
0x16f7   : > { %v6638_v53 = vld [vmem:[%s8960_s18] ss:$0 sm:$0xff] }
0x175f   : > { %v2919_v54 = vpop.xlane.xlu0 %2918 }
0x1760   : > { %7655 = vrcp.f32 %v2919_v54 }
0x1763   : > { %v2924_v55 = vpop.permute.xlu0 %2923 }
0x1764   : > { %v2929_v56 = vsel %vm1494_vm4, %v2924_v55, 0  ;;  %v6639_v55 = vld [vmem:[%s8961_s10] ss:$0 sm:$0xff] }
0x1765   : > { %7111 = vmatpush3.bf16.msra.mxu0 %v2929_v56 }
0x1766   : > { %7122 = vmatprep.subr.bf16.mxu0 %v7802_v32 }
0x176d   : > { %v7656_v57 = vpop.eup %7655 }
0x176e   : > { %v2921_v48 = vmul.f32 %v7656_v57, %v7654_v37 }
0x1770   : > { %v2922_v59 = vpack.c.bf16 %v2921_v48, %v2921_v48 }
0x1772   : > { %7113 = vmatmul.mubr.msk.bf16.vlgmr.msra.gmra.mxu0 %vm1369_vm3, %v2922_v59 }
0x1773   : > { %7126 = vmatprep.mubr.msk.bf16.mxu0 %vm7803_vm2, %v7802_v32  ;;  %7123 = vmatpush3.bf16.msra.mxu0 %v7583_v2 }
0x1774   : > { %7124 = vmatprep.subr.bf16.mxu0 %v7802_v32 }
0x1777   : > { %7125 = vmatpush3.bf16.msra.mxu0 %v7584_v3 }
0x1778   : > { %7138 = vmatprep.subr.bf16.mxu0 %v7802_v32 }
0x1832   : > { %v2965_v49 = vpop.f32.mrf.mxu0 }
0x1833   : > { %v2971_v62 = vpack.c.bf16 %v2965_v49, %v2965_v49 }
0x1834   : > { %v7114_v63 = vpop.f32.mrf.mxu0 }
0x1835   : > { %7119 = vmatmul.mubr.msk.bf16.vlgmr.msra.gmra.mxu1 %vm1369_vm3, %v2971_v62 }
0x1836   : > { %v2968_v0 = vpop.f32.mrf.mxu0  ;;  %7134 = vmatprep.mubr.msk.bf16.mxu1 %vm7803_vm2, %v7802_v32 }
0x1838   : > { %v7115_v1 = vpop.f32.mrf.mxu0 }
0x18f5   : > { %v3013_v7 = vpop.f32.mrf.mxu1 }
0x18f6   : > { %v3019_v10 = vadd.f32 %v3013_v7, %v2859_v51 }
0x18f7   : > { %v7120_v11 = vpop.f32.mrf.mxu1 }
0x18f8   : > { %v3020_v12 = vadd.f32 %v3019_v10, %v8179_v24 }
0x18f9   : > { %v3016_v13 = vpop.f32.mrf.mxu1 }
0x18fa   : > { %v3021_v15 = vsel %vm1247_vm1, %v3020_v12, 0.0 }
0x18fb   : > { %3022 = vadd.xlane.f32.xlu1 %v3021_v15  ;;  %v7121_v17 = vpop.f32.mrf.mxu1 }
0x18ff   : > { %2283 = vadd.xlane.f32.xlu1 %v2282_v18 }
0x1903   : > { %2286 = vadd.xlane.f32.xlu1 %v2285_v22 }
0x1914   : > { %3113 = vrot.lane.b32.xlu1 %v7583_v2, %s8909_s7 }
0x1918   : > { %3111 = vrot.lane.b32.xlu1 %v7584_v3, %s8909_s7 }
0x191c   : > { %3117 = vrot.lane.b32.xlu1 %v8318_v23, %s8909_s7 }
0x1984   : > { %v3023_v24 = vpop.xlane.xlu1 %3022 }
0x1985   : > { %v3024_v25 = vmul.f32 0.03125, %v3023_v24 }
0x1987   : > { %v3025_v26 = vsub.f32 %v3020_v12, %v3024_v25 }
0x1988   : > { %v2284_v27 = vpop.xlane.xlu1 %2283 }
0x1989   : > { %v2288_v28 = vmul.f32 0.03125, %v2284_v27  ;;  %v3026_v29 = vmul.f32 %v3025_v26, %v3025_v26 }
0x198b   : > { %v2290_v30 = vadd.f32 1e-05, %v2288_v28  ;;  %v3027_v58 = vsel %vm1247_vm1, %v3026_v29, 0.0 }
0x198c   : > { %3028 = vadd.xlane.f32.xlu0 %v3027_v58  ;;  %v2287_v31 = vpop.xlane.xlu1 %2286 }
0x198d   : > { %7657 = vrsqrt.f32 %v2290_v30  ;;  %v2289_v33 = vmul.f32 0.03125, %v2287_v31 }
0x198f   : > { %v2291_v34 = vadd.f32 1e-05, %v2289_v33 }
0x1990   : > { %v3114_v36 = vpop.permute.xlu1 %3113 }
0x1991   : > { %7659 = vrsqrt.f32 %v2291_v34  ;;  %7131 = vmatpush3.bf16.msra.mxu1 %v3114_v36 }
0x1992   : > { %7132 = vmatprep.subr.bf16.mxu1 %v7802_v32 }
0x1994   : > { %v3112_v38 = vpop.permute.xlu1 %3111 }
0x1995   : > { %7133 = vmatpush3.bf16.msra.mxu1 %v3112_v38 }
0x1996   : > { %7144 = vmatprep.subr.bf16.mxu1 %v7802_v32 }
0x1998   : > { %v3118_v45 = vpop.permute.xlu1 %3117 }
0x199a   : > { %v7658_v39 = vpop.eup %7657 }
0x199b   : > { %v2294_v40 = vmul.f32 %v7658_v39, %v2278_v8 }
0x199d   : > { %v2302_v44 = vmul.f32 %v6619_v41, %v2294_v40 }
0x199e   : > { %v7660_v42 = vpop.eup %7659 }
0x199f   : > { %v2295_v43 = vmul.f32 %v7660_v42, %v2279_v14  ;;  %v8327_v47 = vadd.f32 %v6620_v35, %v2302_v44 }
0x19a1   : > { %v2303_v46 = vmul.f32 %v6619_v41, %v2295_v43 }
0x19a3   : > { %v8329_v37 = vadd.f32 %v6620_v35, %v2303_v46 }
0x19a5   : > { %v8333_v50 = vpack.c.bf16 %v8329_v37, %v8327_v47 }
0x19a7   : > { %7135 = vmatmul.mubr.msk.bf16.vlgmr.msra.gmra.mxu1 %vm1247_vm1, %v8333_v50 }
0x19a8   : > { %7146 = vmatprep.mubr.msk.bf16.mxu1 %vm7803_vm2, %v7802_v32 }
0x1a15   : > { %v3029_v19 = vpop.xlane.xlu0 %3028 }
0x1a16   : > { %v3030_v51 = vmul.f32 0.03125, %v3029_v19 }
0x1a18   : > { %v3031_v52 = vadd.f32 1e-05, %v3030_v51 }
0x1a1a   : > { %7661 = vrsqrt.f32 %v3031_v52 }
0x1a27   : > { %v7662_v20 = vpop.eup %7661 }
0x1a28   : > { %v3033_v54 = vmul.f32 %v7662_v20, %v3025_v26 }
0x1a2a   : > { %v3040_v56 = vmul.f32 %v6638_v53, %v3033_v54 }
0x1a2c   : > { %v3047_v57 = vadd.f32 %v6639_v55, %v3040_v56 }
0x1a2e   : > { %v3048_v48 = vpack.c.bf16 %v3047_v57, %v3047_v57 }
0x1a30   : > { %7127 = vmatmul.mubr.msk.bf16.vlgmr.msra.gmra.mxu0 %vm1247_vm1, %v3048_v48 }
0x1a31   : > { %7140 = vmatprep.mubr.msk.bf16.mxu0 %vm7803_vm2, %v7802_v32 }
0x1a67   : > { %v3157_v59 = vpop.f32.mrf.mxu1 }
0x1a68   : > { %v3158_v49 = vadd.f32 %v3157_v59, %v3118_v45 }
0x1a69   : > { %v7136_v60 = vpop.f32.mrf.mxu1 }
0x1a6b   : > { %v3160_v61 = vpop.f32.mrf.mxu1 }
0x1a6c   : > { %v3161_v62 = vadd.f32 %v3160_v61, %v3118_v45 }
0x1a6d   : > { %v7137_v63 = vpop.f32.mrf.mxu1 }
0x1a6e   : > { %v8344_v0 = vpack.c.bf16 %v3161_v62, %v3158_v49 }
0x1a70   : > { %3232 = vrot.lane.b32.xlu0 %v8344_v0, %s8909_s7  ;;  %v3176_v1 = vsel %vm1369_vm3, %v8344_v0, 0  ;;  %s8962_s7 = sld [smem:[#allocation5_spill]] }
0x1a71   : > { %7139 = vmatpush3.bf16.xpose.msra.mxu0 %v3176_v1 }
0x1a72   : > { %7150 = vmatprep.subr.bf16.mxu0 %v7802_v32 }
0x1a76   : > { %v990_v29 = vld [vmem:[%s8962_s7] sm:$0xff]  ;;  %v991_v57 = vld [vmem:[%s8962_s7 + $0x8] sm:$0xff] }
0x1a77   : > { %v3279_v30 = vpack.c.bf16 %v990_v29, %v990_v29  ;;  %v3438_v48 = vpack.c.bf16 %v991_v57, %v991_v57 }
0x1a79   : > { %v3284_v58 = vsel %vm1494_vm4, %v3279_v30, 0  ;;  %v3443_v59 = vsel %vm1494_vm4, %v3438_v48, 0 }
0x1ae2   : > { %v3233_v2 = vpop.permute.xlu0 %3232 }
0x1ae3   : > { %7145 = vmatpush3.bf16.msra.mxu1 %v3233_v2 }
0x1ae4   : > { %7156 = vmatprep.subr.bf16.mxu1 %v7802_v32 }
0x1af0   : > { %v3104_v3 = vpop.f32.mrf.mxu0 }
0x1af1   : > { %v3105_v4 = vadd.f32 %v8318_v23, %v3104_v3 }
0x1af2   : > { %v7128_v5 = vpop.f32.mrf.mxu0 }
0x1af3   : > { %v8353_v6 = vpack.c.bf16 %v3105_v4, %v3105_v4 }
0x1af4   : > { %v3107_v7 = vpop.f32.mrf.mxu0 }
0x1af5   : > { %7141 = vmatmul.mubr.msk.bf16.vlgmr.msra.gmra.mxu0 %vm1369_vm3, %v8353_v6 }
0x1af6   : > { %v7129_v8 = vpop.f32.mrf.mxu0  ;;  %7152 = vmatprep.mubr.msk.bf16.mxu0 %vm7803_vm2, %v7802_v32  ;;  %7151 = vmatpush3.bf16.msra.mxu0 %v3284_v58 }
0x1af7   : > { %7162 = vmatprep.subr.bf16.mxu0 %v7802_v32 }
0x1bb5   : > { %v3212_v9 = vpop.f32.mrf.mxu0 }
0x1bb6   : > { %v3218_v10 = vmul.f32 0.35355338, %v3212_v9 }
0x1bb7   : > { %v7142_v11 = vpop.f32.mrf.mxu0 }
0x1bb8   : > { %v3219_v12 = vsel %vm1202_vm0, %v3218_v10, -inf }
0x1bb9   : > { %3220 = vmax.xlane.f32.xlu1 %v3219_v12  ;;  %v3215_v13 = vpop.f32.mrf.mxu0 }
0x1bbb   : > { %v7143_v14 = vpop.f32.mrf.mxu0 }
0x1c42   : > { %v3221_v15 = vpop.xlane.xlu1 %3220 }
0x1c43   : > { %v3222_v16 = vsub.f32 %v3218_v10, %v3221_v15 }
0x1c45   : > { %v3223_v17 = vmul.f32 1.442695, %v3222_v16 }
0x1c47   : > { %7663 = vpow2.f32 %v3223_v17 }
0x1c54   : > { %v7664_v18 = vpop.eup %7663 }
0x1c55   : > { %v3225_v21 = vsel %vm1202_vm0, %v7664_v18, 0.0 }
0x1c56   : > { %3226 = vadd.xlane.f32.xlu0 %v3225_v21 }
0x1c6c   : > { %3330 = vrot.lane.b32.xlu0 %v8344_v0, %s8911_s11 }
0x1c70   : > { %3328 = vrot.lane.b32.xlu0 %v8353_v6, %s8911_s11  ;;  %s8963_s11 = smov 88  }
0x1cdf   : > { %v3227_v22 = vpop.xlane.xlu0 %3226 }
0x1ce0   : > { %7665 = vrcp.f32 %v3227_v22  ;;  %v6645_v22 = vld [vmem:[%s8966_s13] ss:$0 sm:$0xff]  ;;  %s8972_s13 = sld [smem:[#allocation20_spill]] }
0x1ce3   : > { %v3331_v25 = vpop.permute.xlu0 %3330 }
0x1ce4   : > { %v3336_v27 = vsel %vm1369_vm3, %v3331_v25, 0 }
0x1ce7   : > { %v3329_v28 = vpop.permute.xlu0 %3328 }
0x1ced   : > { %v7666_v23 = vpop.eup %7665 }
0x1cee   : > { %v3229_v24 = vmul.f32 %v7666_v23, %v7664_v18 }
0x1cf0   : > { %v3230_v26 = vpack.c.bf16 %v3229_v24, %v3229_v24 }
0x1cf2   : > { %7147 = vmatmul.mubr.msk.bf16.vlgmr.msra.gmra.mxu1 %vm1202_vm0, %v3230_v26 }
0x1cf3   : > { %7157 = vmatpush3.bf16.xpose.msra.mxu1 %v3336_v27  ;;  %7158 = vmatprep.mubr.msk.bf16.mxu1 %vm7803_vm2, %v7802_v32 }
0x1cf4   : > { %7168 = vmatprep.subr.bf16.mxu1 %v7802_v32 }
0x1cfa   : > { %7159 = vmatmul.mubr.msk.bf16.vlgmr.msra.gmra.mxu1 %vm1369_vm3, %v3329_v28 }
0x1cfb   : > { %7170 = vmatprep.mubr.msk.bf16.mxu1 %vm7803_vm2, %v7802_v32  ;;  %7169 = vmatpush3.bf16.msra.mxu1 %v3443_v59 }
0x1cfc   : > { %7180 = vmatprep.subr.bf16.mxu1 %v7802_v32 }
0x1db2   : > { %v3272_v31 = vpop.f32.mrf.mxu1 }
0x1db3   : > { %v3278_v33 = vpack.c.bf16 %v3272_v31, %v3272_v31 }
0x1db4   : > { %v7148_v34 = vpop.f32.mrf.mxu1 }
0x1db5   : > { %7153 = vmatmul.mubr.msk.bf16.vlgmr.msra.gmra.mxu0 %vm1369_vm3, %v3278_v33 }
0x1db6   : > { %v3275_v36 = vpop.f32.mrf.mxu1  ;;  %7164 = vmatprep.mubr.msk.bf16.mxu0 %vm7803_vm2, %v7802_v32 }
0x1db7   : > { %v992_v36 = vld [vmem:[%s8962_s7 + $0x10] sm:$0xff] }
0x1db8   : > { %v7149_v38 = vpop.f32.mrf.mxu1 }
0x1db9   : > { %v3596_v38 = vpack.c.bf16 %v992_v36, %v992_v36 }
0x1dba   : > { %v3372_v39 = vpop.f32.mrf.mxu1 }
0x1dbb   : > { %v3378_v40 = vmul.f32 0.35355338, %v3372_v39  ;;  %v3601_v39 = vsel %vm1494_vm4, %v3596_v38, 0 }
0x1dbc   : > { %v7160_v41 = vpop.f32.mrf.mxu1 }
0x1dbd   : > { %v3379_v42 = vsel %vm1202_vm0, %v3378_v40, -inf }
0x1dbe   : > { %3380 = vmax.xlane.f32.xlu1 %v3379_v42  ;;  %v3375_v43 = vpop.f32.mrf.mxu1 }
0x1dc0   : > { %v7161_v44 = vpop.f32.mrf.mxu1 }
0x1dcf   : > { %3391 = vrot.lane.b32.xlu1 %v8344_v0, %s8963_s11 }
0x1dd3   : > { %3488 = vrot.lane.b32.xlu1 %v8344_v0, %s8964_s4 }
0x1dd7   : > { %3486 = vrot.lane.b32.xlu1 %v8353_v6, %s8964_s4 }
0x1e47   : > { %v3381_v35 = vpop.xlane.xlu1 %3380 }
0x1e48   : > { %v3382_v46 = vsub.f32 %v3378_v40, %v3381_v35 }
0x1e4a   : > { %v3383_v19 = vmul.f32 1.442695, %v3382_v46 }
0x1e4b   : > { %v3392_v51 = vpop.permute.xlu1 %3391 }
0x1e4c   : > { %7667 = vpow2.f32 %v3383_v19  ;;  %7163 = vmatpush3.bf16.msra.mxu0 %v3392_v51 }
0x1e4d   : > { %7174 = vmatprep.subr.bf16.mxu0 %v7802_v32 }
0x1e4f   : > { %v3489_v49 = vpop.permute.xlu1 %3488 }
0x1e50   : > { %v3494_v63 = vsel %vm1369_vm3, %v3489_v49, 0 }
0x1e53   : > { %v3487_v1 = vpop.permute.xlu1 %3486 }
0x1e59   : > { %v7668_v52 = vpop.eup %7667 }
0x1e5a   : > { %v3385_v20 = vsel %vm1202_vm0, %v7668_v52, 0.0 }
0x1e5b   : > { %3386 = vadd.xlane.f32.xlu0 %v3385_v20 }
0x1e71   : > { %3549 = vrot.lane.b32.xlu0 %v8344_v0, %s8965_s5 }
0x1e75   : > { %v3320_v53 = vpop.f32.mrf.mxu0 }
0x1e76   : > { %v3326_v23 = vadd.f32 %v6645_v22, %v3320_v53  ;;  %v6661_v22 = vld [vmem:[%s8944_s8 + $0x1] ss:$0 sm:$0xff]  ;;  %s8974_s8 = smov 120  }
0x1e77   : > { %v7154_v54 = vpop.f32.mrf.mxu0 }
0x1e79   : > { %v3323_v55 = vpop.f32.mrf.mxu0 }
0x1e7b   : > { %v7155_v56 = vpop.f32.mrf.mxu0 }
0x1ee4   : > { %v3387_v45 = vpop.xlane.xlu0 %3386 }
0x1ee5   : > { %7669 = vrcp.f32 %v3387_v45 }
0x1ee8   : > { %v3550_v5 = vpop.permute.xlu0 %3549 }
0x1ef2   : > { %v7670_v60 = vpop.eup %7669 }
0x1ef3   : > { %v3389_v61 = vmul.f32 %v7670_v60, %v7668_v52 }
0x1ef5   : > { %v3390_v62 = vpack.c.bf16 %v3389_v61, %v3389_v61 }
0x1ef7   : > { %7165 = vmatmul.mubr.msk.bf16.vlgmr.msra.gmra.mxu0 %vm1202_vm0, %v3390_v62 }
0x1ef8   : > { %7175 = vmatpush3.bf16.xpose.msra.mxu0 %v3494_v63  ;;  %7176 = vmatprep.mubr.msk.bf16.mxu0 %vm7803_vm2, %v7802_v32 }
0x1ef9   : > { %7186 = vmatprep.subr.bf16.mxu0 %v7802_v32 }
0x1eff   : > { %7177 = vmatmul.mubr.msk.bf16.vlgmr.msra.gmra.mxu0 %vm1369_vm3, %v3487_v1 }
0x1f00   : > { %7188 = vmatprep.mubr.msk.bf16.mxu0 %vm7803_vm2, %v7802_v32  ;;  %7187 = vmatpush3.bf16.msra.mxu0 %v3601_v39 }
0x1f01   : > { %7198 = vmatprep.subr.bf16.mxu0 %v7802_v32 }
0x1fb7   : > { %v3431_v2 = vpop.f32.mrf.mxu0 }
0x1fb8   : > { %v3437_v3 = vpack.c.bf16 %v3431_v2, %v3431_v2  ;;  %v993_v2 = vld [vmem:[%s8962_s7 + $0x18] sm:$0xff] }
0x1fb9   : > { %v7166_v4 = vpop.f32.mrf.mxu0 }
0x1fba   : > { %7171 = vmatmul.mubr.msk.bf16.vlgmr.msra.gmra.mxu1 %vm1369_vm3, %v3437_v3  ;;  %v3754_v3 = vpack.c.bf16 %v993_v2, %v993_v2 }
0x1fbb   : > { %7181 = vmatpush3.bf16.msra.mxu1 %v3550_v5  ;;  %v3434_v7 = vpop.f32.mrf.mxu0  ;;  %7182 = vmatprep.mubr.msk.bf16.mxu1 %vm7803_vm2, %v7802_v32 }
0x1fbc   : > { %7192 = vmatprep.subr.bf16.mxu1 %v7802_v32  ;;  %v3759_v4 = vsel %vm1494_vm4, %v3754_v3, 0  ;;  %v7585_v7 = vld [vmem:[%s8945_s27 + $0x18] sm:$0xff]  }
0x1fbd   : > { %v7167_v8 = vpop.f32.mrf.mxu0 }
0x1fbf   : > { %v3530_v9 = vpop.f32.mrf.mxu0 }
0x1fc0   : > { %v3536_v10 = vmul.f32 0.35355338, %v3530_v9 }
0x1fc1   : > { %v7178_v11 = vpop.f32.mrf.mxu0 }
0x1fc2   : > { %v3537_v12 = vsel %vm1202_vm0, %v3536_v10, -inf  ;;  %v7586_v11 = vld [vmem:[%s8945_s27 + $0x10] sm:$0xff]   ;;  %s8969_s27 = sld [smem:[#allocation14_spill]] }
0x1fc3   : > { %3538 = vmax.xlane.f32.xlu1 %v3537_v12  ;;  %v3533_v13 = vpop.f32.mrf.mxu0 }
0x1fc5   : > { %v7179_v14 = vpop.f32.mrf.mxu0 }
0x1fc8   : > { %v6658_v38 = vld [vmem:[%s8969_s27] ss:$0 sm:$0xff]  ;;  %s8976_s27 = smov 48  }
0x204c   : > { %v3539_v15 = vpop.xlane.xlu1 %3538 }
0x204d   : > { %v3540_v16 = vsub.f32 %v3536_v10, %v3539_v15 }
0x204f   : > { %v3541_v17 = vmul.f32 1.442695, %v3540_v16 }
0x2051   : > { %7671 = vpow2.f32 %v3541_v17 }
0x205e   : > { %v7672_v18 = vpop.eup %7671 }
0x205f   : > { %v3543_v21 = vsel %vm1202_vm0, %v7672_v18, 0.0 }
0x2060   : > { %3544 = vadd.xlane.f32.xlu0 %v3543_v21 }
0x2076   : > { %3646 = vrot.lane.b32.xlu0 %v8344_v0, %s8967_s21 }
0x207a   : > { %3644 = vrot.lane.b32.xlu0 %v8353_v6, %s8967_s21  ;;  %v3479_v24 = vpop.f32.mrf.mxu1 }
0x207b   : > { %v3485_v25 = vadd.f32 %v3479_v24, %v3326_v23 }
0x207c   : > { %v7172_v26 = vpop.f32.mrf.mxu1 }
0x207e   : > { %v3482_v27 = vpop.f32.mrf.mxu1 }
0x2080   : > { %v7173_v28 = vpop.f32.mrf.mxu1 }
0x20e9   : > { %v3545_v29 = vpop.xlane.xlu0 %3544 }
0x20ea   : > { %7673 = vrcp.f32 %v3545_v29 }
0x20ed   : > { %v3647_v31 = vpop.permute.xlu0 %3646 }
0x20ee   : > { %v3652_v34 = vsel %vm1369_vm3, %v3647_v31, 0 }
0x20f1   : > { %v3645_v6 = vpop.permute.xlu0 %3644 }
0x20f7   : > { %v7674_v30 = vpop.eup %7673 }
0x20f8   : > { %v3547_v58 = vmul.f32 %v7674_v30, %v7672_v18 }
0x20fa   : > { %v3548_v33 = vpack.c.bf16 %v3547_v58, %v3547_v58 }
0x20fc   : > { %7183 = vmatmul.mubr.msk.bf16.vlgmr.msra.gmra.mxu1 %vm1202_vm0, %v3548_v33 }
0x20fd   : > { %7193 = vmatpush3.bf16.xpose.msra.mxu1 %v3652_v34  ;;  %7194 = vmatprep.mubr.msk.bf16.mxu1 %vm7803_vm2, %v7802_v32 }
0x20fe   : > { %7204 = vmatprep.subr.bf16.mxu1 %v7802_v32 }
0x2104   : > { %7195 = vmatmul.mubr.msk.bf16.vlgmr.msra.gmra.mxu1 %vm1369_vm3, %v3645_v6 }
0x2105   : > { %7206 = vmatprep.mubr.msk.bf16.mxu1 %vm7803_vm2, %v7802_v32  ;;  %7205 = vmatpush3.bf16.msra.mxu1 %v3759_v4 }
0x2106   : > { %7216 = vmatprep.subr.bf16.mxu1 %v7802_v32 }
0x21bc   : > { %v3589_v40 = vpop.f32.mrf.mxu1 }
0x21bd   : > { %v3595_v41 = vpack.c.bf16 %v3589_v40, %v3589_v40  ;;  %v6659_v40 = vld [vmem:[%s8970_s28] ss:$0 sm:$0xff]  ;;  %s8973_s28 = smov 64  }
0x21be   : > { %v7184_v42 = vpop.f32.mrf.mxu1 }
0x21bf   : > { %7189 = vmatmul.mubr.msk.bf16.vlgmr.msra.gmra.mxu0 %vm1369_vm3, %v3595_v41 }
0x21c0   : > { %v3592_v43 = vpop.f32.mrf.mxu1  ;;  %7200 = vmatprep.mubr.msk.bf16.mxu0 %vm7803_vm2, %v7802_v32 }
0x21c2   : > { %v7185_v44 = vpop.f32.mrf.mxu1 }
0x21c4   : > { %v3688_v35 = vpop.f32.mrf.mxu1 }
0x21c5   : > { %v3694_v46 = vmul.f32 0.35355338, %v3688_v35 }
0x21c6   : > { %v7196_v19 = vpop.f32.mrf.mxu1 }
0x21c7   : > { %v3695_v51 = vsel %vm1202_vm0, %v3694_v46, -inf }
0x21c8   : > { %3696 = vmax.xlane.f32.xlu1 %v3695_v51  ;;  %v3691_v52 = vpop.f32.mrf.mxu1 }
0x21ca   : > { %v7197_v20 = vpop.f32.mrf.mxu1 }
0x21d9   : > { %3707 = vrot.lane.b32.xlu1 %v8344_v0, %s8968_s29 }
0x2251   : > { %v3697_v53 = vpop.xlane.xlu1 %3696 }
0x2252   : > { %v3698_v54 = vsub.f32 %v3694_v46, %v3697_v53  ;;  %v1109_v46 = vld [vmem:[%s8972_s13] sm:$0x3] }
0x2254   : > { %v3699_v55 = vmul.f32 1.442695, %v3698_v54 }
0x2255   : > { %v3708_v56 = vpop.permute.xlu1 %3707 }
0x2256   : > { %7675 = vpow2.f32 %v3699_v55  ;;  %7199 = vmatpush3.bf16.msra.mxu0 %v3708_v56 }
0x2257   : > { %7210 = vmatprep.subr.bf16.mxu0 %v7802_v32 }
0x2263   : > { %v7676_v57 = vpop.eup %7675 }
0x2264   : > { %v3701_v48 = vsel %vm1202_vm0, %v7676_v57, 0.0 }
0x2265   : > { %3702 = vadd.xlane.f32.xlu0 %v3701_v48 }
0x227f   : > { %v3637_v59 = vpop.f32.mrf.mxu0 }
0x2280   : > { %v3643_v45 = vadd.f32 %v3637_v59, %v3485_v25 }
0x2281   : > { %v7190_v60 = vpop.f32.mrf.mxu0 }
0x2283   : > { %v3640_v61 = vpop.f32.mrf.mxu0 }
0x2285   : > { %v7191_v49 = vpop.f32.mrf.mxu0 }
0x22ee   : > { %v3703_v0 = vpop.xlane.xlu0 %3702 }
0x22ef   : > { %7677 = vrcp.f32 %v3703_v0 }
0x22fc   : > { %v7678_v62 = vpop.eup %7677 }
0x22fd   : > { %v3705_v63 = vmul.f32 %v7678_v62, %v7676_v57 }
0x22ff   : > { %v3706_v1 = vpack.c.bf16 %v3705_v63, %v3705_v63 }
0x2301   : > { %7201 = vmatmul.mubr.msk.bf16.vlgmr.msra.gmra.mxu0 %vm1202_vm0, %v3706_v1 }
0x2302   : > { %7212 = vmatprep.mubr.msk.bf16.mxu0 %vm7803_vm2, %v7802_v32 }
0x23c1   : > { %v3747_v5 = vpop.f32.mrf.mxu0 }
0x23c2   : > { %v3753_v8 = vpack.c.bf16 %v3747_v5, %v3747_v5 }
0x23c3   : > { %v7202_v9 = vpop.f32.mrf.mxu0 }
0x23c4   : > { %7207 = vmatmul.mubr.msk.bf16.vlgmr.msra.gmra.mxu1 %vm1369_vm3, %v3753_v8 }
0x23c5   : > { %v3750_v10 = vpop.f32.mrf.mxu0  ;;  %7217 = vmatpush3.bf16.msra.mxu1 %v7585_v7  ;;  %7220 = vmatprep.mubr.msk.bf16.mxu1 %vm7803_vm2, %v7802_v32 }
0x23c6   : > { %7218 = vmatprep.subr.bf16.mxu1 %v7802_v32 }
0x23c7   : > { %v7203_v12 = vpop.f32.mrf.mxu0 }
0x23c9   : > { %7219 = vmatpush3.bf16.msra.mxu1 %v7586_v11 }
0x23ca   : > { %7230 = vmatprep.subr.bf16.mxu1 %v7802_v32 }
0x23cc   : > { %7221 = vmatmul.mubr.msk.bf16.vlgmr.msra.gmra.mxu1 %vm1247_vm1, %v8333_v50 }
0x23cd   : > { %7232 = vmatprep.mubr.msk.bf16.mxu1 %vm7803_vm2, %v7802_v32 }
0x2484   : > { %v3795_v13 = vpop.f32.mrf.mxu1 }
0x2485   : > { %v3801_v14 = vadd.f32 %v3795_v13, %v3643_v45 }
0x2486   : > { %v7208_v15 = vpop.f32.mrf.mxu1 }
0x2487   : > { %v3802_v16 = vsel %vm1247_vm1, %v3801_v14, 0.0 }
0x2488   : > { %3803 = vadd.xlane.f32.xlu1 %v3802_v16  ;;  %v3798_v17 = vpop.f32.mrf.mxu1 }
0x248a   : > { %v7209_v18 = vpop.f32.mrf.mxu1 }
0x248b   : > { %v1066_v18 = vld [vmem:[%s7898_s20 + $0x20] sm:$0xff] }
0x248c   : > { %v3929_v21 = vpop.f32.mrf.mxu1 }
0x248d   : > { %v3930_v25 = vadd.f32 %v6661_v22, %v3929_v21  ;;  %v4066_v21 = vpack.c.bf16 %v1066_v18, %v1066_v18 }
0x248e   : > { %v7222_v23 = vpop.f32.mrf.mxu1 }
0x2490   : > { %v3932_v24 = vpop.f32.mrf.mxu1 }
0x2491   : > { %v3933_v26 = vadd.f32 %v6661_v22, %v3932_v24  ;;  %v4071_v22 = vsel %vm1494_vm4, %v4066_v21, 0 }
0x2492   : > { %v7223_v27 = vpop.f32.mrf.mxu1 }
0x2493   : > { %v8450_v50 = vpack.c.bf16 %v3933_v26, %v3930_v25 }
0x2511   : > { %v3804_v28 = vpop.xlane.xlu1 %3803 }
0x2512   : > { %v3805_v29 = vmul.f32 0.03125, %v3804_v28 }
0x2514   : > { %v3806_v30 = vsub.f32 %v3801_v14, %v3805_v29 }
0x2516   : > { %v3807_v58 = vmul.f32 %v3806_v30, %v3806_v30 }
0x2518   : > { %v3808_v31 = vsel %vm1247_vm1, %v3807_v58, 0.0 }
0x2519   : > { %3809 = vadd.xlane.f32.xlu0 %v3808_v31 }
0x252f   : > { %3944 = vrot.lane.b32.xlu0 %v8450_v50, %s8971_s1 }
0x25a2   : > { %v3810_v33 = vpop.xlane.xlu0 %3809 }
0x25a3   : > { %v3811_v34 = vmul.f32 0.03125, %v3810_v33 }
0x25a5   : > { %v3812_v6 = vadd.f32 1e-05, %v3811_v34 }
0x25a6   : > { %v3945_v35 = vpop.permute.xlu0 %3944 }
0x25a7   : > { %7679 = vrsqrt.f32 %v3812_v6  ;;  %v3950_v19 = vsel %vm1369_vm3, %v3945_v35, 0 }
0x25b4   : > { %v7680_v36 = vpop.eup %7679 }
0x25b5   : > { %v3814_v39 = vmul.f32 %v7680_v36, %v3806_v30 }
0x25b7   : > { %v3821_v41 = vmul.f32 %v6658_v38, %v3814_v39 }
0x25b9   : > { %v3828_v42 = vadd.f32 %v6659_v40, %v3821_v41 }
0x25bb   : > { %v3829_v43 = vpack.c.bf16 %v3828_v42, %v3828_v42 }
0x25bd   : > { %v3834_v44 = vsel %vm1494_vm4, %v3829_v43, 0 }
0x25be   : > { %7211 = vmatpush3.bf16.msra.mxu0 %v3834_v44 }
0x25bf   : > { %7224 = vmatprep.subr.bf16.mxu0 %v7802_v32 }
0x25c1   : > { %7213 = vmatmul.mubr.msk.bf16.vlgmr.msra.gmra.mxu0 %vm1369_vm3, %v1109_v46 }
0x25c2   : > { %7225 = vmatpush3.bf16.xpose.msra.mxu0 %v3950_v19  ;;  %7226 = vmatprep.mubr.msk.bf16.mxu0 %vm7803_vm2, %v7802_v32 }
0x25c3   : > { %7236 = vmatprep.subr.bf16.mxu0 %v7802_v32 }
0x25c9   : > { %7227 = vmatmul.mubr.msk.bf16.vlgmr.msra.gmra.mxu0 %vm1369_vm3, %v8450_v50 }
0x25ca   : > { %7238 = vmatprep.mubr.msk.bf16.mxu0 %vm7803_vm2, %v7802_v32  ;;  %7237 = vmatpush3.bf16.msra.mxu0 %v4071_v22 }
0x25cb   : > { %7248 = vmatprep.subr.bf16.mxu0 %v7802_v32 }
0x2681   : > { %v8469_v51 = vpop.f32.mrf.mxu0 }
0x2683   : > { %v7214_v52 = vpop.f32.mrf.mxu0 }
0x2685   : > { %v3873_v20 = vpop.f32.mrf.mxu0 }
0x2687   : > { %v7215_v53 = vpop.f32.mrf.mxu0 }
0x2689   : > { %v3986_v54 = vpop.f32.mrf.mxu0 }
0x268a   : > { %v3993_v55 = vmul.f32 0.35355338, %v3986_v54 }
0x268b   : > { %v7228_v56 = vpop.f32.mrf.mxu0 }
0x268c   : > { %v3995_v57 = vsel %vm1202_vm0, %v3993_v55, -inf }
0x268d   : > { %3996 = vmax.xlane.f32.xlu1 %v3995_v57  ;;  %v3989_v48 = vpop.f32.mrf.mxu0 }
0x268e   : > { %v3994_v59 = vmul.f32 0.35355338, %v3989_v48 }
0x268f   : > { %v7229_v45 = vpop.f32.mrf.mxu0 }
0x2690   : > { %v3998_v60 = vsel %vm1202_vm0, %v3994_v59, -inf }
0x2691   : > { %3999 = vmax.xlane.f32.xlu0 %v3998_v60 }
0x269e   : > { %4018 = vrot.lane.b32.xlu1 %v8450_v50, %s8973_s28 }
0x26a7   : > { %4116 = vrot.lane.b32.xlu0 %v8450_v50, %s8974_s8 }
0x2716   : > { %v3997_v61 = vpop.xlane.xlu1 %3996 }
0x2717   : > { %v4001_v49 = vsub.f32 %v3993_v55, %v3997_v61 }
0x2719   : > { %v4003_v0 = vmul.f32 1.442695, %v4001_v49 }
0x271a   : > { %v4019_v62 = vpop.permute.xlu1 %4018  ;;  %v4000_v63 = vpop.xlane.xlu0 %3999 }
0x271b   : > { %7681 = vpow2.f32 %v4003_v0  ;;  %v4002_v1 = vsub.f32 %v3994_v59, %v4000_v63  ;;  %7231 = vmatpush3.bf16.msra.mxu1 %v4019_v62  ;;  %v1067_v62 = vld [vmem:[%s7898_s20 + $0x28] sm:$0xff] }
0x271c   : > { %7242 = vmatprep.subr.bf16.mxu1 %v7802_v32  ;;  %v4240_v63 = vpack.c.bf16 %v1067_v62, %v1067_v62 }
0x271d   : > { %v4005_v2 = vmul.f32 1.442695, %v4002_v1 }
0x271e   : > { %v4117_v17 = vpop.permute.xlu0 %4116  ;;  %v4245_v1 = vsel %vm1494_vm4, %v4240_v63, 0 }
0x271f   : > { %7683 = vpow2.f32 %v4005_v2 }
0x2728   : > { %v7682_v3 = vpop.eup %7681 }
0x2729   : > { %v4007_v4 = vsel %vm1202_vm0, %v7682_v3, 0.0 }
0x272a   : > { %4008 = vadd.xlane.f32.xlu1 %v4007_v4 }
0x272c   : > { %v7684_v5 = vpop.eup %7683 }
0x272d   : > { %v4010_v7 = vsel %vm1202_vm0, %v7684_v5, 0.0 }
0x272e   : > { %4011 = vadd.xlane.f32.xlu1 %v4010_v7 }
0x273f   : > { %4118 = vrot.lane.b32.xlu1 %v8450_v50, %s8963_s11 }
0x27b3   : > { %v4009_v8 = vpop.xlane.xlu1 %4008 }
0x27b4   : > { %7685 = vrcp.f32 %v4009_v8 }
0x27b7   : > { %v4012_v9 = vpop.xlane.xlu1 %4011 }
0x27b8   : > { %7687 = vrcp.f32 %v4012_v9 }
0x27bb   : > { %v4119_v14 = vpop.permute.xlu1 %4118 }
0x27bc   : > { %v4124_v16 = vsel %vm1369_vm3, %v4119_v14, 0 }
0x27c1   : > { %v7686_v10 = vpop.eup %7685 }
0x27c2   : > { %v4015_v12 = vmul.f32 %v7686_v10, %v7682_v3 }
0x27c5   : > { %v7688_v11 = vpop.eup %7687 }
0x27c6   : > { %v4016_v13 = vmul.f32 %v7688_v11, %v7684_v5 }
0x27c8   : > { %v4017_v15 = vpack.c.bf16 %v4016_v13, %v4015_v12 }
0x27ca   : > { %7233 = vmatmul.mubr.msk.bf16.vlgmr.msra.gmra.mxu1 %vm1202_vm0, %v4017_v15 }
0x27cb   : > { %7243 = vmatpush3.bf16.xpose.msra.mxu1 %v4124_v16  ;;  %7244 = vmatprep.mubr.msk.bf16.mxu1 %vm7803_vm2, %v7802_v32 }
0x27cc   : > { %7254 = vmatprep.subr.bf16.mxu1 %v7802_v32 }
0x27d2   : > { %7245 = vmatmul.mubr.msk.bf16.vlgmr.msra.gmra.mxu1 %vm1369_vm3, %v4117_v17 }
0x27d3   : > { %7256 = vmatprep.mubr.msk.bf16.mxu1 %vm7803_vm2, %v7802_v32  ;;  %7255 = vmatpush3.bf16.msra.mxu1 %v4245_v1 }
0x27d4   : > { %7266 = vmatprep.subr.bf16.mxu1 %v7802_v32 }
0x288a   : > { %v4058_v23 = vpop.f32.mrf.mxu1 }
0x288c   : > { %v7234_v24 = vpop.f32.mrf.mxu1 }
0x288e   : > { %v4061_v25 = vpop.f32.mrf.mxu1 }
0x288f   : > { %v4065_v26 = vpack.c.bf16 %v4061_v25, %v4058_v23 }
0x2890   : > { %v7235_v27 = vpop.f32.mrf.mxu1 }
0x2891   : > { %7239 = vmatmul.mubr.msk.bf16.vlgmr.msra.gmra.mxu0 %vm1369_vm3, %v4065_v26 }
0x2892   : > { %v4160_v28 = vpop.f32.mrf.mxu1  ;;  %7250 = vmatprep.mubr.msk.bf16.mxu0 %vm7803_vm2, %v7802_v32 }
0x2893   : > { %v4167_v29 = vmul.f32 0.35355338, %v4160_v28 }
0x2894   : > { %v7246_v30 = vpop.f32.mrf.mxu1 }
0x2895   : > { %v4169_v58 = vsel %vm1202_vm0, %v4167_v29, -inf }
0x2896   : > { %4170 = vmax.xlane.f32.xlu1 %v4169_v58  ;;  %v4163_v31 = vpop.f32.mrf.mxu1 }
0x2897   : > { %v4168_v33 = vmul.f32 0.35355338, %v4163_v31 }
0x2898   : > { %v7247_v34 = vpop.f32.mrf.mxu1 }
0x2899   : > { %v4172_v6 = vsel %vm1202_vm0, %v4168_v33, -inf }
0x289a   : > { %4173 = vmax.xlane.f32.xlu0 %v4172_v6 }
0x28b0   : > { %4292 = vrot.lane.b32.xlu0 %v8450_v50, %s8965_s5 }
0x291f   : > { %v4171_v36 = vpop.xlane.xlu1 %4170 }
0x2920   : > { %v4175_v38 = vsub.f32 %v4167_v29, %v4171_v36  ;;  %v6665_v29 = vld [vmem:[%s8943_s3 + $0x1] ss:$0 sm:$0xff]  ;;  %s8977_s3 = smov 40  }
0x2922   : > { %v4177_v39 = vmul.f32 1.442695, %v4175_v38 }
0x2923   : > { %v4174_v40 = vpop.xlane.xlu0 %4173 }
0x2924   : > { %7689 = vpow2.f32 %v4177_v39  ;;  %v4176_v41 = vsub.f32 %v4168_v33, %v4174_v40 }
0x2926   : > { %v4179_v42 = vmul.f32 1.442695, %v4176_v41 }
0x2927   : > { %v4293_v60 = vpop.permute.xlu0 %4292 }
0x2928   : > { %7691 = vpow2.f32 %v4179_v42  ;;  %v4298_v49 = vsel %vm1369_vm3, %v4293_v60, 0 }
0x2931   : > { %v7690_v43 = vpop.eup %7689 }
0x2932   : > { %v4181_v44 = vsel %vm1202_vm0, %v7690_v43, 0.0 }
0x2933   : > { %4182 = vadd.xlane.f32.xlu1 %v4181_v44 }
0x2935   : > { %v7692_v35 = vpop.eup %7691 }
0x2936   : > { %v4184_v46 = vsel %vm1202_vm0, %v7692_v35, 0.0 }
0x2937   : > { %4185 = vadd.xlane.f32.xlu1 %v4184_v46 }
0x2948   : > { %4192 = vrot.lane.b32.xlu1 %v8450_v50, %s8975_s17 }
0x294c   : > { %4290 = vrot.lane.b32.xlu1 %v8450_v50, %s8964_s4 }
0x2951   : > { %v8506_v19 = vpop.f32.mrf.mxu0 }
0x2952   : > { %v4114_v30 = vadd.f32 %v6665_v29, %v8506_v19 }
0x2953   : > { %v7240_v52 = vpop.f32.mrf.mxu0 }
0x2955   : > { %v8508_v20 = vpop.f32.mrf.mxu0 }
0x2956   : > { %v4115_v34 = vadd.f32 %v6665_v29, %v8508_v20  ;;  %v1068_v20 = vld [vmem:[%s7898_s20 + $0x30] sm:$0xff] }
0x2957   : > { %v7241_v53 = vpop.f32.mrf.mxu0 }
0x2958   : > { %v4414_v53 = vpack.c.bf16 %v1068_v20, %v1068_v20 }
0x29bc   : > { %v4183_v54 = vpop.xlane.xlu1 %4182 }
0x29bd   : > { %7693 = vrcp.f32 %v4183_v54  ;;  %v4419_v54 = vsel %vm1494_vm4, %v4414_v53, 0 }
0x29c0   : > { %v4186_v55 = vpop.xlane.xlu1 %4185 }
0x29c1   : > { %7695 = vrcp.f32 %v4186_v55 }
0x29c4   : > { %v4193_v56 = vpop.permute.xlu1 %4192 }
0x29c5   : > { %7249 = vmatpush3.bf16.msra.mxu0 %v4193_v56 }
0x29c6   : > { %7260 = vmatprep.subr.bf16.mxu0 %v7802_v32 }
0x29c8   : > { %v4291_v0 = vpop.permute.xlu1 %4290 }
0x29ca   : > { %v7694_v57 = vpop.eup %7693 }
0x29cb   : > { %v4189_v59 = vmul.f32 %v7694_v57, %v7690_v43 }
0x29ce   : > { %v7696_v48 = vpop.eup %7695 }
0x29cf   : > { %v4190_v45 = vmul.f32 %v7696_v48, %v7692_v35 }
0x29d1   : > { %v4191_v61 = vpack.c.bf16 %v4190_v45, %v4189_v59 }
0x29d3   : > { %7251 = vmatmul.mubr.msk.bf16.vlgmr.msra.gmra.mxu0 %vm1202_vm0, %v4191_v61 }
0x29d4   : > { %7261 = vmatpush3.bf16.xpose.msra.mxu0 %v4298_v49  ;;  %7262 = vmatprep.mubr.msk.bf16.mxu0 %vm7803_vm2, %v7802_v32 }
0x29d5   : > { %7272 = vmatprep.subr.bf16.mxu0 %v7802_v32 }
0x29db   : > { %7263 = vmatmul.mubr.msk.bf16.vlgmr.msra.gmra.mxu0 %vm1369_vm3, %v4291_v0 }
0x29dc   : > { %7274 = vmatprep.mubr.msk.bf16.mxu0 %vm7803_vm2, %v7802_v32  ;;  %7273 = vmatpush3.bf16.msra.mxu0 %v4419_v54 }
0x29dd   : > { %7284 = vmatprep.subr.bf16.mxu0 %v7802_v32 }
0x2a93   : > { %v4232_v2 = vpop.f32.mrf.mxu0 }
0x2a95   : > { %v7252_v3 = vpop.f32.mrf.mxu0 }
0x2a97   : > { %v4235_v4 = vpop.f32.mrf.mxu0 }
0x2a98   : > { %v4239_v5 = vpack.c.bf16 %v4235_v4, %v4232_v2 }
0x2a99   : > { %v7253_v7 = vpop.f32.mrf.mxu0 }
0x2a9a   : > { %7257 = vmatmul.mubr.msk.bf16.vlgmr.msra.gmra.mxu1 %vm1369_vm3, %v4239_v5 }
0x2a9b   : > { %v4334_v8 = vpop.f32.mrf.mxu0  ;;  %7268 = vmatprep.mubr.msk.bf16.mxu1 %vm7803_vm2, %v7802_v32 }
0x2a9c   : > { %v4341_v9 = vmul.f32 0.35355338, %v4334_v8 }
0x2a9d   : > { %v7264_v10 = vpop.f32.mrf.mxu0 }
0x2a9e   : > { %v4343_v11 = vsel %vm1202_vm0, %v4341_v9, -inf }
0x2a9f   : > { %4344 = vmax.xlane.f32.xlu1 %v4343_v11  ;;  %v4337_v12 = vpop.f32.mrf.mxu0 }
0x2aa0   : > { %v4342_v13 = vmul.f32 0.35355338, %v4337_v12 }
0x2aa1   : > { %v7265_v14 = vpop.f32.mrf.mxu0 }
0x2aa2   : > { %v4346_v15 = vsel %vm1202_vm0, %v4342_v13, -inf }
0x2aa3   : > { %4347 = vmax.xlane.f32.xlu0 %v4346_v15 }
0x2ab9   : > { %4366 = vrot.lane.b32.xlu0 %v8450_v50, %s8976_s27 }
0x2b28   : > { %v4345_v16 = vpop.xlane.xlu1 %4344 }
0x2b29   : > { %v4349_v17 = vsub.f32 %v4341_v9, %v4345_v16 }
0x2b2b   : > { %v4351_v18 = vmul.f32 1.442695, %v4349_v17 }
0x2b2c   : > { %v4348_v21 = vpop.xlane.xlu0 %4347 }
0x2b2d   : > { %7697 = vpow2.f32 %v4351_v18  ;;  %v4350_v22 = vsub.f32 %v4342_v13, %v4348_v21 }
0x2b2f   : > { %v4353_v23 = vmul.f32 1.442695, %v4350_v22 }
0x2b30   : > { %v4367_v24 = vpop.permute.xlu0 %4366 }
0x2b31   : > { %7699 = vpow2.f32 %v4353_v23  ;;  %7267 = vmatpush3.bf16.msra.mxu1 %v4367_v24 }
0x2b32   : > { %7278 = vmatprep.subr.bf16.mxu1 %v7802_v32 }
0x2b3a   : > { %v7698_v25 = vpop.eup %7697 }
0x2b3b   : > { %v4355_v26 = vsel %vm1202_vm0, %v7698_v25, 0.0 }
0x2b3c   : > { %4356 = vadd.xlane.f32.xlu1 %v4355_v26 }
0x2b3e   : > { %v7700_v27 = vpop.eup %7699 }
0x2b3f   : > { %v4358_v28 = vsel %vm1202_vm0, %v7700_v27, 0.0 }
0x2b40   : > { %4359 = vadd.xlane.f32.xlu1 %v4358_v28  ;;  %v1069_v28 = vld [vmem:[%s7898_s20 + $0x38] sm:$0xff] }
0x2b41   : > { %v4588_v29 = vpack.c.bf16 %v1069_v28, %v1069_v28 }
0x2b51   : > { %4466 = vrot.lane.b32.xlu1 %v8450_v50, %s8968_s29 }
0x2b55   : > { %4464 = vrot.lane.b32.xlu1 %v8450_v50, %s8967_s21 }
0x2b5a   : > { %v4281_v58 = vpop.f32.mrf.mxu1 }
0x2b5b   : > { %v8538_v31 = vadd.f32 %v4281_v58, %v4114_v30  ;;  %v4593_v30 = vsel %vm1494_vm4, %v4588_v29, 0 }
0x2b5c   : > { %v7258_v33 = vpop.f32.mrf.mxu1 }
0x2b5e   : > { %v4284_v6 = vpop.f32.mrf.mxu1 }
0x2b5f   : > { %v8541_v36 = vadd.f32 %v4284_v6, %v4115_v34 }
0x2b60   : > { %v7259_v38 = vpop.f32.mrf.mxu1 }
0x2bc5   : > { %v4357_v39 = vpop.xlane.xlu1 %4356 }
0x2bc6   : > { %7701 = vrcp.f32 %v4357_v39 }
0x2bc9   : > { %v4360_v40 = vpop.xlane.xlu1 %4359 }
0x2bca   : > { %7703 = vrcp.f32 %v4360_v40 }
0x2bcd   : > { %v4467_v35 = vpop.permute.xlu1 %4466 }
0x2bce   : > { %v4472_v19 = vsel %vm1369_vm3, %v4467_v35, 0 }
0x2bd1   : > { %v4465_v52 = vpop.permute.xlu1 %4464 }
0x2bd3   : > { %v7702_v41 = vpop.eup %7701 }
0x2bd4   : > { %v4363_v43 = vmul.f32 %v7702_v41, %v7698_v25 }
0x2bd7   : > { %v7704_v42 = vpop.eup %7703 }
0x2bd8   : > { %v4364_v44 = vmul.f32 %v7704_v42, %v7700_v27 }
0x2bda   : > { %v4365_v46 = vpack.c.bf16 %v4364_v44, %v4363_v43 }
0x2bdc   : > { %7269 = vmatmul.mubr.msk.bf16.vlgmr.msra.gmra.mxu1 %vm1202_vm0, %v4365_v46 }
0x2bdd   : > { %7279 = vmatpush3.bf16.xpose.msra.mxu1 %v4472_v19  ;;  %7280 = vmatprep.mubr.msk.bf16.mxu1 %vm7803_vm2, %v7802_v32 }
0x2bde   : > { %7290 = vmatprep.subr.bf16.mxu1 %v7802_v32 }
0x2be4   : > { %7281 = vmatmul.mubr.msk.bf16.vlgmr.msra.gmra.mxu1 %vm1369_vm3, %v4465_v52 }
0x2be5   : > { %7292 = vmatprep.mubr.msk.bf16.mxu1 %vm7803_vm2, %v7802_v32  ;;  %7291 = vmatpush3.bf16.msra.mxu1 %v4593_v30 }
0x2be6   : > { %7304 = vmatprep.subr.bf16.mxu1 %v7802_v32 }
0x2c9c   : > { %v4406_v55 = vpop.f32.mrf.mxu1 }
0x2c9e   : > { %v7270_v56 = vpop.f32.mrf.mxu1 }
0x2ca0   : > { %v4409_v57 = vpop.f32.mrf.mxu1 }
0x2ca1   : > { %v4413_v48 = vpack.c.bf16 %v4409_v57, %v4406_v55 }
0x2ca2   : > { %v7271_v59 = vpop.f32.mrf.mxu1 }
0x2ca3   : > { %7275 = vmatmul.mubr.msk.bf16.vlgmr.msra.gmra.mxu0 %vm1369_vm3, %v4413_v48  ;;  %v7587_v48 = vld [vmem:[%s7888_s6 + $0x18] sm:$0xff]   ;;  %v7588_v59 = vld [vmem:[%s7888_s6 + $0x10] sm:$0xff]  }
0x2ca4   : > { %v4508_v45 = vpop.f32.mrf.mxu1  ;;  %7286 = vmatprep.mubr.msk.bf16.mxu0 %vm7803_vm2, %v7802_v32 }
0x2ca5   : > { %v4515_v60 = vmul.f32 0.35355338, %v4508_v45  ;;  %v7591_v45 = vld [vmem:[%s7893_s12 + $0x78] sm:$0xff]  }
0x2ca6   : > { %v7282_v61 = vpop.f32.mrf.mxu1 }
0x2ca7   : > { %v4517_v49 = vsel %vm1202_vm0, %v4515_v60, -inf  ;;  %v7593_v61 = vld [vmem:[%s7893_s12 + $0x68] sm:$0xff]  }
0x2ca8   : > { %4518 = vmax.xlane.f32.xlu0 %v4517_v49  ;;  %v4511_v0 = vpop.f32.mrf.mxu1  ;;  %v7594_v49 = vld [vmem:[%s7893_s12 + $0x60] sm:$0xff]  }
0x2ca9   : > { %v4516_v62 = vmul.f32 0.35355338, %v4511_v0  ;;  %v7595_v0 = vld [vmem:[%s7893_s12 + $0x58] sm:$0xff]  }
0x2caa   : > { %v7283_v63 = vpop.f32.mrf.mxu1 }
0x2cab   : > { %v4520_v1 = vsel %vm1202_vm0, %v4516_v62, -inf }
0x2cac   : > { %4521 = vmax.xlane.f32.xlu1 %v4520_v1 }
0x2cbd   : > { %4540 = vrot.lane.b32.xlu1 %v8450_v50, %s8977_s3 }
0x2d31   : > { %v4519_v2 = vpop.xlane.xlu0 %4518 }
0x2d32   : > { %v4523_v3 = vsub.f32 %v4515_v60, %v4519_v2  ;;  %v7592_v60 = vld [vmem:[%s7893_s12 + $0x70] sm:$0xff]  }
0x2d34   : > { %v4525_v4 = vmul.f32 1.442695, %v4523_v3 }
0x2d35   : > { %v4522_v5 = vpop.xlane.xlu1 %4521 }
0x2d36   : > { %7705 = vpow2.f32 %v4525_v4  ;;  %v4524_v7 = vsub.f32 %v4516_v62, %v4522_v5 }
0x2d38   : > { %v4527_v8 = vmul.f32 1.442695, %v4524_v7 }
0x2d39   : > { %v4541_v9 = vpop.permute.xlu1 %4540 }
0x2d3a   : > { %7707 = vpow2.f32 %v4527_v8  ;;  %7285 = vmatpush3.bf16.msra.mxu0 %v4541_v9  ;;  %v6678_v8 = vld [vmem:[%s7873_s19 + $0x1] ss:$0 sm:$0xff] }
0x2d3b   : > { %7296 = vmatprep.subr.bf16.mxu0 %v7802_v32 }
0x2d43   : > { %v7706_v10 = vpop.eup %7705 }
0x2d44   : > { %v4529_v11 = vsel %vm1202_vm0, %v7706_v10, 0.0 }
0x2d45   : > { %4530 = vadd.xlane.f32.xlu0 %v4529_v11 }
0x2d47   : > { %v7708_v12 = vpop.eup %7707 }
0x2d48   : > { %v4532_v13 = vsel %vm1202_vm0, %v7708_v12, 0.0 }
0x2d49   : > { %4533 = vadd.xlane.f32.xlu0 %v4532_v13 }
0x2d63   : > { %v4455_v50 = vpop.f32.mrf.mxu0 }
0x2d64   : > { %v4462_v14 = vadd.f32 %v4455_v50, %v8538_v31 }
0x2d65   : > { %v7276_v15 = vpop.f32.mrf.mxu0 }
0x2d66   : > { %v7589_v15 = vld [vmem:[%s7943_s24 + $0x18] sm:$0xff]  }
0x2d67   : > { %v4458_v16 = vpop.f32.mrf.mxu0 }
0x2d68   : > { %v4463_v17 = vadd.f32 %v4458_v16, %v8541_v36 }
0x2d69   : > { %v7277_v18 = vpop.f32.mrf.mxu0 }
0x2d6a   : > { %v8609_v18 = vld [vmem:[%s7948_s30 + $0x8] sm:$0xff] }
0x2dce   : > { %v4531_v21 = vpop.xlane.xlu0 %4530 }
0x2dcf   : > { %7709 = vrcp.f32 %v4531_v21  ;;  %v4887_v21 = vpack.c.bf16 %v8609_v18, %v8609_v18 }
0x2dd2   : > { %v4534_v22 = vpop.xlane.xlu0 %4533 }
0x2dd3   : > { %7711 = vrcp.f32 %v4534_v22  ;;  %v7596_v22 = vld [vmem:[%s7893_s12 + $0x50] sm:$0xff]  }
0x2ddc   : > { %v7710_v23 = vpop.eup %7709 }
0x2ddd   : > { %v4537_v25 = vmul.f32 %v7710_v23, %v7706_v10  ;;  %v7597_v23 = vld [vmem:[%s7893_s12 + $0x48] sm:$0xff]  }
0x2de0   : > { %v7712_v24 = vpop.eup %7711 }
0x2de1   : > { %v4538_v26 = vmul.f32 %v7712_v24, %v7708_v12  ;;  %v6679_v12 = vld [vmem:[%s7868_s14 + $0x1] ss:$0 sm:$0xff] }
0x2de2   : > { %v7598_v24 = vld [vmem:[%s7893_s12 + $0x40] sm:$0xff]  }
0x2de3   : > { %v4539_v27 = vpack.c.bf16 %v4538_v26, %v4537_v25  ;;  %v6680_v25 = vld [vmem:[%s7848_s25 + $0x1] ss:$0 sm:$0xff] }
0x2de5   : > { %7287 = vmatmul.mubr.msk.bf16.vlgmr.msra.gmra.mxu0 %vm1202_vm0, %v4539_v27 }
0x2de6   : > { %7300 = vmatprep.mubr.msk.bf16.mxu0 %vm7803_vm2, %v7802_v32  ;;  %7297 = vmatpush3.bf16.msra.mxu0 %v7587_v48 }
0x2de7   : > { %7298 = vmatprep.subr.bf16.mxu0 %v7802_v32 }
0x2dea   : > { %7299 = vmatpush3.bf16.msra.mxu0 %v7588_v59 }
0x2deb   : > { %7324 = vmatprep.subr.bf16.mxu0 %v7802_v32 }
0x2ea5   : > { %v4580_v58 = vpop.f32.mrf.mxu0 }
0x2ea7   : > { %v7288_v31 = vpop.f32.mrf.mxu0 }
0x2ea8   : > { %v6695_v31 = vld [vmem:[%s7933_s9 + $0x1] ss:$0 sm:$0xff] }
0x2ea9   : > { %v4583_v33 = vpop.f32.mrf.mxu0 }
0x2eaa   : > { %v4587_v34 = vpack.c.bf16 %v4583_v33, %v4580_v58 }
0x2eab   : > { %v7289_v6 = vpop.f32.mrf.mxu0 }
0x2eac   : > { %7293 = vmatmul.mubr.msk.bf16.vlgmr.msra.gmra.mxu1 %vm1369_vm3, %v4587_v34 }
0x2ead   : > { %7320 = vmatprep.mubr.msk.bf16.mxu1 %vm7803_vm2, %v7802_v32  ;;  %7305 = vmatpush3.bf16.msra.mxu1 %v7591_v45 }
0x2eae   : > { %7306 = vmatprep.subr.bf16.mxu1 %v7802_v32 }
0x2eb1   : > { %7307 = vmatpush3.bf16.msra.mxu1 %v7592_v60 }
0x2eb2   : > { %7308 = vmatprep.subr.bf16.mxu1 %v7802_v32 }
0x2eb5   : > { %7309 = vmatpush3.bf16.msra.mxu1 %v7593_v61 }
0x2eb6   : > { %7310 = vmatprep.subr.bf16.mxu1 %v7802_v32 }
0x2eb9   : > { %7311 = vmatpush3.bf16.msra.mxu1 %v7594_v49 }
0x2eba   : > { %7312 = vmatprep.subr.bf16.mxu1 %v7802_v32 }
0x2ebd   : > { %7313 = vmatpush3.bf16.msra.mxu1 %v7595_v0 }
0x2ebe   : > { %7314 = vmatprep.subr.bf16.mxu1 %v7802_v32 }
0x2ec1   : > { %7315 = vmatpush3.bf16.msra.mxu1 %v7596_v22 }
0x2ec2   : > { %7316 = vmatprep.subr.bf16.mxu1 %v7802_v32 }
0x2ec5   : > { %7317 = vmatpush3.bf16.msra.mxu1 %v7597_v23 }
0x2ec6   : > { %7318 = vmatprep.subr.bf16.mxu1 %v7802_v32 }
0x2ec9   : > { %7319 = vmatpush3.bf16.msra.mxu1 %v7598_v24 }
0x2eca   : > { %7350 = vmatprep.subr.bf16.mxu1 %v7802_v32 }
0x2f6c   : > { %v4629_v36 = vpop.f32.mrf.mxu1 }
0x2f6d   : > { %v4636_v38 = vadd.f32 %v4629_v36, %v4462_v14 }
0x2f6e   : > { %v7294_v39 = vpop.f32.mrf.mxu1 }
0x2f6f   : > { %v4638_v40 = vadd.f32 %v4636_v38, %v8327_v47 }
0x2f70   : > { %v4632_v41 = vpop.f32.mrf.mxu1 }
0x2f71   : > { %v4637_v42 = vadd.f32 %v4632_v41, %v4463_v17  ;;  %v4640_v43 = vsel %vm1247_vm1, %v4638_v40, 0.0  ;;  %v7590_v17 = vld [vmem:[%s7943_s24 + $0x10] sm:$0xff]  }
0x2f72   : > { %4641 = vadd.xlane.f32.xlu0 %v4640_v43  ;;  %v7295_v44 = vpop.f32.mrf.mxu1 }
0x2f73   : > { %v4639_v35 = vadd.f32 %v4637_v42, %v8329_v37 }
0x2f75   : > { %v4643_v46 = vsel %vm1247_vm1, %v4639_v35, 0.0 }
0x2f76   : > { %4644 = vadd.xlane.f32.xlu0 %v4643_v46 }
0x2ffb   : > { %v4642_v19 = vpop.xlane.xlu0 %4641 }
0x2ffc   : > { %v4646_v52 = vmul.f32 0.03125, %v4642_v19 }
0x2ffe   : > { %v4648_v20 = vsub.f32 %v4638_v40, %v4646_v52 }
0x2fff   : > { %v4645_v53 = vpop.xlane.xlu0 %4644 }
0x3000   : > { %v4647_v54 = vmul.f32 0.03125, %v4645_v53  ;;  %v4650_v47 = vmul.f32 %v4648_v20, %v4648_v20 }
0x3002   : > { %v4649_v55 = vsub.f32 %v4639_v35, %v4647_v54  ;;  %v4652_v56 = vsel %vm1247_vm1, %v4650_v47, 0.0 }
0x3003   : > { %4653 = vadd.xlane.f32.xlu0 %v4652_v56 }
0x3004   : > { %v4651_v57 = vmul.f32 %v4649_v55, %v4649_v55 }
0x3006   : > { %v4655_v37 = vsel %vm1247_vm1, %v4651_v57, 0.0 }
0x3007   : > { %4656 = vadd.xlane.f32.xlu0 %v4655_v37 }
0x308c   : > { %v4654_v62 = vpop.xlane.xlu0 %4653 }
0x308d   : > { %v4658_v63 = vmul.f32 0.03125, %v4654_v62 }
0x308f   : > { %v4660_v1 = vadd.f32 1e-05, %v4658_v63 }
0x3090   : > { %v4657_v2 = vpop.xlane.xlu0 %4656 }
0x3091   : > { %7713 = vrsqrt.f32 %v4660_v1  ;;  %v4659_v3 = vmul.f32 0.03125, %v4657_v2 }
0x3093   : > { %v4661_v4 = vadd.f32 1e-05, %v4659_v3 }
0x3095   : > { %7715 = vrsqrt.f32 %v4661_v4 }
0x309e   : > { %v7714_v5 = vpop.eup %7713 }
0x309f   : > { %v4664_v7 = vmul.f32 %v7714_v5, %v4648_v20 }
0x30a1   : > { %v4672_v10 = vmul.f32 %v6678_v8, %v4664_v7 }
0x30a2   : > { %v7716_v9 = vpop.eup %7715 }
0x30a3   : > { %v4665_v11 = vmul.f32 %v7716_v9, %v4649_v55  ;;  %v8597_v50 = vadd.f32 %v6679_v12, %v4672_v10 }
0x30a5   : > { %v4673_v13 = vmul.f32 %v6678_v8, %v4665_v11 }
0x30a7   : > { %v8599_v14 = vadd.f32 %v6679_v12, %v4673_v13 }
0x30a9   : > { %v4682_v16 = vpack.c.bf16 %v8599_v14, %v8597_v50 }
0x30ab   : > { %7301 = vmatmul.mubr.msk.bf16.vlgmr.msra.gmra.mxu0 %vm1247_vm1, %v4682_v16 }
0x30ac   : > { %7325 = vmatpush3.bf16.msra.mxu0 %v7589_v15  ;;  %7328 = vmatprep.mubr.msk.bf16.mxu0 %vm7803_vm2, %v7802_v32 }
0x30ad   : > { %7326 = vmatprep.subr.bf16.mxu0 %v7802_v32 }
0x30b0   : > { %7327 = vmatpush3.bf16.msra.mxu0 %v7590_v17  ;;  %v1094_v17 = vld [vmem:[%s8953_s15 + $0x20] sm:$0xff] }
0x30b1   : > { %7332 = vmatprep.subr.bf16.mxu0 %v7802_v32 }
0x30b3   : > { %7329 = vmatmul.mubr.msk.bf16.vlgmr.msra.gmra.mxu0 %vm1247_vm1, %v4887_v21  ;;  %v5067_v21 = vpack.c.bf16 %v1094_v17, %v1094_v17  ;;  %v1096_v17 = vld [vmem:[%s8953_s15 + $0x30] sm:$0xff] }
0x30b4   : > { %7334 = vmatprep.mubr.msk.bf16.mxu0 %vm7803_vm2, %v7802_v32 }
0x30b5   : > { %v5072_v22 = vsel %vm1494_vm4, %v5067_v21, 0  ;;  %v5387_v21 = vpack.c.bf16 %v1096_v17, %v1096_v17 }
0x316b   : > { %v4738_v26 = vpop.f32.mrf.mxu0 }
0x316c   : > { %v4739_v28 = vadd.f32 %v6680_v25, %v4738_v26 }
0x316d   : > { %v7302_v27 = vpop.f32.mrf.mxu0 }
0x316e   : > { %v4745_v33 = vmax.f32 %v4739_v28, 0.0 }
0x316f   : > { %v4741_v29 = vpop.f32.mrf.mxu0 }
0x3170   : > { %v4742_v30 = vadd.f32 %v6680_v25, %v4741_v29 }
0x3171   : > { %v7303_v58 = vpop.f32.mrf.mxu0 }
0x3172   : > { %v4746_v34 = vmax.f32 %v4742_v30, 0.0 }
0x3173   : > { %v4943_v6 = vpop.f32.mrf.mxu0 }
0x3174   : > { %v4747_v36 = vpack.c.bf16 %v4746_v34, %v4745_v33  ;;  %v4944_v38 = vadd.f32 %v6695_v31, %v4943_v6 }
0x3175   : > { %v7330_v39 = vpop.f32.mrf.mxu0 }
0x3176   : > { %v8626_v40 = vpack.c.bf16 %v4944_v38, %v4944_v38  ;;  %7321 = vmatmul.mubr.bf16.vlgmr.msra.gmra.mxu1 %v4747_v36  ;;  %v1095_v38 = vld [vmem:[%s8953_s15 + $0x28] sm:$0xff] }
0x3177   : > { %v4946_v41 = vpop.f32.mrf.mxu0  ;;  %7352 = vmatprep.mubr.msk.bf16.mxu1 %vm7803_vm2, %v7802_v32  ;;  %v5227_v39 = vpack.c.bf16 %v1095_v38, %v1095_v38 }
0x3178   : > { %5117 = vrot.lane.b32.xlu1 %v8626_v40, %s8963_s11  ;;  %4957 = vrot.lane.b32.xlu0 %v8626_v40, %s8971_s1 }
0x3179   : > { %v7331_v42 = vpop.f32.mrf.mxu0  ;;  %v5232_v41 = vsel %vm1494_vm4, %v5227_v39, 0 }
0x317c   : > { %5115 = vrot.lane.b32.xlu1 %v8626_v40, %s8974_s8 }
0x31ea   : > { %v5118_v43 = vpop.permute.xlu1 %5117  ;;  %v4958_v44 = vpop.permute.xlu0 %4957 }
0x31eb   : > { %v5123_v35 = vsel %vm1369_vm3, %v5118_v43, 0  ;;  %v4963_v46 = vsel %vm1369_vm3, %v4958_v44, 0 }
0x31ec   : > { %7333 = vmatpush3.bf16.xpose.msra.mxu0 %v4963_v46  ;;  %7351 = vmatpush3.bf16.xpose.msra.mxu1 %v5123_v35 }
0x31ed   : > { %7338 = vmatprep.subr.bf16.mxu0 %v7802_v32  ;;  %7362 = vmatprep.subr.bf16.mxu1 %v7802_v32 }
0x31ee   : > { %v5116_v19 = vpop.permute.xlu1 %5115 }
0x31f3   : > { %7335 = vmatmul.mubr.msk.bf16.vlgmr.msra.gmra.mxu0 %vm1369_vm3, %v8626_v40  ;;  %7353 = vmatmul.mubr.msk.bf16.vlgmr.msra.gmra.mxu1 %vm1369_vm3, %v5116_v19 }
0x31f4   : > { %7340 = vmatprep.mubr.msk.bf16.mxu0 %vm7803_vm2, %v7802_v32  ;;  %7364 = vmatprep.mubr.msk.bf16.mxu1 %vm7803_vm2, %v7802_v32 }
0x31f5   : > { %7363 = vmatpush3.bf16.msra.mxu1 %v5232_v41  ;;  %v6684_v41 = vld [vmem:[%s8955_s23 + $0x1] ss:$0 sm:$0xff] }
0x31f6   : > { %7374 = vmatprep.subr.bf16.mxu1 %v7802_v32 }
0x3236   : > { %v8647_v52 = vpop.f32.mrf.mxu1 }
0x3238   : > { %v7322_v20 = vpop.f32.mrf.mxu1 }
0x323a   : > { %v8649_v53 = vpop.f32.mrf.mxu1 }
0x323c   : > { %v7323_v54 = vpop.f32.mrf.mxu1 }
0x32b3   : > { %v4999_v47 = vpop.f32.mrf.mxu0  ;;  %v5159_v55 = vpop.f32.mrf.mxu1 }
0x32b4   : > { %v5005_v56 = vmul.f32 0.35355338, %v4999_v47  ;;  %v5165_v3 = vmul.f32 0.35355338, %v5159_v55 }
0x32b5   : > { %v7336_v57 = vpop.f32.mrf.mxu0  ;;  %v7354_v37 = vpop.f32.mrf.mxu1 }
0x32b6   : > { %v5006_v48 = vsel %vm1369_vm3, %v5005_v56, -inf  ;;  %v5166_v5 = vsel %vm1369_vm3, %v5165_v3, -inf }
0x32b7   : > { %5007 = vmax.xlane.f32.xlu1 %v5006_v48  ;;  %v5002_v59 = vpop.f32.mrf.mxu0  ;;  %v5162_v45 = vpop.f32.mrf.mxu1 }
0x32b9   : > { %v7337_v60 = vpop.f32.mrf.mxu0  ;;  %v7355_v61 = vpop.f32.mrf.mxu1 }
0x32c8   : > { %5018 = vrot.lane.b32.xlu1 %v8626_v40, %s8973_s28 }
0x32cc   : > { %5277 = vrot.lane.b32.xlu1 %v8626_v40, %s8965_s5 }
0x32d0   : > { %5275 = vrot.lane.b32.xlu1 %v8626_v40, %s8964_s4 }
0x3340   : > { %v5008_v49 = vpop.xlane.xlu1 %5007 }
0x3341   : > { %v5009_v0 = vsub.f32 %v5005_v56, %v5008_v49 }
0x3343   : > { %v5010_v62 = vmul.f32 1.442695, %v5009_v0 }
0x3344   : > { %v5019_v63 = vpop.permute.xlu1 %5018 }
0x3345   : > { %7717 = vpow2.f32 %v5010_v62  ;;  %v5024_v1 = vsel %vm1494_vm4, %v5019_v63, 0 }
0x3346   : > { %7339 = vmatpush3.bf16.msra.mxu0 %v5024_v1  ;;  %v6699_v1 = vld [vmem:[%s8954_s22 + $0x1] ss:$0 sm:$0xff] }
0x3347   : > { %7344 = vmatprep.subr.bf16.mxu0 %v7802_v32 }
0x3348   : > { %v5278_v33 = vpop.permute.xlu1 %5277 }
0x3349   : > { %v5283_v6 = vsel %vm1369_vm3, %v5278_v33, 0 }
0x334c   : > { %v5276_v36 = vpop.permute.xlu1 %5275 }
0x3352   : > { %v7718_v2 = vpop.eup %7717 }
0x3353   : > { %v5012_v4 = vsel %vm1369_vm3, %v7718_v2, 0.0 }
0x3354   : > { %5013 = vadd.xlane.f32.xlu0 %v5012_v4 }
0x3358   : > { %5167 = vmax.xlane.f32.xlu0 %v5166_v5 }
0x33dd   : > { %v5014_v7 = vpop.xlane.xlu0 %5013 }
0x33de   : > { %7719 = vrcp.f32 %v5014_v7 }
0x33e1   : > { %v5168_v8 = vpop.xlane.xlu0 %5167 }
0x33e2   : > { %v5169_v9 = vsub.f32 %v5165_v3, %v5168_v8 }
0x33e4   : > { %v5170_v10 = vmul.f32 1.442695, %v5169_v9 }
0x33e6   : > { %7721 = vpow2.f32 %v5170_v10 }
0x33eb   : > { %v7720_v11 = vpop.eup %7719 }
0x33ec   : > { %v5016_v12 = vmul.f32 %v7720_v11, %v7718_v2 }
0x33ee   : > { %v5017_v13 = vpack.c.bf16 %v5016_v12, %v5016_v12 }
0x33f0   : > { %7341 = vmatmul.mubr.msk.bf16.vlgmr.msra.gmra.mxu0 %vm1369_vm3, %v5017_v13 }
0x33f1   : > { %7346 = vmatprep.mubr.msk.bf16.mxu0 %vm7803_vm2, %v7802_v32  ;;  %7345 = vmatpush3.bf16.msra.mxu0 %v5072_v22  ;;  %v5392_v22 = vsel %vm1494_vm4, %v5387_v21, 0 }
0x33f2   : > { %7356 = vmatprep.subr.bf16.mxu0 %v7802_v32 }
0x33f3   : > { %v7722_v15 = vpop.eup %7721 }
0x33f4   : > { %v5172_v16 = vsel %vm1369_vm3, %v7722_v15, 0.0 }
0x33f5   : > { %5173 = vadd.xlane.f32.xlu0 %v5172_v16 }
0x340b   : > { %5178 = vrot.lane.b32.xlu0 %v8626_v40, %s8975_s17  ;;  %s8978_s17 = sld [smem:[#allocation3_spill]] }
0x347e   : > { %v5174_v23 = vpop.xlane.xlu0 %5173 }
0x347f   : > { %7723 = vrcp.f32 %v5174_v23 }
0x3482   : > { %v5179_v24 = vpop.permute.xlu0 %5178 }
0x3483   : > { %v5184_v29 = vsel %vm1494_vm4, %v5179_v24, 0 }
0x348c   : > { %v7724_v27 = vpop.eup %7723 }
0x348d   : > { %v5176_v58 = vmul.f32 %v7724_v27, %v7722_v15 }
0x348f   : > { %v5177_v34 = vpack.c.bf16 %v5176_v58, %v5176_v58 }
0x34b0   : > { %v5060_v25 = vpop.f32.mrf.mxu0 }
0x34b1   : > { %v5066_v26 = vpack.c.bf16 %v5060_v25, %v5060_v25 }
0x34b2   : > { %v7342_v28 = vpop.f32.mrf.mxu0 }
0x34b3   : > { %7347 = vmatmul.mubr.msk.bf16.vlgmr.msra.gmra.mxu0 %vm1369_vm3, %v5066_v26 }
0x34b4   : > { %7357 = vmatpush3.bf16.msra.mxu0 %v5184_v29  ;;  %v5063_v30 = vpop.f32.mrf.mxu0  ;;  %7358 = vmatprep.mubr.msk.bf16.mxu0 %vm7803_vm2, %v7802_v32 }
0x34b5   : > { %7368 = vmatprep.subr.bf16.mxu0 %v7802_v32 }
0x34b6   : > { %v7343_v31 = vpop.f32.mrf.mxu0 }
0x34bb   : > { %7359 = vmatmul.mubr.msk.bf16.vlgmr.msra.gmra.mxu0 %vm1369_vm3, %v5177_v34 }
0x34bc   : > { %7369 = vmatpush3.bf16.xpose.msra.mxu0 %v5283_v6  ;;  %7370 = vmatprep.mubr.msk.bf16.mxu0 %vm7803_vm2, %v7802_v32 }
0x34bd   : > { %7380 = vmatprep.subr.bf16.mxu0 %v7802_v32 }
0x34c3   : > { %7371 = vmatmul.mubr.msk.bf16.vlgmr.msra.gmra.mxu0 %vm1369_vm3, %v5276_v36 }
0x34c4   : > { %7382 = vmatprep.mubr.msk.bf16.mxu0 %vm7803_vm2, %v7802_v32  ;;  %7381 = vmatpush3.bf16.msra.mxu0 %v5392_v22  ;;  %v7600_v22 = vld [vmem:[%s8956_s0 + $0x10] sm:$0xff]  }
0x34c5   : > { %7392 = vmatprep.subr.bf16.mxu0 %v7802_v32 }
0x3573   : > { %v5108_v42 = vpop.f32.mrf.mxu0 }
0x3574   : > { %v5114_v2 = vadd.f32 %v6699_v1, %v5108_v42  ;;  %v4837_v42 = vadd.f32 %v6684_v41, %v8647_v52 }
0x3575   : > { %v7348_v43 = vpop.f32.mrf.mxu0 }
0x3577   : > { %v5111_v44 = vpop.f32.mrf.mxu0 }
0x3578   : > { %v4843_v44 = vadd.f32 %v4837_v42, %v8597_v50 }
0x3579   : > { %v7349_v35 = vpop.f32.mrf.mxu0 }
0x357a   : > { %v4840_v35 = vadd.f32 %v6684_v41, %v8649_v53  ;;  %v6693_v41 = vld [vmem:[%s8958_s26 + $0x1] ss:$0 sm:$0xff] }
0x357b   : > { %v5220_v46 = vpop.f32.mrf.mxu0 }
0x357c   : > { %v5226_v19 = vpack.c.bf16 %v5220_v46, %v5220_v46  ;;  %v4844_v46 = vadd.f32 %v4840_v35, %v8599_v14 }
0x357d   : > { %v7360_v20 = vpop.f32.mrf.mxu0 }
0x357e   : > { %7365 = vmatmul.mubr.msk.bf16.vlgmr.msra.gmra.mxu1 %vm1369_vm3, %v5226_v19  ;;  %v4845_v19 = vsel %vm1247_vm1, %v4843_v44, 0.0  ;;  %v4848_v20 = vsel %vm1247_vm1, %v4844_v46, 0.0 }
0x357f   : > { %v5223_v54 = vpop.f32.mrf.mxu0  ;;  %7376 = vmatprep.mubr.msk.bf16.mxu1 %vm7803_vm2, %v7802_v32 }
0x3581   : > { %v7361_v47 = vpop.f32.mrf.mxu0 }
0x3583   : > { %v5319_v55 = vpop.f32.mrf.mxu0 }
0x3584   : > { %v5325_v56 = vmul.f32 0.35355338, %v5319_v55 }
0x3585   : > { %v7372_v57 = vpop.f32.mrf.mxu0 }
0x3586   : > { %v5326_v37 = vsel %vm1369_vm3, %v5325_v56, -inf }
0x3587   : > { %5327 = vmax.xlane.f32.xlu1 %v5326_v37  ;;  %v5322_v48 = vpop.f32.mrf.mxu0 }
0x3589   : > { %v7373_v59 = vpop.f32.mrf.mxu0 }
0x3598   : > { %5338 = vrot.lane.b32.xlu1 %v8626_v40, %s8976_s27 }
0x359c   : > { %5435 = vrot.lane.b32.xlu1 %v8626_v40, %s8967_s21 }
0x3610   : > { %v5328_v45 = vpop.xlane.xlu1 %5327 }
0x3611   : > { %v5329_v60 = vsub.f32 %v5325_v56, %v5328_v45 }
0x3613   : > { %v5330_v61 = vmul.f32 1.442695, %v5329_v60 }
0x3614   : > { %v5339_v49 = vpop.permute.xlu1 %5338 }
0x3615   : > { %7725 = vpow2.f32 %v5330_v61  ;;  %v5344_v0 = vsel %vm1494_vm4, %v5339_v49, 0  ;;  %v1097_v49 = vld [vmem:[%s8953_s15 + $0x38] sm:$0xff] }
0x3616   : > { %7375 = vmatpush3.bf16.msra.mxu1 %v5344_v0  ;;  %v5547_v0 = vpack.c.bf16 %v1097_v49, %v1097_v49 }
0x3617   : > { %7386 = vmatprep.subr.bf16.mxu1 %v7802_v32 }
0x3618   : > { %v5436_v16 = vpop.permute.xlu1 %5435 }
0x3622   : > { %v7726_v62 = vpop.eup %7725 }
0x3623   : > { %v5332_v63 = vsel %vm1369_vm3, %v7726_v62, 0.0 }
0x3624   : > { %5333 = vadd.xlane.f32.xlu0 %v5332_v63 }
0x363a   : > { %5437 = vrot.lane.b32.xlu0 %v8626_v40, %s8968_s29 }
0x363e   : > { %v5268_v3 = vpop.f32.mrf.mxu1 }
0x363f   : > { %v5274_v4 = vadd.f32 %v5268_v3, %v5114_v2 }
0x3640   : > { %v7366_v5 = vpop.f32.mrf.mxu1 }
0x3641   : > { %v7599_v5 = vld [vmem:[%s8956_s0 + $0x18] sm:$0xff]  }
0x3642   : > { %v5271_v7 = vpop.f32.mrf.mxu1 }
0x3644   : > { %v7367_v8 = vpop.f32.mrf.mxu1 }
0x36ad   : > { %v5334_v9 = vpop.xlane.xlu0 %5333 }
0x36ae   : > { %7727 = vrcp.f32 %v5334_v9 }
0x36b1   : > { %v5438_v12 = vpop.permute.xlu0 %5437 }
0x36b2   : > { %v5443_v15 = vsel %vm1369_vm3, %v5438_v12, 0 }
0x36bb   : > { %v7728_v10 = vpop.eup %7727 }
0x36bc   : > { %v5336_v11 = vmul.f32 %v7728_v10, %v7726_v62  ;;  %v5552_v62 = vsel %vm1494_vm4, %v5547_v0, 0 }
0x36be   : > { %v5337_v13 = vpack.c.bf16 %v5336_v11, %v5336_v11 }
0x36c0   : > { %7377 = vmatmul.mubr.msk.bf16.vlgmr.msra.gmra.mxu1 %vm1369_vm3, %v5337_v13 }
0x36c1   : > { %7387 = vmatpush3.bf16.xpose.msra.mxu1 %v5443_v15  ;;  %7388 = vmatprep.mubr.msk.bf16.mxu1 %vm7803_vm2, %v7802_v32 }
0x36c2   : > { %7398 = vmatprep.subr.bf16.mxu1 %v7802_v32 }
0x36c8   : > { %7389 = vmatmul.mubr.msk.bf16.vlgmr.msra.gmra.mxu1 %vm1369_vm3, %v5436_v16 }
0x36c9   : > { %7400 = vmatprep.mubr.msk.bf16.mxu1 %vm7803_vm2, %v7802_v32  ;;  %7399 = vmatpush3.bf16.msra.mxu1 %v5552_v62 }
0x36ca   : > { %7412 = vmatprep.subr.bf16.mxu1 %v7802_v32 }
0x3780   : > { %v5380_v23 = vpop.f32.mrf.mxu1 }
0x3781   : > { %v5386_v24 = vpack.c.bf16 %v5380_v23, %v5380_v23 }
0x3782   : > { %v7378_v25 = vpop.f32.mrf.mxu1 }
0x3783   : > { %7383 = vmatmul.mubr.msk.bf16.vlgmr.msra.gmra.mxu0 %vm1369_vm3, %v5386_v24 }
0x3784   : > { %v5383_v26 = vpop.f32.mrf.mxu1  ;;  %7394 = vmatprep.mubr.msk.bf16.mxu0 %vm7803_vm2, %v7802_v32 }
0x3786   : > { %v7379_v27 = vpop.f32.mrf.mxu1 }
0x3788   : > { %v5479_v28 = vpop.f32.mrf.mxu1 }
0x3789   : > { %v5485_v29 = vmul.f32 0.35355338, %v5479_v28 }
0x378a   : > { %v7390_v30 = vpop.f32.mrf.mxu1 }
0x378b   : > { %v5486_v58 = vsel %vm1369_vm3, %v5485_v29, -inf }
0x378c   : > { %5487 = vmax.xlane.f32.xlu1 %v5486_v58  ;;  %v5482_v31 = vpop.f32.mrf.mxu1 }
0x378e   : > { %v7391_v33 = vpop.f32.mrf.mxu1 }
0x379d   : > { %5498 = vrot.lane.b32.xlu1 %v8626_v40, %s8977_s3  ;;  %s8982_s3 = sld [smem:[#allocation27_spill]] }
0x3815   : > { %v5488_v34 = vpop.xlane.xlu1 %5487 }
0x3816   : > { %v5489_v6 = vsub.f32 %v5485_v29, %v5488_v34  ;;  %v6714_v29 = vld [vmem:[%s8957_s2 + $0x1] ss:$0 sm:$0xff] }
0x3818   : > { %v5490_v36 = vmul.f32 1.442695, %v5489_v6 }
0x3819   : > { %v5499_v38 = vpop.permute.xlu1 %5498 }
0x381a   : > { %7729 = vpow2.f32 %v5490_v36  ;;  %v5504_v39 = vsel %vm1494_vm4, %v5499_v38, 0 }
0x381b   : > { %7393 = vmatpush3.bf16.msra.mxu0 %v5504_v39 }
0x381c   : > { %7404 = vmatprep.subr.bf16.mxu0 %v7802_v32 }
0x3827   : > { %v7730_v43 = vpop.eup %7729 }
0x3828   : > { %v5492_v40 = vsel %vm1369_vm3, %v7730_v43, 0.0 }
0x3829   : > { %5493 = vadd.xlane.f32.xlu0 %v5492_v40  ;;  %v6694_v40 = vld [vmem:[%s8959_s16 + $0x1] ss:$0 sm:$0xff] }
0x382d   : > { %4846 = vadd.xlane.f32.xlu0 %v4845_v19 }
0x3831   : > { %4849 = vadd.xlane.f32.xlu0 %v4848_v20 }
0x3843   : > { %v5428_v54 = vpop.f32.mrf.mxu0 }
0x3844   : > { %v5434_v47 = vadd.f32 %v5428_v54, %v5274_v4 }
0x3845   : > { %v7384_v55 = vpop.f32.mrf.mxu0 }
0x3847   : > { %v5431_v52 = vpop.f32.mrf.mxu0 }
0x3848   : > { %v6712_v52 = vld [vmem:[%s8960_s18 + $0x1] ss:$0 sm:$0xff] }
0x3849   : > { %v7385_v56 = vpop.f32.mrf.mxu0 }
0x38b2   : > { %v5494_v50 = vpop.xlane.xlu0 %5493 }
0x38b3   : > { %7731 = vrcp.f32 %v5494_v50  ;;  %v6713_v50 = vld [vmem:[%s8961_s10 + $0x1] ss:$0 sm:$0xff] }
0x38b6   : > { %v4847_v53 = vpop.xlane.xlu0 %4846 }
0x38b7   : > { %v4851_v7 = vmul.f32 0.03125, %v4847_v53 }
0x38b9   : > { %v4853_v9 = vsub.f32 %v4843_v44, %v4851_v7 }
0x38ba   : > { %v4850_v57 = vpop.xlane.xlu0 %4849 }
0x38bb   : > { %v4852_v37 = vmul.f32 0.03125, %v4850_v57  ;;  %v4855_v16 = vmul.f32 %v4853_v9, %v4853_v9 }
0x38bd   : > { %v8728_v48 = vsub.f32 %v4844_v46, %v4852_v37  ;;  %v4857_v21 = vsel %vm1247_vm1, %v4855_v16, 0.0 }
0x38bf   : > { %v4856_v14 = vmul.f32 %v8728_v48, %v8728_v48 }
0x38c0   : > { %v7732_v59 = vpop.eup %7731 }
0x38c1   : > { %v5496_v45 = vmul.f32 %v7732_v59, %v7730_v43  ;;  %v4860_v60 = vsel %vm1247_vm1, %v4856_v14, 0.0 }
0x38c2   : > { %4861 = vadd.xlane.f32.xlu1 %v4860_v60 }
0x38c3   : > { %v5497_v61 = vpack.c.bf16 %v5496_v45, %v5496_v45 }
0x38c5   : > { %7395 = vmatmul.mubr.msk.bf16.vlgmr.msra.gmra.mxu0 %vm1369_vm3, %v5497_v61 }
0x38c6   : > { %7408 = vmatprep.mubr.msk.bf16.mxu0 %vm7803_vm2, %v7802_v32  ;;  %7405 = vmatpush3.bf16.msra.mxu0 %v7599_v5 }
0x38c7   : > { %7406 = vmatprep.subr.bf16.mxu0 %v7802_v32 }
0x38ca   : > { %7407 = vmatpush3.bf16.msra.mxu0 %v7600_v22 }
0x38cb   : > { %7420 = vmatprep.subr.bf16.mxu0 %v7802_v32 }
0x394b   : > { %v4862_v30 = vpop.xlane.xlu1 %4861 }
0x394c   : > { %v4864_v31 = vmul.f32 0.03125, %v4862_v30 }
0x394e   : > { %v4866_v34 = vadd.f32 1e-05, %v4864_v31 }
0x3985   : > { %v5540_v63 = vpop.f32.mrf.mxu0 }
0x3986   : > { %v5546_v1 = vpack.c.bf16 %v5540_v63, %v5540_v63 }
0x3987   : > { %v7396_v2 = vpop.f32.mrf.mxu0 }
0x3988   : > { %7401 = vmatmul.mubr.msk.bf16.vlgmr.msra.gmra.mxu1 %vm1369_vm3, %v5546_v1 }
0x3989   : > { %v5543_v3 = vpop.f32.mrf.mxu0  ;;  %7416 = vmatprep.mubr.msk.bf16.mxu1 %vm7803_vm2, %v7802_v32 }
0x398b   : > { %v7397_v4 = vpop.f32.mrf.mxu0 }
0x3a48   : > { %v5588_v8 = vpop.f32.mrf.mxu1 }
0x3a49   : > { %v5594_v10 = vadd.f32 %v5588_v8, %v5434_v47 }
0x3a4a   : > { %v7402_v11 = vpop.f32.mrf.mxu1 }
0x3a4b   : > { %v5595_v12 = vadd.f32 %v5594_v10, %v8609_v18 }
0x3a4c   : > { %v5591_v13 = vpop.f32.mrf.mxu1 }
0x3a4d   : > { %v5596_v15 = vsel %vm1247_vm1, %v5595_v12, 0.0 }
0x3a4e   : > { %5597 = vadd.xlane.f32.xlu0 %v5596_v15  ;;  %v7403_v17 = vpop.f32.mrf.mxu1 }
0x3a52   : > { %4858 = vadd.xlane.f32.xlu0 %v4857_v21 }
0x3a68   : > { %5688 = vrot.lane.b32.xlu0 %v7599_v5, %s8971_s1 }
0x3ad7   : > { %v5598_v23 = vpop.xlane.xlu0 %5597 }
0x3ad8   : > { %v5599_v24 = vmul.f32 0.03125, %v5598_v23  ;;  %v994_v23 = vld [vmem:[%s8962_s7 + $0x20] sm:$0xff] }
0x3ada   : > { %v5600_v25 = vsub.f32 %v5595_v12, %v5599_v24  ;;  %v5854_v24 = vpack.c.bf16 %v994_v23, %v994_v23 }
0x3adb   : > { %v4859_v18 = vpop.xlane.xlu0 %4858 }
0x3adc   : > { %v5601_v26 = vmul.f32 %v5600_v25, %v5600_v25  ;;  %v4863_v58 = vmul.f32 0.03125, %v4859_v18 }
0x3ade   : > { %v5602_v27 = vsel %vm1247_vm1, %v5601_v26, 0.0  ;;  %v4865_v33 = vadd.f32 1e-05, %v4863_v58 }
0x3adf   : > { %5603 = vadd.xlane.f32.xlu0 %v5602_v27  ;;  %v5689_v28 = vpop.permute.xlu0 %5688 }
0x3ae0   : > { %7413 = vmatpush3.bf16.msra.mxu1 %v5689_v28  ;;  %7733 = vrsqrt.f32 %v4865_v33 }
0x3ae1   : > { %7414 = vmatprep.subr.bf16.mxu1 %v7802_v32  ;;  %7735 = vrsqrt.f32 %v4866_v34 }
0x3aed   : > { %v7734_v6 = vpop.eup %7733 }
0x3aee   : > { %v7736_v36 = vpop.eup %7735  ;;  %v4869_v38 = vmul.f32 %v7734_v6, %v4853_v9 }
0x3aef   : > { %v4870_v39 = vmul.f32 %v7736_v36, %v8728_v48 }
0x3af0   : > { %v4877_v42 = vmul.f32 %v6693_v41, %v4869_v38 }
0x3af1   : > { %v4878_v43 = vmul.f32 %v6693_v41, %v4870_v39 }
0x3af2   : > { %v4885_v46 = vadd.f32 %v6694_v40, %v4877_v42 }
0x3af3   : > { %v4886_v54 = vadd.f32 %v6694_v40, %v4878_v43 }
0x3af5   : > { %5686 = vrot.lane.b32.xlu0 %v7600_v22, %s8971_s1  ;;  %v5685_v47 = vpack.c.bf16 %v4886_v54, %v4885_v46 }
0x3af9   : > { %5692 = vrot.lane.b32.xlu0 %v6714_v29, %s8971_s1 }
0x3b68   : > { %v5604_v44 = vpop.xlane.xlu0 %5603 }
0x3b69   : > { %v5605_v35 = vmul.f32 0.03125, %v5604_v44 }
0x3b6b   : > { %v5606_v19 = vadd.f32 1e-05, %v5605_v35 }
0x3b6c   : > { %v5687_v20 = vpop.permute.xlu0 %5686 }
0x3b6d   : > { %7737 = vrsqrt.f32 %v5606_v19  ;;  %7415 = vmatpush3.bf16.msra.mxu1 %v5687_v20 }
0x3b6e   : > { %7426 = vmatprep.subr.bf16.mxu1 %v7802_v32 }
0x3b70   : > { %7417 = vmatmul.mubr.msk.bf16.vlgmr.msra.gmra.mxu1 %vm1247_vm1, %v5685_v47  ;;  %v5693_v14 = vpop.permute.xlu0 %5692 }
0x3b71   : > { %7428 = vmatprep.mubr.msk.bf16.mxu1 %vm7803_vm2, %v7802_v32 }
0x3b7a   : > { %v7738_v55 = vpop.eup %7737 }
0x3b7b   : > { %v5608_v56 = vmul.f32 %v7738_v55, %v5600_v25  ;;  %v5859_v25 = vsel %vm1494_vm4, %v5854_v24, 0 }
0x3b7d   : > { %v5615_v53 = vmul.f32 %v6712_v52, %v5608_v56 }
0x3b7f   : > { %v5622_v57 = vadd.f32 %v6713_v50, %v5615_v53 }
0x3b81   : > { %v5623_v37 = vpack.c.bf16 %v5622_v57, %v5622_v57 }
0x3b83   : > { %7409 = vmatmul.mubr.msk.bf16.vlgmr.msra.gmra.mxu0 %vm1247_vm1, %v5623_v37 }
0x3b84   : > { %7422 = vmatprep.mubr.msk.bf16.mxu0 %vm7803_vm2, %v7802_v32 }
0x3c30   : > { %v5732_v48 = vpop.f32.mrf.mxu1 }
0x3c31   : > { %v5733_v60 = vadd.f32 %v5732_v48, %v5693_v14 }
0x3c32   : > { %v7418_v59 = vpop.f32.mrf.mxu1 }
0x3c34   : > { %v5735_v45 = vpop.f32.mrf.mxu1 }
0x3c35   : > { %v5736_v61 = vadd.f32 %v5735_v45, %v5693_v14  ;;  %v995_v45 = vld [vmem:[%s8962_s7 + $0x28] sm:$0xff] }
0x3c36   : > { %v7419_v49 = vpop.f32.mrf.mxu1 }
0x3c37   : > { %v8767_v0 = vpack.c.bf16 %v5736_v61, %v5733_v60  ;;  %v6013_v60 = vpack.c.bf16 %v995_v45, %v995_v45 }
0x3c39   : > { %v5751_v62 = vsel %vm1369_vm3, %v8767_v0, 0  ;;  %v6018_v61 = vsel %vm1494_vm4, %v6013_v60, 0 }
0x3c3a   : > { %7421 = vmatpush3.bf16.xpose.msra.mxu0 %v5751_v62 }
0x3c3b   : > { %7432 = vmatprep.subr.bf16.mxu0 %v7802_v32 }
0x3c43   : > { %v5679_v63 = vpop.f32.mrf.mxu0 }
0x3c44   : > { %v5680_v1 = vadd.f32 %v6714_v29, %v5679_v63 }
0x3c45   : > { %v7410_v2 = vpop.f32.mrf.mxu0 }
0x3c46   : > { %v8772_v3 = vpack.c.bf16 %v5680_v1, %v5680_v1 }
0x3c47   : > { %v5682_v4 = vpop.f32.mrf.mxu0 }
0x3c48   : > { %7423 = vmatmul.mubr.msk.bf16.vlgmr.msra.gmra.mxu0 %vm1369_vm3, %v8772_v3 }
0x3c49   : > { %v7411_v5 = vpop.f32.mrf.mxu0  ;;  %7434 = vmatprep.mubr.msk.bf16.mxu0 %vm7803_vm2, %v7802_v32  ;;  %7433 = vmatpush3.bf16.msra.mxu0 %v5859_v25 }
0x3c4a   : > { %7444 = vmatprep.subr.bf16.mxu0 %v7802_v32 }
0x3d08   : > { %v5787_v7 = vpop.f32.mrf.mxu0 }
0x3d09   : > { %v5793_v8 = vmul.f32 0.35355338, %v5787_v7 }
0x3d0a   : > { %v7424_v9 = vpop.f32.mrf.mxu0 }
0x3d0b   : > { %v5794_v10 = vsel %vm1202_vm0, %v5793_v8, -inf }
0x3d0c   : > { %5795 = vmax.xlane.f32.xlu1 %v5794_v10  ;;  %v5790_v11 = vpop.f32.mrf.mxu0 }
0x3d0e   : > { %v7425_v12 = vpop.f32.mrf.mxu0 }
0x3d1d   : > { %5807 = vrot.lane.b32.xlu1 %v8767_v0, %s8971_s1 }
0x3d21   : > { %5905 = vrot.lane.b32.xlu1 %v8767_v0, %s8974_s8 }
0x3d25   : > { %5903 = vrot.lane.b32.xlu1 %v8772_v3, %s8974_s8 }
0x3d95   : > { %v5796_v13 = vpop.xlane.xlu1 %5795 }
0x3d96   : > { %v5797_v15 = vsub.f32 %v5793_v8, %v5796_v13 }
0x3d98   : > { %v5798_v16 = vmul.f32 1.442695, %v5797_v15 }
0x3d99   : > { %v5808_v17 = vpop.permute.xlu1 %5807 }
0x3d9a   : > { %7739 = vpow2.f32 %v5798_v16  ;;  %7427 = vmatpush3.bf16.msra.mxu1 %v5808_v17 }
0x3d9b   : > { %7438 = vmatprep.subr.bf16.mxu1 %v7802_v32 }
0x3d9d   : > { %v5906_v28 = vpop.permute.xlu1 %5905 }
0x3d9e   : > { %v5911_v30 = vsel %vm1369_vm3, %v5906_v28, 0 }
0x3da1   : > { %v5904_v58 = vpop.permute.xlu1 %5903 }
0x3da7   : > { %v7740_v21 = vpop.eup %7739 }
0x3da8   : > { %v5800_v22 = vsel %vm1202_vm0, %v7740_v21, 0.0 }
0x3da9   : > { %5801 = vadd.xlane.f32.xlu0 %v5800_v22 }
0x3dbf   : > { %5966 = vrot.lane.b32.xlu0 %v8767_v0, %s8963_s11 }
0x3e32   : > { %v5802_v18 = vpop.xlane.xlu0 %5801 }
0x3e33   : > { %7741 = vrcp.f32 %v5802_v18 }
0x3e36   : > { %v5967_v6 = vpop.permute.xlu0 %5966 }
0x3e40   : > { %v7742_v26 = vpop.eup %7741 }
0x3e41   : > { %v5804_v27 = vmul.f32 %v7742_v26, %v7740_v21  ;;  %v6719_v21 = vld [vmem:[%s8978_s17 + $0x1] ss:$0 sm:$0xff] }
0x3e43   : > { %v5805_v29 = vpack.c.bf16 %v5804_v27, %v5804_v27 }
0x3e45   : > { %7429 = vmatmul.mubr.msk.bf16.vlgmr.msra.gmra.mxu1 %vm1202_vm0, %v5805_v29 }
0x3e46   : > { %7439 = vmatpush3.bf16.xpose.msra.mxu1 %v5911_v30  ;;  %7440 = vmatprep.mubr.msk.bf16.mxu1 %vm7803_vm2, %v7802_v32 }
0x3e47   : > { %7450 = vmatprep.subr.bf16.mxu1 %v7802_v32 }
0x3e4d   : > { %7441 = vmatmul.mubr.msk.bf16.vlgmr.msra.gmra.mxu1 %vm1369_vm3, %v5904_v58 }
0x3e4e   : > { %7452 = vmatprep.mubr.msk.bf16.mxu1 %vm7803_vm2, %v7802_v32  ;;  %7451 = vmatpush3.bf16.msra.mxu1 %v6018_v61 }
0x3e4f   : > { %7462 = vmatprep.subr.bf16.mxu1 %v7802_v32 }
0x3f05   : > { %v5847_v31 = vpop.f32.mrf.mxu1 }
0x3f06   : > { %v5853_v33 = vpack.c.bf16 %v5847_v31, %v5847_v31 }
0x3f07   : > { %v7430_v34 = vpop.f32.mrf.mxu1 }
0x3f08   : > { %7435 = vmatmul.mubr.msk.bf16.vlgmr.msra.gmra.mxu0 %vm1369_vm3, %v5853_v33  ;;  %v996_v33 = vld [vmem:[%s8962_s7 + $0x30] sm:$0xff] }
0x3f09   : > { %7445 = vmatpush3.bf16.msra.mxu0 %v5967_v6  ;;  %v5850_v36 = vpop.f32.mrf.mxu1  ;;  %7446 = vmatprep.mubr.msk.bf16.mxu0 %vm7803_vm2, %v7802_v32  ;;  %v6171_v34 = vpack.c.bf16 %v996_v33, %v996_v33 }
0x3f0a   : > { %7456 = vmatprep.subr.bf16.mxu0 %v7802_v32 }
0x3f0b   : > { %v7431_v38 = vpop.f32.mrf.mxu1  ;;  %v6176_v6 = vsel %vm1494_vm4, %v6171_v34, 0 }
0x3f0d   : > { %v5947_v39 = vpop.f32.mrf.mxu1 }
0x3f0e   : > { %v5953_v41 = vmul.f32 0.35355338, %v5947_v39 }
0x3f0f   : > { %v7442_v42 = vpop.f32.mrf.mxu1 }
0x3f10   : > { %v5954_v43 = vsel %vm1202_vm0, %v5953_v41, -inf }
0x3f11   : > { %5955 = vmax.xlane.f32.xlu1 %v5954_v43  ;;  %v5950_v44 = vpop.f32.mrf.mxu1 }
0x3f13   : > { %v7443_v35 = vpop.f32.mrf.mxu1 }
0x3f9a   : > { %v5956_v40 = vpop.xlane.xlu1 %5955 }
0x3f9b   : > { %v5957_v46 = vsub.f32 %v5953_v41, %v5956_v40 }
0x3f9d   : > { %v5958_v19 = vmul.f32 1.442695, %v5957_v46 }
0x3f9f   : > { %7743 = vpow2.f32 %v5958_v19 }
0x3fac   : > { %v7744_v20 = vpop.eup %7743 }
0x3fad   : > { %v5960_v54 = vsel %vm1202_vm0, %v7744_v20, 0.0 }
0x3fae   : > { %5961 = vadd.xlane.f32.xlu0 %v5960_v54 }
0x3fc4   : > { %6063 = vrot.lane.b32.xlu0 %v8767_v0, %s8964_s4 }
0x3fc8   : > { %v5895_v47 = vpop.f32.mrf.mxu0  ;;  %6061 = vrot.lane.b32.xlu0 %v8772_v3, %s8964_s4  ;;  %s6571_s4 = sshll.u32 %s8982_s3, 2 }
0x3fc9   : > { %v5901_v22 = vadd.f32 %v6719_v21, %v5895_v47 }
0x3fca   : > { %v7436_v55 = vpop.f32.mrf.mxu0 }
0x3fcc   : > { %v5898_v52 = vpop.f32.mrf.mxu0 }
0x3fce   : > { %v7437_v56 = vpop.f32.mrf.mxu0 }
0x4037   : > { %v5962_v50 = vpop.xlane.xlu0 %5961 }
0x4038   : > { %7745 = vrcp.f32 %v5962_v50 }
0x403b   : > { %v6064_v37 = vpop.permute.xlu0 %6063 }
0x403c   : > { %v6069_v14 = vsel %vm1369_vm3, %v6064_v37, 0 }
0x403f   : > { %v6062_v59 = vpop.permute.xlu0 %6061 }
0x4045   : > { %v7746_v53 = vpop.eup %7745 }
0x4046   : > { %v5964_v57 = vmul.f32 %v7746_v53, %v7744_v20 }
0x4048   : > { %v5965_v48 = vpack.c.bf16 %v5964_v57, %v5964_v57 }
0x404a   : > { %7447 = vmatmul.mubr.msk.bf16.vlgmr.msra.gmra.mxu0 %vm1202_vm0, %v5965_v48 }
0x404b   : > { %7457 = vmatpush3.bf16.xpose.msra.mxu0 %v6069_v14  ;;  %7458 = vmatprep.mubr.msk.bf16.mxu0 %vm7803_vm2, %v7802_v32 }
0x404c   : > { %7468 = vmatprep.subr.bf16.mxu0 %v7802_v32 }
0x4052   : > { %7459 = vmatmul.mubr.msk.bf16.vlgmr.msra.gmra.mxu0 %vm1369_vm3, %v6062_v59 }
0x4053   : > { %7470 = vmatprep.mubr.msk.bf16.mxu0 %vm7803_vm2, %v7802_v32  ;;  %7469 = vmatpush3.bf16.msra.mxu0 %v6176_v6 }
0x4054   : > { %7480 = vmatprep.subr.bf16.mxu0 %v7802_v32 }
0x410a   : > { %v6006_v49 = vpop.f32.mrf.mxu0 }
0x410b   : > { %v6012_v62 = vpack.c.bf16 %v6006_v49, %v6006_v49 }
0x410c   : > { %v7448_v63 = vpop.f32.mrf.mxu0 }
0x410d   : > { %7453 = vmatmul.mubr.msk.bf16.vlgmr.msra.gmra.mxu1 %vm1369_vm3, %v6012_v62 }
0x410e   : > { %v6009_v1 = vpop.f32.mrf.mxu0  ;;  %7464 = vmatprep.mubr.msk.bf16.mxu1 %vm7803_vm2, %v7802_v32 }
0x4110   : > { %v7449_v2 = vpop.f32.mrf.mxu0 }
0x4112   : > { %v6105_v4 = vpop.f32.mrf.mxu0 }
0x4113   : > { %v6111_v5 = vmul.f32 0.35355338, %v6105_v4 }
0x4114   : > { %v7460_v7 = vpop.f32.mrf.mxu0 }
0x4115   : > { %v6112_v8 = vsel %vm1202_vm0, %v6111_v5, -inf }
0x4116   : > { %6113 = vmax.xlane.f32.xlu1 %v6112_v8  ;;  %v6108_v9 = vpop.f32.mrf.mxu0 }
0x4118   : > { %v7461_v10 = vpop.f32.mrf.mxu0 }
0x4127   : > { %6124 = vrot.lane.b32.xlu1 %v8767_v0, %s8965_s5  ;;  %s8979_s5 = sld [smem:[#allocation19_spill]] }
0x412b   : > { %6221 = vrot.lane.b32.xlu1 %v8767_v0, %s8967_s21 }
0x412d   : > { %v1108_v21 = vld [vmem:[%s8979_s5] sm:$0xf] }
0x412f   : > { %6219 = vrot.lane.b32.xlu1 %v8772_v3, %s8967_s21  ;;  %s8980_s21 = sld [smem:[#allocation14_spill]] }
0x419f   : > { %v6114_v11 = vpop.xlane.xlu1 %6113 }
0x41a0   : > { %v6115_v12 = vsub.f32 %v6111_v5, %v6114_v11 }
0x41a2   : > { %v6116_v13 = vmul.f32 1.442695, %v6115_v12 }
0x41a3   : > { %v6125_v15 = vpop.permute.xlu1 %6124 }
0x41a4   : > { %7747 = vpow2.f32 %v6116_v13  ;;  %7463 = vmatpush3.bf16.msra.mxu1 %v6125_v15 }
0x41a5   : > { %7474 = vmatprep.subr.bf16.mxu1 %v7802_v32 }
0x41a7   : > { %v6222_v29 = vpop.permute.xlu1 %6221 }
0x41a8   : > { %v6227_v58 = vsel %vm1369_vm3, %v6222_v29, 0 }
0x41ab   : > { %v6220_v31 = vpop.permute.xlu1 %6219 }
0x41b1   : > { %v7748_v16 = vpop.eup %7747 }
0x41b2   : > { %v6118_v17 = vsel %vm1202_vm0, %v7748_v16, 0.0 }
0x41b3   : > { %6119 = vadd.xlane.f32.xlu0 %v6118_v17  ;;  %v7760_v17 = vld.sshfl [vmem:[%s8972_s13] sm:$0x3 pattern:$0x76325410] }
0x41cd   : > { %v6054_v23 = vpop.f32.mrf.mxu1 }
0x41ce   : > { %v6060_v24 = vadd.f32 %v6054_v23, %v5901_v22 }
0x41cf   : > { %v7454_v25 = vpop.f32.mrf.mxu1 }
0x41d1   : > { %v6057_v18 = vpop.f32.mrf.mxu1 }
0x41d2   : > { %v6732_v18 = vld [vmem:[%s8980_s21 + $0x1] ss:$0 sm:$0xff] }
0x41d3   : > { %v7455_v3 = vpop.f32.mrf.mxu1 }
0x423c   : > { %v6120_v26 = vpop.xlane.xlu0 %6119 }
0x423d   : > { %7749 = vrcp.f32 %v6120_v26 }
0x424a   : > { %v7750_v27 = vpop.eup %7749 }
0x424b   : > { %v6122_v28 = vmul.f32 %v7750_v27, %v7748_v16 }
0x424d   : > { %v6123_v30 = vpack.c.bf16 %v6122_v28, %v6122_v28 }
0x424f   : > { %7465 = vmatmul.mubr.msk.bf16.vlgmr.msra.gmra.mxu1 %vm1202_vm0, %v6123_v30 }
0x4250   : > { %7475 = vmatpush3.bf16.xpose.msra.mxu1 %v6227_v58  ;;  %7476 = vmatprep.mubr.msk.bf16.mxu1 %vm7803_vm2, %v7802_v32 }
0x4251   : > { %7486 = vmatprep.subr.bf16.mxu1 %v7802_v32 }
0x4257   : > { %7477 = vmatmul.mubr.msk.bf16.vlgmr.msra.gmra.mxu1 %vm1369_vm3, %v6220_v31 }
0x4258   : > { %7488 = vmatprep.mubr.msk.bf16.mxu1 %vm7803_vm2, %v7802_v32 }
0x430f   : > { %v6164_v36 = vpop.f32.mrf.mxu1 }
0x4310   : > { %v6170_v38 = vpack.c.bf16 %v6164_v36, %v6164_v36 }
0x4311   : > { %v7466_v39 = vpop.f32.mrf.mxu1 }
0x4312   : > { %7471 = vmatmul.mubr.msk.bf16.vlgmr.msra.gmra.mxu0 %vm1369_vm3, %v6170_v38 }
0x4313   : > { %v6167_v41 = vpop.f32.mrf.mxu1  ;;  %7482 = vmatprep.mubr.msk.bf16.mxu0 %vm7803_vm2, %v7802_v32 }
0x4315   : > { %v7467_v42 = vpop.f32.mrf.mxu1 }
0x4317   : > { %v6263_v43 = vpop.f32.mrf.mxu1 }
0x4318   : > { %v6269_v44 = vmul.f32 0.35355338, %v6263_v43 }
0x4319   : > { %v7478_v35 = vpop.f32.mrf.mxu1 }
0x431a   : > { %v6270_v40 = vsel %vm1202_vm0, %v6269_v44, -inf }
0x431b   : > { %6271 = vmax.xlane.f32.xlu1 %v6270_v40  ;;  %v6266_v46 = vpop.f32.mrf.mxu1 }
0x431d   : > { %v7479_v19 = vpop.f32.mrf.mxu1 }
0x43a4   : > { %v6272_v20 = vpop.xlane.xlu1 %6271 }
0x43a5   : > { %v6273_v54 = vsub.f32 %v6269_v44, %v6272_v20 }
0x43a7   : > { %v6274_v47 = vmul.f32 1.442695, %v6273_v54 }
0x43a9   : > { %7751 = vpow2.f32 %v6274_v47 }
0x43b6   : > { %v7752_v55 = vpop.eup %7751 }
0x43b7   : > { %v6276_v52 = vsel %vm1202_vm0, %v7752_v55, 0.0 }
0x43b8   : > { %6277 = vadd.xlane.f32.xlu0 %v6276_v52 }
0x43ce   : > { %6282 = vrot.lane.b32.xlu0 %v8767_v0, %s8968_s29  ;;  %v997_v0 = vld [vmem:[%s8962_s7 + $0x38] sm:$0xff]  ;;  %s8981_s29 = sld [smem:[#allocation13_spill]] }
0x43cf   : > { %v6329_v61 = vpack.c.bf16 %v997_v0, %v997_v0 }
0x43d1   : > { %v6334_v49 = vsel %vm1494_vm4, %v6329_v61, 0 }
0x43d2   : > { %v6212_v56 = vpop.f32.mrf.mxu0  ;;  %7487 = vmatpush3.bf16.msra.mxu1 %v6334_v49 }
0x43d3   : > { %v6218_v50 = vadd.f32 %v6212_v56, %v6060_v24 }
0x43d4   : > { %v7472_v53 = vpop.f32.mrf.mxu0  ;;  %v6733_v26 = vld [vmem:[%s8981_s29 + $0x1] ss:$0 sm:$0xff] }
0x43d6   : > { %v6215_v57 = vpop.f32.mrf.mxu0 }
0x43d8   : > { %v7473_v37 = vpop.f32.mrf.mxu0 }
0x4441   : > { %v6278_v48 = vpop.xlane.xlu0 %6277 }
0x4442   : > { %7753 = vrcp.f32 %v6278_v48 }
0x4445   : > { %v6283_v14 = vpop.permute.xlu0 %6282 }
0x4446   : > { %7481 = vmatpush3.bf16.msra.mxu0 %v6283_v14 }
0x4447   : > { %7492 = vmatprep.subr.bf16.mxu0 %v7802_v32 }
0x444f   : > { %v7754_v59 = vpop.eup %7753 }
0x4450   : > { %v6280_v45 = vmul.f32 %v7754_v59, %v7752_v55 }
0x4452   : > { %v6281_v60 = vpack.c.bf16 %v6280_v45, %v6280_v45 }
0x4454   : > { %7483 = vmatmul.mubr.msk.bf16.vlgmr.msra.gmra.mxu0 %vm1202_vm0, %v6281_v60 }
0x4455   : > { %7494 = vmatprep.mubr.msk.bf16.mxu0 %vm7803_vm2, %v7802_v32 }
0x4514   : > { %v6322_v62 = vpop.f32.mrf.mxu0 }
0x4515   : > { %v6328_v63 = vpack.c.bf16 %v6322_v62, %v6322_v62 }
0x4516   : > { %v7484_v1 = vpop.f32.mrf.mxu0 }
0x4517   : > { %7489 = vmatmul.mubr.msk.bf16.vlgmr.msra.gmra.mxu1 %vm1369_vm3, %v6328_v63 }
0x4518   : > { %v6325_v2 = vpop.f32.mrf.mxu0 }
0x451a   : > { %v7485_v4 = vpop.f32.mrf.mxu0 }
0x45d7   : > { %v6370_v5 = vpop.f32.mrf.mxu1 }
0x45d8   : > { %v6376_v7 = vadd.f32 %v6370_v5, %v6218_v50 }
0x45d9   : > { %v7490_v8 = vpop.f32.mrf.mxu1 }
0x45da   : > { %v6377_v9 = vsel %vm1247_vm1, %v6376_v7, 0.0 }
0x45db   : > { %6378 = vadd.xlane.f32.xlu0 %v6377_v9  ;;  %v6373_v32 = vpop.f32.mrf.mxu1 }
0x45dd   : > { %v7491_v10 = vpop.f32.mrf.mxu1 }
0x4664   : > { %v6379_v11 = vpop.xlane.xlu0 %6378 }
0x4665   : > { %v6380_v12 = vmul.f32 0.03125, %v6379_v11 }
0x4667   : > { %v6381_v13 = vsub.f32 %v6376_v7, %v6380_v12 }
0x4669   : > { %v6382_v15 = vmul.f32 %v6381_v13, %v6381_v13 }
0x466b   : > { %v6383_v16 = vsel %vm1247_vm1, %v6382_v15, 0.0 }
0x466c   : > { %6384 = vadd.xlane.f32.xlu1 %v6383_v16 }
0x467d   : > { %6413 = vrot.lane.b32.xlu1 %v7760_v17, %s8974_s8  ;;  %s8983_s8 = sld [smem:[#allocation25_spill]] }
0x4681   : > { %1293 = vperm.xlu1 %7555, %v1108_v21  }
0x4683   : > { %s984_s1 = scalar_lea.vmem %s8983_s8, %s6571_s4 }
0x46f5   : > { %v6385_v22 = vpop.xlane.xlu1 %6384 }
0x46f6   : > { %v6386_v23 = vmul.f32 0.03125, %v6385_v22 }
0x46f8   : > { %v6387_v24 = vadd.f32 1e-05, %v6386_v23 }
0x46f9   : > { %v6414_v58 = vpop.permute.xlu1 %6413 }
0x46fa   : > { %7755 = vrsqrt.f32 %v6387_v24 }
0x46fd   : > { %v1294_v31 = vpop.permute.xlu1 %1293 }
0x46fe   : > { %v3876_v33 = vadd.f32 %v8469_v51, %v1294_v31 }
0x4707   : > { %v7756_v25 = vpop.eup %7755 }
0x4708   : > { %v6389_v3 = vmul.f32 %v7756_v25, %v6381_v13 }
0x470a   : > { %v6396_v27 = vmul.f32 %v6732_v18, %v6389_v3 }
0x470c   : > { %v6403_v28 = vadd.f32 %v6733_v26, %v6396_v27 }
0x470e   : > { %v6404_v29 = vpack.c.bf16 %v6403_v28, %v6403_v28 }
0x4710   : > { %v6419_v30 = vsel %vm1494_vm4, %v6404_v29, 0 }
0x4711   : > { %7493 = vmatpush3.bf16.msra.mxu0 %v6419_v30 }
0x4714   : > { %7495 = vmatmul.mubr.msk.bf16.vlgmr.msra.gmra.mxu0 %vm1369_vm3, %v6414_v58 }
0x47d4   : > { %v6455_v34 = vpop.f32.mrf.mxu0 }
0x47d5   : > { %v6461_v6 = vadd.f32 %v6455_v34, %v3876_v33 }
0x47d6   : > { %v7496_v36 = vpop.f32.mrf.mxu0 }
0x47d7   : > { %v6462_v38 = vmul.f32 %v6461_v6, %v6461_v6 }
0x47d8   : > { %v6458_v39 = vpop.f32.mrf.mxu0 }
0x47d9   : > { %v6464_v41 = vsel %vm6463_vm5, %v6462_v38, 0.0 }
0x47da   : > { %v7497_v42 = vpop.f32.mrf.mxu0  ;;  %6465 = vadd.xlane.f32.xlu0 %v6464_v41 }
0x4863   : > { %v6466_v43 = vpop.xlane.xlu0 %6465 }
0x4864   : > { %v6467_v44 = vrot.slane %v6466_v43, 4 }
0x4866   : > { %v6468_v35 = vadd.f32 %v6467_v44, %v6466_v43 }
0x4868   : > { %v6469_v40 = vrot.slane %v6468_v35, 2 }
0x486a   : > { %v6470_v46 = vadd.f32 %v6469_v40, %v6468_v35 }
0x486c   : > { %v6471_v19 = vrot.slane %v6470_v46, 1 }
0x486e   : > { %v6472_v20 = vadd.f32 %v6471_v19, %v6470_v46 }
0x4870   : > { %7498 = vpush %v6472_v20 }
0x48a1   : > { %s7499_s27 = spop %7498 }
0x48a2   : > { %v6474_v51 = vstv %s7499_s27 }
0x48a3   : > { %v6475_v54 = vmax.f32 %v6474_v51, 1e-24 }
0x48a5   : > { %7757 = vrsqrt.f32 %v6475_v54 }
0x48b2   : > { %v7758_v47 = vpop.eup %7757 }
0x48b3   : > { %v6477_v55 = vmul.f32 %v7758_v47, %v6461_v6 }
0x48b5   : > { %6478 = vst.msk [vmem:[%s984_s1] sm:$0xf] %vm6463_vm5, %v6477_v55 }
0x48b6 PF: > { %s8984_s11 = sld [smem:[#allocation26_spill]] }
0x48bc   : > { %s75_s28 = sadd.s32 1, %s8984_s11  }
0x48bd   : > { %p72_p4 = scmp.ge.s32.totalorder %s75_s28, 4  }
0x48bf   :  { %74 = sbr.rel (!%p72_p4) target bundleno = 62 (0x3e), region = 210 }

</bundles_post_ra>
